<compile_context>
chip_gen: v6e
topology: v6e:2x2x1
jax: 0.10.0
libtpu: 0.0.40
codegen_flags: <defaults>
</compile_context>

<pallas_src>
import functools

import jax
import jax.numpy as jnp
from jax import lax
from jax.experimental import pallas as pl
from jax.experimental.pallas import tpu as pltpu


# ---------------------------------------------------------------------------
# Fused Inception kernel: B images per grid step, everything stays in VMEM.
# ---------------------------------------------------------------------------
def _inception_fused_kernel(
    x_ref,                              # (B, H, W, Cin)  compute dtype
    w1_ref, s1_ref, b1_ref,             # (Cin, C1),    (1, C1) f32, (1, C1) f32
    wr3_ref, sr3_ref, br3_ref,          # (Cin, Cr3),   (1, Cr3), (1, Cr3)
    w3_ref, s3_ref, b3_ref,             # (9*Cr3, C3),  (1, C3), (1, C3)
    wr5_ref, sr5_ref, br5_ref,          # (Cin, Cr5),   (1, Cr5), (1, Cr5)
    w5_ref, s5_ref, b5_ref,             # (25*Cr5, C5), (1, C5), (1, C5)
    wm_ref, sm_ref, bm_ref,             # (Cin, Cm),    (1, Cm), (1, Cm)
    o_ref,                              # (B, H*W, Ctot) f32
    t3pad_ref,                          # VMEM (B, H+2, W+2, Cr3)  zero-padded t3
    t5pad_ref,                          # VMEM (B, H+4, W+4, Cr5)  zero-padded t5
    xmpad_ref,                          # VMEM (B, H+2, W+2, Cin)  -inf padded x
    *, B, H, W,
):
    cd = x_ref.dtype
    Cin = x_ref.shape[-1]
    Cr3 = t3pad_ref.shape[-1]
    Cr5 = t5pad_ref.shape[-1]
    BHW = B * H * W

    x = x_ref[...]                      # (B, H, W, Cin)
    xf = x.reshape(BHW, Cin)

    def conv1x1_bn_relu(inp2d, w_ref, s_ref, b_ref):
        y = jnp.dot(inp2d, w_ref[...], preferred_element_type=jnp.float32)
        return jnp.maximum(y * s_ref[...] + b_ref[...], 0.0)

    # Three separate, lane-aligned 1x1 dots over the same xf (no lane-offset
    # slicing of a fused reduce result).
    y1 = conv1x1_bn_relu(xf, w1_ref, s1_ref, b1_ref)        # (BHW, C1)
    t3 = conv1x1_bn_relu(xf, wr3_ref, sr3_ref, br3_ref)     # (BHW, Cr3)
    t5 = conv1x1_bn_relu(xf, wr5_ref, sr5_ref, br5_ref)     # (BHW, Cr5)

    def init_halo(pad_ref, p, fill):
        # Write only the constant halo strips (O(perimeter)), never the full
        # buffer; the HxW interior is overwritten every step below.
        Hp, Wp, C = H + 2 * p, W + 2 * p, pad_ref.shape[-1]
        row = jnp.full((B, p, Wp, C), fill, pad_ref.dtype)
        col = jnp.full((B, Hp, p, C), fill, pad_ref.dtype)
        pad_ref[:, 0:p, :, :] = row
        pad_ref[:, Hp - p:Hp, :, :] = row
        pad_ref[:, :, 0:p, :] = col
        pad_ref[:, :, Wp - p:Wp, :] = col

    def conv_kxk_bn_relu(pad_ref, w_ref, s_ref, b_ref, K, Cred):
        # K*K shifted-slice dots accumulated in f32 — no im2col buffer, per-tap
        # ref slices keep register pressure bounded.
        acc = None
        for ky in range(K):
            for kx in range(K):
                t = ky * K + kx
                patch = pad_ref[:, ky:ky + H, kx:kx + W, :].reshape(BHW, Cred)
                contrib = jnp.dot(patch, w_ref[t * Cred:(t + 1) * Cred, :],
                                  preferred_element_type=jnp.float32)
                acc = contrib if acc is None else acc + contrib
        return jnp.maximum(acc * s_ref[...] + b_ref[...], 0.0)

    # ---- 3x3 branch ----
    init_halo(t3pad_ref, 1, 0.0)
    t3pad_ref[:, 1:1 + H, 1:1 + W, :] = t3.reshape(B, H, W, Cr3).astype(cd)
    y3 = conv_kxk_bn_relu(t3pad_ref, w3_ref, s3_ref, b3_ref, 3, Cr3)

    # ---- 5x5 branch ----
    init_halo(t5pad_ref, 2, 0.0)
    t5pad_ref[:, 2:2 + H, 2:2 + W, :] = t5.reshape(B, H, W, Cr5).astype(cd)
    y5 = conv_kxk_bn_relu(t5pad_ref, w5_ref, s5_ref, b5_ref, 5, Cr5)

    # ---- max branch: separable 3x3 max pool (stride 1, pad 1) then 1x1 conv ----
    init_halo(xmpad_ref, 1, -jnp.inf)
    xmpad_ref[:, 1:1 + H, 1:1 + W, :] = x
    rowmax = jnp.maximum(
        jnp.maximum(xmpad_ref[:, :, 0:W, :], xmpad_ref[:, :, 1:1 + W, :]),
        xmpad_ref[:, :, 2:2 + W, :])                        # (B, H+2, W, Cin)
    m = jnp.maximum(jnp.maximum(rowmax[:, 0:H], rowmax[:, 1:1 + H]),
                    rowmax[:, 2:2 + H])                     # (B, H, W, Cin)
    ym = conv1x1_bn_relu(m.reshape(BHW, Cin), wm_ref, sm_ref, bm_ref)

    # ---- single full-width, lane-dense store (branch concat in registers) ----
    out = jnp.concatenate([y1, y3, y5, ym], axis=-1)        # (BHW, Ctot) f32
    o_ref[...] = out.reshape(B, H * W, -1).astype(o_ref.dtype)


# ---------------------------------------------------------------------------
# Batch-tile picker: biggest B dividing N that fits a VMEM budget while keeping
# >= 2 'parallel' grid steps when N >= 2 (megacore sharding on v7x).
# ---------------------------------------------------------------------------
def _pick_batch_tile(N, H, W, Cin, Ctot, itemsize):
    budget = 8 * 1024 * 1024
    best = 1
    for b in range(1, N + 1):
        if N % b:
            continue
        if N >= 2 and N // b < 2:
            continue
        per_img = H * W * (Cin + 2 * Ctot) * itemsize * 6   # x/out/scratch + margin
        if b * per_img <= budget:
            best = b
    return best


# ---------------------------------------------------------------------------
# Wrapper: NCHW in / NCHW out (matching the PyTorch module)
# ---------------------------------------------------------------------------
def inception_block(x_nchw, params, *, compute_dtype=jnp.float32):
    cd = compute_dtype
    x = jnp.transpose(x_nchw, (0, 2, 3, 1)).astype(cd)      # -> NHWC
    N, H, W, Cin = x.shape

    w1, s1, b1 = params["1x1"]
    wr3, sr3, br3 = params["3x3_red"]
    w3, s3, b3 = params["3x3"]
    wr5, sr5, br5 = params["5x5_red"]
    w5, s5, b5 = params["5x5"]
    wm, sm, bm = params["max"]

    C1, Cr3, Cr5 = w1.shape[3], wr3.shape[3], wr5.shape[3]
    C3, C5, Cm = w3.shape[3], w5.shape[3], wm.shape[3]
    Ctot = C1 + C3 + C5 + Cm

    f32 = jnp.float32

    def row(v):  # per-channel folded BN scale/bias as (1, C) f32
        return v.reshape(1, -1).astype(f32)

    # Weights for the MXU dots, cast to the compute dtype (bf16 on v6e/v7x).
    w1f = w1[0, 0].astype(cd)
    wr3f = wr3[0, 0].astype(cd)
    wr5f = wr5[0, 0].astype(cd)
    wmf = wm[0, 0].astype(cd)
    w3f = w3.reshape(3 * 3 * Cr3, C3).astype(cd)            # row order (ky, kx, cin)
    w5f = w5.reshape(5 * 5 * Cr5, C5).astype(cd)

    flat_w = [
        w1f, row(s1), row(b1),
        wr3f, row(sr3), row(br3),
        w3f, row(s3), row(b3),
        wr5f, row(sr5), row(br5),
        w5f, row(s5), row(b5),
        wmf, row(sm), row(bm),
    ]
    w_specs = [pl.BlockSpec(a.shape, lambda n: (0, 0)) for a in flat_w]

    B = _pick_batch_tile(N, H, W, Cin, Ctot, jnp.dtype(cd).itemsize)

    kernel = functools.partial(_inception_fused_kernel, B=B, H=H, W=W)

    out = pl.pallas_call(
        kernel,
        out_shape=jax.ShapeDtypeStruct((N, H * W, Ctot), f32),
        grid_spec=pltpu.PrefetchScalarGridSpec(
            num_scalar_prefetch=0,
            grid=(N // B,),
            in_specs=[pl.BlockSpec((B, H, W, Cin), lambda n: (n, 0, 0, 0))]
                     + w_specs,
            out_specs=pl.BlockSpec((B, H * W, Ctot), lambda n: (n, 0, 0)),
            scratch_shapes=[
                pltpu.VMEM((B, H + 2, W + 2, Cr3), cd),
                pltpu.VMEM((B, H + 4, W + 4, Cr5), cd),
                pltpu.VMEM((B, H + 2, W + 2, Cin), cd),
            ],
        ),
        compiler_params=pltpu.CompilerParams(
            dimension_semantics=("parallel",),
            vmem_limit_bytes=48 * 1024 * 1024,   # v5e scoped default is only 16 MiB
        ),
    )(x, *flat_w)

    out = out.reshape(N, H, W, Ctot)
    return jnp.transpose(out, (0, 3, 1, 2))                 # -> NCHW


# ---------------------------------------------------------------------------
# Parameter setup: Conv2d weight+bias and eval-mode BatchNorm2d folded into
# per-channel (scale, bias).  Weights are HWIO.
# ---------------------------------------------------------------------------
def _make_conv_bn(key, cin, cout, k, eps=1e-5):
    kw, kb, kg, kbt, km, kv = jax.random.split(key, 6)
    w = 0.1 * jax.random.normal(kw, (k, k, cin, cout), jnp.float32)
    conv_b = 0.1 * jax.random.normal(kb, (cout,), jnp.float32)
    gamma = 1.0 + 0.1 * jax.random.normal(kg, (cout,), jnp.float32)
    beta = 0.1 * jax.random.normal(kbt, (cout,), jnp.float32)
    rmean = 0.1 * jax.random.normal(km, (cout,), jnp.float32)
    rvar = 1.0 + 0.1 * jnp.abs(jax.random.normal(kv, (cout,), jnp.float32))
    scale = gamma / jnp.sqrt(rvar + eps)
    bias = (conv_b - rmean) * scale + beta
    return w, scale, bias


def init_inception_params(key, in_channels, c_red, c_out):
    keys = jax.random.split(key, 6)
    return {
        "1x1":     _make_conv_bn(keys[0], in_channels, c_out["1x1"], 1),
        "3x3_red": _make_conv_bn(keys[1], in_channels, c_red["3x3"], 1),
        "3x3":     _make_conv_bn(keys[2], c_red["3x3"], c_out["3x3"], 3),
        "5x5_red": _make_conv_bn(keys[3], in_channels, c_red["5x5"], 1),
        "5x5":     _make_conv_bn(keys[4], c_red["5x5"], c_out["5x5"], 5),
        "max":     _make_conv_bn(keys[5], in_channels, c_out["max"], 1),
    }


# ---------------------------------------------------------------------------
# Pure-JAX reference (for correctness check)
# ---------------------------------------------------------------------------
def _ref_conv_bn_relu(x, w, s, b):
    p = w.shape[0] // 2
    y = lax.conv_general_dilated(
        x, w, (1, 1), [(p, p), (p, p)],
        dimension_numbers=("NHWC", "HWIO", "NHWC"))
    return jnp.maximum(y * s + b, 0.0)


def _ref_maxpool3(x):
    return lax.reduce_window(x, -jnp.inf, lax.max, (1, 3, 3, 1), (1, 1, 1, 1),
                             [(0, 0), (1, 1), (1, 1), (0, 0)])


def inception_block_ref(x_nchw, params):
    x = jnp.transpose(x_nchw, (0, 2, 3, 1)).astype(jnp.float32)
    w1, s1, b1 = params["1x1"]
    x_1x1 = _ref_conv_bn_relu(x, w1, s1, b1)
    wr3, sr3, br3 = params["3x3_red"]
    w3, s3, b3 = params["3x3"]
    x_3x3 = _ref_conv_bn_relu(_ref_conv_bn_relu(x, wr3, sr3, br3), w3, s3, b3)
    wr5, sr5, br5 = params["5x5_red"]
    w5, s5, b5 = params["5x5"]
    x_5x5 = _ref_conv_bn_relu(_ref_conv_bn_relu(x, wr5, sr5, br5), w5, s5, b5)
    wm, sm, bm = params["max"]
    x_max = _ref_conv_bn_relu(_ref_maxpool3(x), wm, sm, bm)
    out = jnp.concatenate([x_1x1, x_3x3, x_5x5, x_max], axis=-1)
    return jnp.transpose(out, (0, 3, 1, 2))


# ---------------------------------------------------------------------------
if __name__ == "__main__":
    key = jax.random.PRNGKey(0)
    kx, kp = jax.random.split(key)

    N, C, H, W = 2, 4, 16, 16
    c_red = {"3x3": 4, "5x5": 4}
    c_out = {"1x1": 4, "3x3": 4, "5x5": 4, "max": 4}

    x = jax.random.normal(kx, (N, C, H, W), jnp.float32)
    params = init_inception_params(kp, C, c_red, c_out)

    ref = jax.block_until_ready(inception_block_ref(x, params))
    exp_shape = (N, c_out["1x1"] + c_out["3x3"] + c_out["5x5"] + c_out["max"], H, W)

    # f32 compute path (exact semantics; tight tolerance)
    out_f32 = jax.block_until_ready(
        inception_block(x, params, compute_dtype=jnp.float32))
    assert out_f32.shape == exp_shape
    assert jnp.allclose(out_f32, ref, atol=1e-4, rtol=1e-4), "f32 mismatch vs reference"

    # bf16 MXU-operand path (v6e/v7x fast path; per-dtype tolerance)
    out_bf16 = jax.block_until_ready(
        inception_block(x, params, compute_dtype=jnp.bfloat16))
    assert out_bf16.shape == exp_shape
    assert jnp.allclose(out_bf16, ref, atol=1e-1, rtol=1e-1), "bf16 mismatch vs reference"

    print("KERNEL_OK")
</pallas_src>

<mosaic_0001>
module attributes {stable_mosaic.version = 11 : i64} {
  func.func @_inception_fused_kernel(%arg0: i32, %arg1: memref<1x16x16x4xf32, #tpu.memory_space<vmem>>, %arg2: memref<4x4xf32, #tpu.memory_space<vmem>>, %arg3: memref<1x4xf32, #tpu.memory_space<vmem>>, %arg4: memref<1x4xf32, #tpu.memory_space<vmem>>, %arg5: memref<4x4xf32, #tpu.memory_space<vmem>>, %arg6: memref<1x4xf32, #tpu.memory_space<vmem>>, %arg7: memref<1x4xf32, #tpu.memory_space<vmem>>, %arg8: memref<36x4xf32, #tpu.memory_space<vmem>>, %arg9: memref<1x4xf32, #tpu.memory_space<vmem>>, %arg10: memref<1x4xf32, #tpu.memory_space<vmem>>, %arg11: memref<4x4xf32, #tpu.memory_space<vmem>>, %arg12: memref<1x4xf32, #tpu.memory_space<vmem>>, %arg13: memref<1x4xf32, #tpu.memory_space<vmem>>, %arg14: memref<100x4xf32, #tpu.memory_space<vmem>>, %arg15: memref<1x4xf32, #tpu.memory_space<vmem>>, %arg16: memref<1x4xf32, #tpu.memory_space<vmem>>, %arg17: memref<4x4xf32, #tpu.memory_space<vmem>>, %arg18: memref<1x4xf32, #tpu.memory_space<vmem>>, %arg19: memref<1x4xf32, #tpu.memory_space<vmem>>, %arg20: memref<1x256x16xf32, #tpu.memory_space<vmem>>, %arg21: memref<1x18x18x4xf32, #tpu.memory_space<vmem>>, %arg22: memref<1x20x20x4xf32, #tpu.memory_space<vmem>>, %arg23: memref<1x18x18x4xf32, #tpu.memory_space<vmem>>) attributes {dimension_semantics = [#tpu.dimension_semantics<parallel>], iteration_bounds = array<i64: 2>, scalar_prefetch = 0 : i64, scratch_operands = 3 : i64, tpu.core_type = #tpu.core_type<tc>, window_params = [{transform_indices = @transform_0, window_bounds = array<i64: 1, 16, 16, 4>}, {pipeline_mode = #tpu.pipeline_mode<synchronous>, transform_indices = @transform_1, window_bounds = array<i64: 4, 4>}, {pipeline_mode = #tpu.pipeline_mode<synchronous>, transform_indices = @transform_2, window_bounds = array<i64: 1, 4>}, {pipeline_mode = #tpu.pipeline_mode<synchronous>, transform_indices = @transform_3, window_bounds = array<i64: 1, 4>}, {pipeline_mode = #tpu.pipeline_mode<synchronous>, transform_indices = @transform_4, window_bounds = array<i64: 4, 4>}, {pipeline_mode = #tpu.pipeline_mode<synchronous>, transform_indices = @transform_5, window_bounds = array<i64: 1, 4>}, {pipeline_mode = #tpu.pipeline_mode<synchronous>, transform_indices = @transform_6, window_bounds = array<i64: 1, 4>}, {pipeline_mode = #tpu.pipeline_mode<synchronous>, transform_indices = @transform_7, window_bounds = array<i64: 36, 4>}, {pipeline_mode = #tpu.pipeline_mode<synchronous>, transform_indices = @transform_8, window_bounds = array<i64: 1, 4>}, {pipeline_mode = #tpu.pipeline_mode<synchronous>, transform_indices = @transform_9, window_bounds = array<i64: 1, 4>}, {pipeline_mode = #tpu.pipeline_mode<synchronous>, transform_indices = @transform_10, window_bounds = array<i64: 4, 4>}, {pipeline_mode = #tpu.pipeline_mode<synchronous>, transform_indices = @transform_11, window_bounds = array<i64: 1, 4>}, {pipeline_mode = #tpu.pipeline_mode<synchronous>, transform_indices = @transform_12, window_bounds = array<i64: 1, 4>}, {pipeline_mode = #tpu.pipeline_mode<synchronous>, transform_indices = @transform_13, window_bounds = array<i64: 100, 4>}, {pipeline_mode = #tpu.pipeline_mode<synchronous>, transform_indices = @transform_14, window_bounds = array<i64: 1, 4>}, {pipeline_mode = #tpu.pipeline_mode<synchronous>, transform_indices = @transform_15, window_bounds = array<i64: 1, 4>}, {pipeline_mode = #tpu.pipeline_mode<synchronous>, transform_indices = @transform_16, window_bounds = array<i64: 4, 4>}, {pipeline_mode = #tpu.pipeline_mode<synchronous>, transform_indices = @transform_17, window_bounds = array<i64: 1, 4>}, {pipeline_mode = #tpu.pipeline_mode<synchronous>, transform_indices = @transform_18, window_bounds = array<i64: 1, 4>}, {transform_indices = @transform_19, window_bounds = array<i64: 1, 256, 16>}]} {
    %c0 = arith.constant 0 : index
    %c0_0 = arith.constant 0 : index
    %c0_1 = arith.constant 0 : index
    %c0_2 = arith.constant 0 : index
    %0 = vector.load %arg1[%c0, %c0_0, %c0_1, %c0_2] : memref<1x16x16x4xf32, #tpu.memory_space<vmem>>, vector<1x16x16x4xf32>
    %1 = vector.shape_cast %0 : vector<1x16x16x4xf32> to vector<256x4xf32>
    %c0_3 = arith.constant 0 : index
    %c0_4 = arith.constant 0 : index
    %2 = vector.load %arg2[%c0_3, %c0_4] : memref<4x4xf32, #tpu.memory_space<vmem>>, vector<4x4xf32>
    %cst = arith.constant dense<0.000000e+00> : vector<256x4xf32>
    %3 = tpu.matmul %1, %2, %cst {dimension_numbers = #tpu.dot_dimension_numbers<[1], [0], [0], [1], [0, 0, 1, 1], [], []>} : vector<256x4xf32>, vector<4x4xf32>, vector<256x4xf32> -> vector<256x4xf32>
    %c0_5 = arith.constant 0 : index
    %c0_6 = arith.constant 0 : index
    %4 = vector.load %arg3[%c0_5, %c0_6] : memref<1x4xf32, #tpu.memory_space<vmem>>, vector<1x4xf32>
    %5 = vector.broadcast %4 : vector<1x4xf32> to vector<256x4xf32>
    %6 = arith.mulf %3, %5 : vector<256x4xf32>
    %c0_7 = arith.constant 0 : index
    %c0_8 = arith.constant 0 : index
    %7 = vector.load %arg4[%c0_7, %c0_8] : memref<1x4xf32, #tpu.memory_space<vmem>>, vector<1x4xf32>
    %8 = vector.broadcast %7 : vector<1x4xf32> to vector<256x4xf32>
    %9 = arith.addf %6, %8 : vector<256x4xf32>
    %cst_9 = arith.constant 0.000000e+00 : f32
    %10 = vector.broadcast %cst_9 : f32 to vector<256x4xf32>
    %11 = arith.maximumf %9, %10 : vector<256x4xf32>
    %c0_10 = arith.constant 0 : index
    %c0_11 = arith.constant 0 : index
    %12 = vector.load %arg5[%c0_10, %c0_11] : memref<4x4xf32, #tpu.memory_space<vmem>>, vector<4x4xf32>
    %cst_12 = arith.constant dense<0.000000e+00> : vector<256x4xf32>
    %13 = tpu.matmul %1, %12, %cst_12 {dimension_numbers = #tpu.dot_dimension_numbers<[1], [0], [0], [1], [0, 0, 1, 1], [], []>} : vector<256x4xf32>, vector<4x4xf32>, vector<256x4xf32> -> vector<256x4xf32>
    %c0_13 = arith.constant 0 : index
    %c0_14 = arith.constant 0 : index
    %14 = vector.load %arg6[%c0_13, %c0_14] : memref<1x4xf32, #tpu.memory_space<vmem>>, vector<1x4xf32>
    %15 = vector.broadcast %14 : vector<1x4xf32> to vector<256x4xf32>
    %16 = arith.mulf %13, %15 : vector<256x4xf32>
    %c0_15 = arith.constant 0 : index
    %c0_16 = arith.constant 0 : index
    %17 = vector.load %arg7[%c0_15, %c0_16] : memref<1x4xf32, #tpu.memory_space<vmem>>, vector<1x4xf32>
    %18 = vector.broadcast %17 : vector<1x4xf32> to vector<256x4xf32>
    %19 = arith.addf %16, %18 : vector<256x4xf32>
    %cst_17 = arith.constant 0.000000e+00 : f32
    %20 = vector.broadcast %cst_17 : f32 to vector<256x4xf32>
    %21 = arith.maximumf %19, %20 : vector<256x4xf32>
    %c0_18 = arith.constant 0 : index
    %c0_19 = arith.constant 0 : index
    %22 = vector.load %arg11[%c0_18, %c0_19] : memref<4x4xf32, #tpu.memory_space<vmem>>, vector<4x4xf32>
    %cst_20 = arith.constant dense<0.000000e+00> : vector<256x4xf32>
    %23 = tpu.matmul %1, %22, %cst_20 {dimension_numbers = #tpu.dot_dimension_numbers<[1], [0], [0], [1], [0, 0, 1, 1], [], []>} : vector<256x4xf32>, vector<4x4xf32>, vector<256x4xf32> -> vector<256x4xf32>
    %c0_21 = arith.constant 0 : index
    %c0_22 = arith.constant 0 : index
    %24 = vector.load %arg12[%c0_21, %c0_22] : memref<1x4xf32, #tpu.memory_space<vmem>>, vector<1x4xf32>
    %25 = vector.broadcast %24 : vector<1x4xf32> to vector<256x4xf32>
    %26 = arith.mulf %23, %25 : vector<256x4xf32>
    %c0_23 = arith.constant 0 : index
    %c0_24 = arith.constant 0 : index
    %27 = vector.load %arg13[%c0_23, %c0_24] : memref<1x4xf32, #tpu.memory_space<vmem>>, vector<1x4xf32>
    %28 = vector.broadcast %27 : vector<1x4xf32> to vector<256x4xf32>
    %29 = arith.addf %26, %28 : vector<256x4xf32>
    %cst_25 = arith.constant 0.000000e+00 : f32
    %30 = vector.broadcast %cst_25 : f32 to vector<256x4xf32>
    %31 = arith.maximumf %29, %30 : vector<256x4xf32>
    %cst_26 = arith.constant 0.000000e+00 : f32
    %32 = vector.broadcast %cst_26 : f32 to vector<1x1x18x4xf32>
    %cst_27 = arith.constant 0.000000e+00 : f32
    %33 = vector.broadcast %cst_27 : f32 to vector<1x18x1x4xf32>
    %c0_28 = arith.constant 0 : index
    %c0_29 = arith.constant 0 : index
    %c0_30 = arith.constant 0 : index
    %c0_31 = arith.constant 0 : index
    %34 = vector.load %arg21[%c0_28, %c0_29, %c0_30, %c0_31] : memref<1x18x18x4xf32, #tpu.memory_space<vmem>>, vector<1x1x18x4xf32>
    tpu.vector_store %arg21[%c0_28, %c0_29, %c0_30, %c0_31], %32 {strides = array<i32>} : memref<1x18x18x4xf32, #tpu.memory_space<vmem>>, vector<1x1x18x4xf32>,
    %c0_32 = arith.constant 0 : index
    %c17 = arith.constant 17 : index
    %c0_33 = arith.constant 0 : index
    %c0_34 = arith.constant 0 : index
    %35 = vector.load %arg21[%c0_32, %c17, %c0_33, %c0_34] : memref<1x18x18x4xf32, #tpu.memory_space<vmem>>, vector<1x1x18x4xf32>
    tpu.vector_store %arg21[%c0_32, %c17, %c0_33, %c0_34], %32 {strides = array<i32>} : memref<1x18x18x4xf32, #tpu.memory_space<vmem>>, vector<1x1x18x4xf32>,
    %c0_35 = arith.constant 0 : index
    %c0_36 = arith.constant 0 : index
    %c0_37 = arith.constant 0 : index
    %c0_38 = arith.constant 0 : index
    %36 = vector.load %arg21[%c0_35, %c0_36, %c0_37, %c0_38] : memref<1x18x18x4xf32, #tpu.memory_space<vmem>>, vector<1x18x1x4xf32>
    tpu.vector_store %arg21[%c0_35, %c0_36, %c0_37, %c0_38], %33 {strides = array<i32>} : memref<1x18x18x4xf32, #tpu.memory_space<vmem>>, vector<1x18x1x4xf32>,
    %c0_39 = arith.constant 0 : index
    %c0_40 = arith.constant 0 : index
    %c17_41 = arith.constant 17 : index
    %c0_42 = arith.constant 0 : index
    %37 = vector.load %arg21[%c0_39, %c0_40, %c17_41, %c0_42] : memref<1x18x18x4xf32, #tpu.memory_space<vmem>>, vector<1x18x1x4xf32>
    tpu.vector_store %arg21[%c0_39, %c0_40, %c17_41, %c0_42], %33 {strides = array<i32>} : memref<1x18x18x4xf32, #tpu.memory_space<vmem>>, vector<1x18x1x4xf32>,
    %38 = vector.shape_cast %21 : vector<256x4xf32> to vector<1x16x16x4xf32>
    %c0_43 = arith.constant 0 : index
    %c1 = arith.constant 1 : index
    %c1_44 = arith.constant 1 : index
    %c0_45 = arith.constant 0 : index
    %39 = vector.load %arg21[%c0_43, %c1, %c1_44, %c0_45] : memref<1x18x18x4xf32, #tpu.memory_space<vmem>>, vector<1x16x16x4xf32>
    tpu.vector_store %arg21[%c0_43, %c1, %c1_44, %c0_45], %38 {strides = array<i32>} : memref<1x18x18x4xf32, #tpu.memory_space<vmem>>, vector<1x16x16x4xf32>,
    %c0_46 = arith.constant 0 : index
    %c0_47 = arith.constant 0 : index
    %c0_48 = arith.constant 0 : index
    %c0_49 = arith.constant 0 : index
    %40 = vector.load %arg21[%c0_46, %c0_47, %c0_48, %c0_49] : memref<1x18x18x4xf32, #tpu.memory_space<vmem>>, vector<1x16x16x4xf32>
    %41 = vector.shape_cast %40 : vector<1x16x16x4xf32> to vector<256x4xf32>
    %c0_50 = arith.constant 0 : index
    %c0_51 = arith.constant 0 : index
    %42 = vector.load %arg8[%c0_50, %c0_51] : memref<36x4xf32, #tpu.memory_space<vmem>>, vector<4x4xf32>
    %cst_52 = arith.constant dense<0.000000e+00> : vector<256x4xf32>
    %43 = tpu.matmul %41, %42, %cst_52 {dimension_numbers = #tpu.dot_dimension_numbers<[1], [0], [0], [1], [0, 0, 1, 1], [], []>} : vector<256x4xf32>, vector<4x4xf32>, vector<256x4xf32> -> vector<256x4xf32>
    %c0_53 = arith.constant 0 : index
    %c0_54 = arith.constant 0 : index
    %c1_55 = arith.constant 1 : index
    %c0_56 = arith.constant 0 : index
    %44 = vector.load %arg21[%c0_53, %c0_54, %c1_55, %c0_56] : memref<1x18x18x4xf32, #tpu.memory_space<vmem>>, vector<1x16x16x4xf32>
    %45 = vector.shape_cast %44 : vector<1x16x16x4xf32> to vector<256x4xf32>
    %c4 = arith.constant 4 : index
    %c0_57 = arith.constant 0 : index
    %46 = vector.load %arg8[%c4, %c0_57] : memref<36x4xf32, #tpu.memory_space<vmem>>, vector<4x4xf32>
    %cst_58 = arith.constant dense<0.000000e+00> : vector<256x4xf32>
    %47 = tpu.matmul %45, %46, %cst_58 {dimension_numbers = #tpu.dot_dimension_numbers<[1], [0], [0], [1], [0, 0, 1, 1], [], []>} : vector<256x4xf32>, vector<4x4xf32>, vector<256x4xf32> -> vector<256x4xf32>
    %48 = arith.addf %43, %47 : vector<256x4xf32>
    %c0_59 = arith.constant 0 : index
    %c0_60 = arith.constant 0 : index
    %c2 = arith.constant 2 : index
    %c0_61 = arith.constant 0 : index
    %49 = vector.load %arg21[%c0_59, %c0_60, %c2, %c0_61] : memref<1x18x18x4xf32, #tpu.memory_space<vmem>>, vector<1x16x16x4xf32>
    %50 = vector.shape_cast %49 : vector<1x16x16x4xf32> to vector<256x4xf32>
    %c8 = arith.constant 8 : index
    %c0_62 = arith.constant 0 : index
    %51 = vector.load %arg8[%c8, %c0_62] : memref<36x4xf32, #tpu.memory_space<vmem>>, vector<4x4xf32>
    %cst_63 = arith.constant dense<0.000000e+00> : vector<256x4xf32>
    %52 = tpu.matmul %50, %51, %cst_63 {dimension_numbers = #tpu.dot_dimension_numbers<[1], [0], [0], [1], [0, 0, 1, 1], [], []>} : vector<256x4xf32>, vector<4x4xf32>, vector<256x4xf32> -> vector<256x4xf32>
    %53 = arith.addf %48, %52 : vector<256x4xf32>
    %c0_64 = arith.constant 0 : index
    %c1_65 = arith.constant 1 : index
    %c0_66 = arith.constant 0 : index
    %c0_67 = arith.constant 0 : index
    %54 = vector.load %arg21[%c0_64, %c1_65, %c0_66, %c0_67] : memref<1x18x18x4xf32, #tpu.memory_space<vmem>>, vector<1x16x16x4xf32>
    %55 = vector.shape_cast %54 : vector<1x16x16x4xf32> to vector<256x4xf32>
    %c12 = arith.constant 12 : index
    %c0_68 = arith.constant 0 : index
    %56 = vector.load %arg8[%c12, %c0_68] : memref<36x4xf32, #tpu.memory_space<vmem>>, vector<4x4xf32>
    %cst_69 = arith.constant dense<0.000000e+00> : vector<256x4xf32>
    %57 = tpu.matmul %55, %56, %cst_69 {dimension_numbers = #tpu.dot_dimension_numbers<[1], [0], [0], [1], [0, 0, 1, 1], [], []>} : vector<256x4xf32>, vector<4x4xf32>, vector<256x4xf32> -> vector<256x4xf32>
    %58 = arith.addf %53, %57 : vector<256x4xf32>
    %c0_70 = arith.constant 0 : index
    %c1_71 = arith.constant 1 : index
    %c1_72 = arith.constant 1 : index
    %c0_73 = arith.constant 0 : index
    %59 = vector.load %arg21[%c0_70, %c1_71, %c1_72, %c0_73] : memref<1x18x18x4xf32, #tpu.memory_space<vmem>>, vector<1x16x16x4xf32>
    %60 = vector.shape_cast %59 : vector<1x16x16x4xf32> to vector<256x4xf32>
    %c16 = arith.constant 16 : index
    %c0_74 = arith.constant 0 : index
    %61 = vector.load %arg8[%c16, %c0_74] : memref<36x4xf32, #tpu.memory_space<vmem>>, vector<4x4xf32>
    %cst_75 = arith.constant dense<0.000000e+00> : vector<256x4xf32>
    %62 = tpu.matmul %60, %61, %cst_75 {dimension_numbers = #tpu.dot_dimension_numbers<[1], [0], [0], [1], [0, 0, 1, 1], [], []>} : vector<256x4xf32>, vector<4x4xf32>, vector<256x4xf32> -> vector<256x4xf32>
    %63 = arith.addf %58, %62 : vector<256x4xf32>
    %c0_76 = arith.constant 0 : index
    %c1_77 = arith.constant 1 : index
    %c2_78 = arith.constant 2 : index
    %c0_79 = arith.constant 0 : index
    %64 = vector.load %arg21[%c0_76, %c1_77, %c2_78, %c0_79] : memref<1x18x18x4xf32, #tpu.memory_space<vmem>>, vector<1x16x16x4xf32>
    %65 = vector.shape_cast %64 : vector<1x16x16x4xf32> to vector<256x4xf32>
    %c20 = arith.constant 20 : index
    %c0_80 = arith.constant 0 : index
    %66 = vector.load %arg8[%c20, %c0_80] : memref<36x4xf32, #tpu.memory_space<vmem>>, vector<4x4xf32>
    %cst_81 = arith.constant dense<0.000000e+00> : vector<256x4xf32>
    %67 = tpu.matmul %65, %66, %cst_81 {dimension_numbers = #tpu.dot_dimension_numbers<[1], [0], [0], [1], [0, 0, 1, 1], [], []>} : vector<256x4xf32>, vector<4x4xf32>, vector<256x4xf32> -> vector<256x4xf32>
    %68 = arith.addf %63, %67 : vector<256x4xf32>
    %c0_82 = arith.constant 0 : index
    %c2_83 = arith.constant 2 : index
    %c0_84 = arith.constant 0 : index
    %c0_85 = arith.constant 0 : index
    %69 = vector.load %arg21[%c0_82, %c2_83, %c0_84, %c0_85] : memref<1x18x18x4xf32, #tpu.memory_space<vmem>>, vector<1x16x16x4xf32>
    %70 = vector.shape_cast %69 : vector<1x16x16x4xf32> to vector<256x4xf32>
    %c24 = arith.constant 24 : index
    %c0_86 = arith.constant 0 : index
    %71 = vector.load %arg8[%c24, %c0_86] : memref<36x4xf32, #tpu.memory_space<vmem>>, vector<4x4xf32>
    %cst_87 = arith.constant dense<0.000000e+00> : vector<256x4xf32>
    %72 = tpu.matmul %70, %71, %cst_87 {dimension_numbers = #tpu.dot_dimension_numbers<[1], [0], [0], [1], [0, 0, 1, 1], [], []>} : vector<256x4xf32>, vector<4x4xf32>, vector<256x4xf32> -> vector<256x4xf32>
    %73 = arith.addf %68, %72 : vector<256x4xf32>
    %c0_88 = arith.constant 0 : index
    %c2_89 = arith.constant 2 : index
    %c1_90 = arith.constant 1 : index
    %c0_91 = arith.constant 0 : index
    %74 = vector.load %arg21[%c0_88, %c2_89, %c1_90, %c0_91] : memref<1x18x18x4xf32, #tpu.memory_space<vmem>>, vector<1x16x16x4xf32>
    %75 = vector.shape_cast %74 : vector<1x16x16x4xf32> to vector<256x4xf32>
    %c28 = arith.constant 28 : index
    %c0_92 = arith.constant 0 : index
    %76 = vector.load %arg8[%c28, %c0_92] : memref<36x4xf32, #tpu.memory_space<vmem>>, vector<4x4xf32>
    %cst_93 = arith.constant dense<0.000000e+00> : vector<256x4xf32>
    %77 = tpu.matmul %75, %76, %cst_93 {dimension_numbers = #tpu.dot_dimension_numbers<[1], [0], [0], [1], [0, 0, 1, 1], [], []>} : vector<256x4xf32>, vector<4x4xf32>, vector<256x4xf32> -> vector<256x4xf32>
    %78 = arith.addf %73, %77 : vector<256x4xf32>
    %c0_94 = arith.constant 0 : index
    %c2_95 = arith.constant 2 : index
    %c2_96 = arith.constant 2 : index
    %c0_97 = arith.constant 0 : index
    %79 = vector.load %arg21[%c0_94, %c2_95, %c2_96, %c0_97] : memref<1x18x18x4xf32, #tpu.memory_space<vmem>>, vector<1x16x16x4xf32>
    %80 = vector.shape_cast %79 : vector<1x16x16x4xf32> to vector<256x4xf32>
    %c32 = arith.constant 32 : index
    %c0_98 = arith.constant 0 : index
    %81 = vector.load %arg8[%c32, %c0_98] : memref<36x4xf32, #tpu.memory_space<vmem>>, vector<4x4xf32>
    %cst_99 = arith.constant dense<0.000000e+00> : vector<256x4xf32>
    %82 = tpu.matmul %80, %81, %cst_99 {dimension_numbers = #tpu.dot_dimension_numbers<[1], [0], [0], [1], [0, 0, 1, 1], [], []>} : vector<256x4xf32>, vector<4x4xf32>, vector<256x4xf32> -> vector<256x4xf32>
    %83 = arith.addf %78, %82 : vector<256x4xf32>
    %c0_100 = arith.constant 0 : index
    %c0_101 = arith.constant 0 : index
    %84 = vector.load %arg9[%c0_100, %c0_101] : memref<1x4xf32, #tpu.memory_space<vmem>>, vector<1x4xf32>
    %85 = vector.broadcast %84 : vector<1x4xf32> to vector<256x4xf32>
    %86 = arith.mulf %83, %85 : vector<256x4xf32>
    %c0_102 = arith.constant 0 : index
    %c0_103 = arith.constant 0 : index
    %87 = vector.load %arg10[%c0_102, %c0_103] : memref<1x4xf32, #tpu.memory_space<vmem>>, vector<1x4xf32>
    %88 = vector.broadcast %87 : vector<1x4xf32> to vector<256x4xf32>
    %89 = arith.addf %86, %88 : vector<256x4xf32>
    %cst_104 = arith.constant 0.000000e+00 : f32
    %90 = vector.broadcast %cst_104 : f32 to vector<256x4xf32>
    %91 = arith.maximumf %89, %90 : vector<256x4xf32>
    %cst_105 = arith.constant 0.000000e+00 : f32
    %92 = vector.broadcast %cst_105 : f32 to vector<1x2x20x4xf32>
    %cst_106 = arith.constant 0.000000e+00 : f32
    %93 = vector.broadcast %cst_106 : f32 to vector<1x20x2x4xf32>
    %c0_107 = arith.constant 0 : index
    %c0_108 = arith.constant 0 : index
    %c0_109 = arith.constant 0 : index
    %c0_110 = arith.constant 0 : index
    %94 = vector.load %arg22[%c0_107, %c0_108, %c0_109, %c0_110] : memref<1x20x20x4xf32, #tpu.memory_space<vmem>>, vector<1x2x20x4xf32>
    tpu.vector_store %arg22[%c0_107, %c0_108, %c0_109, %c0_110], %92 {strides = array<i32>} : memref<1x20x20x4xf32, #tpu.memory_space<vmem>>, vector<1x2x20x4xf32>,
    %c0_111 = arith.constant 0 : index
    %c18 = arith.constant 18 : index
    %c0_112 = arith.constant 0 : index
    %c0_113 = arith.constant 0 : index
    %95 = vector.load %arg22[%c0_111, %c18, %c0_112, %c0_113] : memref<1x20x20x4xf32, #tpu.memory_space<vmem>>, vector<1x2x20x4xf32>
    tpu.vector_store %arg22[%c0_111, %c18, %c0_112, %c0_113], %92 {strides = array<i32>} : memref<1x20x20x4xf32, #tpu.memory_space<vmem>>, vector<1x2x20x4xf32>,
    %c0_114 = arith.constant 0 : index
    %c0_115 = arith.constant 0 : index
    %c0_116 = arith.constant 0 : index
    %c0_117 = arith.constant 0 : index
    %96 = vector.load %arg22[%c0_114, %c0_115, %c0_116, %c0_117] : memref<1x20x20x4xf32, #tpu.memory_space<vmem>>, vector<1x20x2x4xf32>
    tpu.vector_store %arg22[%c0_114, %c0_115, %c0_116, %c0_117], %93 {strides = array<i32>} : memref<1x20x20x4xf32, #tpu.memory_space<vmem>>, vector<1x20x2x4xf32>,
    %c0_118 = arith.constant 0 : index
    %c0_119 = arith.constant 0 : index
    %c18_120 = arith.constant 18 : index
    %c0_121 = arith.constant 0 : index
    %97 = vector.load %arg22[%c0_118, %c0_119, %c18_120, %c0_121] : memref<1x20x20x4xf32, #tpu.memory_space<vmem>>, vector<1x20x2x4xf32>
    tpu.vector_store %arg22[%c0_118, %c0_119, %c18_120, %c0_121], %93 {strides = array<i32>} : memref<1x20x20x4xf32, #tpu.memory_space<vmem>>, vector<1x20x2x4xf32>,
    %98 = vector.shape_cast %31 : vector<256x4xf32> to vector<1x16x16x4xf32>
    %c0_122 = arith.constant 0 : index
    %c2_123 = arith.constant 2 : index
    %c2_124 = arith.constant 2 : index
    %c0_125 = arith.constant 0 : index
    %99 = vector.load %arg22[%c0_122, %c2_123, %c2_124, %c0_125] : memref<1x20x20x4xf32, #tpu.memory_space<vmem>>, vector<1x16x16x4xf32>
    tpu.vector_store %arg22[%c0_122, %c2_123, %c2_124, %c0_125], %98 {strides = array<i32>} : memref<1x20x20x4xf32, #tpu.memory_space<vmem>>, vector<1x16x16x4xf32>,
    %c0_126 = arith.constant 0 : index
    %c0_127 = arith.constant 0 : index
    %c0_128 = arith.constant 0 : index
    %c0_129 = arith.constant 0 : index
    %100 = vector.load %arg22[%c0_126, %c0_127, %c0_128, %c0_129] : memref<1x20x20x4xf32, #tpu.memory_space<vmem>>, vector<1x16x16x4xf32>
    %101 = vector.shape_cast %100 : vector<1x16x16x4xf32> to vector<256x4xf32>
    %c0_130 = arith.constant 0 : index
    %c0_131 = arith.constant 0 : index
    %102 = vector.load %arg14[%c0_130, %c0_131] : memref<100x4xf32, #tpu.memory_space<vmem>>, vector<4x4xf32>
    %cst_132 = arith.constant dense<0.000000e+00> : vector<256x4xf32>
    %103 = tpu.matmul %101, %102, %cst_132 {dimension_numbers = #tpu.dot_dimension_numbers<[1], [0], [0], [1], [0, 0, 1, 1], [], []>} : vector<256x4xf32>, vector<4x4xf32>, vector<256x4xf32> -> vector<256x4xf32>
    %c0_133 = arith.constant 0 : index
    %c0_134 = arith.constant 0 : index
    %c1_135 = arith.constant 1 : index
    %c0_136 = arith.constant 0 : index
    %104 = vector.load %arg22[%c0_133, %c0_134, %c1_135, %c0_136] : memref<1x20x20x4xf32, #tpu.memory_space<vmem>>, vector<1x16x16x4xf32>
    %105 = vector.shape_cast %104 : vector<1x16x16x4xf32> to vector<256x4xf32>
    %c4_137 = arith.constant 4 : index
    %c0_138 = arith.constant 0 : index
    %106 = vector.load %arg14[%c4_137, %c0_138] : memref<100x4xf32, #tpu.memory_space<vmem>>, vector<4x4xf32>
    %cst_139 = arith.constant dense<0.000000e+00> : vector<256x4xf32>
    %107 = tpu.matmul %105, %106, %cst_139 {dimension_numbers = #tpu.dot_dimension_numbers<[1], [0], [0], [1], [0, 0, 1, 1], [], []>} : vector<256x4xf32>, vector<4x4xf32>, vector<256x4xf32> -> vector<256x4xf32>
    %108 = arith.addf %103, %107 : vector<256x4xf32>
    %c0_140 = arith.constant 0 : index
    %c0_141 = arith.constant 0 : index
    %c2_142 = arith.constant 2 : index
    %c0_143 = arith.constant 0 : index
    %109 = vector.load %arg22[%c0_140, %c0_141, %c2_142, %c0_143] : memref<1x20x20x4xf32, #tpu.memory_space<vmem>>, vector<1x16x16x4xf32>
    %110 = vector.shape_cast %109 : vector<1x16x16x4xf32> to vector<256x4xf32>
    %c8_144 = arith.constant 8 : index
    %c0_145 = arith.constant 0 : index
    %111 = vector.load %arg14[%c8_144, %c0_145] : memref<100x4xf32, #tpu.memory_space<vmem>>, vector<4x4xf32>
    %cst_146 = arith.constant dense<0.000000e+00> : vector<256x4xf32>
    %112 = tpu.matmul %110, %111, %cst_146 {dimension_numbers = #tpu.dot_dimension_numbers<[1], [0], [0], [1], [0, 0, 1, 1], [], []>} : vector<256x4xf32>, vector<4x4xf32>, vector<256x4xf32> -> vector<256x4xf32>
    %113 = arith.addf %108, %112 : vector<256x4xf32>
    %c0_147 = arith.constant 0 : index
    %c0_148 = arith.constant 0 : index
    %c3 = arith.constant 3 : index
    %c0_149 = arith.constant 0 : index
    %114 = vector.load %arg22[%c0_147, %c0_148, %c3, %c0_149] : memref<1x20x20x4xf32, #tpu.memory_space<vmem>>, vector<1x16x16x4xf32>
    %115 = vector.shape_cast %114 : vector<1x16x16x4xf32> to vector<256x4xf32>
    %c12_150 = arith.constant 12 : index
    %c0_151 = arith.constant 0 : index
    %116 = vector.load %arg14[%c12_150, %c0_151] : memref<100x4xf32, #tpu.memory_space<vmem>>, vector<4x4xf32>
    %cst_152 = arith.constant dense<0.000000e+00> : vector<256x4xf32>
    %117 = tpu.matmul %115, %116, %cst_152 {dimension_numbers = #tpu.dot_dimension_numbers<[1], [0], [0], [1], [0, 0, 1, 1], [], []>} : vector<256x4xf32>, vector<4x4xf32>, vector<256x4xf32> -> vector<256x4xf32>
    %118 = arith.addf %113, %117 : vector<256x4xf32>
    %c0_153 = arith.constant 0 : index
    %c0_154 = arith.constant 0 : index
    %c4_155 = arith.constant 4 : index
    %c0_156 = arith.constant 0 : index
    %119 = vector.load %arg22[%c0_153, %c0_154, %c4_155, %c0_156] : memref<1x20x20x4xf32, #tpu.memory_space<vmem>>, vector<1x16x16x4xf32>
    %120 = vector.shape_cast %119 : vector<1x16x16x4xf32> to vector<256x4xf32>
    %c16_157 = arith.constant 16 : index
    %c0_158 = arith.constant 0 : index
    %121 = vector.load %arg14[%c16_157, %c0_158] : memref<100x4xf32, #tpu.memory_space<vmem>>, vector<4x4xf32>
    %cst_159 = arith.constant dense<0.000000e+00> : vector<256x4xf32>
    %122 = tpu.matmul %120, %121, %cst_159 {dimension_numbers = #tpu.dot_dimension_numbers<[1], [0], [0], [1], [0, 0, 1, 1], [], []>} : vector<256x4xf32>, vector<4x4xf32>, vector<256x4xf32> -> vector<256x4xf32>
    %123 = arith.addf %118, %122 : vector<256x4xf32>
    %c0_160 = arith.constant 0 : index
    %c1_161 = arith.constant 1 : index
    %c0_162 = arith.constant 0 : index
    %c0_163 = arith.constant 0 : index
    %124 = vector.load %arg22[%c0_160, %c1_161, %c0_162, %c0_163] : memref<1x20x20x4xf32, #tpu.memory_space<vmem>>, vector<1x16x16x4xf32>
    %125 = vector.shape_cast %124 : vector<1x16x16x4xf32> to vector<256x4xf32>
    %c20_164 = arith.constant 20 : index
    %c0_165 = arith.constant 0 : index
    %126 = vector.load %arg14[%c20_164, %c0_165] : memref<100x4xf32, #tpu.memory_space<vmem>>, vector<4x4xf32>
    %cst_166 = arith.constant dense<0.000000e+00> : vector<256x4xf32>
    %127 = tpu.matmul %125, %126, %cst_166 {dimension_numbers = #tpu.dot_dimension_numbers<[1], [0], [0], [1], [0, 0, 1, 1], [], []>} : vector<256x4xf32>, vector<4x4xf32>, vector<256x4xf32> -> vector<256x4xf32>
    %128 = arith.addf %123, %127 : vector<256x4xf32>
    %c0_167 = arith.constant 0 : index
    %c1_168 = arith.constant 1 : index
    %c1_169 = arith.constant 1 : index
    %c0_170 = arith.constant 0 : index
    %129 = vector.load %arg22[%c0_167, %c1_168, %c1_169, %c0_170] : memref<1x20x20x4xf32, #tpu.memory_space<vmem>>, vector<1x16x16x4xf32>
    %130 = vector.shape_cast %129 : vector<1x16x16x4xf32> to vector<256x4xf32>
    %c24_171 = arith.constant 24 : index
    %c0_172 = arith.constant 0 : index
    %131 = vector.load %arg14[%c24_171, %c0_172] : memref<100x4xf32, #tpu.memory_space<vmem>>, vector<4x4xf32>
    %cst_173 = arith.constant dense<0.000000e+00> : vector<256x4xf32>
    %132 = tpu.matmul %130, %131, %cst_173 {dimension_numbers = #tpu.dot_dimension_numbers<[1], [0], [0], [1], [0, 0, 1, 1], [], []>} : vector<256x4xf32>, vector<4x4xf32>, vector<256x4xf32> -> vector<256x4xf32>
    %133 = arith.addf %128, %132 : vector<256x4xf32>
    %c0_174 = arith.constant 0 : index
    %c1_175 = arith.constant 1 : index
    %c2_176 = arith.constant 2 : index
    %c0_177 = arith.constant 0 : index
    %134 = vector.load %arg22[%c0_174, %c1_175, %c2_176, %c0_177] : memref<1x20x20x4xf32, #tpu.memory_space<vmem>>, vector<1x16x16x4xf32>
    %135 = vector.shape_cast %134 : vector<1x16x16x4xf32> to vector<256x4xf32>
    %c28_178 = arith.constant 28 : index
    %c0_179 = arith.constant 0 : index
    %136 = vector.load %arg14[%c28_178, %c0_179] : memref<100x4xf32, #tpu.memory_space<vmem>>, vector<4x4xf32>
    %cst_180 = arith.constant dense<0.000000e+00> : vector<256x4xf32>
    %137 = tpu.matmul %135, %136, %cst_180 {dimension_numbers = #tpu.dot_dimension_numbers<[1], [0], [0], [1], [0, 0, 1, 1], [], []>} : vector<256x4xf32>, vector<4x4xf32>, vector<256x4xf32> -> vector<256x4xf32>
    %138 = arith.addf %133, %137 : vector<256x4xf32>
    %c0_181 = arith.constant 0 : index
    %c1_182 = arith.constant 1 : index
    %c3_183 = arith.constant 3 : index
    %c0_184 = arith.constant 0 : index
    %139 = vector.load %arg22[%c0_181, %c1_182, %c3_183, %c0_184] : memref<1x20x20x4xf32, #tpu.memory_space<vmem>>, vector<1x16x16x4xf32>
    %140 = vector.shape_cast %139 : vector<1x16x16x4xf32> to vector<256x4xf32>
    %c32_185 = arith.constant 32 : index
    %c0_186 = arith.constant 0 : index
    %141 = vector.load %arg14[%c32_185, %c0_186] : memref<100x4xf32, #tpu.memory_space<vmem>>, vector<4x4xf32>
    %cst_187 = arith.constant dense<0.000000e+00> : vector<256x4xf32>
    %142 = tpu.matmul %140, %141, %cst_187 {dimension_numbers = #tpu.dot_dimension_numbers<[1], [0], [0], [1], [0, 0, 1, 1], [], []>} : vector<256x4xf32>, vector<4x4xf32>, vector<256x4xf32> -> vector<256x4xf32>
    %143 = arith.addf %138, %142 : vector<256x4xf32>
    %c0_188 = arith.constant 0 : index
    %c1_189 = arith.constant 1 : index
    %c4_190 = arith.constant 4 : index
    %c0_191 = arith.constant 0 : index
    %144 = vector.load %arg22[%c0_188, %c1_189, %c4_190, %c0_191] : memref<1x20x20x4xf32, #tpu.memory_space<vmem>>, vector<1x16x16x4xf32>
    %145 = vector.shape_cast %144 : vector<1x16x16x4xf32> to vector<256x4xf32>
    %c36 = arith.constant 36 : index
    %c0_192 = arith.constant 0 : index
    %146 = vector.load %arg14[%c36, %c0_192] : memref<100x4xf32, #tpu.memory_space<vmem>>, vector<4x4xf32>
    %cst_193 = arith.constant dense<0.000000e+00> : vector<256x4xf32>
    %147 = tpu.matmul %145, %146, %cst_193 {dimension_numbers = #tpu.dot_dimension_numbers<[1], [0], [0], [1], [0, 0, 1, 1], [], []>} : vector<256x4xf32>, vector<4x4xf32>, vector<256x4xf32> -> vector<256x4xf32>
    %148 = arith.addf %143, %147 : vector<256x4xf32>
    %c0_194 = arith.constant 0 : index
    %c2_195 = arith.constant 2 : index
    %c0_196 = arith.constant 0 : index
    %c0_197 = arith.constant 0 : index
    %149 = vector.load %arg22[%c0_194, %c2_195, %c0_196, %c0_197] : memref<1x20x20x4xf32, #tpu.memory_space<vmem>>, vector<1x16x16x4xf32>
    %150 = vector.shape_cast %149 : vector<1x16x16x4xf32> to vector<256x4xf32>
    %c40 = arith.constant 40 : index
    %c0_198 = arith.constant 0 : index
    %151 = vector.load %arg14[%c40, %c0_198] : memref<100x4xf32, #tpu.memory_space<vmem>>, vector<4x4xf32>
    %cst_199 = arith.constant dense<0.000000e+00> : vector<256x4xf32>
    %152 = tpu.matmul %150, %151, %cst_199 {dimension_numbers = #tpu.dot_dimension_numbers<[1], [0], [0], [1], [0, 0, 1, 1], [], []>} : vector<256x4xf32>, vector<4x4xf32>, vector<256x4xf32> -> vector<256x4xf32>
    %153 = arith.addf %148, %152 : vector<256x4xf32>
    %c0_200 = arith.constant 0 : index
    %c2_201 = arith.constant 2 : index
    %c1_202 = arith.constant 1 : index
    %c0_203 = arith.constant 0 : index
    %154 = vector.load %arg22[%c0_200, %c2_201, %c1_202, %c0_203] : memref<1x20x20x4xf32, #tpu.memory_space<vmem>>, vector<1x16x16x4xf32>
    %155 = vector.shape_cast %154 : vector<1x16x16x4xf32> to vector<256x4xf32>
    %c44 = arith.constant 44 : index
    %c0_204 = arith.constant 0 : index
    %156 = vector.load %arg14[%c44, %c0_204] : memref<100x4xf32, #tpu.memory_space<vmem>>, vector<4x4xf32>
    %cst_205 = arith.constant dense<0.000000e+00> : vector<256x4xf32>
    %157 = tpu.matmul %155, %156, %cst_205 {dimension_numbers = #tpu.dot_dimension_numbers<[1], [0], [0], [1], [0, 0, 1, 1], [], []>} : vector<256x4xf32>, vector<4x4xf32>, vector<256x4xf32> -> vector<256x4xf32>
    %158 = arith.addf %153, %157 : vector<256x4xf32>
    %c0_206 = arith.constant 0 : index
    %c2_207 = arith.constant 2 : index
    %c2_208 = arith.constant 2 : index
    %c0_209 = arith.constant 0 : index
    %159 = vector.load %arg22[%c0_206, %c2_207, %c2_208, %c0_209] : memref<1x20x20x4xf32, #tpu.memory_space<vmem>>, vector<1x16x16x4xf32>
    %160 = vector.shape_cast %159 : vector<1x16x16x4xf32> to vector<256x4xf32>
    %c48 = arith.constant 48 : index
    %c0_210 = arith.constant 0 : index
    %161 = vector.load %arg14[%c48, %c0_210] : memref<100x4xf32, #tpu.memory_space<vmem>>, vector<4x4xf32>
    %cst_211 = arith.constant dense<0.000000e+00> : vector<256x4xf32>
    %162 = tpu.matmul %160, %161, %cst_211 {dimension_numbers = #tpu.dot_dimension_numbers<[1], [0], [0], [1], [0, 0, 1, 1], [], []>} : vector<256x4xf32>, vector<4x4xf32>, vector<256x4xf32> -> vector<256x4xf32>
    %163 = arith.addf %158, %162 : vector<256x4xf32>
    %c0_212 = arith.constant 0 : index
    %c2_213 = arith.constant 2 : index
    %c3_214 = arith.constant 3 : index
    %c0_215 = arith.constant 0 : index
    %164 = vector.load %arg22[%c0_212, %c2_213, %c3_214, %c0_215] : memref<1x20x20x4xf32, #tpu.memory_space<vmem>>, vector<1x16x16x4xf32>
    %165 = vector.shape_cast %164 : vector<1x16x16x4xf32> to vector<256x4xf32>
    %c52 = arith.constant 52 : index
    %c0_216 = arith.constant 0 : index
    %166 = vector.load %arg14[%c52, %c0_216] : memref<100x4xf32, #tpu.memory_space<vmem>>, vector<4x4xf32>
    %cst_217 = arith.constant dense<0.000000e+00> : vector<256x4xf32>
    %167 = tpu.matmul %165, %166, %cst_217 {dimension_numbers = #tpu.dot_dimension_numbers<[1], [0], [0], [1], [0, 0, 1, 1], [], []>} : vector<256x4xf32>, vector<4x4xf32>, vector<256x4xf32> -> vector<256x4xf32>
    %168 = arith.addf %163, %167 : vector<256x4xf32>
    %c0_218 = arith.constant 0 : index
    %c2_219 = arith.constant 2 : index
    %c4_220 = arith.constant 4 : index
    %c0_221 = arith.constant 0 : index
    %169 = vector.load %arg22[%c0_218, %c2_219, %c4_220, %c0_221] : memref<1x20x20x4xf32, #tpu.memory_space<vmem>>, vector<1x16x16x4xf32>
    %170 = vector.shape_cast %169 : vector<1x16x16x4xf32> to vector<256x4xf32>
    %c56 = arith.constant 56 : index
    %c0_222 = arith.constant 0 : index
    %171 = vector.load %arg14[%c56, %c0_222] : memref<100x4xf32, #tpu.memory_space<vmem>>, vector<4x4xf32>
    %cst_223 = arith.constant dense<0.000000e+00> : vector<256x4xf32>
    %172 = tpu.matmul %170, %171, %cst_223 {dimension_numbers = #tpu.dot_dimension_numbers<[1], [0], [0], [1], [0, 0, 1, 1], [], []>} : vector<256x4xf32>, vector<4x4xf32>, vector<256x4xf32> -> vector<256x4xf32>
    %173 = arith.addf %168, %172 : vector<256x4xf32>
    %c0_224 = arith.constant 0 : index
    %c3_225 = arith.constant 3 : index
    %c0_226 = arith.constant 0 : index
    %c0_227 = arith.constant 0 : index
    %174 = vector.load %arg22[%c0_224, %c3_225, %c0_226, %c0_227] : memref<1x20x20x4xf32, #tpu.memory_space<vmem>>, vector<1x16x16x4xf32>
    %175 = vector.shape_cast %174 : vector<1x16x16x4xf32> to vector<256x4xf32>
    %c60 = arith.constant 60 : index
    %c0_228 = arith.constant 0 : index
    %176 = vector.load %arg14[%c60, %c0_228] : memref<100x4xf32, #tpu.memory_space<vmem>>, vector<4x4xf32>
    %cst_229 = arith.constant dense<0.000000e+00> : vector<256x4xf32>
    %177 = tpu.matmul %175, %176, %cst_229 {dimension_numbers = #tpu.dot_dimension_numbers<[1], [0], [0], [1], [0, 0, 1, 1], [], []>} : vector<256x4xf32>, vector<4x4xf32>, vector<256x4xf32> -> vector<256x4xf32>
    %178 = arith.addf %173, %177 : vector<256x4xf32>
    %c0_230 = arith.constant 0 : index
    %c3_231 = arith.constant 3 : index
    %c1_232 = arith.constant 1 : index
    %c0_233 = arith.constant 0 : index
    %179 = vector.load %arg22[%c0_230, %c3_231, %c1_232, %c0_233] : memref<1x20x20x4xf32, #tpu.memory_space<vmem>>, vector<1x16x16x4xf32>
    %180 = vector.shape_cast %179 : vector<1x16x16x4xf32> to vector<256x4xf32>
    %c64 = arith.constant 64 : index
    %c0_234 = arith.constant 0 : index
    %181 = vector.load %arg14[%c64, %c0_234] : memref<100x4xf32, #tpu.memory_space<vmem>>, vector<4x4xf32>
    %cst_235 = arith.constant dense<0.000000e+00> : vector<256x4xf32>
    %182 = tpu.matmul %180, %181, %cst_235 {dimension_numbers = #tpu.dot_dimension_numbers<[1], [0], [0], [1], [0, 0, 1, 1], [], []>} : vector<256x4xf32>, vector<4x4xf32>, vector<256x4xf32> -> vector<256x4xf32>
    %183 = arith.addf %178, %182 : vector<256x4xf32>
    %c0_236 = arith.constant 0 : index
    %c3_237 = arith.constant 3 : index
    %c2_238 = arith.constant 2 : index
    %c0_239 = arith.constant 0 : index
    %184 = vector.load %arg22[%c0_236, %c3_237, %c2_238, %c0_239] : memref<1x20x20x4xf32, #tpu.memory_space<vmem>>, vector<1x16x16x4xf32>
    %185 = vector.shape_cast %184 : vector<1x16x16x4xf32> to vector<256x4xf32>
    %c68 = arith.constant 68 : index
    %c0_240 = arith.constant 0 : index
    %186 = vector.load %arg14[%c68, %c0_240] : memref<100x4xf32, #tpu.memory_space<vmem>>, vector<4x4xf32>
    %cst_241 = arith.constant dense<0.000000e+00> : vector<256x4xf32>
    %187 = tpu.matmul %185, %186, %cst_241 {dimension_numbers = #tpu.dot_dimension_numbers<[1], [0], [0], [1], [0, 0, 1, 1], [], []>} : vector<256x4xf32>, vector<4x4xf32>, vector<256x4xf32> -> vector<256x4xf32>
    %188 = arith.addf %183, %187 : vector<256x4xf32>
    %c0_242 = arith.constant 0 : index
    %c3_243 = arith.constant 3 : index
    %c3_244 = arith.constant 3 : index
    %c0_245 = arith.constant 0 : index
    %189 = vector.load %arg22[%c0_242, %c3_243, %c3_244, %c0_245] : memref<1x20x20x4xf32, #tpu.memory_space<vmem>>, vector<1x16x16x4xf32>
    %190 = vector.shape_cast %189 : vector<1x16x16x4xf32> to vector<256x4xf32>
    %c72 = arith.constant 72 : index
    %c0_246 = arith.constant 0 : index
    %191 = vector.load %arg14[%c72, %c0_246] : memref<100x4xf32, #tpu.memory_space<vmem>>, vector<4x4xf32>
    %cst_247 = arith.constant dense<0.000000e+00> : vector<256x4xf32>
    %192 = tpu.matmul %190, %191, %cst_247 {dimension_numbers = #tpu.dot_dimension_numbers<[1], [0], [0], [1], [0, 0, 1, 1], [], []>} : vector<256x4xf32>, vector<4x4xf32>, vector<256x4xf32> -> vector<256x4xf32>
    %193 = arith.addf %188, %192 : vector<256x4xf32>
    %c0_248 = arith.constant 0 : index
    %c3_249 = arith.constant 3 : index
    %c4_250 = arith.constant 4 : index
    %c0_251 = arith.constant 0 : index
    %194 = vector.load %arg22[%c0_248, %c3_249, %c4_250, %c0_251] : memref<1x20x20x4xf32, #tpu.memory_space<vmem>>, vector<1x16x16x4xf32>
    %195 = vector.shape_cast %194 : vector<1x16x16x4xf32> to vector<256x4xf32>
    %c76 = arith.constant 76 : index
    %c0_252 = arith.constant 0 : index
    %196 = vector.load %arg14[%c76, %c0_252] : memref<100x4xf32, #tpu.memory_space<vmem>>, vector<4x4xf32>
    %cst_253 = arith.constant dense<0.000000e+00> : vector<256x4xf32>
    %197 = tpu.matmul %195, %196, %cst_253 {dimension_numbers = #tpu.dot_dimension_numbers<[1], [0], [0], [1], [0, 0, 1, 1], [], []>} : vector<256x4xf32>, vector<4x4xf32>, vector<256x4xf32> -> vector<256x4xf32>
    %198 = arith.addf %193, %197 : vector<256x4xf32>
    %c0_254 = arith.constant 0 : index
    %c4_255 = arith.constant 4 : index
    %c0_256 = arith.constant 0 : index
    %c0_257 = arith.constant 0 : index
    %199 = vector.load %arg22[%c0_254, %c4_255, %c0_256, %c0_257] : memref<1x20x20x4xf32, #tpu.memory_space<vmem>>, vector<1x16x16x4xf32>
    %200 = vector.shape_cast %199 : vector<1x16x16x4xf32> to vector<256x4xf32>
    %c80 = arith.constant 80 : index
    %c0_258 = arith.constant 0 : index
    %201 = vector.load %arg14[%c80, %c0_258] : memref<100x4xf32, #tpu.memory_space<vmem>>, vector<4x4xf32>
    %cst_259 = arith.constant dense<0.000000e+00> : vector<256x4xf32>
    %202 = tpu.matmul %200, %201, %cst_259 {dimension_numbers = #tpu.dot_dimension_numbers<[1], [0], [0], [1], [0, 0, 1, 1], [], []>} : vector<256x4xf32>, vector<4x4xf32>, vector<256x4xf32> -> vector<256x4xf32>
    %203 = arith.addf %198, %202 : vector<256x4xf32>
    %c0_260 = arith.constant 0 : index
    %c4_261 = arith.constant 4 : index
    %c1_262 = arith.constant 1 : index
    %c0_263 = arith.constant 0 : index
    %204 = vector.load %arg22[%c0_260, %c4_261, %c1_262, %c0_263] : memref<1x20x20x4xf32, #tpu.memory_space<vmem>>, vector<1x16x16x4xf32>
    %205 = vector.shape_cast %204 : vector<1x16x16x4xf32> to vector<256x4xf32>
    %c84 = arith.constant 84 : index
    %c0_264 = arith.constant 0 : index
    %206 = vector.load %arg14[%c84, %c0_264] : memref<100x4xf32, #tpu.memory_space<vmem>>, vector<4x4xf32>
    %cst_265 = arith.constant dense<0.000000e+00> : vector<256x4xf32>
    %207 = tpu.matmul %205, %206, %cst_265 {dimension_numbers = #tpu.dot_dimension_numbers<[1], [0], [0], [1], [0, 0, 1, 1], [], []>} : vector<256x4xf32>, vector<4x4xf32>, vector<256x4xf32> -> vector<256x4xf32>
    %208 = arith.addf %203, %207 : vector<256x4xf32>
    %c0_266 = arith.constant 0 : index
    %c4_267 = arith.constant 4 : index
    %c2_268 = arith.constant 2 : index
    %c0_269 = arith.constant 0 : index
    %209 = vector.load %arg22[%c0_266, %c4_267, %c2_268, %c0_269] : memref<1x20x20x4xf32, #tpu.memory_space<vmem>>, vector<1x16x16x4xf32>
    %210 = vector.shape_cast %209 : vector<1x16x16x4xf32> to vector<256x4xf32>
    %c88 = arith.constant 88 : index
    %c0_270 = arith.constant 0 : index
    %211 = vector.load %arg14[%c88, %c0_270] : memref<100x4xf32, #tpu.memory_space<vmem>>, vector<4x4xf32>
    %cst_271 = arith.constant dense<0.000000e+00> : vector<256x4xf32>
    %212 = tpu.matmul %210, %211, %cst_271 {dimension_numbers = #tpu.dot_dimension_numbers<[1], [0], [0], [1], [0, 0, 1, 1], [], []>} : vector<256x4xf32>, vector<4x4xf32>, vector<256x4xf32> -> vector<256x4xf32>
    %213 = arith.addf %208, %212 : vector<256x4xf32>
    %c0_272 = arith.constant 0 : index
    %c4_273 = arith.constant 4 : index
    %c3_274 = arith.constant 3 : index
    %c0_275 = arith.constant 0 : index
    %214 = vector.load %arg22[%c0_272, %c4_273, %c3_274, %c0_275] : memref<1x20x20x4xf32, #tpu.memory_space<vmem>>, vector<1x16x16x4xf32>
    %215 = vector.shape_cast %214 : vector<1x16x16x4xf32> to vector<256x4xf32>
    %c92 = arith.constant 92 : index
    %c0_276 = arith.constant 0 : index
    %216 = vector.load %arg14[%c92, %c0_276] : memref<100x4xf32, #tpu.memory_space<vmem>>, vector<4x4xf32>
    %cst_277 = arith.constant dense<0.000000e+00> : vector<256x4xf32>
    %217 = tpu.matmul %215, %216, %cst_277 {dimension_numbers = #tpu.dot_dimension_numbers<[1], [0], [0], [1], [0, 0, 1, 1], [], []>} : vector<256x4xf32>, vector<4x4xf32>, vector<256x4xf32> -> vector<256x4xf32>
    %218 = arith.addf %213, %217 : vector<256x4xf32>
    %c0_278 = arith.constant 0 : index
    %c4_279 = arith.constant 4 : index
    %c4_280 = arith.constant 4 : index
    %c0_281 = arith.constant 0 : index
    %219 = vector.load %arg22[%c0_278, %c4_279, %c4_280, %c0_281] : memref<1x20x20x4xf32, #tpu.memory_space<vmem>>, vector<1x16x16x4xf32>
    %220 = vector.shape_cast %219 : vector<1x16x16x4xf32> to vector<256x4xf32>
    %c96 = arith.constant 96 : index
    %c0_282 = arith.constant 0 : index
    %221 = vector.load %arg14[%c96, %c0_282] : memref<100x4xf32, #tpu.memory_space<vmem>>, vector<4x4xf32>
    %cst_283 = arith.constant dense<0.000000e+00> : vector<256x4xf32>
    %222 = tpu.matmul %220, %221, %cst_283 {dimension_numbers = #tpu.dot_dimension_numbers<[1], [0], [0], [1], [0, 0, 1, 1], [], []>} : vector<256x4xf32>, vector<4x4xf32>, vector<256x4xf32> -> vector<256x4xf32>
    %223 = arith.addf %218, %222 : vector<256x4xf32>
    %c0_284 = arith.constant 0 : index
    %c0_285 = arith.constant 0 : index
    %224 = vector.load %arg15[%c0_284, %c0_285] : memref<1x4xf32, #tpu.memory_space<vmem>>, vector<1x4xf32>
    %225 = vector.broadcast %224 : vector<1x4xf32> to vector<256x4xf32>
    %226 = arith.mulf %223, %225 : vector<256x4xf32>
    %c0_286 = arith.constant 0 : index
    %c0_287 = arith.constant 0 : index
    %227 = vector.load %arg16[%c0_286, %c0_287] : memref<1x4xf32, #tpu.memory_space<vmem>>, vector<1x4xf32>
    %228 = vector.broadcast %227 : vector<1x4xf32> to vector<256x4xf32>
    %229 = arith.addf %226, %228 : vector<256x4xf32>
    %cst_288 = arith.constant 0.000000e+00 : f32
    %230 = vector.broadcast %cst_288 : f32 to vector<256x4xf32>
    %231 = arith.maximumf %229, %230 : vector<256x4xf32>
    %cst_289 = arith.constant 0xFF800000 : f32
    %232 = vector.broadcast %cst_289 : f32 to vector<1x1x18x4xf32>
    %cst_290 = arith.constant 0xFF800000 : f32
    %233 = vector.broadcast %cst_290 : f32 to vector<1x18x1x4xf32>
    %c0_291 = arith.constant 0 : index
    %c0_292 = arith.constant 0 : index
    %c0_293 = arith.constant 0 : index
    %c0_294 = arith.constant 0 : index
    %234 = vector.load %arg23[%c0_291, %c0_292, %c0_293, %c0_294] : memref<1x18x18x4xf32, #tpu.memory_space<vmem>>, vector<1x1x18x4xf32>
    tpu.vector_store %arg23[%c0_291, %c0_292, %c0_293, %c0_294], %232 {strides = array<i32>} : memref<1x18x18x4xf32, #tpu.memory_space<vmem>>, vector<1x1x18x4xf32>,
    %c0_295 = arith.constant 0 : index
    %c17_296 = arith.constant 17 : index
    %c0_297 = arith.constant 0 : index
    %c0_298 = arith.constant 0 : index
    %235 = vector.load %arg23[%c0_295, %c17_296, %c0_297, %c0_298] : memref<1x18x18x4xf32, #tpu.memory_space<vmem>>, vector<1x1x18x4xf32>
    tpu.vector_store %arg23[%c0_295, %c17_296, %c0_297, %c0_298], %232 {strides = array<i32>} : memref<1x18x18x4xf32, #tpu.memory_space<vmem>>, vector<1x1x18x4xf32>,
    %c0_299 = arith.constant 0 : index
    %c0_300 = arith.constant 0 : index
    %c0_301 = arith.constant 0 : index
    %c0_302 = arith.constant 0 : index
    %236 = vector.load %arg23[%c0_299, %c0_300, %c0_301, %c0_302] : memref<1x18x18x4xf32, #tpu.memory_space<vmem>>, vector<1x18x1x4xf32>
    tpu.vector_store %arg23[%c0_299, %c0_300, %c0_301, %c0_302], %233 {strides = array<i32>} : memref<1x18x18x4xf32, #tpu.memory_space<vmem>>, vector<1x18x1x4xf32>,
    %c0_303 = arith.constant 0 : index
    %c0_304 = arith.constant 0 : index
    %c17_305 = arith.constant 17 : index
    %c0_306 = arith.constant 0 : index
    %237 = vector.load %arg23[%c0_303, %c0_304, %c17_305, %c0_306] : memref<1x18x18x4xf32, #tpu.memory_space<vmem>>, vector<1x18x1x4xf32>
    tpu.vector_store %arg23[%c0_303, %c0_304, %c17_305, %c0_306], %233 {strides = array<i32>} : memref<1x18x18x4xf32, #tpu.memory_space<vmem>>, vector<1x18x1x4xf32>,
    %c0_307 = arith.constant 0 : index
    %c1_308 = arith.constant 1 : index
    %c1_309 = arith.constant 1 : index
    %c0_310 = arith.constant 0 : index
    %238 = vector.load %arg23[%c0_307, %c1_308, %c1_309, %c0_310] : memref<1x18x18x4xf32, #tpu.memory_space<vmem>>, vector<1x16x16x4xf32>
    tpu.vector_store %arg23[%c0_307, %c1_308, %c1_309, %c0_310], %0 {strides = array<i32>} : memref<1x18x18x4xf32, #tpu.memory_space<vmem>>, vector<1x16x16x4xf32>,
    %c0_311 = arith.constant 0 : index
    %c0_312 = arith.constant 0 : index
    %c0_313 = arith.constant 0 : index
    %c0_314 = arith.constant 0 : index
    %239 = vector.load %arg23[%c0_311, %c0_312, %c0_313, %c0_314] : memref<1x18x18x4xf32, #tpu.memory_space<vmem>>, vector<1x18x16x4xf32>
    %c0_315 = arith.constant 0 : index
    %c0_316 = arith.constant 0 : index
    %c1_317 = arith.constant 1 : index
    %c0_318 = arith.constant 0 : index
    %240 = vector.load %arg23[%c0_315, %c0_316, %c1_317, %c0_318] : memref<1x18x18x4xf32, #tpu.memory_space<vmem>>, vector<1x18x16x4xf32>
    %241 = arith.maximumf %239, %240 : vector<1x18x16x4xf32>
    %c0_319 = arith.constant 0 : index
    %c0_320 = arith.constant 0 : index
    %c2_321 = arith.constant 2 : index
    %c0_322 = arith.constant 0 : index
    %242 = vector.load %arg23[%c0_319, %c0_320, %c2_321, %c0_322] : memref<1x18x18x4xf32, #tpu.memory_space<vmem>>, vector<1x18x16x4xf32>
    %243 = arith.maximumf %241, %242 : vector<1x18x16x4xf32>
    %244 = vector.extract_strided_slice %243 {offsets = [0, 0, 0, 0], sizes = [1, 16, 16, 4], strides = [1, 1, 1, 1]} : vector<1x18x16x4xf32> to vector<1x16x16x4xf32>
    %245 = vector.extract_strided_slice %243 {offsets = [0, 1, 0, 0], sizes = [1, 16, 16, 4], strides = [1, 1, 1, 1]} : vector<1x18x16x4xf32> to vector<1x16x16x4xf32>
    %246 = arith.maximumf %244, %245 : vector<1x16x16x4xf32>
    %247 = vector.extract_strided_slice %243 {offsets = [0, 2, 0, 0], sizes = [1, 16, 16, 4], strides = [1, 1, 1, 1]} : vector<1x18x16x4xf32> to vector<1x16x16x4xf32>
    %248 = arith.maximumf %246, %247 : vector<1x16x16x4xf32>
    %249 = vector.shape_cast %248 : vector<1x16x16x4xf32> to vector<256x4xf32>
    %c0_323 = arith.constant 0 : index
    %c0_324 = arith.constant 0 : index
    %250 = vector.load %arg17[%c0_323, %c0_324] : memref<4x4xf32, #tpu.memory_space<vmem>>, vector<4x4xf32>
    %cst_325 = arith.constant dense<0.000000e+00> : vector<256x4xf32>
    %251 = tpu.matmul %249, %250, %cst_325 {dimension_numbers = #tpu.dot_dimension_numbers<[1], [0], [0], [1], [0, 0, 1, 1], [], []>} : vector<256x4xf32>, vector<4x4xf32>, vector<256x4xf32> -> vector<256x4xf32>
    %c0_326 = arith.constant 0 : index
    %c0_327 = arith.constant 0 : index
    %252 = vector.load %arg18[%c0_326, %c0_327] : memref<1x4xf32, #tpu.memory_space<vmem>>, vector<1x4xf32>
    %253 = vector.broadcast %252 : vector<1x4xf32> to vector<256x4xf32>
    %254 = arith.mulf %251, %253 : vector<256x4xf32>
    %c0_328 = arith.constant 0 : index
    %c0_329 = arith.constant 0 : index
    %255 = vector.load %arg19[%c0_328, %c0_329] : memref<1x4xf32, #tpu.memory_space<vmem>>, vector<1x4xf32>
    %256 = vector.broadcast %255 : vector<1x4xf32> to vector<256x4xf32>
    %257 = arith.addf %254, %256 : vector<256x4xf32>
    %cst_330 = arith.constant 0.000000e+00 : f32
    %258 = vector.broadcast %cst_330 : f32 to vector<256x4xf32>
    %259 = arith.maximumf %257, %258 : vector<256x4xf32>
    %260 = tpu.concatenate %11, %91, %231, %259 in 1 : vector<256x4xf32>, vector<256x4xf32>, vector<256x4xf32>, vector<256x4xf32> -> vector<256x16xf32>
    %261 = vector.shape_cast %260 : vector<256x16xf32> to vector<1x256x16xf32>
    %c0_331 = arith.constant 0 : index
    %c0_332 = arith.constant 0 : index
    %c0_333 = arith.constant 0 : index
    %262 = vector.load %arg20[%c0_331, %c0_332, %c0_333] : memref<1x256x16xf32, #tpu.memory_space<vmem>>, vector<1x256x16xf32>
    tpu.vector_store %arg20[%c0_331, %c0_332, %c0_333], %261 {strides = array<i32>} : memref<1x256x16xf32, #tpu.memory_space<vmem>>, vector<1x256x16xf32>,
    return
  }
  func.func @transform_0(%arg0: i32) -> (i32, i32, i32, i32) {
    %c0_i32 = arith.constant 0 : i32
    %c0_i32_0 = arith.constant 0 : i32
    %c0_i32_1 = arith.constant 0 : i32
    %c0_i32_2 = arith.constant 0 : i32
    return %arg0, %c0_i32, %c0_i32_0, %c0_i32_1 : i32, i32, i32, i32
  }
  func.func @transform_1(%arg0: i32) -> (i32, i32) {
    %c0_i32 = arith.constant 0 : i32
    %c0_i32_0 = arith.constant 0 : i32
    %c0_i32_1 = arith.constant 0 : i32
    return %c0_i32, %c0_i32_0 : i32, i32
  }
  func.func @transform_2(%arg0: i32) -> (i32, i32) {
    %c0_i32 = arith.constant 0 : i32
    %c0_i32_0 = arith.constant 0 : i32
    %c0_i32_1 = arith.constant 0 : i32
    return %c0_i32, %c0_i32_0 : i32, i32
  }
  func.func @transform_3(%arg0: i32) -> (i32, i32) {
    %c0_i32 = arith.constant 0 : i32
    %c0_i32_0 = arith.constant 0 : i32
    %c0_i32_1 = arith.constant 0 : i32
    return %c0_i32, %c0_i32_0 : i32, i32
  }
  func.func @transform_4(%arg0: i32) -> (i32, i32) {
    %c0_i32 = arith.constant 0 : i32
    %c0_i32_0 = arith.constant 0 : i32
    %c0_i32_1 = arith.constant 0 : i32
    return %c0_i32, %c0_i32_0 : i32, i32
  }
  func.func @transform_5(%arg0: i32) -> (i32, i32) {
    %c0_i32 = arith.constant 0 : i32
    %c0_i32_0 = arith.constant 0 : i32
    %c0_i32_1 = arith.constant 0 : i32
    return %c0_i32, %c0_i32_0 : i32, i32
  }
  func.func @transform_6(%arg0: i32) -> (i32, i32) {
    %c0_i32 = arith.constant 0 : i32
    %c0_i32_0 = arith.constant 0 : i32
    %c0_i32_1 = arith.constant 0 : i32
    return %c0_i32, %c0_i32_0 : i32, i32
  }
  func.func @transform_7(%arg0: i32) -> (i32, i32) {
    %c0_i32 = arith.constant 0 : i32
    %c0_i32_0 = arith.constant 0 : i32
    %c0_i32_1 = arith.constant 0 : i32
    return %c0_i32, %c0_i32_0 : i32, i32
  }
  func.func @transform_8(%arg0: i32) -> (i32, i32) {
    %c0_i32 = arith.constant 0 : i32
    %c0_i32_0 = arith.constant 0 : i32
    %c0_i32_1 = arith.constant 0 : i32
    return %c0_i32, %c0_i32_0 : i32, i32
  }
  func.func @transform_9(%arg0: i32) -> (i32, i32) {
    %c0_i32 = arith.constant 0 : i32
    %c0_i32_0 = arith.constant 0 : i32
    %c0_i32_1 = arith.constant 0 : i32
    return %c0_i32, %c0_i32_0 : i32, i32
  }
  func.func @transform_10(%arg0: i32) -> (i32, i32) {
    %c0_i32 = arith.constant 0 : i32
    %c0_i32_0 = arith.constant 0 : i32
    %c0_i32_1 = arith.constant 0 : i32
    return %c0_i32, %c0_i32_0 : i32, i32
  }
  func.func @transform_11(%arg0: i32) -> (i32, i32) {
    %c0_i32 = arith.constant 0 : i32
    %c0_i32_0 = arith.constant 0 : i32
    %c0_i32_1 = arith.constant 0 : i32
    return %c0_i32, %c0_i32_0 : i32, i32
  }
  func.func @transform_12(%arg0: i32) -> (i32, i32) {
    %c0_i32 = arith.constant 0 : i32
    %c0_i32_0 = arith.constant 0 : i32
    %c0_i32_1 = arith.constant 0 : i32
    return %c0_i32, %c0_i32_0 : i32, i32
  }
  func.func @transform_13(%arg0: i32) -> (i32, i32) {
    %c0_i32 = arith.constant 0 : i32
    %c0_i32_0 = arith.constant 0 : i32
    %c0_i32_1 = arith.constant 0 : i32
    return %c0_i32, %c0_i32_0 : i32, i32
  }
  func.func @transform_14(%arg0: i32) -> (i32, i32) {
    %c0_i32 = arith.constant 0 : i32
    %c0_i32_0 = arith.constant 0 : i32
    %c0_i32_1 = arith.constant 0 : i32
    return %c0_i32, %c0_i32_0 : i32, i32
  }
  func.func @transform_15(%arg0: i32) -> (i32, i32) {
    %c0_i32 = arith.constant 0 : i32
    %c0_i32_0 = arith.constant 0 : i32
    %c0_i32_1 = arith.constant 0 : i32
    return %c0_i32, %c0_i32_0 : i32, i32
  }
  func.func @transform_16(%arg0: i32) -> (i32, i32) {
    %c0_i32 = arith.constant 0 : i32
    %c0_i32_0 = arith.constant 0 : i32
    %c0_i32_1 = arith.constant 0 : i32
    return %c0_i32, %c0_i32_0 : i32, i32
  }
  func.func @transform_17(%arg0: i32) -> (i32, i32) {
    %c0_i32 = arith.constant 0 : i32
    %c0_i32_0 = arith.constant 0 : i32
    %c0_i32_1 = arith.constant 0 : i32
    return %c0_i32, %c0_i32_0 : i32, i32
  }
  func.func @transform_18(%arg0: i32) -> (i32, i32) {
    %c0_i32 = arith.constant 0 : i32
    %c0_i32_0 = arith.constant 0 : i32
    %c0_i32_1 = arith.constant 0 : i32
    return %c0_i32, %c0_i32_0 : i32, i32
  }
  func.func @transform_19(%arg0: i32) -> (i32, i32, i32) {
    %c0_i32 = arith.constant 0 : i32
    %c0_i32_0 = arith.constant 0 : i32
    %c0_i32_1 = arith.constant 0 : i32
    return %arg0, %c0_i32, %c0_i32_0 : i32, i32, i32
  }
}

</mosaic_0001>

<bundles_post_ra>
// kernel: tpu_custom_call.1
= control target key start
LH: loop header
LB: loop body
LE: loop exit
PB: predicated region body
PF: predicated region fallthrough
CT: control target
= control target key end

     0   :  { %s27019_s0 = inlined_call_operand.vmem [shape: f32[2,16,16,4], index: 0, kind: input, shape index: {}]   ;;  %s27020_s1 = inlined_call_operand.vmem [shape: f32[4,4], index: 1, kind: input, shape index: {}]   ;;  %s27021_s2 = inlined_call_operand.vmem [shape: f32[1,4], index: 2, kind: input, shape index: {}]   ;;  %s27022_s3 = inlined_call_operand.vmem [shape: f32[1,4], index: 3, kind: input, shape index: {}]   ;;  %s27023_s4 = inlined_call_operand.vmem [shape: f32[4,4], index: 4, kind: input, shape index: {}]   ;;  %s27024_s5 = inlined_call_operand.vmem [shape: f32[1,4], index: 5, kind: input, shape index: {}]   ;;  %s27025_s6 = inlined_call_operand.vmem [shape: f32[1,4], index: 6, kind: input, shape index: {}]   ;;  %s27026_s7 = inlined_call_operand.vmem [shape: f32[36,4], index: 7, kind: input, shape index: {}]   ;;  %s27027_s8 = inlined_call_operand.vmem [shape: f32[1,4], index: 8, kind: input, shape index: {}]   ;;  %s27028_s9 = inlined_call_operand.vmem [shape: f32[1,4], index: 9, kind: input, shape index: {}]   ;;  %s27029_s10 = inlined_call_operand.vmem [shape: f32[4,4], index: 10, kind: input, shape index: {}]   ;;  %s27030_s11 = inlined_call_operand.vmem [shape: f32[1,4], index: 11, kind: input, shape index: {}]   ;;  %s27031_s12 = inlined_call_operand.vmem [shape: f32[1,4], index: 12, kind: input, shape index: {}]   ;;  %s27032_s13 = inlined_call_operand.vmem [shape: f32[100,4], index: 13, kind: input, shape index: {}]   ;;  %s27033_s14 = inlined_call_operand.vmem [shape: f32[1,4], index: 14, kind: input, shape index: {}]   ;;  %s27034_s15 = inlined_call_operand.vmem [shape: f32[1,4], index: 15, kind: input, shape index: {}]   ;;  %s27035_s16 = inlined_call_operand.vmem [shape: f32[4,4], index: 16, kind: input, shape index: {}]   ;;  %s27036_s17 = inlined_call_operand.vmem [shape: f32[1,4], index: 17, kind: input, shape index: {}]   ;;  %s27037_s18 = inlined_call_operand.vmem [shape: f32[1,4], index: 18, kind: input, shape index: {}]   ;;  %s27038_s19 = inlined_call_operand.vmem [shape: f32[2,256,16], index: 19, kind: output, shape index: {}]  }
   0x1   :  { %27142 = sst [smem:[#allocation82_spill]] %s27019_s0  ;;  %s21134_s0 = smov 0  }
   0x2   :  { %27143 = sst [smem:[#allocation83_spill]] %s27020_s1 }
   0x3   :  { %27144 = sst [smem:[#allocation84_spill]] %s27021_s2 }
   0x4   :  { %27145 = sst [smem:[#allocation85_spill]] %s27022_s3 }
   0x5 LB: > { %s16562_s30 = sadd.s32 4294967295, %s21027_s0   ;;  %p16566_p0 = scmp.ge.s32.totalorder %s21027_s0, 1  ;;  %s21027_s0 = sphi %s21134_s0, %s29_s0  }
   0x6   : > { %p537_p1 = scmp.lt.s32.totalorder %s21027_s0, 3 }
   0x8   : > { %p538_p2 = pnand %p16566_p0, %p537_p1 }
   0xa   : > { %541 = sbr.rel (%p538_p2) target bundleno = 1711 (0x6af), region = 96 }
   0xf   : > { %vm733_vm0 = vcmask 1043456   ;;  %v1072_v0 = vld [vmem:[%s27023_s4] sm:$0xf]  ;;  %p593_p3 = scmp.lt.s32.totalorder %s16562_s30, 1  ;;  %s27146_s2 = sld [smem:[#allocation83_spill]]  ;;  %vm636_vm1 = vcmask 31744  }
  0x10   : > { %19145 = vmatprep.subr.msk.mxu1 %vm733_vm0, %v1072_v0  ;;  %v1411_v2 = vld [vmem:[%s27029_s10] sm:$0xf]  ;;  %v1893_v3 = vld [vmem:[%s27026_s7 + $0x4] sm:$0xf]  ;;  %s27147_s29 = sld [smem:[#allocation82_spill]]  ;;  %v27041_v37 = vmov 0.0  }
  0x11   : > { %19146 = vmatpush3.msk.msra.mxu1 %vm733_vm0, %v1072_v0  ;;  %s27574_s30 = smov (!%p593_p3, %s16562_s30), 1  ;;  %v21182_v7 = vld [vmem:[%s27026_s7] sm:$0xf]  ;;  %1750 = vst.msk [vmem:[#allocation2] sm:$0xff] %vm636_vm1, %v27041_v37  ;;  %1751 = vst.msk [vmem:[#allocation2 + $0x8] sm:$0xff] %vm636_vm1, %v27041_v37  ;;  %vm1758_vm2 = vcmask 24576  }
  0x12   : > { %19245 = vmatprep.subr.msk.mxu1 %vm733_vm0, %v1893_v3  ;;  %s17839_s26 = sshll.u32 %s27574_s30, 8  ;;  %1755 = vst.msk [vmem:[#allocation2 + $0x198] sm:$0xff] %vm636_vm1, %v27041_v37  ;;  %1756 = vst.msk [vmem:[#allocation2 + $0x1a0] sm:$0xff] %vm636_vm1, %v27041_v37  ;;  %vm1752_vm3 = vcmask 25600   ;;  %v2574_v40 = vld [vmem:[%s27026_s7 + $0x8] sm:$0xf] }
  0x13   : > { %5376 = vst.msk [vmem:[#allocation3] sm:$0xff] %vm636_vm1, %v27041_v37  ;;  %5377 = vst.msk [vmem:[#allocation3 + $0x8] sm:$0xff] %vm636_vm1, %v27041_v37  ;;  %v2963_v41 = vld [vmem:[%s27026_s7 + $0xc] sm:$0xf]  ;;  %v21722_v44 = vld [vmem:[%s27026_s7 + $0x10] sm:$0xf] }
  0x14   : > { %5380 = vst.msk [vmem:[#allocation3 + $0x18] sm:$0xff] %vm636_vm1, %v27041_v37  ;;  %5381 = vst.msk [vmem:[#allocation3 + $0x20] sm:$0xff] %vm636_vm1, %v27041_v37  ;;  %v21729_v45 = vld [vmem:[%s27026_s7 + $0x14] sm:$0xf]  ;;  %v21736_v46 = vld [vmem:[%s27024_s5] ss:$0 sm:$0xff] }
  0x15   : > { %v635_v1 = vld [vmem:[%s27146_s2] sm:$0xf]  ;;  %5384 = vst.msk [vmem:[#allocation3 + $0x1b0] sm:$0xff] %vm636_vm1, %v27041_v37  ;;  %5385 = vst.msk [vmem:[#allocation3 + $0x1b8] sm:$0xff] %vm636_vm1, %v27041_v37  ;;  %vm5378_vm4 = vcmask 27648   ;;  %s21030_s22 = smov 4   ;;  %s26762_s2 = scalar_lea.vmem %s27038_s19, %s17839_s26 }
  0x16   : > { %19095 = vmatprep.subr.msk.mxu0 %vm733_vm0, %v635_v1  ;;  %s21168_s20 = scalar_lea.vmem %s27147_s29, %s17839_s26  ;;  %5387 = vst.msk [vmem:[#allocation3 + $0x1c8] sm:$0xff] %vm636_vm1, %v27041_v37  ;;  %5388 = vst.msk [vmem:[#allocation3 + $0x1d0] sm:$0xff] %vm636_vm1, %v27041_v37  ;;  %v21741_v48 = vld [vmem:[%s27025_s6] ss:$0 sm:$0xff]  ;;  %s27227_s28 = sld [smem:[#allocation84_spill]]  ;;  %vm16408_vm5 = vcmask 64512  }
  0x17   : > { %19096 = vmatpush3.msk.msra.mxu0 %vm733_vm0, %v635_v1  ;;  %v21171_v4 = vld [vmem:[%s21168_s20] sm:$0xff]  ;;  %v21174_v5 = vld [vmem:[%s21168_s20 + $0x8] sm:$0xff]  ;;  %v21177_v6 = vld [vmem:[%s21168_s20 + $0x10] sm:$0xff]  ;;  %1759 = vst.msk [vmem:[#allocation2] sm:$0x1] %vm1758_vm2, %v27041_v37  ;;  %s27229_s21 = sld [smem:[#allocation85_spill]] }
  0x18   : > { %19195 = vmatprep.subr.msk.mxu0 %vm733_vm0, %v1411_v2  ;;  %19147 = vmatprep.mubr.msk.f32.mxu1 %vm636_vm1, %v21171_v4  ;;  %15281 = vst.msk [vmem:[#allocation4 + $0x19] sm:$0xff] %vm636_vm1, %v21171_v4  ;;  %15282 = vst.msk [vmem:[#allocation4 + $0x21] sm:$0xff] %vm636_vm1, %v21174_v5  ;;  %v21193_v8 = vld [vmem:[%s21168_s20 + $0x18] sm:$0xff]  ;;  %v21196_v9 = vld [vmem:[%s21168_s20 + $0x20] sm:$0xff]  ;;  %s21032_s1 = smov 8   ;;  %s21033_s25 = smov 12  }
  0x19   : > { %15283 = vst.msk [vmem:[#allocation4 + $0x31] sm:$0xff] %vm636_vm1, %v21177_v6  ;;  %v21199_v10 = vld [vmem:[%s21168_s20 + $0x28] sm:$0xff]  ;;  %19097 = vmatprep.mubr.msk.f32.mxu0 %vm636_vm1, %v21171_v4  ;;  %19148 = vmatmul.mubr.msk.f32.vlgmr.msra.gmra.mxu1 %vm636_vm1, %v21174_v5  ;;  %15284 = vst.msk [vmem:[#allocation4 + $0x39] sm:$0xff] %vm636_vm1, %v21193_v8  ;;  %v21212_v11 = vld [vmem:[%s21168_s20 + $0x30] sm:$0xff]  ;;  %vm16441_vm6 = vcmask 97280   ;;  %vm16474_vm7 = vcmask 130048  }
  0x1a   : > { %15285 = vst.msk [vmem:[#allocation4 + $0x49] sm:$0xff] %vm636_vm1, %v21196_v9  ;;  %15286 = vst.msk [vmem:[#allocation4 + $0x51] sm:$0xff] %vm636_vm1, %v21199_v10  ;;  %v21215_v12 = vld [vmem:[%s21168_s20 + $0x38] sm:$0xff]  ;;  %v21218_v13 = vld [vmem:[%s21168_s20 + $0x40] sm:$0xff]  ;;  %19098 = vmatmul.mubr.msk.f32.vlgmr.msra.gmra.mxu0 %vm636_vm1, %v21174_v5  ;;  %19150 = vmatprep.mubr.msk.f32.mxu1 %vm636_vm1, %v21177_v6 }
  0x1b   : > { %15287 = vst.msk [vmem:[#allocation4 + $0x61] sm:$0xff] %vm636_vm1, %v21212_v11  ;;  %15288 = vst.msk [vmem:[#allocation4 + $0x69] sm:$0xff] %vm636_vm1, %v21215_v12  ;;  %v21231_v14 = vld [vmem:[%s21168_s20 + $0x48] sm:$0xff]  ;;  %v21234_v15 = vld [vmem:[%s21168_s20 + $0x50] sm:$0xff]  ;;  %19100 = vmatprep.mubr.msk.f32.mxu0 %vm636_vm1, %v21177_v6  ;;  %19196 = vmatpush3.msk.msra.mxu0 %vm733_vm0, %v1411_v2 }
  0x1c   : > { %15289 = vst.msk [vmem:[#allocation4 + $0x79] sm:$0xff] %vm636_vm1, %v21218_v13  ;;  %v21237_v16 = vld [vmem:[%s21168_s20 + $0x58] sm:$0xff]  ;;  %15290 = vst.msk [vmem:[#allocation4 + $0x81] sm:$0xff] %vm636_vm1, %v21231_v14  ;;  %v21248_v17 = vld [vmem:[%s21168_s20 + $0x60] sm:$0xff]  ;;  %19246 = vmatpush3.msk.msra.mxu1 %vm733_vm0, %v1893_v3  ;;  %19295 = vmatprep.subr.msk.mxu0 %vm733_vm0, %v21182_v7 }
  0x1d   : > { %15291 = vst.msk [vmem:[#allocation4 + $0x91] sm:$0xff] %vm636_vm1, %v21234_v15  ;;  %15292 = vst.msk [vmem:[#allocation4 + $0x99] sm:$0xff] %vm636_vm1, %v21237_v16  ;;  %v21251_v18 = vld [vmem:[%s21168_s20 + $0x68] sm:$0xff]  ;;  %v21254_v19 = vld [vmem:[%s21168_s20 + $0x70] sm:$0xff]  ;;  %19151 = vmatmul.mubr.msk.f32.gmra.mxu1 %vm636_vm1, %v21193_v8  ;;  %19345 = vmatprep.subr.msk.mxu1 %vm733_vm0, %v2574_v40 }
  0x1e   : > { %15293 = vst.msk [vmem:[#allocation4 + $0xa9] sm:$0xff] %vm636_vm1, %v21248_v17  ;;  %15294 = vst.msk [vmem:[#allocation4 + $0xb1] sm:$0xff] %vm636_vm1, %v21251_v18  ;;  %v21265_v20 = vld [vmem:[%s21168_s20 + $0x78] sm:$0xff]  ;;  %v21268_v21 = vld [vmem:[%s21168_s20 + $0x80] sm:$0xff]  ;;  %19101 = vmatmul.mubr.msk.f32.gmra.mxu0 %vm636_vm1, %v21193_v8  ;;  %19153 = vmatprep.mubr.msk.f32.mxu1 %vm636_vm1, %v21196_v9 }
  0x1f   : > { %15295 = vst.msk [vmem:[#allocation4 + $0xc1] sm:$0xff] %vm636_vm1, %v21254_v19  ;;  %v21271_v22 = vld [vmem:[%s21168_s20 + $0x88] sm:$0xff]  ;;  %15296 = vst.msk [vmem:[#allocation4 + $0xc9] sm:$0xff] %vm636_vm1, %v21265_v20  ;;  %v21284_v23 = vld [vmem:[%s21168_s20 + $0x90] sm:$0xff]  ;;  %19103 = vmatprep.mubr.msk.f32.mxu0 %vm636_vm1, %v21196_v9 }
  0x20   : > { %15297 = vst.msk [vmem:[#allocation4 + $0xd9] sm:$0xff] %vm636_vm1, %v21268_v21  ;;  %15298 = vst.msk [vmem:[#allocation4 + $0xe1] sm:$0xff] %vm636_vm1, %v21271_v22  ;;  %v21287_v24 = vld [vmem:[%s21168_s20 + $0x98] sm:$0xff]  ;;  %v21290_v25 = vld [vmem:[%s21168_s20 + $0xa0] sm:$0xff] }
  0x21   : > { %15299 = vst.msk [vmem:[#allocation4 + $0xf1] sm:$0xff] %vm636_vm1, %v21284_v23  ;;  %15300 = vst.msk [vmem:[#allocation4 + $0xf9] sm:$0xff] %vm636_vm1, %v21287_v24  ;;  %v21303_v26 = vld [vmem:[%s21168_s20 + $0xa8] sm:$0xff]  ;;  %v21306_v27 = vld [vmem:[%s21168_s20 + $0xb0] sm:$0xff]  ;;  %19154 = vmatmul.mubr.msk.f32.gmra.mxu1 %vm636_vm1, %v21199_v10 }
  0x22   : > { %15301 = vst.msk [vmem:[#allocation4 + $0x109] sm:$0xff] %vm636_vm1, %v21290_v25  ;;  %v21309_v28 = vld [vmem:[%s21168_s20 + $0xb8] sm:$0xff]  ;;  %15302 = vst.msk [vmem:[#allocation4 + $0x111] sm:$0xff] %vm636_vm1, %v21303_v26  ;;  %v21320_v29 = vld [vmem:[%s21168_s20 + $0xc0] sm:$0xff]  ;;  %19104 = vmatmul.mubr.msk.f32.gmra.mxu0 %vm636_vm1, %v21199_v10  ;;  %19156 = vmatprep.mubr.msk.f32.mxu1 %vm636_vm1, %v21212_v11 }
  0x23   : > { %15303 = vst.msk [vmem:[#allocation4 + $0x121] sm:$0xff] %vm636_vm1, %v21306_v27  ;;  %15304 = vst.msk [vmem:[#allocation4 + $0x129] sm:$0xff] %vm636_vm1, %v21309_v28  ;;  %v21323_v30 = vld [vmem:[%s21168_s20 + $0xc8] sm:$0xff]  ;;  %v21326_v31 = vld [vmem:[%s21168_s20 + $0xd0] sm:$0xff]  ;;  %19106 = vmatprep.mubr.msk.f32.mxu0 %vm636_vm1, %v21212_v11 }
  0x24   : > { %15305 = vst.msk [vmem:[#allocation4 + $0x139] sm:$0xff] %vm636_vm1, %v21320_v29  ;;  %15306 = vst.msk [vmem:[#allocation4 + $0x141] sm:$0xff] %vm636_vm1, %v21323_v30  ;;  %v21335_v32 = vld [vmem:[%s21168_s20 + $0xd8] sm:$0xff]  ;;  %v21338_v33 = vld [vmem:[%s21168_s20 + $0xe0] sm:$0xff] }
  0x25   : > { %15307 = vst.msk [vmem:[#allocation4 + $0x151] sm:$0xff] %vm636_vm1, %v21326_v31  ;;  %v21341_v34 = vld [vmem:[%s21168_s20 + $0xe8] sm:$0xff]  ;;  %15308 = vst.msk [vmem:[#allocation4 + $0x159] sm:$0xff] %vm636_vm1, %v21335_v32  ;;  %v21354_v35 = vld [vmem:[%s21168_s20 + $0xf0] sm:$0xff]  ;;  %19157 = vmatmul.mubr.msk.f32.gmra.mxu1 %vm636_vm1, %v21215_v12 }
  0x26   : > { %15309 = vst.msk [vmem:[#allocation4 + $0x169] sm:$0xff] %vm636_vm1, %v21338_v33  ;;  %15310 = vst.msk [vmem:[#allocation4 + $0x171] sm:$0xff] %vm636_vm1, %v21341_v34  ;;  %v21357_v36 = vld [vmem:[%s21168_s20 + $0xf8] sm:$0xff]  ;;  %19107 = vmatmul.mubr.msk.f32.gmra.mxu0 %vm636_vm1, %v21215_v12  ;;  %19159 = vmatprep.mubr.msk.f32.mxu1 %vm636_vm1, %v21218_v13  ;;  %v1861_v38 = vld [vmem:[#allocation2 + $0x1] sm:$0xff] }
  0x27   : > { %15311 = vst.msk [vmem:[#allocation4 + $0x181] sm:$0xff] %vm636_vm1, %v21354_v35  ;;  %15312 = vst.msk [vmem:[#allocation4 + $0x189] sm:$0xff] %vm636_vm1, %v21357_v36  ;;  %19109 = vmatprep.mubr.msk.f32.mxu0 %vm636_vm1, %v21218_v13  ;;  %v1828_v42 = vld [vmem:[#allocation2] sm:$0xff]  ;;  %v1829_v43 = vld [vmem:[#allocation2 + $0x8] sm:$0xff] }
  0x28   : > { %1760 = vst.msk [vmem:[#allocation2 + $0x18] sm:$0x1] %vm1758_vm2, %v27041_v37  ;;  %1761 = vst.msk [vmem:[#allocation2 + $0x30] sm:$0x1] %vm1758_vm2, %v27041_v37 }
  0x29   : > { %19160 = vmatmul.mubr.msk.f32.gmra.mxu1 %vm636_vm1, %v21231_v14  ;;  %1762 = vst.msk [vmem:[#allocation2 + $0x48] sm:$0x1] %vm1758_vm2, %v27041_v37  ;;  %1763 = vst.msk [vmem:[#allocation2 + $0x60] sm:$0x1] %vm1758_vm2, %v27041_v37 }
  0x2a   : > { %19110 = vmatmul.mubr.msk.f32.gmra.mxu0 %vm636_vm1, %v21231_v14  ;;  %19162 = vmatprep.mubr.msk.f32.mxu1 %vm636_vm1, %v21234_v15  ;;  %1764 = vst.msk [vmem:[#allocation2 + $0x78] sm:$0x1] %vm1758_vm2, %v27041_v37  ;;  %1765 = vst.msk [vmem:[#allocation2 + $0x90] sm:$0x1] %vm1758_vm2, %v27041_v37 }
  0x2b   : > { %19112 = vmatprep.mubr.msk.f32.mxu0 %vm636_vm1, %v21234_v15  ;;  %1766 = vst.msk [vmem:[#allocation2 + $0xa8] sm:$0x1] %vm1758_vm2, %v27041_v37  ;;  %1767 = vst.msk [vmem:[#allocation2 + $0xc0] sm:$0x1] %vm1758_vm2, %v27041_v37 }
  0x2c   : > { %1768 = vst.msk [vmem:[#allocation2 + $0xd8] sm:$0x1] %vm1758_vm2, %v27041_v37  ;;  %1769 = vst.msk [vmem:[#allocation2 + $0xf0] sm:$0x1] %vm1758_vm2, %v27041_v37 }
  0x2d   : > { %19163 = vmatmul.mubr.msk.f32.gmra.mxu1 %vm636_vm1, %v21237_v16  ;;  %1770 = vst.msk [vmem:[#allocation2 + $0x108] sm:$0x1] %vm1758_vm2, %v27041_v37  ;;  %1771 = vst.msk [vmem:[#allocation2 + $0x120] sm:$0x1] %vm1758_vm2, %v27041_v37 }
  0x2e   : > { %19113 = vmatmul.mubr.msk.f32.gmra.mxu0 %vm636_vm1, %v21237_v16  ;;  %19165 = vmatprep.mubr.msk.f32.mxu1 %vm636_vm1, %v21248_v17  ;;  %1772 = vst.msk [vmem:[#allocation2 + $0x138] sm:$0x1] %vm1758_vm2, %v27041_v37  ;;  %1773 = vst.msk [vmem:[#allocation2 + $0x150] sm:$0x1] %vm1758_vm2, %v27041_v37 }
  0x2f   : > { %19115 = vmatprep.mubr.msk.f32.mxu0 %vm636_vm1, %v21248_v17  ;;  %1774 = vst.msk [vmem:[#allocation2 + $0x168] sm:$0x1] %vm1758_vm2, %v27041_v37  ;;  %1775 = vst.msk [vmem:[#allocation2 + $0x180] sm:$0x1] %vm1758_vm2, %v27041_v37 }
  0x30   : > { %1776 = vst.msk [vmem:[#allocation2 + $0x198] sm:$0x1] %vm1758_vm2, %v27041_v37  ;;  %1778 = vst.msk [vmem:[#allocation2 + $0x29] sm:$0x1] %vm1758_vm2, %v27041_v37 }
  0x31   : > { %19166 = vmatmul.mubr.msk.f32.gmra.mxu1 %vm636_vm1, %v21251_v18  ;;  %1779 = vst.msk [vmem:[#allocation2 + $0x41] sm:$0x1] %vm1758_vm2, %v27041_v37  ;;  %1780 = vst.msk [vmem:[#allocation2 + $0x59] sm:$0x1] %vm1758_vm2, %v27041_v37 }
  0x32   : > { %19116 = vmatmul.mubr.msk.f32.gmra.mxu0 %vm636_vm1, %v21251_v18  ;;  %19168 = vmatprep.mubr.msk.f32.mxu1 %vm636_vm1, %v21254_v19  ;;  %1781 = vst.msk [vmem:[#allocation2 + $0x71] sm:$0x1] %vm1758_vm2, %v27041_v37  ;;  %1782 = vst.msk [vmem:[#allocation2 + $0x89] sm:$0x1] %vm1758_vm2, %v27041_v37 }
  0x33   : > { %19118 = vmatprep.mubr.msk.f32.mxu0 %vm636_vm1, %v21254_v19  ;;  %1783 = vst.msk [vmem:[#allocation2 + $0xa1] sm:$0x1] %vm1758_vm2, %v27041_v37  ;;  %1784 = vst.msk [vmem:[#allocation2 + $0xb9] sm:$0x1] %vm1758_vm2, %v27041_v37 }
  0x34   : > { %1785 = vst.msk [vmem:[#allocation2 + $0xd1] sm:$0x1] %vm1758_vm2, %v27041_v37  ;;  %1786 = vst.msk [vmem:[#allocation2 + $0xe9] sm:$0x1] %vm1758_vm2, %v27041_v37 }
  0x35   : > { %19169 = vmatmul.mubr.msk.f32.gmra.mxu1 %vm636_vm1, %v21265_v20  ;;  %1787 = vst.msk [vmem:[#allocation2 + $0x101] sm:$0x1] %vm1758_vm2, %v27041_v37  ;;  %1788 = vst.msk [vmem:[#allocation2 + $0x119] sm:$0x1] %vm1758_vm2, %v27041_v37 }
  0x36   : > { %19119 = vmatmul.mubr.msk.f32.gmra.mxu0 %vm636_vm1, %v21265_v20  ;;  %19171 = vmatprep.mubr.msk.f32.mxu1 %vm636_vm1, %v21268_v21  ;;  %1789 = vst.msk [vmem:[#allocation2 + $0x131] sm:$0x1] %vm1758_vm2, %v27041_v37  ;;  %1790 = vst.msk [vmem:[#allocation2 + $0x149] sm:$0x1] %vm1758_vm2, %v27041_v37 }
  0x37   : > { %19121 = vmatprep.mubr.msk.f32.mxu0 %vm636_vm1, %v21268_v21  ;;  %1791 = vst.msk [vmem:[#allocation2 + $0x161] sm:$0x1] %vm1758_vm2, %v27041_v37  ;;  %1792 = vst.msk [vmem:[#allocation2 + $0x179] sm:$0x1] %vm1758_vm2, %v27041_v37 }
  0x38   : > { %1793 = vst.msk [vmem:[#allocation2 + $0x191] sm:$0x1] %vm1758_vm2, %v27041_v37 }
  0x39   : > { %19172 = vmatmul.mubr.msk.f32.gmra.mxu1 %vm636_vm1, %v21271_v22  ;;  %1753 = vst.msk [vmem:[#allocation2 + $0x10] sm:$0x3] %vm1752_vm3, %v27041_v37  ;;  %1757 = vst.msk [vmem:[#allocation2 + $0x1a8] sm:$0x3] %vm1752_vm3, %v27041_v37 }
  0x3a   : > { %19122 = vmatmul.mubr.msk.f32.gmra.mxu0 %vm636_vm1, %v21271_v22  ;;  %19174 = vmatprep.mubr.msk.f32.mxu1 %vm636_vm1, %v21284_v23  ;;  %5390 = vst.msk [vmem:[#allocation3] sm:$0x3] %vm1752_vm3, %v27041_v37  ;;  %5391 = vst.msk [vmem:[#allocation3 + $0x18] sm:$0x3] %vm1752_vm3, %v27041_v37 }
  0x3b   : > { %19124 = vmatprep.mubr.msk.f32.mxu0 %vm636_vm1, %v21284_v23  ;;  %5392 = vst.msk [vmem:[#allocation3 + $0x30] sm:$0x3] %vm1752_vm3, %v27041_v37  ;;  %5393 = vst.msk [vmem:[#allocation3 + $0x48] sm:$0x3] %vm1752_vm3, %v27041_v37 }
  0x3c   : > { %5394 = vst.msk [vmem:[#allocation3 + $0x60] sm:$0x3] %vm1752_vm3, %v27041_v37  ;;  %5395 = vst.msk [vmem:[#allocation3 + $0x78] sm:$0x3] %vm1752_vm3, %v27041_v37 }
  0x3d   : > { %19175 = vmatmul.mubr.msk.f32.gmra.mxu1 %vm636_vm1, %v21287_v24  ;;  %5396 = vst.msk [vmem:[#allocation3 + $0x90] sm:$0x3] %vm1752_vm3, %v27041_v37  ;;  %5397 = vst.msk [vmem:[#allocation3 + $0xa8] sm:$0x3] %vm1752_vm3, %v27041_v37 }
  0x3e   : > { %19125 = vmatmul.mubr.msk.f32.gmra.mxu0 %vm636_vm1, %v21287_v24  ;;  %19177 = vmatprep.mubr.msk.f32.mxu1 %vm636_vm1, %v21290_v25  ;;  %5398 = vst.msk [vmem:[#allocation3 + $0xc0] sm:$0x3] %vm1752_vm3, %v27041_v37  ;;  %5399 = vst.msk [vmem:[#allocation3 + $0xd8] sm:$0x3] %vm1752_vm3, %v27041_v37 }
  0x3f   : > { %19127 = vmatprep.mubr.msk.f32.mxu0 %vm636_vm1, %v21290_v25  ;;  %5400 = vst.msk [vmem:[#allocation3 + $0xf0] sm:$0x3] %vm1752_vm3, %v27041_v37  ;;  %5401 = vst.msk [vmem:[#allocation3 + $0x108] sm:$0x3] %vm1752_vm3, %v27041_v37 }
  0x40   : > { %5402 = vst.msk [vmem:[#allocation3 + $0x120] sm:$0x3] %vm1752_vm3, %v27041_v37  ;;  %5403 = vst.msk [vmem:[#allocation3 + $0x138] sm:$0x3] %vm1752_vm3, %v27041_v37  ;;  %v1862_v39 = vld [vmem:[#allocation2 + $0x9] sm:$0xff] }
  0x41   : > { %19178 = vmatmul.mubr.msk.f32.gmra.mxu1 %vm636_vm1, %v21303_v26  ;;  %5404 = vst.msk [vmem:[#allocation3 + $0x150] sm:$0x3] %vm1752_vm3, %v27041_v37  ;;  %5405 = vst.msk [vmem:[#allocation3 + $0x168] sm:$0x3] %vm1752_vm3, %v27041_v37 }
  0x42   : > { %19128 = vmatmul.mubr.msk.f32.gmra.mxu0 %vm636_vm1, %v21303_v26  ;;  %19180 = vmatprep.mubr.msk.f32.mxu1 %vm636_vm1, %v21306_v27  ;;  %5406 = vst.msk [vmem:[#allocation3 + $0x180] sm:$0x3] %vm1752_vm3, %v27041_v37  ;;  %5407 = vst.msk [vmem:[#allocation3 + $0x198] sm:$0x3] %vm1752_vm3, %v27041_v37 }
  0x43   : > { %19130 = vmatprep.mubr.msk.f32.mxu0 %vm636_vm1, %v21306_v27  ;;  %5408 = vst.msk [vmem:[#allocation3 + $0x1b0] sm:$0x3] %vm1752_vm3, %v27041_v37  ;;  %5409 = vst.msk [vmem:[#allocation3 + $0x1c8] sm:$0x3] %vm1752_vm3, %v27041_v37 }
  0x44   : > { %5412 = vst.msk [vmem:[#allocation3 + $0x42] sm:$0x3] %vm1752_vm3, %v27041_v37  ;;  %5413 = vst.msk [vmem:[#allocation3 + $0x5a] sm:$0x3] %vm1752_vm3, %v27041_v37 }
  0x45   : > { %19181 = vmatmul.mubr.msk.f32.gmra.mxu1 %vm636_vm1, %v21309_v28  ;;  %5414 = vst.msk [vmem:[#allocation3 + $0x72] sm:$0x3] %vm1752_vm3, %v27041_v37  ;;  %5415 = vst.msk [vmem:[#allocation3 + $0x8a] sm:$0x3] %vm1752_vm3, %v27041_v37 }
  0x46   : > { %19131 = vmatmul.mubr.msk.f32.gmra.mxu0 %vm636_vm1, %v21309_v28  ;;  %19183 = vmatprep.mubr.msk.f32.mxu1 %vm636_vm1, %v21320_v29  ;;  %5416 = vst.msk [vmem:[#allocation3 + $0xa2] sm:$0x3] %vm1752_vm3, %v27041_v37  ;;  %5417 = vst.msk [vmem:[#allocation3 + $0xba] sm:$0x3] %vm1752_vm3, %v27041_v37 }
  0x47   : > { %19133 = vmatprep.mubr.msk.f32.mxu0 %vm636_vm1, %v21320_v29  ;;  %5418 = vst.msk [vmem:[#allocation3 + $0xd2] sm:$0x3] %vm1752_vm3, %v27041_v37  ;;  %5419 = vst.msk [vmem:[#allocation3 + $0xea] sm:$0x3] %vm1752_vm3, %v27041_v37 }
  0x48   : > { %5420 = vst.msk [vmem:[#allocation3 + $0x102] sm:$0x3] %vm1752_vm3, %v27041_v37  ;;  %5421 = vst.msk [vmem:[#allocation3 + $0x11a] sm:$0x3] %vm1752_vm3, %v27041_v37 }
  0x49   : > { %19184 = vmatmul.mubr.msk.f32.gmra.mxu1 %vm636_vm1, %v21323_v30  ;;  %5422 = vst.msk [vmem:[#allocation3 + $0x132] sm:$0x3] %vm1752_vm3, %v27041_v37  ;;  %5423 = vst.msk [vmem:[#allocation3 + $0x14a] sm:$0x3] %vm1752_vm3, %v27041_v37 }
  0x4a   : > { %19134 = vmatmul.mubr.msk.f32.gmra.mxu0 %vm636_vm1, %v21323_v30  ;;  %19186 = vmatprep.mubr.msk.f32.mxu1 %vm636_vm1, %v21326_v31  ;;  %5424 = vst.msk [vmem:[#allocation3 + $0x162] sm:$0x3] %vm1752_vm3, %v27041_v37  ;;  %5425 = vst.msk [vmem:[#allocation3 + $0x17a] sm:$0x3] %vm1752_vm3, %v27041_v37 }
  0x4b   : > { %19136 = vmatprep.mubr.msk.f32.mxu0 %vm636_vm1, %v21326_v31  ;;  %5426 = vst.msk [vmem:[#allocation3 + $0x192] sm:$0x3] %vm1752_vm3, %v27041_v37  ;;  %5427 = vst.msk [vmem:[#allocation3 + $0x1aa] sm:$0x3] %vm1752_vm3, %v27041_v37 }
  0x4c   : > { %1777 = vst.msk [vmem:[#allocation2 + $0x11] sm:$0x1] %vm1758_vm2, %v27041_v37  ;;  %1794 = vst.msk [vmem:[#allocation2 + $0x1a9] sm:$0x1] %vm1758_vm2, %v27041_v37 }
  0x4d   : > { %19187 = vmatmul.mubr.msk.f32.gmra.mxu1 %vm636_vm1, %v21335_v32 }
  0x4e   : > { %19137 = vmatmul.mubr.msk.f32.gmra.mxu0 %vm636_vm1, %v21335_v32  ;;  %19189 = vmatprep.mubr.msk.f32.mxu1 %vm636_vm1, %v21338_v33 }
  0x4f   : > { %19139 = vmatprep.mubr.msk.f32.mxu0 %vm636_vm1, %v21338_v33 }
  0x51   : > { %19190 = vmatmul.mubr.msk.f32.gmra.mxu1 %vm636_vm1, %v21341_v34 }
  0x52   : > { %19140 = vmatmul.mubr.msk.f32.gmra.mxu0 %vm636_vm1, %v21341_v34  ;;  %19192 = vmatprep.mubr.msk.f32.mxu1 %vm636_vm1, %v21354_v35 }
  0x53   : > { %19142 = vmatprep.mubr.msk.f32.mxu0 %vm636_vm1, %v21354_v35 }
  0x55   : > { %19193 = vmatmul.mubr.msk.f32.gmra.mxu1 %vm636_vm1, %v21357_v36 }
  0x56   : > { %19143 = vmatmul.mubr.msk.f32.gmra.mxu0 %vm636_vm1, %v21357_v36  ;;  %19247 = vmatprep.mubr.msk.f32.mxu1 %vm636_vm1, %v1861_v38 }
  0x57   : > { %19197 = vmatprep.mubr.msk.f32.mxu0 %vm636_vm1, %v21171_v4 }
  0x59   : > { %19248 = vmatmul.mubr.msk.f32.vlgmr.msra.gmra.mxu1 %vm636_vm1, %v1862_v39 }
  0x5a   : > { %19198 = vmatmul.mubr.msk.f32.vlgmr.msra.gmra.mxu0 %vm636_vm1, %v21174_v5  ;;  %19346 = vmatpush3.msk.msra.mxu1 %vm733_vm0, %v2574_v40 }
  0x5b   : > { %19200 = vmatprep.mubr.msk.f32.mxu0 %vm636_vm1, %v21177_v6  ;;  %19296 = vmatpush3.msk.msra.mxu0 %vm733_vm0, %v21182_v7 }
  0x5c   : > { %19395 = vmatprep.subr.msk.mxu0 %vm733_vm0, %v2963_v41  ;;  %19445 = vmatprep.subr.msk.mxu1 %vm733_vm0, %v21722_v44 }
  0x5e   : > { %19201 = vmatmul.mubr.msk.f32.gmra.mxu0 %vm636_vm1, %v21193_v8 }
  0x5f   : > { %19203 = vmatprep.mubr.msk.f32.mxu0 %vm636_vm1, %v21196_v9 }
  0x62   : > { %19204 = vmatmul.mubr.msk.f32.gmra.mxu0 %vm636_vm1, %v21199_v10 }
  0x63   : > { %19206 = vmatprep.mubr.msk.f32.mxu0 %vm636_vm1, %v21212_v11 }
  0x66   : > { %19207 = vmatmul.mubr.msk.f32.gmra.mxu0 %vm636_vm1, %v21215_v12 }
  0x67   : > { %19209 = vmatprep.mubr.msk.f32.mxu0 %vm636_vm1, %v21218_v13 }
  0x6a   : > { %19210 = vmatmul.mubr.msk.f32.gmra.mxu0 %vm636_vm1, %v21231_v14 }
  0x6b   : > { %19212 = vmatprep.mubr.msk.f32.mxu0 %vm636_vm1, %v21234_v15 }
  0x6e   : > { %19213 = vmatmul.mubr.msk.f32.gmra.mxu0 %vm636_vm1, %v21237_v16 }
  0x6f   : > { %19215 = vmatprep.mubr.msk.f32.mxu0 %vm636_vm1, %v21248_v17 }
  0x72   : > { %19216 = vmatmul.mubr.msk.f32.gmra.mxu0 %vm636_vm1, %v21251_v18 }
  0x73   : > { %19218 = vmatprep.mubr.msk.f32.mxu0 %vm636_vm1, %v21254_v19 }
  0x76   : > { %19219 = vmatmul.mubr.msk.f32.gmra.mxu0 %vm636_vm1, %v21265_v20 }
  0x77   : > { %19221 = vmatprep.mubr.msk.f32.mxu0 %vm636_vm1, %v21268_v21 }
  0x7a   : > { %19222 = vmatmul.mubr.msk.f32.gmra.mxu0 %vm636_vm1, %v21271_v22 }
  0x7b   : > { %19224 = vmatprep.mubr.msk.f32.mxu0 %vm636_vm1, %v21284_v23 }
  0x7e   : > { %19225 = vmatmul.mubr.msk.f32.gmra.mxu0 %vm636_vm1, %v21287_v24 }
  0x7f   : > { %19227 = vmatprep.mubr.msk.f32.mxu0 %vm636_vm1, %v21290_v25 }
  0x82   : > { %19228 = vmatmul.mubr.msk.f32.gmra.mxu0 %vm636_vm1, %v21303_v26 }
  0x83   : > { %19230 = vmatprep.mubr.msk.f32.mxu0 %vm636_vm1, %v21306_v27 }
  0x86   : > { %19231 = vmatmul.mubr.msk.f32.gmra.mxu0 %vm636_vm1, %v21309_v28 }
  0x87   : > { %19233 = vmatprep.mubr.msk.f32.mxu0 %vm636_vm1, %v21320_v29 }
  0x8a   : > { %19234 = vmatmul.mubr.msk.f32.gmra.mxu0 %vm636_vm1, %v21323_v30 }
  0x8b   : > { %19236 = vmatprep.mubr.msk.f32.mxu0 %vm636_vm1, %v21326_v31 }
  0x8e   : > { %19237 = vmatmul.mubr.msk.f32.gmra.mxu0 %vm636_vm1, %v21335_v32 }
  0x8f   : > { %19239 = vmatprep.mubr.msk.f32.mxu0 %vm636_vm1, %v21338_v33 }
  0x92   : > { %19240 = vmatmul.mubr.msk.f32.gmra.mxu0 %vm636_vm1, %v21341_v34 }
  0x93   : > { %19242 = vmatprep.mubr.msk.f32.mxu0 %vm636_vm1, %v21354_v35 }
  0x96   : > { %19243 = vmatmul.mubr.msk.f32.gmra.mxu0 %vm636_vm1, %v21357_v36 }
  0x97   : > { %19297 = vmatprep.mubr.msk.f32.mxu0 %vm636_vm1, %v1828_v42 }
  0x9a   : > { %19298 = vmatmul.mubr.msk.f32.vlgmr.msra.gmra.mxu0 %vm636_vm1, %v1829_v43 }
  0x9b   : > { %19396 = vmatpush3.msk.msra.mxu0 %vm733_vm0, %v2963_v41 }
  0x9c   : > { %19495 = vmatprep.subr.msk.mxu0 %vm733_vm0, %v21729_v45 }
  0xd9   : > { %v19149_v47 = vpop.f32.mrf.mxu1 }
  0xda   : > { %v21743_v49 = vpop.f32.mrf.mxu0  ;;  %v1309_v50 = vmul.f32 %v19149_v47, %v21736_v46 }
  0xdb   : > { %27148 = vst [vmem:[#allocation5_spill] sm:$0xff] %v21743_v49  ;;  %v1142_v51 = vpop.f32.mrf.mxu1 }
  0xdc   : > { %v21746_v52 = vpop.f32.mrf.mxu0  ;;  %v1348_v53 = vadd.f32 %v21741_v48, %v1309_v50  ;;  %v1308_v54 = vmul.f32 %v21736_v46, %v1142_v51 }
  0xdd   : > { %27149 = vst [vmem:[#allocation6_spill] sm:$0xff] %v21746_v52  ;;  %v19152_v55 = vpop.f32.mrf.mxu1 }
  0xde   : > { %v21750_v56 = vpop.f32.mrf.mxu0  ;;  %v1380_v57 = vmax.f32 %v1348_v53, 0.0  ;;  %v1347_v58 = vadd.f32 %v21741_v48, %v1308_v54  ;;  %v1311_v59 = vmul.f32 %v19152_v55, %v21736_v46 }
  0xdf   : > { %27150 = vst [vmem:[#allocation7_spill] sm:$0xff] %v21750_v56  ;;  %v1152_v60 = vpop.f32.mrf.mxu1 }
  0xe0   : > { %v21754_v61 = vpop.f32.mrf.mxu0  ;;  %1797 = vst.msk [vmem:[#allocation2 + $0x21] sm:$0xff] %vm636_vm1, %v1380_v57  ;;  %v1379_v62 = vmax.f32 %v1347_v58, 0.0  ;;  %v1350_v63 = vadd.f32 %v21741_v48, %v1311_v59  ;;  %v1310_v0 = vmul.f32 %v21736_v46, %v1152_v60 }
  0xe1   : > { %27151 = vst [vmem:[#allocation8_spill] sm:$0xff] %v21754_v61  ;;  %v19155_v1 = vpop.f32.mrf.mxu1 }
  0xe2   : > { %v21759_v2 = vpop.f32.mrf.mxu0  ;;  %1796 = vst.msk [vmem:[#allocation2 + $0x19] sm:$0xff] %vm636_vm1, %v1379_v62  ;;  %v1382_v3 = vmax.f32 %v1350_v63, 0.0  ;;  %v1349_v4 = vadd.f32 %v21741_v48, %v1310_v0  ;;  %v1313_v5 = vmul.f32 %v19155_v1, %v21736_v46 }
  0xe3   : > { %27152 = vst [vmem:[#allocation9_spill] sm:$0xff] %v21759_v2  ;;  %v1162_v6 = vpop.f32.mrf.mxu1 }
  0xe4   : > { %v21764_v7 = vpop.f32.mrf.mxu0  ;;  %1799 = vst.msk [vmem:[#allocation2 + $0x39] sm:$0xff] %vm636_vm1, %v1382_v3  ;;  %v1381_v8 = vmax.f32 %v1349_v4, 0.0  ;;  %v1352_v9 = vadd.f32 %v21741_v48, %v1313_v5  ;;  %v1312_v10 = vmul.f32 %v21736_v46, %v1162_v6 }
  0xe5   : > { %27153 = vst [vmem:[#allocation10_spill] sm:$0xff] %v21764_v7  ;;  %v19158_v11 = vpop.f32.mrf.mxu1 }
  0xe6   : > { %v21769_v12 = vpop.f32.mrf.mxu0  ;;  %1798 = vst.msk [vmem:[#allocation2 + $0x31] sm:$0xff] %vm636_vm1, %v1381_v8  ;;  %v1384_v13 = vmax.f32 %v1352_v9, 0.0  ;;  %v1351_v14 = vadd.f32 %v21741_v48, %v1312_v10  ;;  %v1315_v15 = vmul.f32 %v19158_v11, %v21736_v46 }
  0xe7   : > { %27154 = vst [vmem:[#allocation11_spill] sm:$0xff] %v21769_v12  ;;  %v1172_v16 = vpop.f32.mrf.mxu1  ;;  %v1864_v29 = vld [vmem:[#allocation2 + $0x21] sm:$0xff] }
  0xe8   : > { %v21774_v17 = vpop.f32.mrf.mxu0  ;;  %1801 = vst.msk [vmem:[#allocation2 + $0x51] sm:$0xff] %vm636_vm1, %v1384_v13  ;;  %v1383_v18 = vmax.f32 %v1351_v14, 0.0  ;;  %v1354_v19 = vadd.f32 %v21741_v48, %v1315_v15  ;;  %v1314_v20 = vmul.f32 %v21736_v46, %v1172_v16 }
  0xe9   : > { %27155 = vst [vmem:[#allocation12_spill] sm:$0xff] %v21774_v17  ;;  %v19161_v21 = vpop.f32.mrf.mxu1  ;;  %v1863_v22 = vld [vmem:[#allocation2 + $0x19] sm:$0xff] }
  0xea   : > { %v21779_v23 = vld [vmem:[#allocation2 + $0x18] sm:$0xff]  ;;  %v21781_v24 = vld [vmem:[#allocation2 + $0x20] sm:$0xff]  ;;  %v21783_v25 = vpop.f32.mrf.mxu0  ;;  %1800 = vst.msk [vmem:[#allocation2 + $0x49] sm:$0xff] %vm636_vm1, %v1383_v18  ;;  %v1386_v26 = vmax.f32 %v1354_v19, 0.0  ;;  %v1353_v27 = vadd.f32 %v21741_v48, %v1314_v20  ;;  %v1317_v28 = vmul.f32 %v19161_v21, %v21736_v46  ;;  %19250 = vmatprep.mubr.msk.f32.mxu1 %vm636_vm1, %v1863_v22 }
  0xeb   : > { %27156 = vst [vmem:[#allocation13_spill] sm:$0xff] %v21783_v25  ;;  %19300 = vmatprep.mubr.msk.f32.mxu0 %vm636_vm1, %v21779_v23  ;;  %v1182_v30 = vpop.f32.mrf.mxu1  ;;  %19251 = vmatmul.mubr.msk.f32.gmra.mxu1 %vm636_vm1, %v1864_v29  ;;  %v1866_v47 = vld [vmem:[#allocation2 + $0x39] sm:$0xff] }
  0xec   : > { %19301 = vmatmul.mubr.msk.f32.gmra.mxu0 %vm636_vm1, %v21781_v24  ;;  %v21794_v31 = vpop.f32.mrf.mxu0  ;;  %1803 = vst.msk [vmem:[#allocation2 + $0x69] sm:$0xff] %vm636_vm1, %v1386_v26  ;;  %v1385_v32 = vmax.f32 %v1353_v27, 0.0  ;;  %v1356_v33 = vadd.f32 %v21741_v48, %v1317_v28  ;;  %v1316_v34 = vmul.f32 %v21736_v46, %v1182_v30 }
  0xed   : > { %27157 = vst [vmem:[#allocation14_spill] sm:$0xff] %v21794_v31  ;;  %v19164_v35 = vpop.f32.mrf.mxu1  ;;  %v1865_v36 = vld [vmem:[#allocation2 + $0x31] sm:$0xff] }
  0xee   : > { %v21799_v38 = vld [vmem:[#allocation2 + $0x30] sm:$0xff]  ;;  %v21801_v39 = vld [vmem:[#allocation2 + $0x38] sm:$0xff]  ;;  %v21803_v40 = vpop.f32.mrf.mxu0  ;;  %1802 = vst.msk [vmem:[#allocation2 + $0x61] sm:$0xff] %vm636_vm1, %v1385_v32  ;;  %v1388_v41 = vmax.f32 %v1356_v33, 0.0  ;;  %v1355_v42 = vadd.f32 %v21741_v48, %v1316_v34  ;;  %v1319_v43 = vmul.f32 %v19164_v35, %v21736_v46  ;;  %19253 = vmatprep.mubr.msk.f32.mxu1 %vm636_vm1, %v1865_v36 }
  0xef   : > { %27158 = vst [vmem:[#allocation15_spill] sm:$0xff] %v21803_v40  ;;  %19303 = vmatprep.mubr.msk.f32.mxu0 %vm636_vm1, %v21799_v38  ;;  %v1192_v50 = vpop.f32.mrf.mxu1  ;;  %19254 = vmatmul.mubr.msk.f32.gmra.mxu1 %vm636_vm1, %v1866_v47  ;;  %v1868_v3 = vld [vmem:[#allocation2 + $0x51] sm:$0xff] }
  0xf0   : > { %19304 = vmatmul.mubr.msk.f32.gmra.mxu0 %vm636_vm1, %v21801_v39  ;;  %v21814_v51 = vpop.f32.mrf.mxu0  ;;  %1805 = vst.msk [vmem:[#allocation2 + $0x81] sm:$0xff] %vm636_vm1, %v1388_v41  ;;  %v1387_v53 = vmax.f32 %v1355_v42, 0.0  ;;  %v1358_v54 = vadd.f32 %v21741_v48, %v1319_v43  ;;  %v1318_v55 = vmul.f32 %v21736_v46, %v1192_v50 }
  0xf1   : > { %27159 = vst [vmem:[#allocation16_spill] sm:$0xff] %v21814_v51  ;;  %v19167_v57 = vpop.f32.mrf.mxu1  ;;  %v1867_v58 = vld [vmem:[#allocation2 + $0x49] sm:$0xff] }
  0xf2   : > { %v21819_v59 = vld [vmem:[#allocation2 + $0x48] sm:$0xff]  ;;  %v21821_v60 = vld [vmem:[#allocation2 + $0x50] sm:$0xff]  ;;  %v21823_v62 = vpop.f32.mrf.mxu0  ;;  %1804 = vst.msk [vmem:[#allocation2 + $0x79] sm:$0xff] %vm636_vm1, %v1387_v53  ;;  %v1390_v63 = vmax.f32 %v1358_v54, 0.0  ;;  %v1357_v0 = vadd.f32 %v21741_v48, %v1318_v55  ;;  %v1321_v1 = vmul.f32 %v19167_v57, %v21736_v46  ;;  %19256 = vmatprep.mubr.msk.f32.mxu1 %vm636_vm1, %v1867_v58 }
  0xf3   : > { %27160 = vst [vmem:[#allocation17_spill] sm:$0xff] %v21823_v62  ;;  %19306 = vmatprep.mubr.msk.f32.mxu0 %vm636_vm1, %v21819_v59  ;;  %v1202_v4 = vpop.f32.mrf.mxu1  ;;  %19257 = vmatmul.mubr.msk.f32.gmra.mxu1 %vm636_vm1, %v1868_v3  ;;  %v21854_v20 = vld [vmem:[#allocation2 + $0x69] sm:$0xff] }
  0xf4   : > { %19307 = vmatmul.mubr.msk.f32.gmra.mxu0 %vm636_vm1, %v21821_v60  ;;  %v21834_v5 = vpop.f32.mrf.mxu0  ;;  %1807 = vst.msk [vmem:[#allocation2 + $0x99] sm:$0xff] %vm636_vm1, %v1390_v63  ;;  %v1389_v6 = vmax.f32 %v1357_v0, 0.0  ;;  %v1360_v8 = vadd.f32 %v21741_v48, %v1321_v1  ;;  %v1320_v9 = vmul.f32 %v21736_v46, %v1202_v4 }
  0xf5   : > { %27161 = vst [vmem:[#allocation18_spill] sm:$0xff] %v21834_v5  ;;  %v19170_v10 = vpop.f32.mrf.mxu1  ;;  %v21839_v11 = vld [vmem:[#allocation2 + $0x61] sm:$0xff] }
  0xf6   : > { %v21841_v13 = vld [vmem:[#allocation2 + $0x60] sm:$0xff]  ;;  %v21843_v14 = vld [vmem:[#allocation2 + $0x68] sm:$0xff]  ;;  %v21845_v15 = vpop.f32.mrf.mxu0  ;;  %1806 = vst.msk [vmem:[#allocation2 + $0x91] sm:$0xff] %vm636_vm1, %v1389_v6  ;;  %v1392_v16 = vmax.f32 %v1360_v8, 0.0  ;;  %v1359_v18 = vadd.f32 %v21741_v48, %v1320_v9  ;;  %v1323_v19 = vmul.f32 %v19170_v10, %v21736_v46  ;;  %19259 = vmatprep.mubr.msk.f32.mxu1 %vm636_vm1, %v21839_v11 }
  0xf7   : > { %27162 = vst [vmem:[#allocation19_spill] sm:$0xff] %v21845_v15  ;;  %19309 = vmatprep.mubr.msk.f32.mxu0 %vm636_vm1, %v21841_v13  ;;  %v1212_v21 = vpop.f32.mrf.mxu1  ;;  %19260 = vmatmul.mubr.msk.f32.gmra.mxu1 %vm636_vm1, %v21854_v20  ;;  %v21880_v42 = vld [vmem:[#allocation2 + $0x81] sm:$0xff] }
  0xf8   : > { %19310 = vmatmul.mubr.msk.f32.gmra.mxu0 %vm636_vm1, %v21843_v14  ;;  %v21860_v22 = vpop.f32.mrf.mxu0  ;;  %1809 = vst.msk [vmem:[#allocation2 + $0xb1] sm:$0xff] %vm636_vm1, %v1392_v16  ;;  %v1391_v26 = vmax.f32 %v1359_v18, 0.0  ;;  %v1362_v27 = vadd.f32 %v21741_v48, %v1323_v19  ;;  %v1322_v28 = vmul.f32 %v21736_v46, %v1212_v21 }
  0xf9   : > { %27163 = vst [vmem:[#allocation20_spill] sm:$0xff] %v21860_v22  ;;  %v19173_v29 = vpop.f32.mrf.mxu1  ;;  %v21865_v30 = vld [vmem:[#allocation2 + $0x79] sm:$0xff] }
  0xfa   : > { %v21867_v32 = vld [vmem:[#allocation2 + $0x78] sm:$0xff]  ;;  %v21869_v33 = vld [vmem:[#allocation2 + $0x80] sm:$0xff]  ;;  %v21871_v34 = vpop.f32.mrf.mxu0  ;;  %1808 = vst.msk [vmem:[#allocation2 + $0xa9] sm:$0xff] %vm636_vm1, %v1391_v26  ;;  %v1394_v35 = vmax.f32 %v1362_v27, 0.0  ;;  %v1361_v36 = vadd.f32 %v21741_v48, %v1322_v28  ;;  %v1325_v41 = vmul.f32 %v19173_v29, %v21736_v46  ;;  %19262 = vmatprep.mubr.msk.f32.mxu1 %vm636_vm1, %v21865_v30 }
  0xfb   : > { %27164 = vst [vmem:[#allocation21_spill] sm:$0xff] %v21871_v34  ;;  %19312 = vmatprep.mubr.msk.f32.mxu0 %vm636_vm1, %v21867_v32  ;;  %v1222_v43 = vpop.f32.mrf.mxu1  ;;  %19263 = vmatmul.mubr.msk.f32.gmra.mxu1 %vm636_vm1, %v21880_v42  ;;  %v21906_v6 = vld [vmem:[#allocation2 + $0x99] sm:$0xff] }
  0xfc   : > { %19313 = vmatmul.mubr.msk.f32.gmra.mxu0 %vm636_vm1, %v21869_v33  ;;  %v21886_v47 = vpop.f32.mrf.mxu0  ;;  %1811 = vst.msk [vmem:[#allocation2 + $0xc9] sm:$0xff] %vm636_vm1, %v1394_v35  ;;  %v1393_v50 = vmax.f32 %v1361_v36, 0.0  ;;  %v1364_v53 = vadd.f32 %v21741_v48, %v1325_v41  ;;  %v1324_v54 = vmul.f32 %v21736_v46, %v1222_v43 }
  0xfd   : > { %27165 = vst [vmem:[#allocation22_spill] sm:$0xff] %v21886_v47  ;;  %v19176_v55 = vpop.f32.mrf.mxu1  ;;  %v21891_v57 = vld [vmem:[#allocation2 + $0x91] sm:$0xff] }
  0xfe   : > { %v21893_v58 = vld [vmem:[#allocation2 + $0x90] sm:$0xff]  ;;  %v21895_v63 = vld [vmem:[#allocation2 + $0x98] sm:$0xff]  ;;  %v21897_v0 = vpop.f32.mrf.mxu0  ;;  %1810 = vst.msk [vmem:[#allocation2 + $0xc1] sm:$0xff] %vm636_vm1, %v1393_v50  ;;  %v1396_v1 = vmax.f32 %v1364_v53, 0.0  ;;  %v1363_v3 = vadd.f32 %v21741_v48, %v1324_v54  ;;  %v1327_v4 = vmul.f32 %v19176_v55, %v21736_v46  ;;  %19265 = vmatprep.mubr.msk.f32.mxu1 %vm636_vm1, %v21891_v57 }
  0xff   : > { %27166 = vst [vmem:[#allocation23_spill] sm:$0xff] %v21897_v0  ;;  %19315 = vmatprep.mubr.msk.f32.mxu0 %vm636_vm1, %v21893_v58  ;;  %v1232_v8 = vpop.f32.mrf.mxu1  ;;  %19266 = vmatmul.mubr.msk.f32.gmra.mxu1 %vm636_vm1, %v21906_v6  ;;  %v21932_v41 = vld [vmem:[#allocation2 + $0xb1] sm:$0xff] }
 0x100   : > { %19316 = vmatmul.mubr.msk.f32.gmra.mxu0 %vm636_vm1, %v21895_v63  ;;  %v21912_v9 = vpop.f32.mrf.mxu0  ;;  %1813 = vst.msk [vmem:[#allocation2 + $0xe1] sm:$0xff] %vm636_vm1, %v1396_v1  ;;  %v1395_v10 = vmax.f32 %v1363_v3, 0.0  ;;  %v1366_v16 = vadd.f32 %v21741_v48, %v1327_v4  ;;  %v1326_v18 = vmul.f32 %v21736_v46, %v1232_v8 }
 0x101   : > { %27167 = vst [vmem:[#allocation24_spill] sm:$0xff] %v21912_v9  ;;  %v19179_v19 = vpop.f32.mrf.mxu1  ;;  %v21917_v21 = vld [vmem:[#allocation2 + $0xa9] sm:$0xff] }
 0x102   : > { %v21919_v26 = vld [vmem:[#allocation2 + $0xa8] sm:$0xff]  ;;  %v21921_v27 = vld [vmem:[#allocation2 + $0xb0] sm:$0xff]  ;;  %v21923_v28 = vpop.f32.mrf.mxu0  ;;  %1812 = vst.msk [vmem:[#allocation2 + $0xd9] sm:$0xff] %vm636_vm1, %v1395_v10  ;;  %v1398_v29 = vmax.f32 %v1366_v16, 0.0  ;;  %v1365_v35 = vadd.f32 %v21741_v48, %v1326_v18  ;;  %v1329_v36 = vmul.f32 %v19179_v19, %v21736_v46  ;;  %19268 = vmatprep.mubr.msk.f32.mxu1 %vm636_vm1, %v21917_v21 }
 0x103   : > { %27168 = vst [vmem:[#allocation25_spill] sm:$0xff] %v21923_v28  ;;  %19318 = vmatprep.mubr.msk.f32.mxu0 %vm636_vm1, %v21919_v26  ;;  %v1242_v43 = vpop.f32.mrf.mxu1  ;;  %19269 = vmatmul.mubr.msk.f32.gmra.mxu1 %vm636_vm1, %v21932_v41 }
 0x104   : > { %19319 = vmatmul.mubr.msk.f32.gmra.mxu0 %vm636_vm1, %v21921_v27  ;;  %v21938_v50 = vpop.f32.mrf.mxu0  ;;  %1815 = vst.msk [vmem:[#allocation2 + $0xf9] sm:$0xff] %vm636_vm1, %v1398_v29  ;;  %v1397_v53 = vmax.f32 %v1365_v35, 0.0  ;;  %v1368_v54 = vadd.f32 %v21741_v48, %v1329_v36  ;;  %v1328_v55 = vmul.f32 %v21736_v46, %v1242_v43  ;;  %v21958_v29 = vld [vmem:[#allocation2 + $0xc9] sm:$0xff] }
 0x105   : > { %27169 = vst [vmem:[#allocation26_spill] sm:$0xff] %v21938_v50  ;;  %v19182_v1 = vpop.f32.mrf.mxu1  ;;  %v21943_v3 = vld [vmem:[#allocation2 + $0xc1] sm:$0xff] }
 0x106   : > { %v21945_v4 = vld [vmem:[#allocation2 + $0xc0] sm:$0xff]  ;;  %v21947_v8 = vld [vmem:[#allocation2 + $0xc8] sm:$0xff]  ;;  %v21949_v10 = vpop.f32.mrf.mxu0  ;;  %1814 = vst.msk [vmem:[#allocation2 + $0xf1] sm:$0xff] %vm636_vm1, %v1397_v53  ;;  %v1400_v16 = vmax.f32 %v1368_v54, 0.0  ;;  %v1367_v18 = vadd.f32 %v21741_v48, %v1328_v55  ;;  %v1331_v19 = vmul.f32 %v19182_v1, %v21736_v46  ;;  %19271 = vmatprep.mubr.msk.f32.mxu1 %vm636_vm1, %v21943_v3 }
 0x107   : > { %27170 = vst [vmem:[#allocation27_spill] sm:$0xff] %v21949_v10  ;;  %19321 = vmatprep.mubr.msk.f32.mxu0 %vm636_vm1, %v21945_v4  ;;  %v1252_v35 = vpop.f32.mrf.mxu1  ;;  %19272 = vmatmul.mubr.msk.f32.gmra.mxu1 %vm636_vm1, %v21958_v29 }
 0x108   : > { %19322 = vmatmul.mubr.msk.f32.gmra.mxu0 %vm636_vm1, %v21947_v8  ;;  %v21964_v36 = vpop.f32.mrf.mxu0  ;;  %1817 = vst.msk [vmem:[#allocation2 + $0x111] sm:$0xff] %vm636_vm1, %v1400_v16  ;;  %v1399_v43 = vmax.f32 %v1367_v18, 0.0  ;;  %v1370_v53 = vadd.f32 %v21741_v48, %v1331_v19  ;;  %v1330_v54 = vmul.f32 %v21736_v46, %v1252_v35  ;;  %v21984_v18 = vld [vmem:[#allocation2 + $0xe1] sm:$0xff] }
 0x109   : > { %27171 = vst [vmem:[#allocation28_spill] sm:$0xff] %v21964_v36  ;;  %v19185_v55 = vpop.f32.mrf.mxu1  ;;  %v21969_v1 = vld [vmem:[#allocation2 + $0xd9] sm:$0xff] }
 0x10a   : > { %v21971_v37 = vld [vmem:[#allocation2 + $0xd8] sm:$0xff]  ;;  %v21973_v50 = vld [vmem:[#allocation2 + $0xe0] sm:$0xff]  ;;  %v21975_v9 = vpop.f32.mrf.mxu0  ;;  %1816 = vst.msk [vmem:[#allocation2 + $0x109] sm:$0xff] %vm636_vm1, %v1399_v43  ;;  %v1402_v47 = vmax.f32 %v1370_v53, 0.0  ;;  %v1369_v36 = vadd.f32 %v21741_v48, %v1330_v54  ;;  %v1333_v16 = vmul.f32 %v19185_v55, %v21736_v46  ;;  %19274 = vmatprep.mubr.msk.f32.mxu1 %vm636_vm1, %v21969_v1 }
 0x10b   : > { %27172 = vst [vmem:[#allocation29_spill] sm:$0xff] %v21975_v9  ;;  %19324 = vmatprep.mubr.msk.f32.mxu0 %vm636_vm1, %v21971_v37  ;;  %v1262_v19 = vpop.f32.mrf.mxu1  ;;  %19275 = vmatmul.mubr.msk.f32.gmra.mxu1 %vm636_vm1, %v21984_v18 }
 0x10c   : > { %19325 = vmatmul.mubr.msk.f32.gmra.mxu0 %vm636_vm1, %v21973_v50  ;;  %v21990_v35 = vpop.f32.mrf.mxu0  ;;  %1819 = vst.msk [vmem:[#allocation2 + $0x129] sm:$0xff] %vm636_vm1, %v1402_v47  ;;  %v1401_v43 = vmax.f32 %v1369_v36, 0.0  ;;  %v1372_v53 = vadd.f32 %v21741_v48, %v1333_v16  ;;  %v1332_v54 = vmul.f32 %v21736_v46, %v1262_v19  ;;  %v22010_v36 = vld [vmem:[#allocation2 + $0xf9] sm:$0xff] }
 0x10d   : > { %27173 = vst [vmem:[#allocation30_spill] sm:$0xff] %v21990_v35  ;;  %v19188_v55 = vpop.f32.mrf.mxu1  ;;  %v21995_v22 = vld [vmem:[#allocation2 + $0xf1] sm:$0xff] }
 0x10e   : > { %v21997_v5 = vld [vmem:[#allocation2 + $0xf0] sm:$0xff]  ;;  %v21999_v51 = vld [vmem:[#allocation2 + $0xf8] sm:$0xff]  ;;  %v22001_v31 = vpop.f32.mrf.mxu0  ;;  %1818 = vst.msk [vmem:[#allocation2 + $0x121] sm:$0xff] %vm636_vm1, %v1401_v43  ;;  %v1404_v17 = vmax.f32 %v1372_v53, 0.0  ;;  %v1371_v35 = vadd.f32 %v21741_v48, %v1332_v54  ;;  %v1335_v47 = vmul.f32 %v19188_v55, %v21736_v46  ;;  %19277 = vmatprep.mubr.msk.f32.mxu1 %vm636_vm1, %v21995_v22 }
 0x10f   : > { %27174 = vst [vmem:[#allocation31_spill] sm:$0xff] %v22001_v31  ;;  %19327 = vmatprep.mubr.msk.f32.mxu0 %vm636_vm1, %v21997_v5  ;;  %v1272_v16 = vpop.f32.mrf.mxu1  ;;  %19278 = vmatmul.mubr.msk.f32.gmra.mxu1 %vm636_vm1, %v22010_v36 }
 0x110   : > { %19328 = vmatmul.mubr.msk.f32.gmra.mxu0 %vm636_vm1, %v21999_v51  ;;  %v22016_v19 = vpop.f32.mrf.mxu0  ;;  %1821 = vst.msk [vmem:[#allocation2 + $0x141] sm:$0xff] %vm636_vm1, %v1404_v17  ;;  %v1403_v43 = vmax.f32 %v1371_v35, 0.0  ;;  %v1374_v53 = vadd.f32 %v21741_v48, %v1335_v47  ;;  %v1334_v54 = vmul.f32 %v21736_v46, %v1272_v16  ;;  %v22036_v35 = vld [vmem:[#allocation2 + $0x111] sm:$0xff] }
 0x111   : > { %27175 = vst [vmem:[#allocation32_spill] sm:$0xff] %v22016_v19  ;;  %v19191_v55 = vpop.f32.mrf.mxu1  ;;  %v22021_v7 = vld [vmem:[#allocation2 + $0x109] sm:$0xff] }
 0x112   : > { %v22023_v61 = vld [vmem:[#allocation2 + $0x108] sm:$0xff]  ;;  %v22025_v52 = vld [vmem:[#allocation2 + $0x110] sm:$0xff]  ;;  %v22027_v31 = vpop.f32.mrf.mxu0  ;;  %1820 = vst.msk [vmem:[#allocation2 + $0x139] sm:$0xff] %vm636_vm1, %v1403_v43  ;;  %v1406_v9 = vmax.f32 %v1374_v53, 0.0  ;;  %v1373_v19 = vadd.f32 %v21741_v48, %v1334_v54  ;;  %v1337_v17 = vmul.f32 %v19191_v55, %v21736_v46  ;;  %19280 = vmatprep.mubr.msk.f32.mxu1 %vm636_vm1, %v22021_v7 }
 0x113   : > { %27176 = vst [vmem:[#allocation33_spill] sm:$0xff] %v22027_v31  ;;  %19330 = vmatprep.mubr.msk.f32.mxu0 %vm636_vm1, %v22023_v61  ;;  %v1282_v47 = vpop.f32.mrf.mxu1  ;;  %19281 = vmatmul.mubr.msk.f32.gmra.mxu1 %vm636_vm1, %v22036_v35 }
 0x114   : > { %19331 = vmatmul.mubr.msk.f32.gmra.mxu0 %vm636_vm1, %v22025_v52  ;;  %v22042_v16 = vpop.f32.mrf.mxu0  ;;  %1823 = vst.msk [vmem:[#allocation2 + $0x159] sm:$0xff] %vm636_vm1, %v1406_v9  ;;  %v1405_v43 = vmax.f32 %v1373_v19, 0.0  ;;  %v1376_v53 = vadd.f32 %v21741_v48, %v1337_v17  ;;  %v1336_v54 = vmul.f32 %v21736_v46, %v1282_v47  ;;  %v1886_v9 = vld [vmem:[#allocation2 + $0x129] sm:$0xff] }
 0x115   : > { %27177 = vst [vmem:[#allocation34_spill] sm:$0xff] %v22042_v16  ;;  %v22047_v55 = vld [vmem:[#allocation2 + $0x121] sm:$0xff]  ;;  %v19194_v28 = vpop.f32.mrf.mxu1 }
 0x116   : > { %v22049_v31 = vld [vmem:[#allocation2 + $0x120] sm:$0xff]  ;;  %v22051_v10 = vld [vmem:[#allocation2 + $0x128] sm:$0xff]  ;;  %v22053_v0 = vpop.f32.mrf.mxu0  ;;  %1822 = vst.msk [vmem:[#allocation2 + $0x151] sm:$0xff] %vm636_vm1, %v1405_v43  ;;  %v1408_v34 = vmax.f32 %v1376_v53, 0.0  ;;  %v1375_v16 = vadd.f32 %v21741_v48, %v1336_v54  ;;  %19283 = vmatprep.mubr.msk.f32.mxu1 %vm636_vm1, %v22047_v55  ;;  %v1339_v19 = vmul.f32 %v19194_v28, %v21736_v46 }
 0x117   : > { %27178 = vst [vmem:[#allocation35_spill] sm:$0xff] %v22053_v0  ;;  %19333 = vmatprep.mubr.msk.f32.mxu0 %vm636_vm1, %v22049_v31  ;;  %19284 = vmatmul.mubr.msk.f32.gmra.mxu1 %vm636_vm1, %v1886_v9  ;;  %v1292_v17 = vpop.f32.mrf.mxu1  ;;  %v22070_v43 = vld [vmem:[%s27030_s11] ss:$0 sm:$0xff] }
 0x118   : > { %19334 = vmatmul.mubr.msk.f32.gmra.mxu0 %vm636_vm1, %v22051_v10  ;;  %v22065_v47 = vpop.f32.mrf.mxu0  ;;  %1825 = vst.msk [vmem:[#allocation2 + $0x171] sm:$0xff] %vm636_vm1, %v1408_v34  ;;  %v1407_v53 = vmax.f32 %v1375_v16, 0.0  ;;  %v1378_v54 = vadd.f32 %v21741_v48, %v1339_v19  ;;  %v1338_v28 = vmul.f32 %v21736_v46, %v1292_v17  ;;  %v22078_v9 = vld [vmem:[%s27031_s12] ss:$0 sm:$0xff]  ;;  %v1888_v34 = vld [vmem:[#allocation2 + $0x141] sm:$0xff] }
 0x119   : > { %27179 = vst [vmem:[#allocation36_spill] sm:$0xff] %v22065_v47  ;;  %v1887_v0 = vld [vmem:[#allocation2 + $0x139] sm:$0xff] }
 0x11a   : > { %v22080_v15 = vld [vmem:[#allocation2 + $0x138] sm:$0xff]  ;;  %v22082_v47 = vld [vmem:[#allocation2 + $0x140] sm:$0xff]  ;;  %v19199_v62 = vpop.f32.mrf.mxu0  ;;  %1824 = vst.msk [vmem:[#allocation2 + $0x169] sm:$0xff] %vm636_vm1, %v1407_v53  ;;  %19286 = vmatprep.mubr.msk.f32.mxu1 %vm636_vm1, %v1887_v0  ;;  %v1410_v46 = vmax.f32 %v1378_v54, 0.0  ;;  %v1377_v16 = vadd.f32 %v21741_v48, %v1338_v28 }
 0x11b   : > { %19336 = vmatprep.mubr.msk.f32.mxu0 %vm636_vm1, %v22080_v15  ;;  %v1648_v19 = vmul.f32 %v19199_v62, %v22070_v43  ;;  %19287 = vmatmul.mubr.msk.f32.gmra.mxu1 %vm636_vm1, %v1888_v34  ;;  %v1890_v62 = vld [vmem:[#allocation2 + $0x159] sm:$0xff] }
 0x11c   : > { %19337 = vmatmul.mubr.msk.f32.gmra.mxu0 %vm636_vm1, %v22082_v47  ;;  %v1481_v17 = vpop.f32.mrf.mxu0  ;;  %1827 = vst.msk [vmem:[#allocation2 + $0x189] sm:$0xff] %vm636_vm1, %v1410_v46  ;;  %v1409_v53 = vmax.f32 %v1377_v16, 0.0 }
 0x11d   : > { %v1687_v0 = vadd.f32 %v22078_v9, %v1648_v19  ;;  %v1647_v40 = vmul.f32 %v22070_v43, %v1481_v17  ;;  %v1889_v25 = vld [vmem:[#allocation2 + $0x151] sm:$0xff]  ;;  %v2542_v19 = vld [vmem:[#allocation2 + $0x2] sm:$0xff] }
 0x11e   : > { %v22096_v12 = vld [vmem:[#allocation2 + $0x150] sm:$0xff]  ;;  %v22098_v54 = vld [vmem:[#allocation2 + $0x158] sm:$0xff]  ;;  %v19202_v48 = vpop.f32.mrf.mxu0  ;;  %19289 = vmatprep.mubr.msk.f32.mxu1 %vm636_vm1, %v1889_v25  ;;  %1826 = vst.msk [vmem:[#allocation2 + $0x181] sm:$0xff] %vm636_vm1, %v1409_v53 }
 0x11f   : > { %19339 = vmatprep.mubr.msk.f32.mxu0 %vm636_vm1, %v22096_v12  ;;  %v1719_v28 = vmax.f32 %v1687_v0, 0.0  ;;  %v1686_v34 = vadd.f32 %v22078_v9, %v1647_v40  ;;  %v1650_v46 = vmul.f32 %v19202_v48, %v22070_v43  ;;  %19290 = vmatmul.mubr.msk.f32.gmra.mxu1 %vm636_vm1, %v1890_v62  ;;  %v1892_v62 = vld [vmem:[#allocation2 + $0x171] sm:$0xff] }
 0x120   : > { %19340 = vmatmul.mubr.msk.f32.gmra.mxu0 %vm636_vm1, %v22098_v54  ;;  %v1491_v16 = vpop.f32.mrf.mxu0 }
 0x121   : > { %5432 = vst.msk [vmem:[#allocation3 + $0x3a] sm:$0xff] %vm636_vm1, %v1719_v28  ;;  %v1718_v25 = vmax.f32 %v1686_v34, 0.0  ;;  %v1689_v17 = vadd.f32 %v22078_v9, %v1650_v46  ;;  %v1649_v2 = vmul.f32 %v22070_v43, %v1491_v16  ;;  %v1891_v53 = vld [vmem:[#allocation2 + $0x169] sm:$0xff] }
 0x122   : > { %v22112_v0 = vld [vmem:[#allocation2 + $0x168] sm:$0xff]  ;;  %v22114_v40 = vld [vmem:[#allocation2 + $0x170] sm:$0xff]  ;;  %v19205_v48 = vpop.f32.mrf.mxu0  ;;  %19292 = vmatprep.mubr.msk.f32.mxu1 %vm636_vm1, %v1891_v53 }
 0x123   : > { %19342 = vmatprep.mubr.msk.f32.mxu0 %vm636_vm1, %v22112_v0  ;;  %5431 = vst.msk [vmem:[#allocation3 + $0x32] sm:$0xff] %vm636_vm1, %v1718_v25  ;;  %v1721_v28 = vmax.f32 %v1689_v17, 0.0  ;;  %v1688_v34 = vadd.f32 %v22078_v9, %v1649_v2  ;;  %v1652_v46 = vmul.f32 %v19205_v48, %v22070_v43  ;;  %19293 = vmatmul.mubr.msk.f32.gmra.mxu1 %vm636_vm1, %v1892_v62  ;;  %v2543_v53 = vld [vmem:[#allocation2 + $0xa] sm:$0xff] }
 0x124   : > { %19343 = vmatmul.mubr.msk.f32.gmra.mxu0 %vm636_vm1, %v22114_v40  ;;  %v1501_v16 = vpop.f32.mrf.mxu0  ;;  %19347 = vmatprep.mubr.msk.f32.mxu1 %vm636_vm1, %v2542_v19  ;;  %v22142_v19 = vld [vmem:[%s27026_s7 + $0x18] sm:$0xf] }
 0x125   : > { %19397 = vmatprep.mubr.msk.f32.mxu0 %vm636_vm1, %v21779_v23  ;;  %5434 = vst.msk [vmem:[#allocation3 + $0x52] sm:$0xff] %vm636_vm1, %v1721_v28  ;;  %v1720_v25 = vmax.f32 %v1688_v34, 0.0  ;;  %v1691_v17 = vadd.f32 %v22078_v9, %v1652_v46  ;;  %v1651_v2 = vmul.f32 %v22070_v43, %v1501_v16  ;;  %v22137_v23 = vld [vmem:[#allocation2 + $0x1a] sm:$0xff] }
 0x126   : > { %v19208_v48 = vpop.f32.mrf.mxu0  ;;  %v22147_v28 = vld [vmem:[%s27026_s7 + $0x1c] sm:$0xf] }
 0x127   : > { %5433 = vst.msk [vmem:[#allocation3 + $0x4a] sm:$0xff] %vm636_vm1, %v1720_v25  ;;  %v1723_v62 = vmax.f32 %v1691_v17, 0.0  ;;  %v1690_v56 = vadd.f32 %v22078_v9, %v1651_v2  ;;  %v1654_v49 = vmul.f32 %v19208_v48, %v22070_v43  ;;  %19348 = vmatmul.mubr.msk.f32.vlgmr.msra.gmra.mxu1 %vm636_vm1, %v2543_v53  ;;  %v22160_v25 = vld [vmem:[#allocation2 + $0x22] sm:$0xff] }
 0x128   : > { %19398 = vmatmul.mubr.msk.f32.vlgmr.msra.gmra.mxu0 %vm636_vm1, %v21781_v24  ;;  %v1511_v34 = vpop.f32.mrf.mxu0  ;;  %19446 = vmatpush3.msk.msra.mxu1 %vm733_vm0, %v21722_v44 }
 0x129   : > { %19350 = vmatprep.mubr.msk.f32.mxu1 %vm636_vm1, %v22137_v23  ;;  %5436 = vst.msk [vmem:[#allocation3 + $0x6a] sm:$0xff] %vm636_vm1, %v1723_v62  ;;  %v1722_v24 = vmax.f32 %v1690_v56, 0.0  ;;  %v1693_v46 = vadd.f32 %v22078_v9, %v1654_v49  ;;  %v1653_v16 = vmul.f32 %v22070_v43, %v1511_v34  ;;  %19400 = vmatprep.mubr.msk.f32.mxu0 %vm636_vm1, %v21799_v38  ;;  %v22182_v34 = vld [vmem:[#allocation2 + $0x3a] sm:$0xff] }
 0x12a   : > { %19496 = vmatpush3.msk.msra.mxu0 %vm733_vm0, %v21729_v45  ;;  %v19211_v53 = vpop.f32.mrf.mxu0  ;;  %19545 = vmatprep.subr.msk.mxu1 %vm733_vm0, %v22142_v19  ;;  %v22173_v45 = vld [vmem:[#allocation2 + $0x32] sm:$0xff] }
 0x12b   : > { %19595 = vmatprep.subr.msk.mxu0 %vm733_vm0, %v22147_v28  ;;  %5435 = vst.msk [vmem:[#allocation3 + $0x62] sm:$0xff] %vm636_vm1, %v1722_v24  ;;  %v1725_v44 = vmax.f32 %v1693_v46, 0.0  ;;  %v1692_v49 = vadd.f32 %v22078_v9, %v1653_v16  ;;  %v1656_v56 = vmul.f32 %v19211_v53, %v22070_v43  ;;  %19351 = vmatmul.mubr.msk.f32.gmra.mxu1 %vm636_vm1, %v22160_v25 }
 0x12c   : > { %19401 = vmatmul.mubr.msk.f32.gmra.mxu0 %vm636_vm1, %v21801_v39  ;;  %v1521_v38 = vpop.f32.mrf.mxu0  ;;  %19353 = vmatprep.mubr.msk.f32.mxu1 %vm636_vm1, %v22173_v45 }
 0x12d   : > { %19403 = vmatprep.mubr.msk.f32.mxu0 %vm636_vm1, %v21819_v59  ;;  %5438 = vst.msk [vmem:[#allocation3 + $0x82] sm:$0xff] %vm636_vm1, %v1725_v44  ;;  %v1724_v17 = vmax.f32 %v1692_v49, 0.0  ;;  %v1695_v2 = vadd.f32 %v22078_v9, %v1656_v56  ;;  %v1655_v48 = vmul.f32 %v22070_v43, %v1521_v38  ;;  %v22191_v59 = vld [vmem:[#allocation2 + $0x4a] sm:$0xff]  ;;  %v22200_v38 = vld [vmem:[#allocation2 + $0x52] sm:$0xff] }
 0x12e   : > { %v19214_v62 = vpop.f32.mrf.mxu0 }
 0x12f   : > { %5437 = vst.msk [vmem:[#allocation3 + $0x7a] sm:$0xff] %vm636_vm1, %v1724_v17  ;;  %v1727_v39 = vmax.f32 %v1695_v2, 0.0  ;;  %v1694_v24 = vadd.f32 %v22078_v9, %v1655_v48  ;;  %v1658_v46 = vmul.f32 %v19214_v62, %v22070_v43  ;;  %19354 = vmatmul.mubr.msk.f32.gmra.mxu1 %vm636_vm1, %v22182_v34 }
 0x130   : > { %19404 = vmatmul.mubr.msk.f32.gmra.mxu0 %vm636_vm1, %v21821_v60  ;;  %v1531_v16 = vpop.f32.mrf.mxu0  ;;  %19356 = vmatprep.mubr.msk.f32.mxu1 %vm636_vm1, %v22191_v59 }
 0x131   : > { %19406 = vmatprep.mubr.msk.f32.mxu0 %vm636_vm1, %v21841_v13  ;;  %5440 = vst.msk [vmem:[#allocation3 + $0x9a] sm:$0xff] %vm636_vm1, %v1727_v39  ;;  %v1726_v53 = vmax.f32 %v1694_v24, 0.0  ;;  %v1697_v44 = vadd.f32 %v22078_v9, %v1658_v46  ;;  %v1657_v49 = vmul.f32 %v22070_v43, %v1531_v16  ;;  %v22209_v13 = vld [vmem:[#allocation2 + $0x62] sm:$0xff]  ;;  %v22218_v16 = vld [vmem:[#allocation2 + $0x6a] sm:$0xff] }
 0x132   : > { %v19217_v56 = vpop.f32.mrf.mxu0 }
 0x133   : > { %5439 = vst.msk [vmem:[#allocation3 + $0x92] sm:$0xff] %vm636_vm1, %v1726_v53  ;;  %v1729_v60 = vmax.f32 %v1697_v44, 0.0  ;;  %v1696_v17 = vadd.f32 %v22078_v9, %v1657_v49  ;;  %v1660_v2 = vmul.f32 %v19217_v56, %v22070_v43  ;;  %19357 = vmatmul.mubr.msk.f32.gmra.mxu1 %vm636_vm1, %v22200_v38 }
 0x134   : > { %19407 = vmatmul.mubr.msk.f32.gmra.mxu0 %vm636_vm1, %v21843_v14  ;;  %v1541_v48 = vpop.f32.mrf.mxu0  ;;  %19359 = vmatprep.mubr.msk.f32.mxu1 %vm636_vm1, %v22209_v13 }
 0x135   : > { %19409 = vmatprep.mubr.msk.f32.mxu0 %vm636_vm1, %v21867_v32  ;;  %5442 = vst.msk [vmem:[#allocation3 + $0xb2] sm:$0xff] %vm636_vm1, %v1729_v60  ;;  %v1728_v62 = vmax.f32 %v1696_v17, 0.0  ;;  %v1699_v39 = vadd.f32 %v22078_v9, %v1660_v2  ;;  %v1659_v24 = vmul.f32 %v22070_v43, %v1541_v48  ;;  %v22227_v32 = vld [vmem:[#allocation2 + $0x7a] sm:$0xff]  ;;  %v22236_v48 = vld [vmem:[#allocation2 + $0x82] sm:$0xff] }
 0x136   : > { %v19220_v46 = vpop.f32.mrf.mxu0 }
 0x137   : > { %5441 = vst.msk [vmem:[#allocation3 + $0xaa] sm:$0xff] %vm636_vm1, %v1728_v62  ;;  %v1731_v14 = vmax.f32 %v1699_v39, 0.0  ;;  %v1698_v53 = vadd.f32 %v22078_v9, %v1659_v24  ;;  %v1662_v44 = vmul.f32 %v19220_v46, %v22070_v43  ;;  %19360 = vmatmul.mubr.msk.f32.gmra.mxu1 %vm636_vm1, %v22218_v16 }
 0x138   : > { %19410 = vmatmul.mubr.msk.f32.gmra.mxu0 %vm636_vm1, %v21869_v33  ;;  %v1551_v49 = vpop.f32.mrf.mxu0  ;;  %19362 = vmatprep.mubr.msk.f32.mxu1 %vm636_vm1, %v22227_v32 }
 0x139   : > { %19412 = vmatprep.mubr.msk.f32.mxu0 %vm636_vm1, %v21893_v58  ;;  %5444 = vst.msk [vmem:[#allocation3 + $0xca] sm:$0xff] %vm636_vm1, %v1731_v14  ;;  %v1730_v56 = vmax.f32 %v1698_v53, 0.0  ;;  %v1701_v60 = vadd.f32 %v22078_v9, %v1662_v44  ;;  %v1661_v17 = vmul.f32 %v22070_v43, %v1551_v49  ;;  %v22245_v58 = vld [vmem:[#allocation2 + $0x92] sm:$0xff]  ;;  %v22254_v49 = vld [vmem:[#allocation2 + $0x9a] sm:$0xff] }
 0x13a   : > { %v19223_v2 = vpop.f32.mrf.mxu0 }
 0x13b   : > { %5443 = vst.msk [vmem:[#allocation3 + $0xc2] sm:$0xff] %vm636_vm1, %v1730_v56  ;;  %v1733_v33 = vmax.f32 %v1701_v60, 0.0  ;;  %v1700_v62 = vadd.f32 %v22078_v9, %v1661_v17  ;;  %v1664_v39 = vmul.f32 %v19223_v2, %v22070_v43  ;;  %19363 = vmatmul.mubr.msk.f32.gmra.mxu1 %vm636_vm1, %v22236_v48 }
 0x13c   : > { %19413 = vmatmul.mubr.msk.f32.gmra.mxu0 %vm636_vm1, %v21895_v63  ;;  %v1561_v24 = vpop.f32.mrf.mxu0  ;;  %19365 = vmatprep.mubr.msk.f32.mxu1 %vm636_vm1, %v22245_v58 }
 0x13d   : > { %19415 = vmatprep.mubr.msk.f32.mxu0 %vm636_vm1, %v21919_v26  ;;  %5446 = vst.msk [vmem:[#allocation3 + $0xe2] sm:$0xff] %vm636_vm1, %v1733_v33  ;;  %v1732_v46 = vmax.f32 %v1700_v62, 0.0  ;;  %v1703_v14 = vadd.f32 %v22078_v9, %v1664_v39  ;;  %v1663_v53 = vmul.f32 %v22070_v43, %v1561_v24  ;;  %v22263_v26 = vld [vmem:[#allocation2 + $0xaa] sm:$0xff]  ;;  %v22272_v24 = vld [vmem:[#allocation2 + $0xb2] sm:$0xff] }
 0x13e   : > { %v19226_v44 = vpop.f32.mrf.mxu0 }
 0x13f   : > { %5445 = vst.msk [vmem:[#allocation3 + $0xda] sm:$0xff] %vm636_vm1, %v1732_v46  ;;  %v1735_v63 = vmax.f32 %v1703_v14, 0.0  ;;  %v1702_v56 = vadd.f32 %v22078_v9, %v1663_v53  ;;  %v1666_v60 = vmul.f32 %v19226_v44, %v22070_v43  ;;  %19366 = vmatmul.mubr.msk.f32.gmra.mxu1 %vm636_vm1, %v22254_v49 }
 0x140   : > { %19416 = vmatmul.mubr.msk.f32.gmra.mxu0 %vm636_vm1, %v21921_v27  ;;  %v1571_v17 = vpop.f32.mrf.mxu0  ;;  %19368 = vmatprep.mubr.msk.f32.mxu1 %vm636_vm1, %v22263_v26 }
 0x141   : > { %19418 = vmatprep.mubr.msk.f32.mxu0 %vm636_vm1, %v21945_v4  ;;  %5448 = vst.msk [vmem:[#allocation3 + $0xfa] sm:$0xff] %vm636_vm1, %v1735_v63  ;;  %v1734_v2 = vmax.f32 %v1702_v56, 0.0  ;;  %v1705_v33 = vadd.f32 %v22078_v9, %v1666_v60  ;;  %v1665_v62 = vmul.f32 %v22070_v43, %v1571_v17  ;;  %v22281_v4 = vld [vmem:[#allocation2 + $0xc2] sm:$0xff]  ;;  %v22290_v17 = vld [vmem:[#allocation2 + $0xca] sm:$0xff] }
 0x142   : > { %v19229_v39 = vpop.f32.mrf.mxu0 }
 0x143   : > { %5447 = vst.msk [vmem:[#allocation3 + $0xf2] sm:$0xff] %vm636_vm1, %v1734_v2  ;;  %v1737_v27 = vmax.f32 %v1705_v33, 0.0  ;;  %v1704_v46 = vadd.f32 %v22078_v9, %v1665_v62  ;;  %v1668_v14 = vmul.f32 %v19229_v39, %v22070_v43  ;;  %19369 = vmatmul.mubr.msk.f32.gmra.mxu1 %vm636_vm1, %v22272_v24 }
 0x144   : > { %19419 = vmatmul.mubr.msk.f32.gmra.mxu0 %vm636_vm1, %v21947_v8  ;;  %v1581_v53 = vpop.f32.mrf.mxu0  ;;  %19371 = vmatprep.mubr.msk.f32.mxu1 %vm636_vm1, %v22281_v4 }
 0x145   : > { %19421 = vmatprep.mubr.msk.f32.mxu0 %vm636_vm1, %v21971_v37  ;;  %5450 = vst.msk [vmem:[#allocation3 + $0x112] sm:$0xff] %vm636_vm1, %v1737_v27  ;;  %v1736_v44 = vmax.f32 %v1704_v46, 0.0  ;;  %v1707_v63 = vadd.f32 %v22078_v9, %v1668_v14  ;;  %v1667_v56 = vmul.f32 %v22070_v43, %v1581_v53  ;;  %v22299_v37 = vld [vmem:[#allocation2 + $0xda] sm:$0xff]  ;;  %v22308_v53 = vld [vmem:[#allocation2 + $0xe2] sm:$0xff] }
 0x146   : > { %v19232_v60 = vpop.f32.mrf.mxu0 }
 0x147   : > { %5449 = vst.msk [vmem:[#allocation3 + $0x10a] sm:$0xff] %vm636_vm1, %v1736_v44  ;;  %v1739_v8 = vmax.f32 %v1707_v63, 0.0  ;;  %v1706_v2 = vadd.f32 %v22078_v9, %v1667_v56  ;;  %v1670_v33 = vmul.f32 %v19232_v60, %v22070_v43  ;;  %19372 = vmatmul.mubr.msk.f32.gmra.mxu1 %vm636_vm1, %v22290_v17 }
 0x148   : > { %19422 = vmatmul.mubr.msk.f32.gmra.mxu0 %vm636_vm1, %v21973_v50  ;;  %v1591_v62 = vpop.f32.mrf.mxu0  ;;  %19374 = vmatprep.mubr.msk.f32.mxu1 %vm636_vm1, %v22299_v37 }
 0x149   : > { %19424 = vmatprep.mubr.msk.f32.mxu0 %vm636_vm1, %v21997_v5  ;;  %5452 = vst.msk [vmem:[#allocation3 + $0x12a] sm:$0xff] %vm636_vm1, %v1739_v8  ;;  %v1738_v39 = vmax.f32 %v1706_v2, 0.0  ;;  %v1709_v27 = vadd.f32 %v22078_v9, %v1670_v33  ;;  %v1669_v46 = vmul.f32 %v22070_v43, %v1591_v62  ;;  %v22317_v5 = vld [vmem:[#allocation2 + $0xf2] sm:$0xff]  ;;  %v22326_v62 = vld [vmem:[#allocation2 + $0xfa] sm:$0xff] }
 0x14a   : > { %v19235_v14 = vpop.f32.mrf.mxu0 }
 0x14b   : > { %5451 = vst.msk [vmem:[#allocation3 + $0x122] sm:$0xff] %vm636_vm1, %v1738_v39  ;;  %v1741_v50 = vmax.f32 %v1709_v27, 0.0  ;;  %v1708_v44 = vadd.f32 %v22078_v9, %v1669_v46  ;;  %v1672_v63 = vmul.f32 %v19235_v14, %v22070_v43  ;;  %19375 = vmatmul.mubr.msk.f32.gmra.mxu1 %vm636_vm1, %v22308_v53 }
 0x14c   : > { %19425 = vmatmul.mubr.msk.f32.gmra.mxu0 %vm636_vm1, %v21999_v51  ;;  %v1601_v56 = vpop.f32.mrf.mxu0  ;;  %19377 = vmatprep.mubr.msk.f32.mxu1 %vm636_vm1, %v22317_v5 }
 0x14d   : > { %19427 = vmatprep.mubr.msk.f32.mxu0 %vm636_vm1, %v22023_v61  ;;  %5454 = vst.msk [vmem:[#allocation3 + $0x142] sm:$0xff] %vm636_vm1, %v1741_v50  ;;  %v1740_v60 = vmax.f32 %v1708_v44, 0.0  ;;  %v1711_v8 = vadd.f32 %v22078_v9, %v1672_v63  ;;  %v1671_v2 = vmul.f32 %v22070_v43, %v1601_v56  ;;  %v22335_v61 = vld [vmem:[#allocation2 + $0x10a] sm:$0xff]  ;;  %v22344_v56 = vld [vmem:[#allocation2 + $0x112] sm:$0xff] }
 0x14e   : > { %v19238_v33 = vpop.f32.mrf.mxu0 }
 0x14f   : > { %5453 = vst.msk [vmem:[#allocation3 + $0x13a] sm:$0xff] %vm636_vm1, %v1740_v60  ;;  %v1743_v51 = vmax.f32 %v1711_v8, 0.0  ;;  %v1710_v39 = vadd.f32 %v22078_v9, %v1671_v2  ;;  %v1674_v27 = vmul.f32 %v19238_v33, %v22070_v43  ;;  %19378 = vmatmul.mubr.msk.f32.gmra.mxu1 %vm636_vm1, %v22326_v62 }
 0x150   : > { %19428 = vmatmul.mubr.msk.f32.gmra.mxu0 %vm636_vm1, %v22025_v52  ;;  %v1611_v46 = vpop.f32.mrf.mxu0  ;;  %19380 = vmatprep.mubr.msk.f32.mxu1 %vm636_vm1, %v22335_v61 }
 0x151   : > { %19430 = vmatprep.mubr.msk.f32.mxu0 %vm636_vm1, %v22049_v31  ;;  %5456 = vst.msk [vmem:[#allocation3 + $0x15a] sm:$0xff] %vm636_vm1, %v1743_v51  ;;  %v1742_v14 = vmax.f32 %v1710_v39, 0.0  ;;  %v1713_v50 = vadd.f32 %v22078_v9, %v1674_v27  ;;  %v1673_v44 = vmul.f32 %v22070_v43, %v1611_v46  ;;  %v22353_v31 = vld [vmem:[#allocation2 + $0x122] sm:$0xff]  ;;  %v22362_v46 = vld [vmem:[#allocation2 + $0x12a] sm:$0xff] }
 0x152   : > { %v19241_v63 = vpop.f32.mrf.mxu0 }
 0x153   : > { %5455 = vst.msk [vmem:[#allocation3 + $0x152] sm:$0xff] %vm636_vm1, %v1742_v14  ;;  %v1745_v52 = vmax.f32 %v1713_v50, 0.0  ;;  %v1712_v60 = vadd.f32 %v22078_v9, %v1673_v44  ;;  %v1676_v8 = vmul.f32 %v19241_v63, %v22070_v43  ;;  %19381 = vmatmul.mubr.msk.f32.gmra.mxu1 %vm636_vm1, %v22344_v56 }
 0x154   : > { %19431 = vmatmul.mubr.msk.f32.gmra.mxu0 %vm636_vm1, %v22051_v10  ;;  %v1621_v2 = vpop.f32.mrf.mxu0  ;;  %19383 = vmatprep.mubr.msk.f32.mxu1 %vm636_vm1, %v22353_v31 }
 0x155   : > { %19433 = vmatprep.mubr.msk.f32.mxu0 %vm636_vm1, %v22080_v15  ;;  %5458 = vst.msk [vmem:[#allocation3 + $0x172] sm:$0xff] %vm636_vm1, %v1745_v52  ;;  %v1744_v33 = vmax.f32 %v1712_v60, 0.0  ;;  %v1715_v51 = vadd.f32 %v22078_v9, %v1676_v8  ;;  %v1675_v39 = vmul.f32 %v22070_v43, %v1621_v2  ;;  %v22371_v15 = vld [vmem:[#allocation2 + $0x13a] sm:$0xff]  ;;  %v19249_v8 = vpop.f32.mrf.mxu1 }
 0x156   : > { %v19244_v27 = vpop.f32.mrf.mxu0 }
 0x157   : > { %5457 = vst.msk [vmem:[#allocation3 + $0x16a] sm:$0xff] %vm636_vm1, %v1744_v33  ;;  %v1747_v10 = vmax.f32 %v1715_v51, 0.0  ;;  %v1714_v14 = vadd.f32 %v22078_v9, %v1675_v39  ;;  %v1678_v50 = vmul.f32 %v19244_v27, %v22070_v43  ;;  %19384 = vmatmul.mubr.msk.f32.gmra.mxu1 %vm636_vm1, %v22362_v46  ;;  %v22380_v33 = vld [vmem:[#allocation2 + $0x142] sm:$0xff]  ;;  %v22399_v27 = vld [vmem:[#allocation2 + $0x15a] sm:$0xff] }
 0x158   : > { %19434 = vmatmul.mubr.msk.f32.gmra.mxu0 %vm636_vm1, %v22082_v47  ;;  %v1631_v44 = vpop.f32.mrf.mxu0  ;;  %19386 = vmatprep.mubr.msk.f32.mxu1 %vm636_vm1, %v22371_v15 }
 0x159   : > { %19436 = vmatprep.mubr.msk.f32.mxu0 %vm636_vm1, %v22096_v12  ;;  %5460 = vst.msk [vmem:[#allocation3 + $0x18a] sm:$0xff] %vm636_vm1, %v1747_v10  ;;  %v1746_v63 = vmax.f32 %v1714_v14, 0.0  ;;  %v1717_v52 = vadd.f32 %v22078_v9, %v1678_v50  ;;  %v1677_v60 = vmul.f32 %v22070_v43, %v1631_v44  ;;  %v22390_v12 = vld [vmem:[#allocation2 + $0x152] sm:$0xff]  ;;  %v27180_v14 = vmov 0.0   ;;  %v21009_v50 = vld [vmem:[#allocation2 + $0x21] sm:$0xff] }
 0x15a   : > { %v19299_v2 = vpop.f32.mrf.mxu0  ;;  %v22414_v10 = vld [vmem:[#allocation2 + $0x172] sm:$0xff]  ;;  %5379 = vst.msk [vmem:[#allocation3 + $0x10] sm:$0xf] %vm5378_vm4, %v27180_v14  ;;  %5382 = vst.msk [vmem:[#allocation3 + $0x28] sm:$0xf] %vm5378_vm4, %v27180_v14 }
 0x15b   : > { %5459 = vst.msk [vmem:[#allocation3 + $0x182] sm:$0xff] %vm636_vm1, %v1746_v63  ;;  %v1749_v47 = vmax.f32 %v1717_v52, 0.0  ;;  %v1716_v51 = vadd.f32 %v22078_v9, %v1677_v60  ;;  %v22384_v39 = vadd.f32 %v19299_v2, %v19249_v8  ;;  %19387 = vmatmul.mubr.msk.f32.gmra.mxu1 %vm636_vm1, %v22380_v33  ;;  %v22397_v9 = vld [vmem:[#allocation2 + $0x180] sm:$0xff] }
 0x15c   : > { %19437 = vmatmul.mubr.msk.f32.gmra.mxu0 %vm636_vm1, %v22098_v54  ;;  %19389 = vmatprep.mubr.msk.f32.mxu1 %vm636_vm1, %v22390_v12  ;;  %v22406_v54 = vld [vmem:[#allocation2 + $0x16a] sm:$0xff]  ;;  %5386 = vst.msk [vmem:[#allocation3 + $0x1c0] sm:$0xf] %vm5378_vm4, %v27180_v14  ;;  %5389 = vst.msk [vmem:[#allocation3 + $0x1d8] sm:$0xf] %vm5378_vm4, %v27180_v14  ;;  %v4106_v60 = vld [vmem:[#allocation2 + $0x80] sm:$0xff] }
 0x15d   : > { %19439 = vmatprep.mubr.msk.f32.mxu0 %vm636_vm1, %v22112_v0  ;;  %5462 = vst.msk [vmem:[#allocation3 + $0x1a2] sm:$0xff] %vm636_vm1, %v1749_v47  ;;  %v1748_v43 = vmax.f32 %v1716_v51, 0.0  ;;  %v22412_v0 = vld [vmem:[#allocation2 + $0x188] sm:$0xff]  ;;  %v22441_v44 = vld [vmem:[%s27026_s7 + $0x20] sm:$0xf]  ;;  %v4107_v47 = vld [vmem:[#allocation2 + $0x90] sm:$0xff] }
 0x15e   : > { %5410 = vst.msk [vmem:[#allocation3 + $0x12] sm:$0x3] %vm1752_vm3, %v27180_v14  ;;  %5411 = vst.msk [vmem:[#allocation3 + $0x2a] sm:$0x3] %vm1752_vm3, %v27180_v14  ;;  %v22446_v63 = vld [vmem:[%s27032_s13 + $0x4] sm:$0xf] }
 0x15f   : > { %5461 = vst.msk [vmem:[#allocation3 + $0x19a] sm:$0xff] %vm636_vm1, %v1748_v43  ;;  %19390 = vmatmul.mubr.msk.f32.gmra.mxu1 %vm636_vm1, %v22399_v27  ;;  %v4495_v8 = vld [vmem:[#allocation2 + $0x81] sm:$0xff]  ;;  %v4496_v51 = vld [vmem:[#allocation2 + $0x91] sm:$0xff] }
 0x160   : > { %19440 = vmatmul.mubr.msk.f32.gmra.mxu0 %vm636_vm1, %v22114_v40  ;;  %19392 = vmatprep.mubr.msk.f32.mxu1 %vm636_vm1, %v22406_v54  ;;  %5428 = vst.msk [vmem:[#allocation3 + $0x1c2] sm:$0x3] %vm1752_vm3, %v27180_v14  ;;  %5429 = vst.msk [vmem:[#allocation3 + $0x1da] sm:$0x3] %vm1752_vm3, %v27180_v14  ;;  %v21008_v40 = vld [vmem:[#allocation2 + $0x19] sm:$0xff] }
 0x161   : > { %19442 = vmatprep.mubr.msk.f32.mxu0 %vm636_vm1, %v22397_v9  ;;  %v4497_v14 = vld [vmem:[#allocation2 + $0x99] sm:$0xff] }
 0x163   : > { %19393 = vmatmul.mubr.msk.f32.gmra.mxu1 %vm636_vm1, %v22414_v10 }
 0x164   : > { %19443 = vmatmul.mubr.msk.f32.gmra.mxu0 %vm636_vm1, %v22412_v0  ;;  %19447 = vmatprep.mubr.msk.f32.mxu1 %vm636_vm1, %v21008_v40 }
 0x165   : > { %19497 = vmatprep.mubr.msk.f32.mxu0 %vm636_vm1, %v22137_v23  ;;  %v21010_v23 = vld [vmem:[#allocation2 + $0x31] sm:$0xff] }
 0x167   : > { %19448 = vmatmul.mubr.msk.f32.vlgmr.msra.gmra.mxu1 %vm636_vm1, %v21009_v50 }
 0x168   : > { %19498 = vmatmul.mubr.msk.f32.vlgmr.msra.gmra.mxu0 %vm636_vm1, %v22160_v25  ;;  %19546 = vmatpush3.msk.msra.mxu1 %vm733_vm0, %v22142_v19  ;;  %v21011_v25 = vld [vmem:[#allocation2 + $0x39] sm:$0xff]  ;;  %v21012_v19 = vld [vmem:[#allocation2 + $0x49] sm:$0xff] }
 0x169   : > { %19450 = vmatprep.mubr.msk.f32.mxu1 %vm636_vm1, %v21010_v23  ;;  %19500 = vmatprep.mubr.msk.f32.mxu0 %vm636_vm1, %v22173_v45  ;;  %v21013_v45 = vld [vmem:[#allocation2 + $0x51] sm:$0xff] }
 0x16a   : > { %19596 = vmatpush3.msk.msra.mxu0 %vm733_vm0, %v22147_v28  ;;  %19645 = vmatprep.subr.msk.mxu1 %vm733_vm0, %v22441_v44  ;;  %v22606_v28 = vld [vmem:[%s27032_s13 + $0x8] sm:$0xf] }
 0x16b   : > { %19695 = vmatprep.subr.msk.mxu0 %vm733_vm0, %v22446_v63  ;;  %19451 = vmatmul.mubr.msk.f32.gmra.mxu1 %vm636_vm1, %v21011_v25 }
 0x16c   : > { %19501 = vmatmul.mubr.msk.f32.gmra.mxu0 %vm636_vm1, %v22182_v34  ;;  %19453 = vmatprep.mubr.msk.f32.mxu1 %vm636_vm1, %v21012_v19  ;;  %v4490_v34 = vld [vmem:[#allocation2 + $0x49] sm:$0xff] }
 0x16d   : > { %19503 = vmatprep.mubr.msk.f32.mxu0 %vm636_vm1, %v22191_v59  ;;  %v22611_v59 = vpop.f32.mrf.mxu1 }
 0x16f   : > { %19454 = vmatmul.mubr.msk.f32.gmra.mxu1 %vm636_vm1, %v21013_v45 }
 0x170   : > { %19504 = vmatmul.mubr.msk.f32.gmra.mxu0 %vm636_vm1, %v22200_v38  ;;  %19456 = vmatprep.mubr.msk.f32.mxu1 %vm636_vm1, %v21839_v11  ;;  %v22536_v11 = vld [vmem:[#allocation2 + $0x129] sm:$0xff]  ;;  %v22613_v38 = vpop.f32.mrf.mxu0 }
 0x171   : > { %19506 = vmatprep.mubr.msk.f32.mxu0 %vm636_vm1, %v22209_v13  ;;  %v4102_v13 = vld [vmem:[#allocation2 + $0x50] sm:$0xff] }
 0x173   : > { %19457 = vmatmul.mubr.msk.f32.gmra.mxu1 %vm636_vm1, %v21854_v20  ;;  %v22548_v20 = vld [vmem:[#allocation2 + $0x141] sm:$0xff] }
 0x174   : > { %19507 = vmatmul.mubr.msk.f32.gmra.mxu0 %vm636_vm1, %v22218_v16  ;;  %19459 = vmatprep.mubr.msk.f32.mxu1 %vm636_vm1, %v21865_v30  ;;  %v22560_v30 = vld [vmem:[#allocation2 + $0x159] sm:$0xff]  ;;  %v4491_v16 = vld [vmem:[#allocation2 + $0x51] sm:$0xff] }
 0x175   : > { %19509 = vmatprep.mubr.msk.f32.mxu0 %vm636_vm1, %v22227_v32 }
 0x177   : > { %19460 = vmatmul.mubr.msk.f32.gmra.mxu1 %vm636_vm1, %v21880_v42  ;;  %v22566_v42 = vld [vmem:[#allocation2 + $0x169] sm:$0xff] }
 0x178   : > { %19510 = vmatmul.mubr.msk.f32.gmra.mxu0 %vm636_vm1, %v22236_v48  ;;  %19462 = vmatprep.mubr.msk.f32.mxu1 %vm636_vm1, %v21891_v57  ;;  %v22572_v57 = vld [vmem:[#allocation2 + $0x171] sm:$0xff] }
 0x179   : > { %19512 = vmatprep.mubr.msk.f32.mxu0 %vm636_vm1, %v22245_v58  ;;  %v4103_v58 = vld [vmem:[#allocation2 + $0x60] sm:$0xff] }
 0x17b   : > { %19463 = vmatmul.mubr.msk.f32.gmra.mxu1 %vm636_vm1, %v21906_v6  ;;  %v22578_v6 = vld [vmem:[#allocation2 + $0x181] sm:$0xff] }
 0x17c   : > { %19513 = vmatmul.mubr.msk.f32.gmra.mxu0 %vm636_vm1, %v22254_v49  ;;  %19465 = vmatprep.mubr.msk.f32.mxu1 %vm636_vm1, %v21917_v21  ;;  %v22580_v21 = vld [vmem:[#allocation2 + $0x182] sm:$0xff] }
 0x17d   : > { %19515 = vmatprep.mubr.msk.f32.mxu0 %vm636_vm1, %v22263_v26  ;;  %v4492_v49 = vld [vmem:[#allocation2 + $0x61] sm:$0xff] }
 0x17f   : > { %19466 = vmatmul.mubr.msk.f32.gmra.mxu1 %vm636_vm1, %v21932_v41  ;;  %v22586_v41 = vld [vmem:[#allocation2 + $0x189] sm:$0xff] }
 0x180   : > { %19516 = vmatmul.mubr.msk.f32.gmra.mxu0 %vm636_vm1, %v22272_v24  ;;  %19468 = vmatprep.mubr.msk.f32.mxu1 %vm636_vm1, %v21943_v3  ;;  %v22588_v3 = vld [vmem:[#allocation2 + $0x18a] sm:$0xff] }
 0x181   : > { %19518 = vmatprep.mubr.msk.f32.mxu0 %vm636_vm1, %v22281_v4 }
 0x183   : > { %19469 = vmatmul.mubr.msk.f32.gmra.mxu1 %vm636_vm1, %v21958_v29  ;;  %v4099_v29 = vld [vmem:[#allocation2 + $0x30] sm:$0xff] }
 0x184   : > { %19519 = vmatmul.mubr.msk.f32.gmra.mxu0 %vm636_vm1, %v22290_v17  ;;  %19471 = vmatprep.mubr.msk.f32.mxu1 %vm636_vm1, %v21969_v1  ;;  %v4488_v1 = vld [vmem:[#allocation2 + $0x31] sm:$0xff] }
 0x185   : > { %19521 = vmatprep.mubr.msk.f32.mxu0 %vm636_vm1, %v22299_v37  ;;  %v4104_v37 = vld [vmem:[#allocation2 + $0x68] sm:$0xff] }
 0x187   : > { %19472 = vmatmul.mubr.msk.f32.gmra.mxu1 %vm636_vm1, %v21984_v18  ;;  %v4100_v18 = vld [vmem:[#allocation2 + $0x38] sm:$0xff] }
 0x188   : > { %19522 = vmatmul.mubr.msk.f32.gmra.mxu0 %vm636_vm1, %v22308_v53  ;;  %19474 = vmatprep.mubr.msk.f32.mxu1 %vm636_vm1, %v21995_v22  ;;  %v22554_v22 = vld [vmem:[#allocation2 + $0x151] sm:$0xff]  ;;  %v4493_v53 = vld [vmem:[#allocation2 + $0x69] sm:$0xff] }
 0x189   : > { %19524 = vmatprep.mubr.msk.f32.mxu0 %vm636_vm1, %v22317_v5 }
 0x18b   : > { %19475 = vmatmul.mubr.msk.f32.gmra.mxu1 %vm636_vm1, %v22010_v36  ;;  %v4489_v36 = vld [vmem:[#allocation2 + $0x39] sm:$0xff] }
 0x18c   : > { %19525 = vmatmul.mubr.msk.f32.gmra.mxu0 %vm636_vm1, %v22326_v62  ;;  %19477 = vmatprep.mubr.msk.f32.mxu1 %vm636_vm1, %v22021_v7  ;;  %v22542_v7 = vld [vmem:[#allocation2 + $0x139] sm:$0xff] }
 0x18d   : > { %19527 = vmatprep.mubr.msk.f32.mxu0 %vm636_vm1, %v22335_v61  ;;  %v4105_v61 = vld [vmem:[#allocation2 + $0x78] sm:$0xff] }
 0x18f   : > { %19478 = vmatmul.mubr.msk.f32.gmra.mxu1 %vm636_vm1, %v22036_v35  ;;  %v4101_v35 = vld [vmem:[#allocation2 + $0x48] sm:$0xff] }
 0x190   : > { %19528 = vmatmul.mubr.msk.f32.gmra.mxu0 %vm636_vm1, %v22344_v56  ;;  %19480 = vmatprep.mubr.msk.f32.mxu1 %vm636_vm1, %v22047_v55  ;;  %v22601_v55 = vld [vmem:[%s27032_s13] sm:$0xf] }
 0x191   : > { %19530 = vmatprep.mubr.msk.f32.mxu0 %vm636_vm1, %v22353_v31  ;;  %v4494_v56 = vld [vmem:[#allocation2 + $0x79] sm:$0xff] }
 0x193   : > { %19481 = vmatmul.mubr.msk.f32.gmra.mxu1 %vm636_vm1, %v22536_v11 }
 0x194   : > { %19531 = vmatmul.mubr.msk.f32.gmra.mxu0 %vm636_vm1, %v22362_v46  ;;  %19483 = vmatprep.mubr.msk.f32.mxu1 %vm636_vm1, %v22542_v7 }
 0x195   : > { %19533 = vmatprep.mubr.msk.f32.mxu0 %vm636_vm1, %v22371_v15 }
 0x197   : > { %19484 = vmatmul.mubr.msk.f32.gmra.mxu1 %vm636_vm1, %v22548_v20 }
 0x198   : > { %19534 = vmatmul.mubr.msk.f32.gmra.mxu0 %vm636_vm1, %v22380_v33  ;;  %19486 = vmatprep.mubr.msk.f32.mxu1 %vm636_vm1, %v22554_v22 }
 0x199   : > { %19536 = vmatprep.mubr.msk.f32.mxu0 %vm636_vm1, %v22390_v12 }
 0x19b   : > { %19487 = vmatmul.mubr.msk.f32.gmra.mxu1 %vm636_vm1, %v22560_v30 }
 0x19c   : > { %19537 = vmatmul.mubr.msk.f32.gmra.mxu0 %vm636_vm1, %v22399_v27  ;;  %19489 = vmatprep.mubr.msk.f32.mxu1 %vm636_vm1, %v22566_v42 }
 0x19d   : > { %19539 = vmatprep.mubr.msk.f32.mxu0 %vm636_vm1, %v22406_v54 }
 0x19f   : > { %19490 = vmatmul.mubr.msk.f32.gmra.mxu1 %vm636_vm1, %v22572_v57 }
 0x1a0   : > { %19540 = vmatmul.mubr.msk.f32.gmra.mxu0 %vm636_vm1, %v22414_v10  ;;  %19492 = vmatprep.mubr.msk.f32.mxu1 %vm636_vm1, %v22578_v6  ;;  %v4108_v10 = vld [vmem:[#allocation2 + $0x98] sm:$0xff] }
 0x1a1   : > { %19542 = vmatprep.mubr.msk.f32.mxu0 %vm636_vm1, %v22580_v21 }
 0x1a3   : > { %19493 = vmatmul.mubr.msk.f32.gmra.mxu1 %vm636_vm1, %v22586_v41 }
 0x1a4   : > { %19543 = vmatmul.mubr.msk.f32.gmra.mxu0 %vm636_vm1, %v22588_v3  ;;  %19547 = vmatprep.mubr.msk.f32.mxu1 %vm636_vm1, %v4099_v29  ;;  %v4110_v29 = vld [vmem:[#allocation2 + $0xb0] sm:$0xff] }
 0x1a5   : > { %19597 = vmatprep.mubr.msk.f32.mxu0 %vm636_vm1, %v4488_v1  ;;  %v4499_v1 = vld [vmem:[#allocation2 + $0xb1] sm:$0xff] }
 0x1a7   : > { %19548 = vmatmul.mubr.msk.f32.vlgmr.msra.gmra.mxu1 %vm636_vm1, %v4100_v18 }
 0x1a8   : > { %19598 = vmatmul.mubr.msk.f32.vlgmr.msra.gmra.mxu0 %vm636_vm1, %v4489_v36  ;;  %19646 = vmatpush3.msk.msra.mxu1 %vm733_vm0, %v22441_v44  ;;  %v4109_v44 = vld [vmem:[#allocation2 + $0xa8] sm:$0xff] }
 0x1a9   : > { %19550 = vmatprep.mubr.msk.f32.mxu1 %vm636_vm1, %v4101_v35  ;;  %19600 = vmatprep.mubr.msk.f32.mxu0 %vm636_vm1, %v4490_v34  ;;  %v4111_v35 = vld [vmem:[#allocation2 + $0xc0] sm:$0xff] }
 0x1aa   : > { %19696 = vmatpush3.msk.msra.mxu0 %vm733_vm0, %v22446_v63  ;;  %19745 = vmatprep.subr.msk.mxu1 %vm733_vm0, %v22601_v55  ;;  %v4498_v63 = vld [vmem:[#allocation2 + $0xa9] sm:$0xff]  ;;  %v4500_v34 = vld [vmem:[#allocation2 + $0xc1] sm:$0xff] }
 0x1ab   : > { %19795 = vmatprep.subr.msk.mxu0 %vm733_vm0, %v22606_v28  ;;  %v19252_v32 = vpop.f32.mrf.mxu1  ;;  %19551 = vmatmul.mubr.msk.f32.gmra.mxu1 %vm636_vm1, %v4102_v13 }
 0x1ac   : > { %v19302_v48 = vpop.f32.mrf.mxu0  ;;  %19601 = vmatmul.mubr.msk.f32.gmra.mxu0 %vm636_vm1, %v4491_v16  ;;  %19553 = vmatprep.mubr.msk.f32.mxu1 %vm636_vm1, %v4103_v58  ;;  %v4112_v58 = vld [vmem:[#allocation2 + $0xc8] sm:$0xff] }
 0x1ad   : > { %v22624_v26 = vadd.f32 %v19302_v48, %v19252_v32  ;;  %19603 = vmatprep.mubr.msk.f32.mxu0 %vm636_vm1, %v4492_v49  ;;  %v2069_v24 = vpop.f32.mrf.mxu1  ;;  %v4501_v49 = vld [vmem:[#allocation2 + $0xc9] sm:$0xff] }
 0x1ae   : > { %v2393_v4 = vpop.f32.mrf.mxu0 }
 0x1af   : > { %v22628_v17 = vadd.f32 %v2393_v4, %v2069_v24  ;;  %v19255_v5 = vpop.f32.mrf.mxu1  ;;  %19554 = vmatmul.mubr.msk.f32.gmra.mxu1 %vm636_vm1, %v4104_v37  ;;  %v4113_v37 = vld [vmem:[#allocation2 + $0xd8] sm:$0xff] }
 0x1b0   : > { %v19305_v62 = vpop.f32.mrf.mxu0  ;;  %19604 = vmatmul.mubr.msk.f32.gmra.mxu0 %vm636_vm1, %v4493_v53  ;;  %19556 = vmatprep.mubr.msk.f32.mxu1 %vm636_vm1, %v4105_v61  ;;  %v4502_v53 = vld [vmem:[#allocation2 + $0xd9] sm:$0xff] }
 0x1b1   : > { %v22632_v31 = vadd.f32 %v19305_v62, %v19255_v5  ;;  %19606 = vmatprep.mubr.msk.f32.mxu0 %vm636_vm1, %v4494_v56  ;;  %v2079_v46 = vpop.f32.mrf.mxu1 }
 0x1b2   : > { %v2403_v15 = vpop.f32.mrf.mxu0 }
 0x1b3   : > { %v22636_v52 = vadd.f32 %v2403_v15, %v2079_v46  ;;  %v19258_v2 = vpop.f32.mrf.mxu1  ;;  %19557 = vmatmul.mubr.msk.f32.gmra.mxu1 %vm636_vm1, %v4106_v60  ;;  %v4114_v46 = vld [vmem:[#allocation2 + $0xe0] sm:$0xff] }
 0x1b4   : > { %v19308_v33 = vpop.f32.mrf.mxu0  ;;  %19607 = vmatmul.mubr.msk.f32.gmra.mxu0 %vm636_vm1, %v4495_v8  ;;  %19559 = vmatprep.mubr.msk.f32.mxu1 %vm636_vm1, %v4107_v47  ;;  %v4503_v15 = vld [vmem:[#allocation2 + $0xe1] sm:$0xff] }
 0x1b5   : > { %v22640_v12 = vadd.f32 %v19308_v33, %v19258_v2  ;;  %19609 = vmatprep.mubr.msk.f32.mxu0 %vm636_vm1, %v4496_v51  ;;  %v2089_v43 = vpop.f32.mrf.mxu1  ;;  %v4115_v2 = vld [vmem:[#allocation2 + $0xf0] sm:$0xff] }
 0x1b6   : > { %v2413_v27 = vpop.f32.mrf.mxu0  ;;  %v4504_v33 = vld [vmem:[#allocation2 + $0xf1] sm:$0xff] }
 0x1b7   : > { %v22644_v54 = vadd.f32 %v2413_v27, %v2089_v43  ;;  %v19261_v40 = vpop.f32.mrf.mxu1  ;;  %19560 = vmatmul.mubr.msk.f32.gmra.mxu1 %vm636_vm1, %v4108_v10  ;;  %v4116_v10 = vld [vmem:[#allocation2 + $0xf8] sm:$0xff] }
 0x1b8   : > { %v19311_v50 = vpop.f32.mrf.mxu0  ;;  %19610 = vmatmul.mubr.msk.f32.gmra.mxu0 %vm636_vm1, %v4497_v14  ;;  %19562 = vmatprep.mubr.msk.f32.mxu1 %vm636_vm1, %v4109_v44  ;;  %v4505_v14 = vld [vmem:[#allocation2 + $0xf9] sm:$0xff]  ;;  %v4117_v44 = vld [vmem:[#allocation2 + $0x108] sm:$0xff] }
 0x1b9   : > { %v22648_v23 = vadd.f32 %v19311_v50, %v19261_v40  ;;  %19612 = vmatprep.mubr.msk.f32.mxu0 %vm636_vm1, %v4498_v63  ;;  %v2099_v25 = vpop.f32.mrf.mxu1  ;;  %v4506_v63 = vld [vmem:[#allocation2 + $0x109] sm:$0xff] }
 0x1ba   : > { %v2423_v19 = vpop.f32.mrf.mxu0 }
 0x1bb   : > { %v22652_v45 = vadd.f32 %v2423_v19, %v2099_v25  ;;  %v19264_v18 = vpop.f32.mrf.mxu1  ;;  %19563 = vmatmul.mubr.msk.f32.gmra.mxu1 %vm636_vm1, %v4110_v29 }
 0x1bc   : > { %v19314_v36 = vpop.f32.mrf.mxu0  ;;  %19613 = vmatmul.mubr.msk.f32.gmra.mxu0 %vm636_vm1, %v4499_v1  ;;  %19565 = vmatprep.mubr.msk.f32.mxu1 %vm636_vm1, %v4111_v35 }
 0x1bd   : > { %v22656_v13 = vadd.f32 %v19314_v36, %v19264_v18  ;;  %19615 = vmatprep.mubr.msk.f32.mxu0 %vm636_vm1, %v4500_v34  ;;  %v2109_v16 = vpop.f32.mrf.mxu1  ;;  %v4118_v18 = vld [vmem:[#allocation2 + $0x110] sm:$0xff] }
 0x1be   : > { %v2433_v32 = vpop.f32.mrf.mxu0  ;;  %v4507_v36 = vld [vmem:[#allocation2 + $0x111] sm:$0xff] }
 0x1bf   : > { %v22660_v48 = vadd.f32 %v2433_v32, %v2109_v16  ;;  %v19267_v24 = vpop.f32.mrf.mxu1  ;;  %19566 = vmatmul.mubr.msk.f32.gmra.mxu1 %vm636_vm1, %v4112_v58  ;;  %v4119_v16 = vld [vmem:[#allocation2 + $0x120] sm:$0xff] }
 0x1c0   : > { %v19317_v4 = vpop.f32.mrf.mxu0  ;;  %19616 = vmatmul.mubr.msk.f32.gmra.mxu0 %vm636_vm1, %v4501_v49  ;;  %19568 = vmatprep.mubr.msk.f32.mxu1 %vm636_vm1, %v4113_v37  ;;  %v4508_v32 = vld [vmem:[#allocation2 + $0x121] sm:$0xff] }
 0x1c1   : > { %v22664_v5 = vadd.f32 %v19317_v4, %v19267_v24  ;;  %19618 = vmatprep.mubr.msk.f32.mxu0 %vm636_vm1, %v4502_v53  ;;  %v2119_v62 = vpop.f32.mrf.mxu1  ;;  %v4120_v37 = vld [vmem:[#allocation2 + $0x128] sm:$0xff] }
 0x1c2   : > { %v2443_v61 = vpop.f32.mrf.mxu0 }
 0x1c3   : > { %v22668_v56 = vadd.f32 %v2443_v61, %v2119_v62  ;;  %v19270_v60 = vpop.f32.mrf.mxu1  ;;  %19569 = vmatmul.mubr.msk.f32.gmra.mxu1 %vm636_vm1, %v4114_v46  ;;  %v4121_v61 = vld [vmem:[#allocation2 + $0x138] sm:$0xff] }
 0x1c4   : > { %v19320_v8 = vpop.f32.mrf.mxu0  ;;  %19619 = vmatmul.mubr.msk.f32.gmra.mxu0 %vm636_vm1, %v4503_v15  ;;  %19571 = vmatprep.mubr.msk.f32.mxu1 %vm636_vm1, %v4115_v2  ;;  %v4122_v2 = vld [vmem:[#allocation2 + $0x140] sm:$0xff] }
 0x1c5   : > { %v22672_v47 = vadd.f32 %v19320_v8, %v19270_v60  ;;  %19621 = vmatprep.mubr.msk.f32.mxu0 %vm636_vm1, %v4504_v33  ;;  %v2129_v51 = vpop.f32.mrf.mxu1 }
 0x1c6   : > { %v2453_v43 = vpop.f32.mrf.mxu0 }
 0x1c7   : > { %v22676_v27 = vadd.f32 %v2453_v43, %v2129_v51  ;;  %v19273_v40 = vpop.f32.mrf.mxu1  ;;  %19572 = vmatmul.mubr.msk.f32.gmra.mxu1 %vm636_vm1, %v4116_v10 }
 0x1c8   : > { %v19323_v50 = vpop.f32.mrf.mxu0  ;;  %19622 = vmatmul.mubr.msk.f32.gmra.mxu0 %vm636_vm1, %v4505_v14  ;;  %19574 = vmatprep.mubr.msk.f32.mxu1 %vm636_vm1, %v4117_v44 }
 0x1c9   : > { %v22680_v25 = vadd.f32 %v19323_v50, %v19273_v40  ;;  %19624 = vmatprep.mubr.msk.f32.mxu0 %vm636_vm1, %v4506_v63  ;;  %v2139_v19 = vpop.f32.mrf.mxu1  ;;  %v4124_v40 = vld [vmem:[#allocation2 + $0x158] sm:$0xff] }
 0x1ca   : > { %v2463_v29 = vpop.f32.mrf.mxu0 }
 0x1cb   : > { %v22684_v1 = vadd.f32 %v2463_v29, %v2139_v19  ;;  %v19276_v35 = vpop.f32.mrf.mxu1  ;;  %19575 = vmatmul.mubr.msk.f32.gmra.mxu1 %vm636_vm1, %v4118_v18  ;;  %v4126_v18 = vld [vmem:[#allocation2 + $0x170] sm:$0xff] }
 0x1cc   : > { %v19326_v34 = vpop.f32.mrf.mxu0  ;;  %19625 = vmatmul.mubr.msk.f32.gmra.mxu0 %vm636_vm1, %v4507_v36  ;;  %19577 = vmatprep.mubr.msk.f32.mxu1 %vm636_vm1, %v4119_v16  ;;  %v4129_v16 = vld [vmem:[#allocation2 + $0x198] sm:$0xff] }
 0x1cd   : > { %v22688_v58 = vadd.f32 %v19326_v34, %v19276_v35  ;;  %19627 = vmatprep.mubr.msk.f32.mxu0 %vm636_vm1, %v4508_v32  ;;  %v2149_v49 = vpop.f32.mrf.mxu1  ;;  %v4518_v32 = vld [vmem:[#allocation2 + $0x199] sm:$0xff] }
 0x1ce   : > { %v2473_v24 = vpop.f32.mrf.mxu0 }
 0x1cf   : > { %v22692_v4 = vadd.f32 %v2473_v24, %v2149_v49  ;;  %v19279_v53 = vpop.f32.mrf.mxu1  ;;  %19578 = vmatmul.mubr.msk.f32.gmra.mxu1 %vm636_vm1, %v4120_v37 }
 0x1d0   : > { %v19329_v62 = vpop.f32.mrf.mxu0  ;;  %19628 = vmatmul.mubr.msk.f32.gmra.mxu0 %vm636_vm1, %v22536_v11  ;;  %19580 = vmatprep.mubr.msk.f32.mxu1 %vm636_vm1, %v4121_v61  ;;  %v4123_v11 = vld [vmem:[#allocation2 + $0x150] sm:$0xff] }
 0x1d1   : > { %v22697_v46 = vadd.f32 %v19329_v62, %v19279_v53  ;;  %19630 = vmatprep.mubr.msk.f32.mxu0 %vm636_vm1, %v22542_v7  ;;  %v2159_v15 = vpop.f32.mrf.mxu1  ;;  %v5496_v61 = vld [vmem:[#allocation3 + $0x1] sm:$0xff] }
 0x1d2   : > { %v2483_v60 = vpop.f32.mrf.mxu0 }
 0x1d3   : > { %v22702_v8 = vadd.f32 %v2483_v60, %v2159_v15  ;;  %v19282_v33 = vpop.f32.mrf.mxu1  ;;  %19581 = vmatmul.mubr.msk.f32.gmra.mxu1 %vm636_vm1, %v4122_v2 }
 0x1d4   : > { %v19332_v51 = vpop.f32.mrf.mxu0  ;;  %19631 = vmatmul.mubr.msk.f32.gmra.mxu0 %vm636_vm1, %v22548_v20  ;;  %19583 = vmatprep.mubr.msk.f32.mxu1 %vm636_vm1, %v4123_v11  ;;  %v4125_v20 = vld [vmem:[#allocation2 + $0x168] sm:$0xff] }
 0x1d5   : > { %v22707_v43 = vadd.f32 %v19332_v51, %v19282_v33  ;;  %19633 = vmatprep.mubr.msk.f32.mxu0 %vm636_vm1, %v22554_v22  ;;  %v2169_v7 = vpop.f32.mrf.mxu1  ;;  %v5497_v33 = vld [vmem:[#allocation3 + $0x9] sm:$0xff] }
 0x1d6   : > { %v2493_v10 = vpop.f32.mrf.mxu0 }
 0x1d7   : > { %v22712_v14 = vadd.f32 %v2493_v10, %v2169_v7  ;;  %v19285_v50 = vpop.f32.mrf.mxu1  ;;  %19584 = vmatmul.mubr.msk.f32.gmra.mxu1 %vm636_vm1, %v4124_v40  ;;  %v4878_v10 = vld [vmem:[#allocation2 + $0x3a] sm:$0xff]  ;;  %v5498_v40 = vld [vmem:[#allocation3 + $0x19] sm:$0xff] }
 0x1d8   : > { %v19335_v44 = vpop.f32.mrf.mxu0  ;;  %19634 = vmatmul.mubr.msk.f32.gmra.mxu0 %vm636_vm1, %v22560_v30  ;;  %19586 = vmatprep.mubr.msk.f32.mxu1 %vm636_vm1, %v4125_v20  ;;  %v4879_v20 = vld [vmem:[#allocation2 + $0x4a] sm:$0xff] }
 0x1d9   : > { %v22717_v63 = vadd.f32 %v19335_v44, %v19285_v50  ;;  %19636 = vmatprep.mubr.msk.f32.mxu0 %vm636_vm1, %v22566_v42  ;;  %v2179_v22 = vpop.f32.mrf.mxu1 }
 0x1da   : > { %v2503_v19 = vpop.f32.mrf.mxu0 }
 0x1db   : > { %v22722_v29 = vadd.f32 %v2503_v19, %v2179_v22  ;;  %v19288_v36 = vpop.f32.mrf.mxu1  ;;  %19587 = vmatmul.mubr.msk.f32.gmra.mxu1 %vm636_vm1, %v4126_v18  ;;  %v22758_v22 = vld [vmem:[%s27032_s13 + $0xc] sm:$0xf]  ;;  %v22763_v19 = vld [vmem:[%s27032_s13 + $0x10] sm:$0xf]  ;;  %v2384_v18 = vadd.f32 %v22613_v38, %v22611_v59  ;;  %v4881_v59 = vld [vmem:[#allocation2 + $0x62] sm:$0xff] }
 0x1dc   : > { %v19338_v35 = vpop.f32.mrf.mxu0  ;;  %19637 = vmatmul.mubr.msk.f32.gmra.mxu0 %vm636_vm1, %v22572_v57  ;;  %19589 = vmatprep.mubr.msk.f32.mxu1 %vm636_vm1, %v22397_v9  ;;  %v4130_v9 = vld [vmem:[#allocation2 + $0x1a0] sm:$0xff] }
 0x1dd   : > { %v22727_v30 = vadd.f32 %v19338_v35, %v19288_v36  ;;  %19639 = vmatprep.mubr.msk.f32.mxu0 %vm636_vm1, %v22578_v6  ;;  %v2189_v42 = vpop.f32.mrf.mxu1  ;;  %v4519_v6 = vld [vmem:[#allocation2 + $0x1a1] sm:$0xff]  ;;  %v5499_v35 = vld [vmem:[#allocation3 + $0x21] sm:$0xff] }
 0x1de   : > { %v2513_v34 = vpop.f32.mrf.mxu0 }
 0x1df   : > { %v22733_v49 = vadd.f32 %v2513_v34, %v2189_v42  ;;  %v19291_v24 = vpop.f32.mrf.mxu1  ;;  %19590 = vmatmul.mubr.msk.f32.gmra.mxu1 %vm636_vm1, %v22412_v0  ;;  %v4877_v0 = vld [vmem:[#allocation2 + $0x32] sm:$0xff] }
 0x1e0   : > { %v19341_v37 = vpop.f32.mrf.mxu0  ;;  %19640 = vmatmul.mubr.msk.f32.gmra.mxu0 %vm636_vm1, %v22586_v41  ;;  %19592 = vmatprep.mubr.msk.f32.mxu1 %vm636_vm1, %v4129_v16 }
 0x1e1   : > { %v22739_v57 = vadd.f32 %v19341_v37, %v19291_v24  ;;  %19642 = vmatprep.mubr.msk.f32.mxu0 %vm636_vm1, %v4518_v32  ;;  %v2199_v53 = vpop.f32.mrf.mxu1  ;;  %v4880_v24 = vld [vmem:[#allocation2 + $0x52] sm:$0xff] }
 0x1e2   : > { %v2523_v62 = vpop.f32.mrf.mxu0 }
 0x1e3   : > { %v22743_v15 = vadd.f32 %v2523_v62, %v2199_v53  ;;  %v19294_v60 = vpop.f32.mrf.mxu1  ;;  %19593 = vmatmul.mubr.msk.f32.gmra.mxu1 %vm636_vm1, %v4130_v9 }
 0x1e4   : > { %v19344_v2 = vpop.f32.mrf.mxu0  ;;  %19643 = vmatmul.mubr.msk.f32.gmra.mxu0 %vm636_vm1, %v4519_v6  ;;  %19647 = vmatprep.mubr.msk.f32.mxu1 %vm636_vm1, %v4877_v0 }
 0x1e5   : > { %v22747_v41 = vadd.f32 %v19344_v2, %v19294_v60  ;;  %19697 = vmatprep.mubr.msk.f32.mxu0 %vm636_vm1, %v5496_v61  ;;  %v2209_v51 = vpop.f32.mrf.mxu1  ;;  %v4882_v61 = vld [vmem:[#allocation2 + $0x6a] sm:$0xff] }
 0x1e6   : > { %v2533_v11 = vpop.f32.mrf.mxu0  ;;  %v5501_v60 = vld [vmem:[#allocation3 + $0x39] sm:$0xff] }
 0x1e7   : > { %v22751_v7 = vadd.f32 %v2533_v11, %v2209_v51  ;;  %v19349_v50 = vpop.f32.mrf.mxu1  ;;  %19648 = vmatmul.mubr.msk.f32.vlgmr.msra.gmra.mxu1 %vm636_vm1, %v4878_v10 }
 0x1e8   : > { %v19399_v44 = vpop.f32.mrf.mxu0  ;;  %19698 = vmatmul.mubr.msk.f32.vlgmr.msra.gmra.mxu0 %vm636_vm1, %v5497_v33  ;;  %v2900_v36 = vadd.f32 %v19349_v50, %v22384_v39  ;;  %19746 = vmatpush3.msk.msra.mxu1 %vm733_vm0, %v22601_v55  ;;  %v4883_v33 = vld [vmem:[#allocation2 + $0x7a] sm:$0xff] }
 0x1e9   : > { %19650 = vmatprep.mubr.msk.f32.mxu1 %vm636_vm1, %v4879_v20  ;;  %v2740_v42 = vpop.f32.mrf.mxu1  ;;  %19796 = vmatpush3.msk.msra.mxu0 %vm733_vm0, %v22606_v28  ;;  %v5500_v28 = vld [vmem:[#allocation3 + $0x31] sm:$0xff] }
 0x1ea   : > { %v3129_v34 = vpop.f32.mrf.mxu0  ;;  %19700 = vmatprep.mubr.msk.f32.mxu0 %vm636_vm1, %v5498_v40  ;;  %v22774_v16 = vadd.f32 %v19399_v44, %v2900_v36  ;;  %v2899_v32 = vadd.f32 %v2740_v42, %v2384_v18  ;;  %19845 = vmatprep.subr.msk.mxu1 %vm733_vm0, %v22758_v22  ;;  %v4884_v44 = vld [vmem:[#allocation2 + $0x82] sm:$0xff] }
 0x1eb   : > { %19895 = vmatprep.subr.msk.mxu0 %vm733_vm0, %v22763_v19  ;;  %v19352_v39 = vpop.f32.mrf.mxu1  ;;  %19651 = vmatmul.mubr.msk.f32.gmra.mxu1 %vm636_vm1, %v4880_v24  ;;  %v5503_v20 = vld [vmem:[#allocation3 + $0x51] sm:$0xff] }
 0x1ec   : > { %v19402_v55 = vpop.f32.mrf.mxu0  ;;  %19701 = vmatmul.mubr.msk.f32.gmra.mxu0 %vm636_vm1, %v5499_v35  ;;  %v22782_v38 = vadd.f32 %v3129_v34, %v2899_v32  ;;  %v2902_v37 = vadd.f32 %v19352_v39, %v22624_v26  ;;  %19653 = vmatprep.mubr.msk.f32.mxu1 %vm636_vm1, %v4881_v59  ;;  %v5502_v26 = vld [vmem:[#allocation3 + $0x49] sm:$0xff] }
 0x1ed   : > { %19703 = vmatprep.mubr.msk.f32.mxu0 %vm636_vm1, %v5500_v28  ;;  %v2750_v9 = vpop.f32.mrf.mxu1  ;;  %v4885_v35 = vld [vmem:[#allocation2 + $0x92] sm:$0xff] }
 0x1ee   : > { %v3139_v6 = vpop.f32.mrf.mxu0  ;;  %v22787_v53 = vadd.f32 %v19402_v55, %v2902_v37  ;;  %v2901_v62 = vadd.f32 %v2750_v9, %v22628_v17  ;;  %v4886_v55 = vld [vmem:[#allocation2 + $0x9a] sm:$0xff]  ;;  %v4887_v9 = vld [vmem:[#allocation2 + $0xaa] sm:$0xff] }
 0x1ef   : > { %v19355_v2 = vpop.f32.mrf.mxu1  ;;  %19654 = vmatmul.mubr.msk.f32.gmra.mxu1 %vm636_vm1, %v4882_v61  ;;  %v5505_v59 = vld [vmem:[#allocation3 + $0x69] sm:$0xff] }
 0x1f0   : > { %v19405_v0 = vpop.f32.mrf.mxu0  ;;  %19704 = vmatmul.mubr.msk.f32.gmra.mxu0 %vm636_vm1, %v5501_v60  ;;  %v22792_v51 = vadd.f32 %v3139_v6, %v2901_v62  ;;  %v2904_v11 = vadd.f32 %v19355_v2, %v22632_v31  ;;  %19656 = vmatprep.mubr.msk.f32.mxu1 %vm636_vm1, %v4883_v33  ;;  %v5504_v31 = vld [vmem:[#allocation3 + $0x61] sm:$0xff] }
 0x1f1   : > { %19706 = vmatprep.mubr.msk.f32.mxu0 %vm636_vm1, %v5502_v26  ;;  %v2760_v10 = vpop.f32.mrf.mxu1  ;;  %v5507_v33 = vld [vmem:[#allocation3 + $0x81] sm:$0xff] }
 0x1f2   : > { %v3149_v17 = vpop.f32.mrf.mxu0  ;;  %v22797_v40 = vadd.f32 %v19405_v0, %v2904_v11  ;;  %v2903_v50 = vadd.f32 %v2760_v10, %v22636_v52  ;;  %v4888_v0 = vld [vmem:[#allocation2 + $0xb2] sm:$0xff]  ;;  %v4889_v10 = vld [vmem:[#allocation2 + $0xc2] sm:$0xff] }
 0x1f3   : > { %v19358_v18 = vpop.f32.mrf.mxu1  ;;  %19657 = vmatmul.mubr.msk.f32.gmra.mxu1 %vm636_vm1, %v4884_v44 }
 0x1f4   : > { %v19408_v36 = vpop.f32.mrf.mxu0  ;;  %19707 = vmatmul.mubr.msk.f32.gmra.mxu0 %vm636_vm1, %v5503_v20  ;;  %v22802_v42 = vadd.f32 %v3149_v17, %v2903_v50  ;;  %v2906_v34 = vadd.f32 %v19358_v18, %v22640_v12  ;;  %19659 = vmatprep.mubr.msk.f32.mxu1 %vm636_vm1, %v4885_v35  ;;  %v5506_v12 = vld [vmem:[#allocation3 + $0x79] sm:$0xff] }
 0x1f5   : > { %19709 = vmatprep.mubr.msk.f32.mxu0 %vm636_vm1, %v5504_v31  ;;  %v2770_v32 = vpop.f32.mrf.mxu1  ;;  %v5509_v35 = vld [vmem:[#allocation3 + $0x99] sm:$0xff] }
 0x1f6   : > { %v3159_v52 = vpop.f32.mrf.mxu0  ;;  %v22807_v24 = vadd.f32 %v19408_v36, %v2906_v34  ;;  %v2905_v39 = vadd.f32 %v2770_v32, %v22644_v54  ;;  %v4890_v36 = vld [vmem:[#allocation2 + $0xca] sm:$0xff]  ;;  %v4891_v32 = vld [vmem:[#allocation2 + $0xda] sm:$0xff] }
 0x1f7   : > { %v19361_v28 = vpop.f32.mrf.mxu1  ;;  %19660 = vmatmul.mubr.msk.f32.gmra.mxu1 %vm636_vm1, %v4886_v55 }
 0x1f8   : > { %v19411_v37 = vpop.f32.mrf.mxu0  ;;  %19710 = vmatmul.mubr.msk.f32.gmra.mxu0 %vm636_vm1, %v5505_v59  ;;  %v22812_v6 = vadd.f32 %v3159_v52, %v2905_v39  ;;  %v2908_v62 = vadd.f32 %v19361_v28, %v22648_v23  ;;  %19662 = vmatprep.mubr.msk.f32.mxu1 %vm636_vm1, %v4887_v9  ;;  %v5508_v23 = vld [vmem:[#allocation3 + $0x91] sm:$0xff] }
 0x1f9   : > { %19712 = vmatprep.mubr.msk.f32.mxu0 %vm636_vm1, %v5506_v12  ;;  %v2780_v61 = vpop.f32.mrf.mxu1  ;;  %v5511_v9 = vld [vmem:[#allocation3 + $0xb1] sm:$0xff] }
 0x1fa   : > { %v3169_v54 = vpop.f32.mrf.mxu0  ;;  %v22817_v60 = vadd.f32 %v19411_v37, %v2908_v62  ;;  %v2907_v2 = vadd.f32 %v2780_v61, %v22652_v45  ;;  %v4892_v37 = vld [vmem:[#allocation2 + $0xe2] sm:$0xff]  ;;  %v4893_v61 = vld [vmem:[#allocation2 + $0xf2] sm:$0xff] }
 0x1fb   : > { %v19364_v26 = vpop.f32.mrf.mxu1  ;;  %19663 = vmatmul.mubr.msk.f32.gmra.mxu1 %vm636_vm1, %v4888_v0 }
 0x1fc   : > { %v19414_v11 = vpop.f32.mrf.mxu0  ;;  %19713 = vmatmul.mubr.msk.f32.gmra.mxu0 %vm636_vm1, %v5507_v33  ;;  %v22822_v17 = vadd.f32 %v3169_v54, %v2907_v2  ;;  %v2910_v50 = vadd.f32 %v19364_v26, %v22656_v13  ;;  %19665 = vmatprep.mubr.msk.f32.mxu1 %vm636_vm1, %v4889_v10  ;;  %v5510_v13 = vld [vmem:[#allocation3 + $0xa9] sm:$0xff] }
 0x1fd   : > { %19715 = vmatprep.mubr.msk.f32.mxu0 %vm636_vm1, %v5508_v23  ;;  %v2790_v44 = vpop.f32.mrf.mxu1  ;;  %v5513_v10 = vld [vmem:[#allocation3 + $0xc9] sm:$0xff] }
 0x1fe   : > { %v3179_v45 = vpop.f32.mrf.mxu0  ;;  %v22827_v20 = vadd.f32 %v19414_v11, %v2910_v50  ;;  %v2909_v18 = vadd.f32 %v2790_v44, %v22660_v48  ;;  %v4894_v11 = vld [vmem:[#allocation2 + $0xfa] sm:$0xff]  ;;  %v4895_v44 = vld [vmem:[#allocation2 + $0x10a] sm:$0xff] }
 0x1ff   : > { %v19367_v31 = vpop.f32.mrf.mxu1  ;;  %19666 = vmatmul.mubr.msk.f32.gmra.mxu1 %vm636_vm1, %v4890_v36 }
 0x200   : > { %v19417_v34 = vpop.f32.mrf.mxu0  ;;  %19716 = vmatmul.mubr.msk.f32.gmra.mxu0 %vm636_vm1, %v5509_v35  ;;  %v22832_v52 = vadd.f32 %v3179_v45, %v2909_v18  ;;  %v2912_v39 = vadd.f32 %v19367_v31, %v22664_v5  ;;  %19668 = vmatprep.mubr.msk.f32.mxu1 %vm636_vm1, %v4891_v32  ;;  %v5512_v5 = vld [vmem:[#allocation3 + $0xc1] sm:$0xff] }
 0x201   : > { %19718 = vmatprep.mubr.msk.f32.mxu0 %vm636_vm1, %v5510_v13  ;;  %v2800_v55 = vpop.f32.mrf.mxu1  ;;  %v5515_v32 = vld [vmem:[#allocation3 + $0xe1] sm:$0xff] }
 0x202   : > { %v3189_v48 = vpop.f32.mrf.mxu0  ;;  %v22837_v59 = vadd.f32 %v19417_v34, %v2912_v39  ;;  %v2911_v28 = vadd.f32 %v2800_v55, %v22668_v56  ;;  %v4896_v34 = vld [vmem:[#allocation2 + $0x112] sm:$0xff]  ;;  %v4897_v55 = vld [vmem:[#allocation2 + $0x122] sm:$0xff] }
 0x203   : > { %v19370_v12 = vpop.f32.mrf.mxu1  ;;  %19669 = vmatmul.mubr.msk.f32.gmra.mxu1 %vm636_vm1, %v4892_v37 }
 0x204   : > { %v19420_v62 = vpop.f32.mrf.mxu0  ;;  %19719 = vmatmul.mubr.msk.f32.gmra.mxu0 %vm636_vm1, %v5511_v9  ;;  %v22842_v54 = vadd.f32 %v3189_v48, %v2911_v28  ;;  %v2914_v2 = vadd.f32 %v19370_v12, %v22672_v47  ;;  %19671 = vmatprep.mubr.msk.f32.mxu1 %vm636_vm1, %v4893_v61  ;;  %v5514_v47 = vld [vmem:[#allocation3 + $0xd9] sm:$0xff] }
 0x205   : > { %19721 = vmatprep.mubr.msk.f32.mxu0 %vm636_vm1, %v5512_v5  ;;  %v2810_v0 = vpop.f32.mrf.mxu1  ;;  %v5517_v61 = vld [vmem:[#allocation3 + $0xf9] sm:$0xff] }
 0x206   : > { %v3199_v56 = vpop.f32.mrf.mxu0  ;;  %v22847_v33 = vadd.f32 %v19420_v62, %v2914_v2  ;;  %v2913_v26 = vadd.f32 %v2810_v0, %v22676_v27  ;;  %v4898_v62 = vld [vmem:[#allocation2 + $0x12a] sm:$0xff]  ;;  %v4899_v0 = vld [vmem:[#allocation2 + $0x13a] sm:$0xff] }
 0x207   : > { %v19373_v23 = vpop.f32.mrf.mxu1  ;;  %19672 = vmatmul.mubr.msk.f32.gmra.mxu1 %vm636_vm1, %v4894_v11 }
 0x208   : > { %v19423_v50 = vpop.f32.mrf.mxu0  ;;  %19722 = vmatmul.mubr.msk.f32.gmra.mxu0 %vm636_vm1, %v5513_v10  ;;  %v22852_v45 = vadd.f32 %v3199_v56, %v2913_v26  ;;  %v2916_v18 = vadd.f32 %v19373_v23, %v22680_v25  ;;  %19674 = vmatprep.mubr.msk.f32.mxu1 %vm636_vm1, %v4895_v44  ;;  %v5516_v25 = vld [vmem:[#allocation3 + $0xf1] sm:$0xff] }
 0x209   : > { %19724 = vmatprep.mubr.msk.f32.mxu0 %vm636_vm1, %v5514_v47  ;;  %v2820_v36 = vpop.f32.mrf.mxu1  ;;  %v5519_v44 = vld [vmem:[#allocation3 + $0x111] sm:$0xff] }
 0x20a   : > { %v3209_v27 = vpop.f32.mrf.mxu0  ;;  %v22857_v35 = vadd.f32 %v19423_v50, %v2916_v18  ;;  %v2915_v31 = vadd.f32 %v2820_v36, %v22684_v1  ;;  %v4900_v50 = vld [vmem:[#allocation2 + $0x142] sm:$0xff]  ;;  %v4901_v36 = vld [vmem:[#allocation2 + $0x152] sm:$0xff] }
 0x20b   : > { %v19376_v13 = vpop.f32.mrf.mxu1  ;;  %19675 = vmatmul.mubr.msk.f32.gmra.mxu1 %vm636_vm1, %v4896_v34 }
 0x20c   : > { %v19426_v39 = vpop.f32.mrf.mxu0  ;;  %19725 = vmatmul.mubr.msk.f32.gmra.mxu0 %vm636_vm1, %v5515_v32  ;;  %v22862_v48 = vadd.f32 %v3209_v27, %v2915_v31  ;;  %v2918_v28 = vadd.f32 %v19376_v13, %v22688_v58  ;;  %19677 = vmatprep.mubr.msk.f32.mxu1 %vm636_vm1, %v4897_v55  ;;  %v5518_v58 = vld [vmem:[#allocation3 + $0x109] sm:$0xff] }
 0x20d   : > { %19727 = vmatprep.mubr.msk.f32.mxu0 %vm636_vm1, %v5516_v25  ;;  %v2830_v37 = vpop.f32.mrf.mxu1  ;;  %v5521_v55 = vld [vmem:[#allocation3 + $0x129] sm:$0xff] }
 0x20e   : > { %v3219_v1 = vpop.f32.mrf.mxu0  ;;  %v22867_v9 = vadd.f32 %v19426_v39, %v2918_v28  ;;  %v2917_v12 = vadd.f32 %v2830_v37, %v22692_v4  ;;  %v4902_v39 = vld [vmem:[#allocation2 + $0x15a] sm:$0xff]  ;;  %v4903_v37 = vld [vmem:[#allocation2 + $0x16a] sm:$0xff] }
 0x20f   : > { %v19379_v5 = vpop.f32.mrf.mxu1  ;;  %19678 = vmatmul.mubr.msk.f32.gmra.mxu1 %vm636_vm1, %v4898_v62 }
 0x210   : > { %v19429_v2 = vpop.f32.mrf.mxu0  ;;  %19728 = vmatmul.mubr.msk.f32.gmra.mxu0 %vm636_vm1, %v5517_v61  ;;  %v22872_v56 = vadd.f32 %v3219_v1, %v2917_v12  ;;  %v2920_v26 = vadd.f32 %v19379_v5, %v22697_v46  ;;  %19680 = vmatprep.mubr.msk.f32.mxu1 %vm636_vm1, %v4899_v0  ;;  %v5520_v46 = vld [vmem:[#allocation3 + $0x121] sm:$0xff] }
 0x211   : > { %19730 = vmatprep.mubr.msk.f32.mxu0 %vm636_vm1, %v5518_v58  ;;  %v2840_v11 = vpop.f32.mrf.mxu1  ;;  %v5523_v0 = vld [vmem:[#allocation3 + $0x141] sm:$0xff] }
 0x212   : > { %v3229_v4 = vpop.f32.mrf.mxu0  ;;  %v22877_v10 = vadd.f32 %v19429_v2, %v2920_v26  ;;  %v2919_v23 = vadd.f32 %v2840_v11, %v22702_v8  ;;  %v4904_v2 = vld [vmem:[#allocation2 + $0x172] sm:$0xff]  ;;  %v5524_v11 = vld [vmem:[#allocation3 + $0x151] sm:$0xff] }
 0x213   : > { %v19382_v47 = vpop.f32.mrf.mxu1  ;;  %19681 = vmatmul.mubr.msk.f32.gmra.mxu1 %vm636_vm1, %v4900_v50  ;;  %v4907_v50 = vld [vmem:[#allocation2 + $0x19a] sm:$0xff] }
 0x214   : > { %v19432_v18 = vpop.f32.mrf.mxu0  ;;  %19731 = vmatmul.mubr.msk.f32.gmra.mxu0 %vm636_vm1, %v5519_v44  ;;  %v22882_v27 = vadd.f32 %v3229_v4, %v2919_v23  ;;  %v2922_v31 = vadd.f32 %v19382_v47, %v22707_v43  ;;  %19683 = vmatprep.mubr.msk.f32.mxu1 %vm636_vm1, %v4901_v36  ;;  %v5522_v43 = vld [vmem:[#allocation3 + $0x139] sm:$0xff] }
 0x215   : > { %19733 = vmatprep.mubr.msk.f32.mxu0 %vm636_vm1, %v5520_v46  ;;  %v2850_v34 = vpop.f32.mrf.mxu1 }
 0x216   : > { %v3239_v8 = vpop.f32.mrf.mxu0  ;;  %v22887_v32 = vadd.f32 %v19432_v18, %v2922_v31  ;;  %v2921_v13 = vadd.f32 %v2850_v34, %v22712_v14  ;;  %v5525_v18 = vld [vmem:[#allocation3 + $0x159] sm:$0xff] }
 0x217   : > { %v19385_v25 = vpop.f32.mrf.mxu1  ;;  %19684 = vmatmul.mubr.msk.f32.gmra.mxu1 %vm636_vm1, %v4902_v39  ;;  %v4908_v34 = vld [vmem:[#allocation2 + $0x1a2] sm:$0xff]  ;;  %v6177_v39 = vld [vmem:[#allocation3 + $0x2] sm:$0xff] }
 0x218   : > { %v19435_v28 = vpop.f32.mrf.mxu0  ;;  %19734 = vmatmul.mubr.msk.f32.gmra.mxu0 %vm636_vm1, %v5521_v55  ;;  %v22892_v1 = vadd.f32 %v3239_v8, %v2921_v13  ;;  %v2924_v12 = vadd.f32 %v19385_v25, %v22717_v63  ;;  %19686 = vmatprep.mubr.msk.f32.mxu1 %vm636_vm1, %v4903_v37  ;;  %v5463_v13 = vld [vmem:[#allocation3] sm:$0xff]  ;;  %v5527_v25 = vld [vmem:[#allocation3 + $0x171] sm:$0xff] }
 0x219   : > { %19736 = vmatprep.mubr.msk.f32.mxu0 %vm636_vm1, %v5522_v43  ;;  %v2860_v62 = vpop.f32.mrf.mxu1 }
 0x21a   : > { %v3249_v14 = vpop.f32.mrf.mxu0  ;;  %v22897_v61 = vadd.f32 %v19435_v28, %v2924_v12  ;;  %v2923_v5 = vadd.f32 %v2860_v62, %v22722_v29  ;;  %v5464_v12 = vld [vmem:[#allocation3 + $0x8] sm:$0xff] }
 0x21b   : > { %v19388_v58 = vpop.f32.mrf.mxu1  ;;  %19687 = vmatmul.mubr.msk.f32.gmra.mxu1 %vm636_vm1, %v4904_v2  ;;  %v6178_v62 = vld [vmem:[#allocation3 + $0xa] sm:$0xff] }
 0x21c   : > { %v19438_v26 = vpop.f32.mrf.mxu0  ;;  %19737 = vmatmul.mubr.msk.f32.gmra.mxu0 %vm636_vm1, %v5523_v0  ;;  %v22902_v63 = vadd.f32 %v3249_v14, %v2923_v5  ;;  %v2926_v4 = vadd.f32 %v19388_v58, %v22727_v30  ;;  %19689 = vmatprep.mubr.msk.f32.mxu1 %vm636_vm1, %v22580_v21  ;;  %v5526_v30 = vld [vmem:[#allocation3 + $0x169] sm:$0xff]  ;;  %v22932_v0 = vld [vmem:[#allocation3 + $0x18] sm:$0xff] }
 0x21d   : > { %19739 = vmatprep.mubr.msk.f32.mxu0 %vm636_vm1, %v5524_v11  ;;  %v2870_v23 = vpop.f32.mrf.mxu1  ;;  %v6179_v58 = vld [vmem:[#allocation3 + $0x1a] sm:$0xff] }
 0x21e   : > { %v3259_v29 = vpop.f32.mrf.mxu0  ;;  %v22908_v44 = vadd.f32 %v19438_v26, %v2926_v4  ;;  %v2925_v47 = vadd.f32 %v2870_v23, %v22733_v49  ;;  %v22944_v4 = vld [vmem:[%s27032_s13 + $0x18] sm:$0xf] }
 0x21f   : > { %v19391_v36 = vpop.f32.mrf.mxu1  ;;  %19690 = vmatmul.mubr.msk.f32.gmra.mxu1 %vm636_vm1, %v22588_v3 }
 0x220   : > { %v19441_v46 = vpop.f32.mrf.mxu0  ;;  %19740 = vmatmul.mubr.msk.f32.gmra.mxu0 %vm636_vm1, %v5525_v18  ;;  %v22914_v31 = vadd.f32 %v3259_v29, %v2925_v47  ;;  %v2928_v21 = vadd.f32 %v19391_v36, %v22739_v57  ;;  %19692 = vmatprep.mubr.msk.f32.mxu1 %vm636_vm1, %v4907_v50  ;;  %v22953_v29 = vld [vmem:[#allocation3 + $0x20] sm:$0xff] }
 0x221   : > { %19742 = vmatprep.mubr.msk.f32.mxu0 %vm636_vm1, %v5526_v30  ;;  %v2880_v8 = vpop.f32.mrf.mxu1  ;;  %v6180_v50 = vld [vmem:[#allocation3 + $0x22] sm:$0xff]  ;;  %v6181_v30 = vld [vmem:[#allocation3 + $0x32] sm:$0xff] }
 0x222   : > { %v3269_v49 = vpop.f32.mrf.mxu0  ;;  %v22919_v55 = vadd.f32 %v19441_v46, %v2928_v21  ;;  %v2927_v3 = vadd.f32 %v2880_v8, %v22743_v15  ;;  %v22968_v46 = vld [vmem:[#allocation3 + $0x30] sm:$0xff] }
 0x223   : > { %v19394_v28 = vpop.f32.mrf.mxu1  ;;  %19693 = vmatmul.mubr.msk.f32.gmra.mxu1 %vm636_vm1, %v4908_v34 }
 0x224   : > { %v19444_v37 = vpop.f32.mrf.mxu0  ;;  %19743 = vmatmul.mubr.msk.f32.gmra.mxu0 %vm636_vm1, %v5527_v25  ;;  %v22924_v57 = vadd.f32 %v3269_v49, %v2927_v3  ;;  %v2930_v43 = vadd.f32 %v19394_v28, %v22747_v41  ;;  %19747 = vmatprep.mubr.msk.f32.mxu1 %vm636_vm1, %v5463_v13  ;;  %v22939_v41 = vld [vmem:[%s27032_s13 + $0x14] sm:$0xf]  ;;  %v6182_v3 = vld [vmem:[#allocation3 + $0x3a] sm:$0xff] }
 0x225   : > { %19797 = vmatprep.mubr.msk.f32.mxu0 %vm636_vm1, %v6177_v39  ;;  %v2890_v14 = vpop.f32.mrf.mxu1  ;;  %v22979_v39 = vld [vmem:[#allocation3 + $0x38] sm:$0xff] }
 0x226   : > { %v3279_v5 = vpop.f32.mrf.mxu0  ;;  %v22929_v15 = vadd.f32 %v19444_v37, %v2930_v43  ;;  %v2929_v2 = vadd.f32 %v2890_v14, %v22751_v7  ;;  %v6183_v37 = vld [vmem:[#allocation3 + $0x4a] sm:$0xff] }
 0x227   : > { %v19449_v26 = vpop.f32.mrf.mxu1  ;;  %19748 = vmatmul.mubr.msk.f32.vlgmr.msra.gmra.mxu1 %vm636_vm1, %v5464_v12 }
 0x228   : > { %v19499_v11 = vpop.f32.mrf.mxu0  ;;  %19798 = vmatmul.mubr.msk.f32.vlgmr.msra.gmra.mxu0 %vm636_vm1, %v6178_v62  ;;  %v22946_v7 = vadd.f32 %v3279_v5, %v2929_v2  ;;  %v3678_v23 = vadd.f32 %v19449_v26, %v22774_v16  ;;  %19846 = vmatpush3.msk.msra.mxu1 %vm733_vm0, %v22758_v22  ;;  %v22995_v2 = vld [vmem:[#allocation3 + $0x50] sm:$0xff] }
 0x229   : > { %19896 = vmatpush3.msk.msra.mxu0 %vm733_vm0, %v22763_v19  ;;  %v3518_v47 = vpop.f32.mrf.mxu1  ;;  %19750 = vmatprep.mubr.msk.f32.mxu1 %vm636_vm1, %v22932_v0 }
 0x22a   : > { %v3907_v18 = vpop.f32.mrf.mxu0  ;;  %19800 = vmatprep.mubr.msk.f32.mxu0 %vm636_vm1, %v6179_v58  ;;  %v22958_v36 = vadd.f32 %v19499_v11, %v3678_v23  ;;  %v3677_v16 = vadd.f32 %v3518_v47, %v22782_v38  ;;  %19945 = vmatprep.subr.msk.mxu1 %vm733_vm0, %v22939_v41  ;;  %v6184_v58 = vld [vmem:[#allocation3 + $0x52] sm:$0xff]  ;;  %v6185_v23 = vld [vmem:[#allocation3 + $0x62] sm:$0xff] }
 0x22b   : > { %19995 = vmatprep.subr.msk.mxu0 %vm733_vm0, %v22944_v4  ;;  %v19452_v22 = vpop.f32.mrf.mxu1  ;;  %19751 = vmatmul.mubr.msk.f32.gmra.mxu1 %vm636_vm1, %v22953_v29 }
 0x22c   : > { %v19502_v19 = vpop.f32.mrf.mxu0  ;;  %19801 = vmatmul.mubr.msk.f32.gmra.mxu0 %vm636_vm1, %v6180_v50  ;;  %v22970_v21 = vadd.f32 %v3907_v18, %v3677_v16  ;;  %v3680_v38 = vadd.f32 %v19452_v22, %v22787_v53  ;;  %19753 = vmatprep.mubr.msk.f32.mxu1 %vm636_vm1, %v22968_v46  ;;  %v22984_v53 = vld [vmem:[#allocation3 + $0x48] sm:$0xff] }
 0x22d   : > { %19803 = vmatprep.mubr.msk.f32.mxu0 %vm636_vm1, %v6181_v30  ;;  %v3528_v34 = vpop.f32.mrf.mxu1  ;;  %v6186_v30 = vld [vmem:[#allocation3 + $0x6a] sm:$0xff] }
 0x22e   : > { %v3917_v8 = vpop.f32.mrf.mxu0  ;;  %v22976_v49 = vadd.f32 %v19502_v19, %v3680_v38  ;;  %v3679_v13 = vadd.f32 %v3528_v34, %v22792_v51  ;;  %v5472_v19 = vld [vmem:[#allocation3 + $0x68] sm:$0xff] }
 0x22f   : > { %v19455_v25 = vpop.f32.mrf.mxu1  ;;  %19754 = vmatmul.mubr.msk.f32.gmra.mxu1 %vm636_vm1, %v22979_v39 }
 0x230   : > { %v19505_v28 = vpop.f32.mrf.mxu0  ;;  %19804 = vmatmul.mubr.msk.f32.gmra.mxu0 %vm636_vm1, %v6182_v3  ;;  %v22986_v43 = vadd.f32 %v3917_v8, %v3679_v13  ;;  %v3682_v12 = vadd.f32 %v19455_v25, %v22797_v40  ;;  %19756 = vmatprep.mubr.msk.f32.mxu1 %vm636_vm1, %v22984_v53  ;;  %v23000_v40 = vld [vmem:[#allocation3 + $0x60] sm:$0xff] }
 0x231   : > { %19806 = vmatprep.mubr.msk.f32.mxu0 %vm636_vm1, %v6183_v37  ;;  %v3538_v51 = vpop.f32.mrf.mxu1  ;;  %v6187_v8 = vld [vmem:[#allocation3 + $0x7a] sm:$0xff] }
 0x232   : > { %v3927_v62 = vpop.f32.mrf.mxu0  ;;  %v22992_v14 = vadd.f32 %v19505_v28, %v3682_v12  ;;  %v3681_v5 = vadd.f32 %v3538_v51, %v22802_v42  ;;  %v5474_v12 = vld [vmem:[#allocation3 + $0x80] sm:$0xff] }
 0x233   : > { %v19458_v26 = vpop.f32.mrf.mxu1  ;;  %19757 = vmatmul.mubr.msk.f32.gmra.mxu1 %vm636_vm1, %v22995_v2  ;;  %v6188_v51 = vld [vmem:[#allocation3 + $0x82] sm:$0xff] }
 0x234   : > { %v19508_v11 = vpop.f32.mrf.mxu0  ;;  %19807 = vmatmul.mubr.msk.f32.gmra.mxu0 %vm636_vm1, %v6184_v58  ;;  %v23002_v50 = vadd.f32 %v3927_v62, %v3681_v5  ;;  %v3684_v47 = vadd.f32 %v19458_v26, %v22807_v24  ;;  %19759 = vmatprep.mubr.msk.f32.mxu1 %vm636_vm1, %v23000_v40  ;;  %v5473_v24 = vld [vmem:[#allocation3 + $0x78] sm:$0xff]  ;;  %v5475_v58 = vld [vmem:[#allocation3 + $0x90] sm:$0xff] }
 0x235   : > { %19809 = vmatprep.mubr.msk.f32.mxu0 %vm636_vm1, %v6185_v23  ;;  %v3548_v42 = vpop.f32.mrf.mxu1 }
 0x236   : > { %v3937_v18 = vpop.f32.mrf.mxu0  ;;  %v23008_v16 = vadd.f32 %v19508_v11, %v3684_v47  ;;  %v3683_v22 = vadd.f32 %v3548_v42, %v22812_v6 }
 0x237   : > { %v19461_v38 = vpop.f32.mrf.mxu1  ;;  %19760 = vmatmul.mubr.msk.f32.gmra.mxu1 %vm636_vm1, %v5472_v19 }
 0x238   : > { %v19511_v34 = vpop.f32.mrf.mxu0  ;;  %19810 = vmatmul.mubr.msk.f32.gmra.mxu0 %vm636_vm1, %v6186_v30  ;;  %v23013_v13 = vadd.f32 %v3937_v18, %v3683_v22  ;;  %v3686_v3 = vadd.f32 %v19461_v38, %v22817_v60  ;;  %19762 = vmatprep.mubr.msk.f32.mxu1 %vm636_vm1, %v5473_v24  ;;  %v6189_v60 = vld [vmem:[#allocation3 + $0x92] sm:$0xff]  ;;  %v6190_v22 = vld [vmem:[#allocation3 + $0x9a] sm:$0xff]  ;;  %v5477_v38 = vld [vmem:[#allocation3 + $0xa8] sm:$0xff] }
 0x239   : > { %19812 = vmatprep.mubr.msk.f32.mxu0 %vm636_vm1, %v6187_v8  ;;  %v3558_v25 = vpop.f32.mrf.mxu1  ;;  %v5476_v18 = vld [vmem:[#allocation3 + $0x98] sm:$0xff] }
 0x23a   : > { %v3947_v6 = vpop.f32.mrf.mxu0  ;;  %v23018_v28 = vadd.f32 %v19511_v34, %v3686_v3  ;;  %v3685_v37 = vadd.f32 %v3558_v25, %v22822_v17 }
 0x23b   : > { %v19464_v62 = vpop.f32.mrf.mxu1  ;;  %19763 = vmatmul.mubr.msk.f32.gmra.mxu1 %vm636_vm1, %v5474_v12 }
 0x23c   : > { %v19514_v5 = vpop.f32.mrf.mxu0  ;;  %19813 = vmatmul.mubr.msk.f32.gmra.mxu0 %vm636_vm1, %v6188_v51  ;;  %v23023_v26 = vadd.f32 %v3947_v6, %v3685_v37  ;;  %v3688_v11 = vadd.f32 %v19464_v62, %v22827_v20  ;;  %19765 = vmatprep.mubr.msk.f32.mxu1 %vm636_vm1, %v5475_v58  ;;  %v6191_v20 = vld [vmem:[#allocation3 + $0xaa] sm:$0xff]  ;;  %v6192_v37 = vld [vmem:[#allocation3 + $0xb2] sm:$0xff]  ;;  %v5479_v62 = vld [vmem:[#allocation3 + $0xc0] sm:$0xff] }
 0x23d   : > { %19815 = vmatprep.mubr.msk.f32.mxu0 %vm636_vm1, %v6189_v60  ;;  %v3568_v23 = vpop.f32.mrf.mxu1  ;;  %v5478_v6 = vld [vmem:[#allocation3 + $0xb0] sm:$0xff] }
 0x23e   : > { %v3957_v17 = vpop.f32.mrf.mxu0  ;;  %v23028_v47 = vadd.f32 %v19514_v5, %v3688_v11  ;;  %v3687_v42 = vadd.f32 %v3568_v23, %v22832_v52 }
 0x23f   : > { %v19467_v19 = vpop.f32.mrf.mxu1  ;;  %19766 = vmatmul.mubr.msk.f32.gmra.mxu1 %vm636_vm1, %v5476_v18 }
 0x240   : > { %v19517_v30 = vpop.f32.mrf.mxu0  ;;  %19816 = vmatmul.mubr.msk.f32.gmra.mxu0 %vm636_vm1, %v6190_v22  ;;  %v23033_v34 = vadd.f32 %v3957_v17, %v3687_v42  ;;  %v3690_v24 = vadd.f32 %v19467_v19, %v22837_v59  ;;  %19768 = vmatprep.mubr.msk.f32.mxu1 %vm636_vm1, %v5477_v38  ;;  %v6193_v59 = vld [vmem:[#allocation3 + $0xc2] sm:$0xff]  ;;  %v6194_v42 = vld [vmem:[#allocation3 + $0xca] sm:$0xff]  ;;  %v5481_v19 = vld [vmem:[#allocation3 + $0xd8] sm:$0xff] }
 0x241   : > { %19818 = vmatprep.mubr.msk.f32.mxu0 %vm636_vm1, %v6191_v20  ;;  %v3578_v8 = vpop.f32.mrf.mxu1  ;;  %v5480_v17 = vld [vmem:[#allocation3 + $0xc8] sm:$0xff] }
 0x242   : > { %v3967_v52 = vpop.f32.mrf.mxu0  ;;  %v23038_v3 = vadd.f32 %v19517_v30, %v3690_v24  ;;  %v3689_v25 = vadd.f32 %v3578_v8, %v22842_v54 }
 0x243   : > { %v19470_v12 = vpop.f32.mrf.mxu1  ;;  %19769 = vmatmul.mubr.msk.f32.gmra.mxu1 %vm636_vm1, %v5478_v6 }
 0x244   : > { %v19520_v51 = vpop.f32.mrf.mxu0  ;;  %19819 = vmatmul.mubr.msk.f32.gmra.mxu0 %vm636_vm1, %v6192_v37  ;;  %v23043_v5 = vadd.f32 %v3967_v52, %v3689_v25  ;;  %v3692_v58 = vadd.f32 %v19470_v12, %v22847_v33  ;;  %19771 = vmatprep.mubr.msk.f32.mxu1 %vm636_vm1, %v5479_v62  ;;  %v6195_v33 = vld [vmem:[#allocation3 + $0xda] sm:$0xff]  ;;  %v6196_v25 = vld [vmem:[#allocation3 + $0xe2] sm:$0xff]  ;;  %v5483_v12 = vld [vmem:[#allocation3 + $0xf0] sm:$0xff] }
 0x245   : > { %19821 = vmatprep.mubr.msk.f32.mxu0 %vm636_vm1, %v6193_v59  ;;  %v3588_v60 = vpop.f32.mrf.mxu1  ;;  %v5482_v52 = vld [vmem:[#allocation3 + $0xe0] sm:$0xff] }
 0x246   : > { %v3977_v54 = vpop.f32.mrf.mxu0  ;;  %v23048_v11 = vadd.f32 %v19520_v51, %v3692_v58  ;;  %v3691_v23 = vadd.f32 %v3588_v60, %v22852_v45 }
 0x247   : > { %v19473_v18 = vpop.f32.mrf.mxu1  ;;  %19772 = vmatmul.mubr.msk.f32.gmra.mxu1 %vm636_vm1, %v5480_v17 }
 0x248   : > { %v19523_v22 = vpop.f32.mrf.mxu0  ;;  %19822 = vmatmul.mubr.msk.f32.gmra.mxu0 %vm636_vm1, %v6194_v42  ;;  %v23053_v30 = vadd.f32 %v3977_v54, %v3691_v23  ;;  %v3694_v38 = vadd.f32 %v19473_v18, %v22857_v35  ;;  %19774 = vmatprep.mubr.msk.f32.mxu1 %vm636_vm1, %v5481_v19  ;;  %v6197_v35 = vld [vmem:[#allocation3 + $0xf2] sm:$0xff]  ;;  %v6198_v23 = vld [vmem:[#allocation3 + $0xfa] sm:$0xff]  ;;  %v5485_v18 = vld [vmem:[#allocation3 + $0x108] sm:$0xff] }
 0x249   : > { %19824 = vmatprep.mubr.msk.f32.mxu0 %vm636_vm1, %v6195_v33  ;;  %v3598_v20 = vpop.f32.mrf.mxu1  ;;  %v5484_v54 = vld [vmem:[#allocation3 + $0xf8] sm:$0xff] }
 0x24a   : > { %v3987_v45 = vpop.f32.mrf.mxu0  ;;  %v23058_v24 = vadd.f32 %v19523_v22, %v3694_v38  ;;  %v3693_v8 = vadd.f32 %v3598_v20, %v22862_v48 }
 0x24b   : > { %v19476_v6 = vpop.f32.mrf.mxu1  ;;  %19775 = vmatmul.mubr.msk.f32.gmra.mxu1 %vm636_vm1, %v5482_v52 }
 0x24c   : > { %v19526_v37 = vpop.f32.mrf.mxu0  ;;  %19825 = vmatmul.mubr.msk.f32.gmra.mxu0 %vm636_vm1, %v6196_v25  ;;  %v23063_v51 = vadd.f32 %v3987_v45, %v3693_v8  ;;  %v3696_v62 = vadd.f32 %v19476_v6, %v22867_v9  ;;  %19777 = vmatprep.mubr.msk.f32.mxu1 %vm636_vm1, %v5483_v12  ;;  %v6199_v9 = vld [vmem:[#allocation3 + $0x10a] sm:$0xff]  ;;  %v6200_v8 = vld [vmem:[#allocation3 + $0x112] sm:$0xff]  ;;  %v5487_v6 = vld [vmem:[#allocation3 + $0x120] sm:$0xff] }
 0x24d   : > { %19827 = vmatprep.mubr.msk.f32.mxu0 %vm636_vm1, %v6197_v35  ;;  %v3608_v59 = vpop.f32.mrf.mxu1  ;;  %v5486_v45 = vld [vmem:[#allocation3 + $0x110] sm:$0xff] }
 0x24e   : > { %27181 = vst [vmem:[#allocation37_spill] sm:$0xff] %v23063_v51  ;;  %v3997_v48 = vpop.f32.mrf.mxu0  ;;  %v23068_v58 = vadd.f32 %v19526_v37, %v3696_v62  ;;  %v3695_v60 = vadd.f32 %v3608_v59, %v22872_v56 }
 0x24f   : > { %v19479_v17 = vpop.f32.mrf.mxu1  ;;  %19778 = vmatmul.mubr.msk.f32.gmra.mxu1 %vm636_vm1, %v5484_v54 }
 0x250   : > { %v19529_v42 = vpop.f32.mrf.mxu0  ;;  %19828 = vmatmul.mubr.msk.f32.gmra.mxu0 %vm636_vm1, %v6198_v23  ;;  %v23073_v22 = vadd.f32 %v3997_v48, %v3695_v60  ;;  %v3698_v19 = vadd.f32 %v19479_v17, %v22877_v10  ;;  %19780 = vmatprep.mubr.msk.f32.mxu1 %vm636_vm1, %v5485_v18  ;;  %v6201_v10 = vld [vmem:[#allocation3 + $0x122] sm:$0xff]  ;;  %v6202_v60 = vld [vmem:[#allocation3 + $0x12a] sm:$0xff]  ;;  %v5489_v17 = vld [vmem:[#allocation3 + $0x138] sm:$0xff] }
 0x251   : > { %19830 = vmatprep.mubr.msk.f32.mxu0 %vm636_vm1, %v6199_v9  ;;  %v3618_v33 = vpop.f32.mrf.mxu1  ;;  %v5488_v48 = vld [vmem:[#allocation3 + $0x128] sm:$0xff] }
 0x252   : > { %27182 = vst [vmem:[#allocation38_spill] sm:$0xff] %v23073_v22  ;;  %v4007_v56 = vpop.f32.mrf.mxu0  ;;  %v23078_v38 = vadd.f32 %v19529_v42, %v3698_v19  ;;  %v3697_v20 = vadd.f32 %v3618_v33, %v22882_v27  ;;  %v6972_v22 = vld [vmem:[#allocation3 + $0xcc] sm:$0xff] }
 0x253   : > { %v19482_v52 = vpop.f32.mrf.mxu1  ;;  %19781 = vmatmul.mubr.msk.f32.gmra.mxu1 %vm636_vm1, %v5486_v45 }
 0x254   : > { %v19532_v25 = vpop.f32.mrf.mxu0  ;;  %19831 = vmatmul.mubr.msk.f32.gmra.mxu0 %vm636_vm1, %v6200_v8  ;;  %v23083_v37 = vadd.f32 %v4007_v56, %v3697_v20  ;;  %v3700_v12 = vadd.f32 %v19482_v52, %v22887_v32  ;;  %19783 = vmatprep.mubr.msk.f32.mxu1 %vm636_vm1, %v5487_v6  ;;  %v6203_v32 = vld [vmem:[#allocation3 + $0x13a] sm:$0xff]  ;;  %v6204_v20 = vld [vmem:[#allocation3 + $0x142] sm:$0xff]  ;;  %v5491_v52 = vld [vmem:[#allocation3 + $0x150] sm:$0xff] }
 0x255   : > { %19833 = vmatprep.mubr.msk.f32.mxu0 %vm636_vm1, %v6201_v10  ;;  %v3628_v35 = vpop.f32.mrf.mxu1  ;;  %v5490_v56 = vld [vmem:[#allocation3 + $0x140] sm:$0xff] }
 0x256   : > { %27183 = vst [vmem:[#allocation39_spill] sm:$0xff] %v23083_v37  ;;  %v4017_v27 = vpop.f32.mrf.mxu0  ;;  %v23088_v62 = vadd.f32 %v19532_v25, %v3700_v12  ;;  %v3699_v59 = vadd.f32 %v3628_v35, %v22892_v1 }
 0x257   : > { %v19485_v54 = vpop.f32.mrf.mxu1  ;;  %19784 = vmatmul.mubr.msk.f32.gmra.mxu1 %vm636_vm1, %v5488_v48 }
 0x258   : > { %v19535_v23 = vpop.f32.mrf.mxu0  ;;  %19834 = vmatmul.mubr.msk.f32.gmra.mxu0 %vm636_vm1, %v6202_v60  ;;  %v23093_v42 = vadd.f32 %v4017_v27, %v3699_v59  ;;  %v3702_v18 = vadd.f32 %v19485_v54, %v22897_v61  ;;  %19786 = vmatprep.mubr.msk.f32.mxu1 %vm636_vm1, %v5489_v17  ;;  %v6205_v61 = vld [vmem:[#allocation3 + $0x152] sm:$0xff]  ;;  %v6206_v59 = vld [vmem:[#allocation3 + $0x15a] sm:$0xff]  ;;  %v5493_v54 = vld [vmem:[#allocation3 + $0x168] sm:$0xff] }
 0x259   : > { %19836 = vmatprep.mubr.msk.f32.mxu0 %vm636_vm1, %v6203_v32  ;;  %v3638_v9 = vpop.f32.mrf.mxu1  ;;  %v5492_v27 = vld [vmem:[#allocation3 + $0x158] sm:$0xff] }
 0x25a   : > { %27184 = vst [vmem:[#allocation40_spill] sm:$0xff] %v23093_v42  ;;  %v4027_v1 = vpop.f32.mrf.mxu0  ;;  %v23098_v19 = vadd.f32 %v19535_v23, %v3702_v18  ;;  %v3701_v33 = vadd.f32 %v3638_v9, %v22902_v63  ;;  %v6566_v18 = vld [vmem:[#allocation3 + $0x3] sm:$0xff]  ;;  %v6970_v42 = vld [vmem:[#allocation3 + $0xb4] sm:$0xff] }
 0x25b   : > { %v19488_v45 = vpop.f32.mrf.mxu1  ;;  %19787 = vmatmul.mubr.msk.f32.gmra.mxu1 %vm636_vm1, %v5490_v56  ;;  %v6955_v9 = vld [vmem:[#allocation3 + $0x4] sm:$0xff]  ;;  %v5494_v56 = vld [vmem:[#allocation3 + $0x170] sm:$0xff] }
 0x25c   : > { %v19538_v8 = vpop.f32.mrf.mxu0  ;;  %19837 = vmatmul.mubr.msk.f32.gmra.mxu0 %vm636_vm1, %v6204_v20  ;;  %v23103_v25 = vadd.f32 %v4027_v1, %v3701_v33  ;;  %v3704_v6 = vadd.f32 %v19488_v45, %v22908_v44  ;;  %19789 = vmatprep.mubr.msk.f32.mxu1 %vm636_vm1, %v5491_v52  ;;  %v6207_v44 = vld [vmem:[#allocation3 + $0x16a] sm:$0xff]  ;;  %v6208_v20 = vld [vmem:[#allocation3 + $0x172] sm:$0xff] }
 0x25d   : > { %19839 = vmatprep.mubr.msk.f32.mxu0 %vm636_vm1, %v6205_v61  ;;  %v3648_v10 = vpop.f32.mrf.mxu1  ;;  %v6567_v61 = vld [vmem:[#allocation3 + $0xb] sm:$0xff] }
 0x25e   : > { %27185 = vst [vmem:[#allocation41_spill] sm:$0xff] %v23103_v25  ;;  %v4037_v63 = vpop.f32.mrf.mxu0  ;;  %v23108_v12 = vadd.f32 %v19538_v8, %v3704_v6  ;;  %v3703_v35 = vadd.f32 %v3648_v10, %v22914_v31  ;;  %v6956_v6 = vld [vmem:[#allocation3 + $0xc] sm:$0xff] }
 0x25f   : > { %v19491_v48 = vpop.f32.mrf.mxu1  ;;  %19790 = vmatmul.mubr.msk.f32.gmra.mxu1 %vm636_vm1, %v5492_v27  ;;  %v6568_v27 = vld [vmem:[#allocation3 + $0x1b] sm:$0xff] }
 0x260   : > { %v19541_v60 = vpop.f32.mrf.mxu0  ;;  %19840 = vmatmul.mubr.msk.f32.gmra.mxu0 %vm636_vm1, %v6206_v59  ;;  %v23113_v23 = vadd.f32 %v4037_v63, %v3703_v35  ;;  %v3706_v17 = vadd.f32 %v19491_v48, %v22919_v55  ;;  %19792 = vmatprep.mubr.msk.f32.mxu1 %vm636_vm1, %v5493_v54  ;;  %v6957_v59 = vld [vmem:[#allocation3 + $0x1c] sm:$0xff]  ;;  %v23145_v54 = vld [vmem:[%s27032_s13 + $0x20] sm:$0xf] }
 0x261   : > { %19842 = vmatprep.mubr.msk.f32.mxu0 %vm636_vm1, %v6207_v44  ;;  %v3658_v32 = vpop.f32.mrf.mxu1  ;;  %v6569_v44 = vld [vmem:[#allocation3 + $0x23] sm:$0xff] }
 0x262   : > { %27186 = vst [vmem:[#allocation42_spill] sm:$0xff] %v23113_v23  ;;  %v4047_v31 = vpop.f32.mrf.mxu0  ;;  %v23118_v1 = vadd.f32 %v19541_v60, %v3706_v17  ;;  %v3705_v33 = vadd.f32 %v3658_v32, %v22924_v57  ;;  %v6958_v17 = vld [vmem:[#allocation3 + $0x24] sm:$0xff]  ;;  %v6968_v23 = vld [vmem:[#allocation3 + $0x9c] sm:$0xff] }
 0x263   : > { %v19494_v45 = vpop.f32.mrf.mxu1  ;;  %19793 = vmatmul.mubr.msk.f32.gmra.mxu1 %vm636_vm1, %v5494_v56 }
 0x264   : > { %v19544_v8 = vpop.f32.mrf.mxu0  ;;  %19843 = vmatmul.mubr.msk.f32.gmra.mxu0 %vm636_vm1, %v6208_v20  ;;  %v23123_v55 = vadd.f32 %v4047_v31, %v3705_v33  ;;  %v3708_v52 = vadd.f32 %v19494_v45, %v22929_v15  ;;  %19847 = vmatprep.mubr.msk.f32.mxu1 %vm636_vm1, %v6566_v18  ;;  %v23140_v15 = vld [vmem:[%s27032_s13 + $0x1c] sm:$0xf]  ;;  %v6571_v20 = vld [vmem:[#allocation3 + $0x3b] sm:$0xff] }
 0x265   : > { %19897 = vmatprep.mubr.msk.f32.mxu0 %vm636_vm1, %v6955_v9  ;;  %v3668_v10 = vpop.f32.mrf.mxu1  ;;  %v6959_v9 = vld [vmem:[#allocation3 + $0x34] sm:$0xff]  ;;  %v6960_v45 = vld [vmem:[#allocation3 + $0x3c] sm:$0xff] }
 0x266   : > { %27187 = vst [vmem:[#allocation43_spill] sm:$0xff] %v23123_v55  ;;  %v4057_v57 = vpop.f32.mrf.mxu0  ;;  %v23128_v63 = vadd.f32 %v19544_v8, %v3708_v52  ;;  %v3707_v35 = vadd.f32 %v3668_v10, %v22946_v7 }
 0x267   : > { %v23131_v48 = vpop.f32.mrf.mxu1  ;;  %19848 = vmatmul.mubr.msk.f32.vlgmr.msra.gmra.mxu1 %vm636_vm1, %v6567_v61  ;;  %v6572_v61 = vld [vmem:[#allocation3 + $0x4b] sm:$0xff] }
 0x268   : > { %v23133_v60 = vpop.f32.mrf.mxu0  ;;  %19898 = vmatmul.mubr.msk.f32.vlgmr.msra.gmra.mxu0 %vm636_vm1, %v6956_v6  ;;  %v23147_v7 = vadd.f32 %v4057_v57, %v3707_v35  ;;  %19946 = vmatpush3.msk.msra.mxu1 %vm733_vm0, %v22939_v41  ;;  %v6961_v6 = vld [vmem:[#allocation3 + $0x4c] sm:$0xff] }
 0x269   : > { %19996 = vmatpush3.msk.msra.mxu0 %vm733_vm0, %v22944_v4  ;;  %v23153_v32 = vpop.f32.mrf.mxu1  ;;  %19850 = vmatprep.mubr.msk.f32.mxu1 %vm636_vm1, %v6568_v27  ;;  %v6570_v4 = vld [vmem:[#allocation3 + $0x33] sm:$0xff] }
 0x26a   : > { %27188 = vst [vmem:[#allocation44_spill] sm:$0xff] %v23147_v7  ;;  %v23155_v31 = vpop.f32.mrf.mxu0  ;;  %19900 = vmatprep.mubr.msk.f32.mxu0 %vm636_vm1, %v6957_v59  ;;  %20045 = vmatprep.subr.msk.mxu1 %vm733_vm0, %v23140_v15  ;;  %v6573_v59 = vld [vmem:[#allocation3 + $0x53] sm:$0xff]  ;;  %v6966_v7 = vld [vmem:[#allocation3 + $0x84] sm:$0xff] }
 0x26b   : > { %20095 = vmatprep.subr.msk.mxu0 %vm733_vm0, %v23145_v54  ;;  %v23163_v41 = vpop.f32.mrf.mxu1  ;;  %19851 = vmatmul.mubr.msk.f32.gmra.mxu1 %vm636_vm1, %v6569_v44  ;;  %v6962_v44 = vld [vmem:[#allocation3 + $0x54] sm:$0xff] }
 0x26c   : > { %v23165_v18 = vpop.f32.mrf.mxu0  ;;  %19901 = vmatmul.mubr.msk.f32.gmra.mxu0 %vm636_vm1, %v6958_v17  ;;  %19853 = vmatprep.mubr.msk.f32.mxu1 %vm636_vm1, %v6570_v4 }
 0x26d   : > { %19903 = vmatprep.mubr.msk.f32.mxu0 %vm636_vm1, %v6959_v9  ;;  %v23171_v33 = vpop.f32.mrf.mxu1  ;;  %v6574_v9 = vld [vmem:[#allocation3 + $0x63] sm:$0xff] }
 0x26e   : > { %v23173_v56 = vpop.f32.mrf.mxu0 }
 0x26f   : > { %v19555_v8 = vpop.f32.mrf.mxu1  ;;  %19854 = vmatmul.mubr.msk.f32.gmra.mxu1 %vm636_vm1, %v6571_v20 }
 0x270   : > { %v19605_v52 = vpop.f32.mrf.mxu0  ;;  %19904 = vmatmul.mubr.msk.f32.gmra.mxu0 %vm636_vm1, %v6960_v45  ;;  %v4461_v10 = vadd.f32 %v19555_v8, %v22992_v14  ;;  %19856 = vmatprep.mubr.msk.f32.mxu1 %vm636_vm1, %v6572_v61  ;;  %v6963_v14 = vld [vmem:[#allocation3 + $0x64] sm:$0xff] }
 0x271   : > { %19906 = vmatprep.mubr.msk.f32.mxu0 %vm636_vm1, %v6961_v6  ;;  %v23180_v57 = vpop.f32.mrf.mxu1  ;;  %v6575_v61 = vld [vmem:[#allocation3 + $0x6b] sm:$0xff] }
 0x272   : > { %v23182_v35 = vpop.f32.mrf.mxu0  ;;  %v23184_v27 = vadd.f32 %v19605_v52, %v4461_v10  ;;  %v6964_v6 = vld [vmem:[#allocation3 + $0x6c] sm:$0xff] }
 0x273   : > { %v19558_v17 = vpop.f32.mrf.mxu1  ;;  %19857 = vmatmul.mubr.msk.f32.gmra.mxu1 %vm636_vm1, %v6573_v59 }
 0x274   : > { %v19608_v4 = vpop.f32.mrf.mxu0  ;;  %19907 = vmatmul.mubr.msk.f32.gmra.mxu0 %vm636_vm1, %v6962_v44  ;;  %v4463_v20 = vadd.f32 %v19558_v17, %v23008_v16  ;;  %19859 = vmatprep.mubr.msk.f32.mxu1 %vm636_vm1, %v6574_v9  ;;  %v6576_v44 = vld [vmem:[#allocation3 + $0x7b] sm:$0xff] }
 0x275   : > { %19909 = vmatprep.mubr.msk.f32.mxu0 %vm636_vm1, %v6963_v14  ;;  %v23191_v45 = vpop.f32.mrf.mxu1  ;;  %v6965_v16 = vld [vmem:[#allocation3 + $0x7c] sm:$0xff] }
 0x276   : > { %v23193_v8 = vpop.f32.mrf.mxu0  ;;  %v23195_v52 = vadd.f32 %v19608_v4, %v4463_v20  ;;  %v6577_v20 = vld [vmem:[#allocation3 + $0x83] sm:$0xff] }
 0x277   : > { %v19561_v10 = vpop.f32.mrf.mxu1  ;;  %19860 = vmatmul.mubr.msk.f32.gmra.mxu1 %vm636_vm1, %v6575_v61 }
 0x278   : > { %v19611_v59 = vpop.f32.mrf.mxu0  ;;  %19910 = vmatmul.mubr.msk.f32.gmra.mxu0 %vm636_vm1, %v6964_v6  ;;  %v4465_v17 = vadd.f32 %v19561_v10, %v23018_v28  ;;  %19862 = vmatprep.mubr.msk.f32.mxu1 %vm636_vm1, %v6576_v44  ;;  %v6578_v6 = vld [vmem:[#allocation3 + $0x93] sm:$0xff] }
 0x279   : > { %19912 = vmatprep.mubr.msk.f32.mxu0 %vm636_vm1, %v6965_v16  ;;  %v23202_v9 = vpop.f32.mrf.mxu1  ;;  %v6967_v28 = vld [vmem:[#allocation3 + $0x94] sm:$0xff] }
 0x27a   : > { %v23204_v4 = vpop.f32.mrf.mxu0  ;;  %v23206_v14 = vadd.f32 %v19611_v59, %v4465_v17  ;;  %v6579_v17 = vld [vmem:[#allocation3 + $0x9b] sm:$0xff] }
 0x27b   : > { %v19564_v55 = vpop.f32.mrf.mxu1  ;;  %19863 = vmatmul.mubr.msk.f32.gmra.mxu1 %vm636_vm1, %v6577_v20 }
 0x27c   : > { %v19614_v61 = vpop.f32.mrf.mxu0  ;;  %19913 = vmatmul.mubr.msk.f32.gmra.mxu0 %vm636_vm1, %v6966_v7  ;;  %v4467_v10 = vadd.f32 %v19564_v55, %v23028_v47  ;;  %19865 = vmatprep.mubr.msk.f32.mxu1 %vm636_vm1, %v6578_v6  ;;  %v6580_v7 = vld [vmem:[#allocation3 + $0xab] sm:$0xff] }
 0x27d   : > { %19915 = vmatprep.mubr.msk.f32.mxu0 %vm636_vm1, %v6967_v28  ;;  %v23213_v44 = vpop.f32.mrf.mxu1  ;;  %v6969_v47 = vld [vmem:[#allocation3 + $0xac] sm:$0xff] }
 0x27e   : > { %v23215_v59 = vpop.f32.mrf.mxu0  ;;  %v23217_v16 = vadd.f32 %v19614_v61, %v4467_v10  ;;  %v6581_v10 = vld [vmem:[#allocation3 + $0xb3] sm:$0xff] }
 0x27f   : > { %v19567_v25 = vpop.f32.mrf.mxu1  ;;  %19866 = vmatmul.mubr.msk.f32.gmra.mxu1 %vm636_vm1, %v6579_v17 }
 0x280   : > { %v19617_v20 = vpop.f32.mrf.mxu0  ;;  %19916 = vmatmul.mubr.msk.f32.gmra.mxu0 %vm636_vm1, %v6968_v23  ;;  %v4469_v55 = vadd.f32 %v19567_v25, %v23038_v3  ;;  %19868 = vmatprep.mubr.msk.f32.mxu1 %vm636_vm1, %v6580_v7  ;;  %v6582_v23 = vld [vmem:[#allocation3 + $0xc3] sm:$0xff] }
 0x281   : > { %19918 = vmatprep.mubr.msk.f32.mxu0 %vm636_vm1, %v6969_v47  ;;  %v23224_v6 = vpop.f32.mrf.mxu1  ;;  %v6971_v3 = vld [vmem:[#allocation3 + $0xc4] sm:$0xff] }
 0x282   : > { %v23226_v61 = vpop.f32.mrf.mxu0  ;;  %v23228_v28 = vadd.f32 %v19617_v20, %v4469_v55  ;;  %v6583_v55 = vld [vmem:[#allocation3 + $0xcb] sm:$0xff] }
 0x283   : > { %v19570_v37 = vpop.f32.mrf.mxu1  ;;  %19869 = vmatmul.mubr.msk.f32.gmra.mxu1 %vm636_vm1, %v6581_v10 }
 0x284   : > { %v19620_v17 = vpop.f32.mrf.mxu0  ;;  %19919 = vmatmul.mubr.msk.f32.gmra.mxu0 %vm636_vm1, %v6970_v42  ;;  %v4471_v25 = vadd.f32 %v19570_v37, %v23048_v11  ;;  %19871 = vmatprep.mubr.msk.f32.mxu1 %vm636_vm1, %v6582_v23  ;;  %v6584_v42 = vld [vmem:[#allocation3 + $0xdb] sm:$0xff] }
 0x285   : > { %19921 = vmatprep.mubr.msk.f32.mxu0 %vm636_vm1, %v6971_v3  ;;  %v23235_v7 = vpop.f32.mrf.mxu1  ;;  %v6973_v11 = vld [vmem:[#allocation3 + $0xdc] sm:$0xff] }
 0x286   : > { %v23237_v20 = vpop.f32.mrf.mxu0  ;;  %v23239_v47 = vadd.f32 %v19620_v17, %v4471_v25  ;;  %v6585_v25 = vld [vmem:[#allocation3 + $0xe3] sm:$0xff] }
 0x287   : > { %27189 = vst [vmem:[#allocation45_spill] sm:$0xff] %v23237_v20  ;;  %v19573_v51 = vpop.f32.mrf.mxu1  ;;  %19872 = vmatmul.mubr.msk.f32.gmra.mxu1 %vm636_vm1, %v6583_v55 }
 0x288   : > { %27190 = vst [vmem:[#allocation46_spill] sm:$0xff] %v23239_v47  ;;  %v19623_v10 = vpop.f32.mrf.mxu0  ;;  %19922 = vmatmul.mubr.msk.f32.gmra.mxu0 %vm636_vm1, %v6972_v22  ;;  %v4473_v37 = vadd.f32 %v19573_v51, %v23058_v24  ;;  %19874 = vmatprep.mubr.msk.f32.mxu1 %vm636_vm1, %v6584_v42  ;;  %v6974_v47 = vld [vmem:[#allocation3 + $0xe4] sm:$0xff]  ;;  %v6586_v22 = vld [vmem:[#allocation3 + $0xf3] sm:$0xff] }
 0x289   : > { %19924 = vmatprep.mubr.msk.f32.mxu0 %vm636_vm1, %v6973_v11  ;;  %v23246_v23 = vpop.f32.mrf.mxu1  ;;  %v6975_v24 = vld [vmem:[#allocation3 + $0xf4] sm:$0xff] }
 0x28a   : > { %v23248_v17 = vpop.f32.mrf.mxu0  ;;  %v23250_v3 = vadd.f32 %v19623_v10, %v4473_v37  ;;  %v6587_v37 = vld [vmem:[#allocation3 + $0xfb] sm:$0xff] }
 0x28b   : > { %27191 = vst [vmem:[#allocation47_spill] sm:$0xff] %v23248_v17  ;;  %v19576_v20 = vpop.f32.mrf.mxu1  ;;  %19875 = vmatmul.mubr.msk.f32.gmra.mxu1 %vm636_vm1, %v6585_v25 }
 0x28c   : > { %27192 = vst [vmem:[#allocation48_spill] sm:$0xff] %v23250_v3  ;;  %v19626_v55 = vpop.f32.mrf.mxu0  ;;  %19925 = vmatmul.mubr.msk.f32.gmra.mxu0 %vm636_vm1, %v6974_v47  ;;  %v4475_v51 = vadd.f32 %v19576_v20, %v23068_v58  ;;  %19877 = vmatprep.mubr.msk.f32.mxu1 %vm636_vm1, %v6586_v22  ;;  %v6976_v3 = vld [vmem:[#allocation3 + $0xfc] sm:$0xff]  ;;  %v6588_v47 = vld [vmem:[#allocation3 + $0x10b] sm:$0xff] }
 0x28d   : > { %19927 = vmatprep.mubr.msk.f32.mxu0 %vm636_vm1, %v6975_v24  ;;  %v23257_v42 = vpop.f32.mrf.mxu1  ;;  %v6977_v58 = vld [vmem:[#allocation3 + $0x10c] sm:$0xff] }
 0x28e   : > { %v23259_v10 = vpop.f32.mrf.mxu0  ;;  %v23261_v11 = vadd.f32 %v19626_v55, %v4475_v51  ;;  %v6589_v51 = vld [vmem:[#allocation3 + $0x113] sm:$0xff] }
 0x28f   : > { %27193 = vst [vmem:[#allocation49_spill] sm:$0xff] %v23259_v10  ;;  %v19579_v17 = vpop.f32.mrf.mxu1  ;;  %19878 = vmatmul.mubr.msk.f32.gmra.mxu1 %vm636_vm1, %v6587_v37 }
 0x290   : > { %27194 = vst [vmem:[#allocation50_spill] sm:$0xff] %v23261_v11  ;;  %v19629_v25 = vpop.f32.mrf.mxu0  ;;  %19928 = vmatmul.mubr.msk.f32.gmra.mxu0 %vm636_vm1, %v6976_v3  ;;  %v4477_v20 = vadd.f32 %v19579_v17, %v23078_v38  ;;  %19880 = vmatprep.mubr.msk.f32.mxu1 %vm636_vm1, %v6588_v47  ;;  %v6978_v11 = vld [vmem:[#allocation3 + $0x114] sm:$0xff]  ;;  %v6590_v3 = vld [vmem:[#allocation3 + $0x123] sm:$0xff] }
 0x291   : > { %19930 = vmatprep.mubr.msk.f32.mxu0 %vm636_vm1, %v6977_v58  ;;  %v23268_v22 = vpop.f32.mrf.mxu1  ;;  %v6979_v38 = vld [vmem:[#allocation3 + $0x124] sm:$0xff] }
 0x292   : > { %v23270_v55 = vpop.f32.mrf.mxu0  ;;  %v23272_v24 = vadd.f32 %v19629_v25, %v4477_v20  ;;  %v6591_v20 = vld [vmem:[#allocation3 + $0x12b] sm:$0xff] }
 0x293   : > { %27195 = vst [vmem:[#allocation51_spill] sm:$0xff] %v23270_v55  ;;  %v19582_v10 = vpop.f32.mrf.mxu1  ;;  %19881 = vmatmul.mubr.msk.f32.gmra.mxu1 %vm636_vm1, %v6589_v51 }
 0x294   : > { %27196 = vst [vmem:[#allocation52_spill] sm:$0xff] %v23272_v24  ;;  %v19632_v37 = vpop.f32.mrf.mxu0  ;;  %19931 = vmatmul.mubr.msk.f32.gmra.mxu0 %vm636_vm1, %v6978_v11  ;;  %v4479_v17 = vadd.f32 %v19582_v10, %v23088_v62  ;;  %19883 = vmatprep.mubr.msk.f32.mxu1 %vm636_vm1, %v6590_v3  ;;  %v6980_v24 = vld [vmem:[#allocation3 + $0x12c] sm:$0xff]  ;;  %v6592_v11 = vld [vmem:[#allocation3 + $0x13b] sm:$0xff] }
 0x295   : > { %19933 = vmatprep.mubr.msk.f32.mxu0 %vm636_vm1, %v6979_v38  ;;  %v23279_v47 = vpop.f32.mrf.mxu1  ;;  %v6981_v62 = vld [vmem:[#allocation3 + $0x13c] sm:$0xff] }
 0x296   : > { %v23281_v25 = vpop.f32.mrf.mxu0  ;;  %v23283_v58 = vadd.f32 %v19632_v37, %v4479_v17  ;;  %v6593_v17 = vld [vmem:[#allocation3 + $0x143] sm:$0xff] }
 0x297   : > { %27197 = vst [vmem:[#allocation53_spill] sm:$0xff] %v23281_v25  ;;  %v19585_v55 = vpop.f32.mrf.mxu1  ;;  %19884 = vmatmul.mubr.msk.f32.gmra.mxu1 %vm636_vm1, %v6591_v20 }
 0x298   : > { %27198 = vst [vmem:[#allocation54_spill] sm:$0xff] %v23283_v58  ;;  %v19635_v51 = vpop.f32.mrf.mxu0  ;;  %19934 = vmatmul.mubr.msk.f32.gmra.mxu0 %vm636_vm1, %v6980_v24  ;;  %v4481_v10 = vadd.f32 %v19585_v55, %v23098_v19  ;;  %19886 = vmatprep.mubr.msk.f32.mxu1 %vm636_vm1, %v6592_v11  ;;  %v6982_v58 = vld [vmem:[#allocation3 + $0x144] sm:$0xff]  ;;  %v6594_v24 = vld [vmem:[#allocation3 + $0x153] sm:$0xff] }
 0x299   : > { %19936 = vmatprep.mubr.msk.f32.mxu0 %vm636_vm1, %v6981_v62  ;;  %v23290_v3 = vpop.f32.mrf.mxu1  ;;  %v6983_v19 = vld [vmem:[#allocation3 + $0x154] sm:$0xff] }
 0x29a   : > { %v23292_v37 = vpop.f32.mrf.mxu0  ;;  %v23294_v38 = vadd.f32 %v19635_v51, %v4481_v10  ;;  %v6595_v10 = vld [vmem:[#allocation3 + $0x15b] sm:$0xff] }
 0x29b   : > { %27199 = vst [vmem:[#allocation55_spill] sm:$0xff] %v23292_v37  ;;  %v19588_v25 = vpop.f32.mrf.mxu1  ;;  %19887 = vmatmul.mubr.msk.f32.gmra.mxu1 %vm636_vm1, %v6593_v17 }
 0x29c   : > { %27200 = vst [vmem:[#allocation56_spill] sm:$0xff] %v23294_v38  ;;  %v19638_v20 = vpop.f32.mrf.mxu0  ;;  %19937 = vmatmul.mubr.msk.f32.gmra.mxu0 %vm636_vm1, %v6982_v58  ;;  %v4483_v55 = vadd.f32 %v19588_v25, %v23108_v12  ;;  %19889 = vmatprep.mubr.msk.f32.mxu1 %vm636_vm1, %v6594_v24  ;;  %v6984_v38 = vld [vmem:[#allocation3 + $0x15c] sm:$0xff]  ;;  %v6596_v58 = vld [vmem:[#allocation3 + $0x16b] sm:$0xff] }
 0x29d   : > { %19939 = vmatprep.mubr.msk.f32.mxu0 %vm636_vm1, %v6983_v19  ;;  %v23301_v11 = vpop.f32.mrf.mxu1  ;;  %v6985_v12 = vld [vmem:[#allocation3 + $0x16c] sm:$0xff]  ;;  %v7734_v19 = vld [vmem:[#allocation3 + $0x19] sm:$0xff] }
 0x29e   : > { %27201 = vst [vmem:[#allocation57_spill] sm:$0xff] %v23301_v11  ;;  %v23303_v51 = vpop.f32.mrf.mxu0  ;;  %v23305_v62 = vadd.f32 %v19638_v20, %v4483_v55  ;;  %v4457_v55 = vadd.f32 %v23131_v48, %v22958_v36  ;;  %v7735_v36 = vld [vmem:[#allocation3 + $0x21] sm:$0xff] }
 0x29f   : > { %27202 = vst [vmem:[#allocation58_spill] sm:$0xff] %v23303_v51  ;;  %v19591_v37 = vpop.f32.mrf.mxu1  ;;  %19890 = vmatmul.mubr.msk.f32.gmra.mxu1 %vm636_vm1, %v6595_v10  ;;  %v6597_v10 = vld [vmem:[#allocation3 + $0x173] sm:$0xff] }
 0x2a0   : > { %27203 = vst [vmem:[#allocation59_spill] sm:$0xff] %v23305_v62  ;;  %v19641_v17 = vpop.f32.mrf.mxu0  ;;  %19940 = vmatmul.mubr.msk.f32.gmra.mxu0 %vm636_vm1, %v6984_v38  ;;  %v4485_v25 = vadd.f32 %v19591_v37, %v23118_v1  ;;  %19892 = vmatprep.mubr.msk.f32.mxu1 %vm636_vm1, %v6596_v58  ;;  %v6986_v38 = vld [vmem:[#allocation3 + $0x174] sm:$0xff]  ;;  %v4456_v1 = vadd.f32 %v23153_v32, %v22970_v21 }
 0x2a1   : > { %19942 = vmatprep.mubr.msk.f32.mxu0 %vm636_vm1, %v6985_v12  ;;  %v23312_v24 = vpop.f32.mrf.mxu1  ;;  %v4846_v58 = vadd.f32 %v23133_v60, %v4457_v55  ;;  %v4459_v12 = vadd.f32 %v23163_v41, %v22976_v49  ;;  %v4458_v21 = vadd.f32 %v23171_v33, %v22986_v43  ;;  %v23352_v49 = vld [vmem:[%s27032_s13 + $0x24] sm:$0xf]  ;;  %v23357_v43 = vld [vmem:[%s27032_s13 + $0x28] sm:$0xf] }
 0x2a2   : > { %v23314_v20 = vpop.f32.mrf.mxu0  ;;  %v23318_v62 = vadd.f32 %v19641_v17, %v4485_v25  ;;  %v4845_v60 = vadd.f32 %v23155_v31, %v4456_v1  ;;  %v23372_v31 = vld [vmem:[%s27028_s9] ss:$0 sm:$0xff] }
 0x2a3   : > { %v19594_v51 = vpop.f32.mrf.mxu1  ;;  %19893 = vmatmul.mubr.msk.f32.gmra.mxu1 %vm636_vm1, %v6597_v10  ;;  %v4847_v55 = vadd.f32 %v23173_v56, %v4458_v21 }
 0x2a4   : > { %v19644_v11 = vpop.f32.mrf.mxu0  ;;  %19943 = vmatmul.mubr.msk.f32.gmra.mxu0 %vm636_vm1, %v6986_v38  ;;  %v4487_v37 = vadd.f32 %v19594_v51, %v23128_v63  ;;  %19947 = vmatprep.mubr.msk.f32.mxu1 %vm636_vm1, %v22932_v0  ;;  %v23342_v0 = vld [vmem:[%s27027_s8] ss:$0 sm:$0xff]  ;;  %v4848_v51 = vadd.f32 %v23165_v18, %v4459_v12 }
 0x2a5   : > { %19997 = vmatprep.mubr.msk.f32.mxu0 %vm636_vm1, %v7734_v19  ;;  %v23328_v48 = vpop.f32.mrf.mxu1  ;;  %v7738_v18 = vld [vmem:[#allocation3 + $0x49] sm:$0xff] }
 0x2a6   : > { %v23330_v17 = vpop.f32.mrf.mxu0  ;;  %v23335_v25 = vadd.f32 %v19644_v11, %v4487_v37 }
 0x2a7   : > { %v19649_v63 = vpop.f32.mrf.mxu1  ;;  %19948 = vmatmul.mubr.msk.f32.vlgmr.msra.gmra.mxu1 %vm636_vm1, %v22953_v29  ;;  %v7736_v29 = vld [vmem:[#allocation3 + $0x31] sm:$0xff] }
 0x2a8   : > { %v23344_v32 = vpop.f32.mrf.mxu0  ;;  %19998 = vmatmul.mubr.msk.f32.vlgmr.msra.gmra.mxu0 %vm636_vm1, %v7735_v36  ;;  %v5235_v41 = vadd.f32 %v19649_v63, %v4846_v58  ;;  %20046 = vmatpush3.msk.msra.mxu1 %vm733_vm0, %v23140_v15  ;;  %v4462_v63 = vadd.f32 %v23191_v45, %v23013_v13  ;;  %v7740_v13 = vld [vmem:[#allocation3 + $0x61] sm:$0xff] }
 0x2a9   : > { %19950 = vmatprep.mubr.msk.f32.mxu1 %vm636_vm1, %v22968_v46  ;;  %20000 = vmatprep.mubr.msk.f32.mxu0 %vm636_vm1, %v7736_v29  ;;  %v5075_v33 = vpop.f32.mrf.mxu1  ;;  %v7737_v46 = vld [vmem:[#allocation3 + $0x39] sm:$0xff] }
 0x2aa   : > { %v23365_v11 = vpop.f32.mrf.mxu0  ;;  %20096 = vmatpush3.msk.msra.mxu0 %vm733_vm0, %v23145_v54  ;;  %v5274_v15 = vmul.f32 %v23342_v0, %v5235_v41  ;;  %v5234_v19 = vadd.f32 %v5075_v33, %v4845_v60  ;;  %20145 = vmatprep.subr.msk.mxu1 %vm733_vm0, %v23352_v49  ;;  %v4460_v54 = vadd.f32 %v23180_v57, %v23002_v50 }
 0x2ab   : > { %20195 = vmatprep.subr.msk.mxu0 %vm733_vm0, %v23357_v43  ;;  %v19652_v10 = vpop.f32.mrf.mxu1  ;;  %19951 = vmatmul.mubr.msk.f32.gmra.mxu1 %vm636_vm1, %v22979_v39  ;;  %v7739_v39 = vld [vmem:[#allocation3 + $0x51] sm:$0xff] }
 0x2ac   : > { %v23383_v38 = vpop.f32.mrf.mxu0  ;;  %20001 = vmatmul.mubr.msk.f32.gmra.mxu0 %vm636_vm1, %v7737_v46  ;;  %v5273_v1 = vmul.f32 %v23342_v0, %v5234_v19  ;;  %v5237_v37 = vadd.f32 %v19652_v10, %v4848_v51  ;;  %19953 = vmatprep.mubr.msk.f32.mxu1 %vm636_vm1, %v22984_v53  ;;  %v5313_v56 = vadd.f32 %v23372_v31, %v5274_v15  ;;  %v7352_v15 = vld [vmem:[#allocation3 + $0x68] sm:$0xff]  ;;  %v7353_v10 = vld [vmem:[#allocation3 + $0x78] sm:$0xff] }
 0x2ad   : > { %20003 = vmatprep.mubr.msk.f32.mxu0 %vm636_vm1, %v7738_v18  ;;  %v5085_v50 = vpop.f32.mrf.mxu1  ;;  %v4849_v21 = vadd.f32 %v23182_v35, %v4460_v54  ;;  %v7741_v19 = vld [vmem:[#allocation3 + $0x69] sm:$0xff] }
 0x2ae   : > { %v23393_v57 = vpop.f32.mrf.mxu0  ;;  %v5276_v36 = vmul.f32 %v23342_v0, %v5237_v37  ;;  %v5236_v58 = vadd.f32 %v5085_v50, %v4847_v55  ;;  %v5345_v12 = vmax.f32 %v5313_v56, 0.0  ;;  %v5312_v53 = vadd.f32 %v23372_v31, %v5273_v1 }
 0x2af   : > { %v19655_v60 = vpop.f32.mrf.mxu1  ;;  %19954 = vmatmul.mubr.msk.f32.gmra.mxu1 %vm636_vm1, %v22995_v2  ;;  %v4851_v37 = vadd.f32 %v23193_v8, %v4462_v63 }
 0x2b0   : > { %v23399_v41 = vpop.f32.mrf.mxu0  ;;  %20004 = vmatmul.mubr.msk.f32.gmra.mxu0 %vm636_vm1, %v7739_v39  ;;  %v5275_v29 = vmul.f32 %v23342_v0, %v5236_v58  ;;  %v5239_v33 = vadd.f32 %v19655_v60, %v23184_v27  ;;  %19956 = vmatprep.mubr.msk.f32.mxu1 %vm636_vm1, %v23000_v40  ;;  %v5315_v35 = vadd.f32 %v23372_v31, %v5276_v36  ;;  %v5344_v18 = vmax.f32 %v5312_v53, 0.0  ;;  %v7354_v39 = vld [vmem:[#allocation3 + $0x80] sm:$0xff]  ;;  %v7355_v53 = vld [vmem:[#allocation3 + $0x90] sm:$0xff] }
 0x2b1   : > { %16026 = vrot.lane.b32.xlu0 %v5345_v12, %s21030_s22  ;;  %20006 = vmatprep.mubr.msk.f32.mxu0 %vm636_vm1, %v7740_v13  ;;  %v5095_v2 = vpop.f32.mrf.mxu1  ;;  %v4464_v27 = vadd.f32 %v23202_v9, %v23023_v26  ;;  %v7742_v26 = vld [vmem:[#allocation3 + $0x79] sm:$0xff]  ;;  %v7743_v12 = vld [vmem:[#allocation3 + $0x81] sm:$0xff] }
 0x2b2   : > { %v23412_v45 = vpop.f32.mrf.mxu0  ;;  %v5238_v51 = vadd.f32 %v5095_v2, %v4849_v21  ;;  %v5347_v46 = vmax.f32 %v5315_v35, 0.0  ;;  %v5278_v40 = vmul.f32 %v23342_v0, %v5239_v33  ;;  %v5314_v1 = vadd.f32 %v23372_v31, %v5275_v29  ;;  %v7744_v29 = vld [vmem:[#allocation3 + $0x91] sm:$0xff] }
 0x2b3   : > { %v19658_v55 = vpop.f32.mrf.mxu1  ;;  %19957 = vmatmul.mubr.msk.f32.gmra.mxu1 %vm636_vm1, %v7352_v15  ;;  %v4853_v21 = vadd.f32 %v23204_v4, %v4464_v27  ;;  %v4466_v35 = vadd.f32 %v23213_v44, %v23033_v34  ;;  %v7356_v27 = vld [vmem:[#allocation3 + $0x98] sm:$0xff] }
 0x2b4   : > { %v23417_v54 = vpop.f32.mrf.mxu0  ;;  %20007 = vmatmul.mubr.msk.f32.gmra.mxu0 %vm636_vm1, %v7741_v19  ;;  %v5277_v56 = vmul.f32 %v23342_v0, %v5238_v51  ;;  %v5241_v50 = vadd.f32 %v19658_v55, %v23195_v52  ;;  %19959 = vmatprep.mubr.msk.f32.mxu1 %vm636_vm1, %v7353_v10  ;;  %v5346_v33 = vmax.f32 %v5314_v1, 0.0  ;;  %v5317_v13 = vadd.f32 %v23372_v31, %v5278_v40  ;;  %v7745_v40 = vld [vmem:[#allocation3 + $0x99] sm:$0xff]  ;;  %v7746_v1 = vld [vmem:[#allocation3 + $0xa9] sm:$0xff] }
 0x2b5   : > { %16030 = vrot.lane.b32.xlu1 %v5347_v46, %s21030_s22  ;;  %20009 = vmatprep.mubr.msk.f32.mxu0 %vm636_vm1, %v7742_v26  ;;  %v5105_v9 = vpop.f32.mrf.mxu1 }
 0x2b6   : > { %16024 = vrot.lane.b32.xlu0 %v5344_v18, %s21030_s22  ;;  %v23429_v36 = vpop.f32.mrf.mxu0  ;;  %v5240_v58 = vadd.f32 %v5105_v9, %v4851_v37  ;;  %v5316_v8 = vadd.f32 %v23372_v31, %v5277_v56  ;;  %v5280_v52 = vmul.f32 %v23342_v0, %v5241_v50  ;;  %v7357_v18 = vld [vmem:[#allocation3 + $0xa8] sm:$0xff]  ;;  %v5349_v37 = vmax.f32 %v5317_v13, 0.0 }
 0x2b7   : > { %v19661_v63 = vpop.f32.mrf.mxu1  ;;  %19960 = vmatmul.mubr.msk.f32.gmra.mxu1 %vm636_vm1, %v7354_v39  ;;  %v4855_v50 = vadd.f32 %v23215_v59, %v4466_v35  ;;  %v4470_v35 = vadd.f32 %v23235_v7, %v23053_v30  ;;  %v27204_v7 = vld [vmem:[#allocation37_spill] sm:$0xff] }
 0x2b8   : > { %v23434_v60 = vpop.f32.mrf.mxu0  ;;  %20010 = vmatmul.mubr.msk.f32.gmra.mxu0 %vm636_vm1, %v7743_v12  ;;  %v5279_v2 = vmul.f32 %v23342_v0, %v5240_v58  ;;  %v5243_v4 = vadd.f32 %v19661_v63, %v23206_v14  ;;  %19962 = vmatprep.mubr.msk.f32.mxu1 %vm636_vm1, %v7355_v53  ;;  %v5348_v51 = vmax.f32 %v5316_v8, 0.0  ;;  %v4468_v14 = vadd.f32 %v23224_v6, %v23043_v5  ;;  %v7358_v12 = vld [vmem:[#allocation3 + $0xb0] sm:$0xff]  ;;  %v7359_v53 = vld [vmem:[#allocation3 + $0xc0] sm:$0xff] }
 0x2b9   : > { %20012 = vmatprep.mubr.msk.f32.mxu0 %vm636_vm1, %v7744_v29  ;;  %16028 = vrot.lane.b32.xlu1 %v5346_v33, %s21030_s22  ;;  %v5115_v15 = vpop.f32.mrf.mxu1  ;;  %v5319_v56 = vadd.f32 %v23372_v31, %v5280_v52  ;;  %v7747_v8 = vld [vmem:[#allocation3 + $0xb1] sm:$0xff]  ;;  %v7748_v29 = vld [vmem:[#allocation3 + $0xc1] sm:$0xff] }
 0x2ba   : > { %v23446_v19 = vpop.f32.mrf.mxu0  ;;  %v5242_v46 = vadd.f32 %v5115_v15, %v4853_v21  ;;  %16032 = vrot.lane.b32.xlu0 %v5348_v51, %s21030_s22  ;;  %v5318_v34 = vadd.f32 %v23372_v31, %v5279_v2  ;;  %v5282_v44 = vmul.f32 %v23342_v0, %v5243_v4  ;;  %v4857_v21 = vadd.f32 %v23226_v61, %v4468_v14 }
 0x2bb   : > { %v19664_v55 = vpop.f32.mrf.mxu1  ;;  %19963 = vmatmul.mubr.msk.f32.gmra.mxu1 %vm636_vm1, %v7356_v27  ;;  %v5351_v33 = vmax.f32 %v5319_v56, 0.0  ;;  %v7360_v27 = vld [vmem:[#allocation3 + $0xc8] sm:$0xff]  ;;  %v27205_v56 = vld [vmem:[#allocation45_spill] sm:$0xff] }
 0x2bc   : > { %v23453_v10 = vpop.f32.mrf.mxu0  ;;  %20013 = vmatmul.mubr.msk.f32.gmra.mxu0 %vm636_vm1, %v7745_v40  ;;  %v5281_v26 = vmul.f32 %v23342_v0, %v5242_v46  ;;  %v5245_v5 = vadd.f32 %v19664_v55, %v23217_v16  ;;  %19965 = vmatprep.mubr.msk.f32.mxu1 %vm636_vm1, %v7357_v18  ;;  %v5350_v6 = vmax.f32 %v5318_v34, 0.0  ;;  %v5321_v13 = vadd.f32 %v23372_v31, %v5282_v44  ;;  %v7749_v40 = vld [vmem:[#allocation3 + $0xc9] sm:$0xff]  ;;  %v7361_v55 = vld [vmem:[#allocation3 + $0xd8] sm:$0xff] }
 0x2bd   : > { %20015 = vmatprep.mubr.msk.f32.mxu0 %vm636_vm1, %v7746_v1  ;;  %16034 = vrot.lane.b32.xlu1 %v5349_v37, %s21030_s22  ;;  %v5125_v9 = vpop.f32.mrf.mxu1  ;;  %v7750_v18 = vld [vmem:[#allocation3 + $0xd9] sm:$0xff] }
 0x2be   : > { %v23464_v58 = vpop.f32.mrf.mxu0  ;;  %v5244_v39 = vadd.f32 %v5125_v9, %v4855_v50  ;;  %16036 = vrot.lane.b32.xlu0 %v5350_v6, %s21030_s22  ;;  %v5320_v59 = vadd.f32 %v23372_v31, %v5281_v26  ;;  %v5284_v16 = vmul.f32 %v23342_v0, %v5245_v5  ;;  %v5353_v1 = vmax.f32 %v5321_v13, 0.0  ;;  %v27206_v5 = vld [vmem:[#allocation46_spill] sm:$0xff]  ;;  %v7363_v13 = vld [vmem:[#allocation3 + $0xf0] sm:$0xff] }
 0x2bf   : > { %v19667_v52 = vpop.f32.mrf.mxu1  ;;  %19966 = vmatmul.mubr.msk.f32.gmra.mxu1 %vm636_vm1, %v7358_v12  ;;  %v4859_v50 = vadd.f32 %v27205_v56, %v4470_v35  ;;  %v7752_v35 = vld [vmem:[#allocation3 + $0xf1] sm:$0xff] }
 0x2c0   : > { %v23470_v63 = vpop.f32.mrf.mxu0  ;;  %20016 = vmatmul.mubr.msk.f32.gmra.mxu0 %vm636_vm1, %v7747_v8  ;;  %v5283_v2 = vmul.f32 %v23342_v0, %v5244_v39  ;;  %v5247_v61 = vadd.f32 %v19667_v52, %v23228_v28  ;;  %19968 = vmatprep.mubr.msk.f32.mxu1 %vm636_vm1, %v7359_v53  ;;  %v5352_v4 = vmax.f32 %v5320_v59, 0.0  ;;  %v4472_v28 = vadd.f32 %v23246_v23, %v27204_v7  ;;  %v7362_v8 = vld [vmem:[#allocation3 + $0xe0] sm:$0xff] }
 0x2c1   : > { %20018 = vmatprep.mubr.msk.f32.mxu0 %vm636_vm1, %v7748_v29  ;;  %16038 = vrot.lane.b32.xlu1 %v5351_v33, %s21030_s22  ;;  %v5135_v51 = vpop.f32.mrf.mxu1  ;;  %v5323_v37 = vadd.f32 %v23372_v31, %v5284_v16  ;;  %v7751_v59 = vld [vmem:[#allocation3 + $0xe1] sm:$0xff] }
 0x2c2   : > { %v23482_v15 = vpop.f32.mrf.mxu0  ;;  %v5246_v46 = vadd.f32 %v5135_v51, %v4857_v21  ;;  %16040 = vrot.lane.b32.xlu0 %v5352_v4, %s21030_s22  ;;  %v5322_v30 = vadd.f32 %v23372_v31, %v5283_v2  ;;  %v5286_v34 = vmul.f32 %v23342_v0, %v5247_v61  ;;  %v27207_v16 = vld [vmem:[#allocation47_spill] sm:$0xff]  ;;  %v27208_v4 = vld [vmem:[#allocation38_spill] sm:$0xff] }
 0x2c3   : > { %v19670_v14 = vpop.f32.mrf.mxu1  ;;  %19969 = vmatmul.mubr.msk.f32.gmra.mxu1 %vm636_vm1, %v7360_v27  ;;  %v4861_v52 = vadd.f32 %v27207_v16, %v4472_v28  ;;  %v5355_v2 = vmax.f32 %v5323_v37, 0.0  ;;  %v4474_v51 = vadd.f32 %v23257_v42, %v27208_v4  ;;  %v27209_v27 = vld [vmem:[#allocation48_spill] sm:$0xff] }
 0x2c4   : > { %v23489_v44 = vpop.f32.mrf.mxu0  ;;  %20019 = vmatmul.mubr.msk.f32.gmra.mxu0 %vm636_vm1, %v7749_v40  ;;  %v5285_v26 = vmul.f32 %v23342_v0, %v5246_v46  ;;  %v5249_v23 = vadd.f32 %v19670_v14, %v27206_v5  ;;  %19971 = vmatprep.mubr.msk.f32.mxu1 %vm636_vm1, %v7361_v55  ;;  %v5354_v6 = vmax.f32 %v5322_v30, 0.0  ;;  %v5325_v61 = vadd.f32 %v23372_v31, %v5286_v34  ;;  %v7364_v34 = vld [vmem:[#allocation3 + $0xf8] sm:$0xff]  ;;  %v7754_v5 = vld [vmem:[#allocation3 + $0x109] sm:$0xff] }
 0x2c5   : > { %20021 = vmatprep.mubr.msk.f32.mxu0 %vm636_vm1, %v7750_v18  ;;  %16042 = vrot.lane.b32.xlu1 %v5353_v1, %s21030_s22  ;;  %v5145_v9 = vpop.f32.mrf.mxu1  ;;  %v7753_v55 = vld [vmem:[#allocation3 + $0xf9] sm:$0xff] }
 0x2c6   : > { %v23500_v39 = vpop.f32.mrf.mxu0  ;;  %v5248_v12 = vadd.f32 %v5145_v9, %v4859_v50  ;;  %16044 = vrot.lane.b32.xlu0 %v5354_v6, %s21030_s22  ;;  %v5324_v21 = vadd.f32 %v23372_v31, %v5285_v26  ;;  %v5288_v53 = vmul.f32 %v23342_v0, %v5249_v23  ;;  %v27210_v18 = vld [vmem:[#allocation39_spill] sm:$0xff]  ;;  %v7365_v26 = vld [vmem:[#allocation3 + $0x108] sm:$0xff]  ;;  %v5357_v23 = vmax.f32 %v5325_v61, 0.0  ;;  %v27211_v9 = vld [vmem:[#allocation49_spill] sm:$0xff] }
 0x2c7   : > { %v19673_v29 = vpop.f32.mrf.mxu1  ;;  %19972 = vmatmul.mubr.msk.f32.gmra.mxu1 %vm636_vm1, %v7362_v8  ;;  %v4476_v1 = vadd.f32 %v23268_v22, %v27210_v18 }
 0x2c8   : > { %v23506_v33 = vpop.f32.mrf.mxu0  ;;  %20022 = vmatmul.mubr.msk.f32.gmra.mxu0 %vm636_vm1, %v7751_v59  ;;  %v5287_v46 = vmul.f32 %v23342_v0, %v5248_v12  ;;  %v5251_v40 = vadd.f32 %v19673_v29, %v27209_v27  ;;  %19974 = vmatprep.mubr.msk.f32.mxu1 %vm636_vm1, %v7363_v13  ;;  %v5356_v30 = vmax.f32 %v5324_v21, 0.0  ;;  %v5327_v6 = vadd.f32 %v23372_v31, %v5288_v53  ;;  %v27212_v59 = vld [vmem:[#allocation50_spill] sm:$0xff]  ;;  %v7366_v53 = vld [vmem:[#allocation3 + $0x110] sm:$0xff]  ;;  %v7367_v27 = vld [vmem:[#allocation3 + $0x120] sm:$0xff] }
 0x2c9   : > { %20024 = vmatprep.mubr.msk.f32.mxu0 %vm636_vm1, %v7752_v35  ;;  %16046 = vrot.lane.b32.xlu1 %v5355_v2, %s21030_s22  ;;  %v5155_v7 = vpop.f32.mrf.mxu1  ;;  %v4863_v12 = vadd.f32 %v27211_v9, %v4474_v51  ;;  %v7755_v13 = vld [vmem:[#allocation3 + $0x111] sm:$0xff]  ;;  %v27213_v2 = vld [vmem:[#allocation51_spill] sm:$0xff] }
 0x2ca   : > { %v23518_v28 = vpop.f32.mrf.mxu0  ;;  %v5250_v14 = vadd.f32 %v5155_v7, %v4861_v52  ;;  %16048 = vrot.lane.b32.xlu0 %v5356_v30, %s21030_s22  ;;  %v5326_v42 = vadd.f32 %v23372_v31, %v5287_v46  ;;  %v5290_v37 = vmul.f32 %v23342_v0, %v5251_v40  ;;  %v4865_v61 = vadd.f32 %v27213_v2, %v4476_v1  ;;  %v7756_v40 = vld [vmem:[#allocation3 + $0x121] sm:$0xff]  ;;  %v27218_v2 = vld [vmem:[#allocation54_spill] sm:$0xff] }
 0x2cb   : > { %v19676_v56 = vpop.f32.mrf.mxu1  ;;  %19975 = vmatmul.mubr.msk.f32.gmra.mxu1 %vm636_vm1, %v7364_v34  ;;  %v5359_v30 = vmax.f32 %v5327_v6, 0.0  ;;  %v27216_v6 = vld [vmem:[#allocation41_spill] sm:$0xff] }
 0x2cc   : > { %v23525_v50 = vpop.f32.mrf.mxu0  ;;  %20025 = vmatmul.mubr.msk.f32.gmra.mxu0 %vm636_vm1, %v7753_v55  ;;  %v5289_v8 = vmul.f32 %v23342_v0, %v5250_v14  ;;  %v5253_v22 = vadd.f32 %v19676_v56, %v27212_v59  ;;  %19977 = vmatprep.mubr.msk.f32.mxu1 %vm636_vm1, %v7365_v26  ;;  %v5358_v21 = vmax.f32 %v5326_v42, 0.0  ;;  %v5329_v7 = vadd.f32 %v23372_v31, %v5290_v37  ;;  %v27214_v14 = vld [vmem:[#allocation40_spill] sm:$0xff] }
 0x2cd   : > { %20027 = vmatprep.mubr.msk.f32.mxu0 %vm636_vm1, %v7754_v5  ;;  %16050 = vrot.lane.b32.xlu1 %v5357_v23, %s21030_s22  ;;  %v5165_v16 = vpop.f32.mrf.mxu1  ;;  %v4478_v34 = vadd.f32 %v23279_v47, %v27214_v14  ;;  %v27215_v42 = vld [vmem:[#allocation52_spill] sm:$0xff]  ;;  %v4480_v9 = vadd.f32 %v23290_v3, %v27216_v6  ;;  %v27219_v14 = vld [vmem:[#allocation55_spill] sm:$0xff] }
 0x2ce   : > { %v23536_v52 = vpop.f32.mrf.mxu0  ;;  %v5252_v29 = vadd.f32 %v5165_v16, %v4863_v12  ;;  %16052 = vrot.lane.b32.xlu0 %v5358_v21, %s21030_s22  ;;  %v5328_v35 = vadd.f32 %v23372_v31, %v5289_v8  ;;  %v5292_v4 = vmul.f32 %v23342_v0, %v5253_v22  ;;  %v7368_v37 = vld [vmem:[#allocation3 + $0x128] sm:$0xff]  ;;  %v7369_v22 = vld [vmem:[#allocation3 + $0x138] sm:$0xff]  ;;  %v5361_v16 = vmax.f32 %v5329_v7, 0.0 }
 0x2cf   : > { %v19679_v51 = vpop.f32.mrf.mxu1  ;;  %19978 = vmatmul.mubr.msk.f32.gmra.mxu1 %vm636_vm1, %v7366_v53  ;;  %v7757_v23 = vld [vmem:[#allocation3 + $0x129] sm:$0xff]  ;;  %v7758_v21 = vld [vmem:[#allocation3 + $0x139] sm:$0xff] }
 0x2d0   : > { %v23542_v46 = vpop.f32.mrf.mxu0  ;;  %20028 = vmatmul.mubr.msk.f32.gmra.mxu0 %vm636_vm1, %v7755_v13  ;;  %v5291_v55 = vmul.f32 %v23342_v0, %v5252_v29  ;;  %v5255_v18 = vadd.f32 %v19679_v51, %v27215_v42  ;;  %19980 = vmatprep.mubr.msk.f32.mxu1 %vm636_vm1, %v7367_v27  ;;  %v5360_v1 = vmax.f32 %v5328_v35, 0.0  ;;  %v5331_v29 = vadd.f32 %v23372_v31, %v5292_v4  ;;  %v27217_v53 = vld [vmem:[#allocation53_spill] sm:$0xff]  ;;  %v7370_v4 = vld [vmem:[#allocation3 + $0x140] sm:$0xff] }
 0x2d1   : > { %20030 = vmatprep.mubr.msk.f32.mxu0 %vm636_vm1, %v7756_v40  ;;  %16054 = vrot.lane.b32.xlu1 %v5359_v30, %s21030_s22  ;;  %v5175_v56 = vpop.f32.mrf.mxu1  ;;  %v4867_v13 = vadd.f32 %v27217_v53, %v4478_v34  ;;  %v7759_v30 = vld [vmem:[#allocation3 + $0x141] sm:$0xff]  ;;  %v4869_v34 = vadd.f32 %v27219_v14, %v4480_v9 }
 0x2d2   : > { %v23554_v26 = vpop.f32.mrf.mxu0  ;;  %v5254_v5 = vadd.f32 %v5175_v56, %v4865_v61  ;;  %16056 = vrot.lane.b32.xlu0 %v5360_v1, %s21030_s22  ;;  %v5330_v47 = vadd.f32 %v23372_v31, %v5291_v55  ;;  %v5294_v12 = vmul.f32 %v23342_v0, %v5255_v18  ;;  %v7371_v1 = vld [vmem:[#allocation3 + $0x150] sm:$0xff]  ;;  %v27222_v9 = vld [vmem:[#allocation56_spill] sm:$0xff] }
 0x2d3   : > { %v19682_v8 = vpop.f32.mrf.mxu1  ;;  %19981 = vmatmul.mubr.msk.f32.gmra.mxu1 %vm636_vm1, %v7368_v37  ;;  %v7760_v56 = vld [vmem:[#allocation3 + $0x151] sm:$0xff] }
 0x2d4   : > { %v23561_v59 = vpop.f32.mrf.mxu0  ;;  %20031 = vmatmul.mubr.msk.f32.gmra.mxu0 %vm636_vm1, %v7757_v23  ;;  %v5293_v35 = vmul.f32 %v23342_v0, %v5254_v5  ;;  %v5257_v3 = vadd.f32 %v19682_v8, %v27218_v2  ;;  %19983 = vmatprep.mubr.msk.f32.mxu1 %vm636_vm1, %v7369_v22  ;;  %v5362_v61 = vmax.f32 %v5330_v47, 0.0  ;;  %v5363_v5 = vmax.f32 %v5331_v29, 0.0  ;;  %v27220_v23 = vld [vmem:[#allocation42_spill] sm:$0xff]  ;;  %v27221_v47 = vld [vmem:[#allocation57_spill] sm:$0xff]  ;;  %v27223_v2 = vld [vmem:[#allocation43_spill] sm:$0xff] }
 0x2d5   : > { %20033 = vmatprep.mubr.msk.f32.mxu0 %vm636_vm1, %v7758_v21  ;;  %16058 = vrot.lane.b32.xlu1 %v5361_v16, %s21030_s22  ;;  %v5185_v51 = vpop.f32.mrf.mxu1  ;;  %v5333_v37 = vadd.f32 %v23372_v31, %v5294_v12  ;;  %v4482_v6 = vadd.f32 %v27221_v47, %v27220_v23  ;;  %v7372_v12 = vld [vmem:[#allocation3 + $0x158] sm:$0xff] }
 0x2d6   : > { %v23572_v27 = vpop.f32.mrf.mxu0  ;;  %v5256_v40 = vadd.f32 %v5185_v51, %v4867_v13  ;;  %16060 = vrot.lane.b32.xlu0 %v5362_v61, %s21030_s22  ;;  %v5332_v7 = vadd.f32 %v23372_v31, %v5293_v35  ;;  %v5296_v55 = vmul.f32 %v23342_v0, %v5257_v3  ;;  %v7761_v13 = vld [vmem:[#allocation3 + $0x159] sm:$0xff]  ;;  %v4484_v3 = vadd.f32 %v23312_v24, %v27223_v2  ;;  %v27226_v2 = vld [vmem:[#allocation44_spill] sm:$0xff] }
 0x2d7   : > { %v19685_v42 = vpop.f32.mrf.mxu1  ;;  %19984 = vmatmul.mubr.msk.f32.gmra.mxu1 %vm636_vm1, %v7370_v4  ;;  %v7373_v4 = vld [vmem:[#allocation3 + $0x168] sm:$0xff] }
 0x2d8   : > { %v23578_v18 = vpop.f32.mrf.mxu0  ;;  %20034 = vmatmul.mubr.msk.f32.gmra.mxu0 %vm636_vm1, %v7759_v30  ;;  %v5295_v8 = vmul.f32 %v23342_v0, %v5256_v40  ;;  %v5259_v22 = vadd.f32 %v19685_v42, %v27222_v9  ;;  %19986 = vmatprep.mubr.msk.f32.mxu1 %vm636_vm1, %v7371_v1  ;;  %v5364_v21 = vmax.f32 %v5332_v7, 0.0  ;;  %v7762_v30 = vld [vmem:[#allocation3 + $0x169] sm:$0xff]  ;;  %v5365_v7 = vmax.f32 %v5333_v37, 0.0  ;;  %v7763_v37 = vld [vmem:[#allocation3 + $0x171] sm:$0xff] }
 0x2d9   : > { %20036 = vmatprep.mubr.msk.f32.mxu0 %vm636_vm1, %v7760_v56  ;;  %16062 = vrot.lane.b32.xlu1 %v5363_v5, %s21030_s22  ;;  %v5195_v16 = vpop.f32.mrf.mxu1  ;;  %v5335_v14 = vadd.f32 %v23372_v31, %v5296_v55  ;;  %v27225_v56 = vld [vmem:[#allocation59_spill] sm:$0xff]  ;;  %v7374_v55 = vld [vmem:[#allocation3 + $0x170] sm:$0xff]  ;;  %v4873_v9 = vadd.f32 %v23314_v20, %v4484_v3 }
 0x2da   : > { %v23590_v53 = vpop.f32.mrf.mxu0  ;;  %v5258_v29 = vadd.f32 %v5195_v16, %v4869_v34  ;;  %16064 = vrot.lane.b32.xlu0 %v5364_v21, %s21030_s22  ;;  %v5334_v35 = vadd.f32 %v23372_v31, %v5295_v8  ;;  %v5298_v61 = vmul.f32 %v23342_v0, %v5259_v22  ;;  %v27224_v34 = vld [vmem:[#allocation58_spill] sm:$0xff] }
 0x2db   : > { %v19688_v51 = vpop.f32.mrf.mxu1  ;;  %19987 = vmatmul.mubr.msk.f32.gmra.mxu1 %vm636_vm1, %v7372_v12  ;;  %v4871_v42 = vadd.f32 %v27224_v34, %v4482_v6  ;;  %v7764_v12 = vld [vmem:[#allocation3 + $0x181] sm:$0xff] }
 0x2dc   : > { %v23597_v40 = vpop.f32.mrf.mxu0  ;;  %20037 = vmatmul.mubr.msk.f32.gmra.mxu0 %vm636_vm1, %v7761_v13  ;;  %v5297_v1 = vmul.f32 %v23342_v0, %v5258_v29  ;;  %v5261_v24 = vadd.f32 %v19688_v51, %v27225_v56  ;;  %19989 = vmatprep.mubr.msk.f32.mxu1 %vm636_vm1, %v7373_v4  ;;  %v5366_v5 = vmax.f32 %v5334_v35, 0.0  ;;  %v7375_v29 = vld [vmem:[#allocation3 + $0x180] sm:$0xff]  ;;  %v5367_v13 = vmax.f32 %v5335_v14, 0.0 }
 0x2dd   : > { %20039 = vmatprep.mubr.msk.f32.mxu0 %vm636_vm1, %v7762_v30  ;;  %16066 = vrot.lane.b32.xlu1 %v5365_v7, %s21030_s22  ;;  %v5205_v23 = vpop.f32.mrf.mxu1  ;;  %v5337_v35 = vadd.f32 %v23372_v31, %v5298_v61  ;;  %v4486_v51 = vadd.f32 %v23328_v48, %v27226_v2  ;;  %v8123_v14 = vld [vmem:[#allocation3 + $0x1a] sm:$0xff]  ;;  %v7376_v48 = vld [vmem:[#allocation3 + $0x188] sm:$0xff]  ;;  %v8125_v2 = vld [vmem:[#allocation3 + $0x32] sm:$0xff] }
 0x2de   : > { %v23608_v47 = vpop.f32.mrf.mxu0  ;;  %v5260_v8 = vadd.f32 %v5205_v23, %v4871_v42  ;;  %16068 = vrot.lane.b32.xlu0 %v5366_v5, %s21030_s22  ;;  %v5336_v6 = vadd.f32 %v23372_v31, %v5297_v1  ;;  %v5300_v22 = vmul.f32 %v23342_v0, %v5261_v24  ;;  %v8512_v34 = vld [vmem:[#allocation3 + $0x1b] sm:$0xff]  ;;  %v7765_v42 = vld [vmem:[#allocation3 + $0x189] sm:$0xff] }
 0x2df   : > { %v19691_v21 = vpop.f32.mrf.mxu1  ;;  %19990 = vmatmul.mubr.msk.f32.gmra.mxu1 %vm636_vm1, %v7374_v55  ;;  %v5369_v5 = vmax.f32 %v5337_v35, 0.0 }
 0x2e0   : > { %v23614_v16 = vpop.f32.mrf.mxu0  ;;  %20040 = vmatmul.mubr.msk.f32.gmra.mxu0 %vm636_vm1, %v7763_v37  ;;  %v5299_v4 = vmul.f32 %v23342_v0, %v5260_v8  ;;  %v5263_v20 = vadd.f32 %v19691_v21, %v23318_v62  ;;  %19992 = vmatprep.mubr.msk.f32.mxu1 %vm636_vm1, %v7375_v29  ;;  %v5368_v3 = vmax.f32 %v5336_v6, 0.0  ;;  %v5339_v23 = vadd.f32 %v23372_v31, %v5300_v22  ;;  %v8513_v21 = vld [vmem:[#allocation3 + $0x23] sm:$0xff] }
 0x2e1   : > { %20042 = vmatprep.mubr.msk.f32.mxu0 %vm636_vm1, %v7764_v12  ;;  %16070 = vrot.lane.b32.xlu1 %v5367_v13, %s21030_s22  ;;  %v5215_v30 = vpop.f32.mrf.mxu1  ;;  %v4875_v8 = vadd.f32 %v23330_v17, %v4486_v51 }
 0x2e2   : > { %v23626_v7 = vpop.f32.mrf.mxu0  ;;  %v5262_v61 = vadd.f32 %v5215_v30, %v4873_v9  ;;  %16072 = vrot.lane.b32.xlu0 %v5368_v3, %s21030_s22  ;;  %v5338_v1 = vadd.f32 %v23372_v31, %v5299_v4  ;;  %v5302_v62 = vmul.f32 %v23342_v0, %v5263_v20  ;;  %v8124_v9 = vld [vmem:[#allocation3 + $0x22] sm:$0xff]  ;;  %v5371_v51 = vmax.f32 %v5339_v23, 0.0  ;;  %v8514_v30 = vld [vmem:[#allocation3 + $0x33] sm:$0xff]  ;;  %v8516_v23 = vld [vmem:[#allocation3 + $0x4b] sm:$0xff] }
 0x2e3   : > { %v19694_v56 = vpop.f32.mrf.mxu1  ;;  %19993 = vmatmul.mubr.msk.f32.gmra.mxu1 %vm636_vm1, %v7376_v48 }
 0x2e4   : > { %v23631_v24 = vpop.f32.mrf.mxu0  ;;  %20043 = vmatmul.mubr.msk.f32.gmra.mxu0 %vm636_vm1, %v7765_v42  ;;  %v5301_v55 = vmul.f32 %v23342_v0, %v5262_v61  ;;  %v5265_v37 = vadd.f32 %v19694_v56, %v23335_v25  ;;  %20047 = vmatprep.mubr.msk.f32.mxu1 %vm636_vm1, %v8123_v14  ;;  %v5370_v6 = vmax.f32 %v5338_v1, 0.0  ;;  %v5341_v4 = vadd.f32 %v23372_v31, %v5302_v62  ;;  %v23668_v62 = vld [vmem:[%s27032_s13 + $0x2c] sm:$0xf] }
 0x2e5   : > { %20097 = vmatprep.mubr.msk.f32.mxu0 %vm636_vm1, %v8512_v34  ;;  %16074 = vrot.lane.b32.xlu1 %v5369_v5, %s21030_s22  ;;  %v5225_v29 = vpop.f32.mrf.mxu1 }
 0x2e6   : > { %v23642_v12 = vpop.f32.mrf.mxu0  ;;  %v5304_v22 = vmul.f32 %v23342_v0, %v5265_v37  ;;  %v5264_v13 = vadd.f32 %v5225_v29, %v4875_v8  ;;  %16076 = vrot.lane.b32.xlu0 %v5370_v6, %s21030_s22  ;;  %v5340_v17 = vadd.f32 %v23372_v31, %v5301_v55  ;;  %v23675_v8 = vld [vmem:[%s27032_s13 + $0x30] sm:$0xf] }
 0x2e7   : > { %v19749_v25 = vpop.f32.mrf.mxu1  ;;  %20048 = vmatmul.mubr.msk.f32.vlgmr.msra.gmra.mxu1 %vm636_vm1, %v8124_v9 }
 0x2e8   : > { %v19799_v35 = vpop.f32.mrf.mxu0  ;;  %20098 = vmatmul.mubr.msk.f32.vlgmr.msra.gmra.mxu0 %vm636_vm1, %v8513_v21  ;;  %v5303_v20 = vmul.f32 %v23342_v0, %v5264_v13  ;;  %v6024_v3 = vadd.f32 %v19749_v25, %v23344_v32  ;;  %20146 = vmatpush3.msk.msra.mxu1 %vm733_vm0, %v23352_v49  ;;  %v5372_v14 = vmax.f32 %v5340_v17, 0.0  ;;  %v5343_v34 = vadd.f32 %v23372_v31, %v5304_v22  ;;  %v8126_v32 = vld [vmem:[#allocation3 + $0x3a] sm:$0xff]  ;;  %v8128_v22 = vld [vmem:[#allocation3 + $0x52] sm:$0xff]  ;;  %v8129_v25 = vld [vmem:[#allocation3 + $0x62] sm:$0xff] }
 0x2e9   : > { %20050 = vmatprep.mubr.msk.f32.mxu1 %vm636_vm1, %v8125_v2  ;;  %20100 = vmatprep.mubr.msk.f32.mxu0 %vm636_vm1, %v8514_v30  ;;  %v6018_v61 = vpop.f32.mrf.mxu1  ;;  %v8515_v49 = vld [vmem:[#allocation3 + $0x3b] sm:$0xff] }
 0x2ea   : > { %16078 = vrot.lane.b32.xlu1 %v5371_v51, %s21030_s22  ;;  %v6375_v48 = vpop.f32.mrf.mxu0  ;;  %v23658_v42 = vadd.f32 %v19799_v35, %v6024_v3  ;;  %v6019_v0 = vadd.f32 %v6018_v61, %v23365_v11  ;;  %20196 = vmatpush3.msk.msra.mxu0 %vm733_vm0, %v23357_v43  ;;  %v5342_v1 = vadd.f32 %v23372_v31, %v5303_v20  ;;  %v8127_v11 = vld [vmem:[#allocation3 + $0x4a] sm:$0xff]  ;;  %v5373_v43 = vmax.f32 %v5341_v4, 0.0 }
 0x2eb   : > { %16080 = vrot.lane.b32.xlu0 %v5372_v14, %s21030_s22  ;;  %v19752_v56 = vpop.f32.mrf.mxu1  ;;  %20051 = vmatmul.mubr.msk.f32.gmra.mxu1 %vm636_vm1, %v8126_v32  ;;  %v8518_v35 = vld [vmem:[#allocation3 + $0x63] sm:$0xff]  ;;  %v5375_v2 = vmax.f32 %v5343_v34, 0.0  ;;  %v8519_v61 = vld [vmem:[#allocation3 + $0x6b] sm:$0xff] }
 0x2ec   : > { %v19802_v5 = vpop.f32.mrf.mxu0  ;;  %20101 = vmatmul.mubr.msk.f32.gmra.mxu0 %vm636_vm1, %v8515_v49  ;;  %v23677_v31 = vadd.f32 %v6375_v48, %v6019_v0  ;;  %v6034_v55 = vadd.f32 %v19752_v56, %v23383_v38  ;;  %20053 = vmatprep.mubr.msk.f32.mxu1 %vm636_vm1, %v8127_v11  ;;  %v5374_v37 = vmax.f32 %v5342_v1, 0.0  ;;  %v8517_v38 = vld [vmem:[#allocation3 + $0x53] sm:$0xff]  ;;  %v8130_v14 = vld [vmem:[#allocation3 + $0x6a] sm:$0xff]  ;;  %v8520_v0 = vld [vmem:[#allocation3 + $0x7b] sm:$0xff] }
 0x2ed   : > { %20103 = vmatprep.mubr.msk.f32.mxu0 %vm636_vm1, %v8516_v23  ;;  %v6028_v6 = vpop.f32.mrf.mxu1  ;;  %20245 = vmatprep.subr.msk.mxu1 %vm733_vm0, %v23668_v62  ;;  %v8132_v11 = vld [vmem:[#allocation3 + $0x82] sm:$0xff] }
 0x2ee   : > { %16082 = vrot.lane.b32.xlu1 %v5373_v43, %s21030_s22  ;;  %v6385_v9 = vpop.f32.mrf.mxu0  ;;  %v23685_v21 = vadd.f32 %v19802_v5, %v6034_v55  ;;  %v6029_v29 = vadd.f32 %v6028_v6, %v23393_v57  ;;  %20295 = vmatprep.subr.msk.mxu0 %vm733_vm0, %v23675_v8  ;;  %v8521_v23 = vld [vmem:[#allocation3 + $0x83] sm:$0xff] }
 0x2ef   : > { %16084 = vrot.lane.b32.xlu0 %v5374_v37, %s21030_s22  ;;  %v19755_v13 = vpop.f32.mrf.mxu1  ;;  %20054 = vmatmul.mubr.msk.f32.gmra.mxu1 %vm636_vm1, %v8128_v22  ;;  %v8133_v37 = vld [vmem:[#allocation3 + $0x92] sm:$0xff] }
 0x2f0   : > { %v19805_v17 = vpop.f32.mrf.mxu0  ;;  %20104 = vmatmul.mubr.msk.f32.gmra.mxu0 %vm636_vm1, %v8517_v38  ;;  %v23693_v51 = vadd.f32 %v6385_v9, %v6029_v29  ;;  %v6044_v57 = vadd.f32 %v19755_v13, %v23399_v41  ;;  %20056 = vmatprep.mubr.msk.f32.mxu1 %vm636_vm1, %v8129_v25  ;;  %v8131_v41 = vld [vmem:[#allocation3 + $0x7a] sm:$0xff] }
 0x2f1   : > { %20106 = vmatprep.mubr.msk.f32.mxu0 %vm636_vm1, %v8518_v35  ;;  %v6038_v4 = vpop.f32.mrf.mxu1  ;;  %v8134_v13 = vld [vmem:[#allocation3 + $0x9a] sm:$0xff] }
 0x2f2   : > { %16086 = vrot.lane.b32.xlu1 %v5375_v2, %s21030_s22  ;;  %v6395_v20 = vpop.f32.mrf.mxu0  ;;  %v23699_v3 = vadd.f32 %v19805_v17, %v6044_v57  ;;  %v6039_v30 = vadd.f32 %v6038_v4, %v23412_v45  ;;  %v8523_v17 = vld [vmem:[#allocation3 + $0x9b] sm:$0xff]  ;;  %v8135_v2 = vld [vmem:[#allocation3 + $0xaa] sm:$0xff] }
 0x2f3   : > { %v19758_v48 = vpop.f32.mrf.mxu1  ;;  %20057 = vmatmul.mubr.msk.f32.gmra.mxu1 %vm636_vm1, %v8130_v14 }
 0x2f4   : > { %v19808_v34 = vpop.f32.mrf.mxu0  ;;  %20107 = vmatmul.mubr.msk.f32.gmra.mxu0 %vm636_vm1, %v8519_v61  ;;  %v23704_v32 = vadd.f32 %v6395_v20, %v6039_v30  ;;  %v6054_v49 = vadd.f32 %v19758_v48, %v23417_v54  ;;  %20059 = vmatprep.mubr.msk.f32.mxu1 %vm636_vm1, %v8131_v41  ;;  %v8522_v54 = vld [vmem:[#allocation3 + $0x93] sm:$0xff] }
 0x2f5   : > { %20109 = vmatprep.mubr.msk.f32.mxu0 %vm636_vm1, %v8520_v0  ;;  %v6048_v1 = vpop.f32.mrf.mxu1  ;;  %v8136_v61 = vld [vmem:[#allocation3 + $0xb2] sm:$0xff]  ;;  %v8137_v0 = vld [vmem:[#allocation3 + $0xc2] sm:$0xff] }
 0x2f6   : > { %v6405_v45 = vpop.f32.mrf.mxu0  ;;  %v23709_v56 = vadd.f32 %v19808_v34, %v6054_v49  ;;  %v6049_v5 = vadd.f32 %v6048_v1, %v23429_v36  ;;  %v8525_v48 = vld [vmem:[#allocation3 + $0xb3] sm:$0xff] }
 0x2f7   : > { %v19761_v43 = vpop.f32.mrf.mxu1  ;;  %20060 = vmatmul.mubr.msk.f32.gmra.mxu1 %vm636_vm1, %v8132_v11 }
 0x2f8   : > { %v19811_v55 = vpop.f32.mrf.mxu0  ;;  %20110 = vmatmul.mubr.msk.f32.gmra.mxu0 %vm636_vm1, %v8521_v23  ;;  %v23714_v6 = vadd.f32 %v6405_v45, %v6049_v5  ;;  %v6064_v9 = vadd.f32 %v19761_v43, %v23434_v60  ;;  %20062 = vmatprep.mubr.msk.f32.mxu1 %vm636_vm1, %v8133_v37  ;;  %v8524_v60 = vld [vmem:[#allocation3 + $0xab] sm:$0xff] }
 0x2f9   : > { %20112 = vmatprep.mubr.msk.f32.mxu0 %vm636_vm1, %v8522_v54  ;;  %v6058_v29 = vpop.f32.mrf.mxu1  ;;  %v8138_v23 = vld [vmem:[#allocation3 + $0xca] sm:$0xff]  ;;  %v8139_v54 = vld [vmem:[#allocation3 + $0xda] sm:$0xff] }
 0x2fa   : > { %v6415_v36 = vpop.f32.mrf.mxu0  ;;  %v23719_v22 = vadd.f32 %v19811_v55, %v6064_v9  ;;  %v6059_v38 = vadd.f32 %v6058_v29, %v23446_v19  ;;  %v8527_v43 = vld [vmem:[#allocation3 + $0xcb] sm:$0xff] }
 0x2fb   : > { %v19764_v25 = vpop.f32.mrf.mxu1  ;;  %20063 = vmatmul.mubr.msk.f32.gmra.mxu1 %vm636_vm1, %v8134_v13 }
 0x2fc   : > { %v19814_v35 = vpop.f32.mrf.mxu0  ;;  %20113 = vmatmul.mubr.msk.f32.gmra.mxu0 %vm636_vm1, %v8523_v17  ;;  %v23724_v57 = vadd.f32 %v6415_v36, %v6059_v38  ;;  %v6074_v4 = vadd.f32 %v19764_v25, %v23453_v10  ;;  %20065 = vmatprep.mubr.msk.f32.mxu1 %vm636_vm1, %v8135_v2  ;;  %v8526_v10 = vld [vmem:[#allocation3 + $0xc3] sm:$0xff] }
 0x2fd   : > { %20115 = vmatprep.mubr.msk.f32.mxu0 %vm636_vm1, %v8524_v60  ;;  %v6068_v20 = vpop.f32.mrf.mxu1  ;;  %v8140_v17 = vld [vmem:[#allocation3 + $0xe2] sm:$0xff]  ;;  %v8141_v60 = vld [vmem:[#allocation3 + $0xf2] sm:$0xff] }
 0x2fe   : > { %v6425_v19 = vpop.f32.mrf.mxu0  ;;  %v23729_v30 = vadd.f32 %v19814_v35, %v6074_v4  ;;  %v6069_v14 = vadd.f32 %v6068_v20, %v23464_v58  ;;  %v8529_v25 = vld [vmem:[#allocation3 + $0xe3] sm:$0xff] }
 0x2ff   : > { %v19767_v34 = vpop.f32.mrf.mxu1  ;;  %20066 = vmatmul.mubr.msk.f32.gmra.mxu1 %vm636_vm1, %v8136_v61 }
 0x300   : > { %v19817_v41 = vpop.f32.mrf.mxu0  ;;  %20116 = vmatmul.mubr.msk.f32.gmra.mxu0 %vm636_vm1, %v8525_v48  ;;  %v23734_v49 = vadd.f32 %v6425_v19, %v6069_v14  ;;  %v6084_v1 = vadd.f32 %v19767_v34, %v23470_v63  ;;  %20068 = vmatprep.mubr.msk.f32.mxu1 %vm636_vm1, %v8137_v0  ;;  %v8528_v63 = vld [vmem:[#allocation3 + $0xdb] sm:$0xff] }
 0x301   : > { %20118 = vmatprep.mubr.msk.f32.mxu0 %vm636_vm1, %v8526_v10  ;;  %v6078_v45 = vpop.f32.mrf.mxu1  ;;  %v8142_v48 = vld [vmem:[#allocation3 + $0xfa] sm:$0xff]  ;;  %v8143_v10 = vld [vmem:[#allocation3 + $0x10a] sm:$0xff] }
 0x302   : > { %v6435_v58 = vpop.f32.mrf.mxu0  ;;  %v23739_v5 = vadd.f32 %v19817_v41, %v6084_v1  ;;  %v6079_v11 = vadd.f32 %v6078_v45, %v23482_v15  ;;  %v8531_v34 = vld [vmem:[#allocation3 + $0xfb] sm:$0xff] }
 0x303   : > { %v19770_v55 = vpop.f32.mrf.mxu1  ;;  %20069 = vmatmul.mubr.msk.f32.gmra.mxu1 %vm636_vm1, %v8138_v23 }
 0x304   : > { %v19820_v37 = vpop.f32.mrf.mxu0  ;;  %20119 = vmatmul.mubr.msk.f32.gmra.mxu0 %vm636_vm1, %v8527_v43  ;;  %v23744_v9 = vadd.f32 %v6435_v58, %v6079_v11  ;;  %v6094_v29 = vadd.f32 %v19770_v55, %v23489_v44  ;;  %20071 = vmatprep.mubr.msk.f32.mxu1 %vm636_vm1, %v8139_v54  ;;  %v8530_v44 = vld [vmem:[#allocation3 + $0xf3] sm:$0xff] }
 0x305   : > { %20121 = vmatprep.mubr.msk.f32.mxu0 %vm636_vm1, %v8528_v63  ;;  %v6088_v36 = vpop.f32.mrf.mxu1  ;;  %v8144_v43 = vld [vmem:[#allocation3 + $0x112] sm:$0xff]  ;;  %v8145_v63 = vld [vmem:[#allocation3 + $0x122] sm:$0xff] }
 0x306   : > { %v6445_v15 = vpop.f32.mrf.mxu0  ;;  %v23749_v38 = vadd.f32 %v19820_v37, %v6094_v29  ;;  %v6089_v13 = vadd.f32 %v6088_v36, %v23500_v39  ;;  %v8533_v55 = vld [vmem:[#allocation3 + $0x113] sm:$0xff] }
 0x307   : > { %v19773_v35 = vpop.f32.mrf.mxu1  ;;  %20072 = vmatmul.mubr.msk.f32.gmra.mxu1 %vm636_vm1, %v8140_v17 }
 0x308   : > { %v19823_v2 = vpop.f32.mrf.mxu0  ;;  %20122 = vmatmul.mubr.msk.f32.gmra.mxu0 %vm636_vm1, %v8529_v25  ;;  %v23754_v4 = vadd.f32 %v6445_v15, %v6089_v13  ;;  %v6104_v20 = vadd.f32 %v19773_v35, %v23506_v33  ;;  %20074 = vmatprep.mubr.msk.f32.mxu1 %vm636_vm1, %v8141_v60  ;;  %v8532_v33 = vld [vmem:[#allocation3 + $0x10b] sm:$0xff] }
 0x309   : > { %20124 = vmatprep.mubr.msk.f32.mxu0 %vm636_vm1, %v8530_v44  ;;  %v6098_v19 = vpop.f32.mrf.mxu1  ;;  %v8146_v25 = vld [vmem:[#allocation3 + $0x12a] sm:$0xff]  ;;  %v8147_v44 = vld [vmem:[#allocation3 + $0x13a] sm:$0xff] }
 0x30a   : > { %v6455_v39 = vpop.f32.mrf.mxu0  ;;  %v23759_v14 = vadd.f32 %v19823_v2, %v6104_v20  ;;  %v6099_v61 = vadd.f32 %v6098_v19, %v23518_v28  ;;  %v8535_v35 = vld [vmem:[#allocation3 + $0x12b] sm:$0xff] }
 0x30b   : > { %v19776_v41 = vpop.f32.mrf.mxu1  ;;  %20075 = vmatmul.mubr.msk.f32.gmra.mxu1 %vm636_vm1, %v8142_v48 }
 0x30c   : > { %v19826_v0 = vpop.f32.mrf.mxu0  ;;  %20125 = vmatmul.mubr.msk.f32.gmra.mxu0 %vm636_vm1, %v8531_v34  ;;  %v23764_v1 = vadd.f32 %v6455_v39, %v6099_v61  ;;  %v6114_v45 = vadd.f32 %v19776_v41, %v23525_v50  ;;  %20077 = vmatprep.mubr.msk.f32.mxu1 %vm636_vm1, %v8143_v10  ;;  %v8534_v50 = vld [vmem:[#allocation3 + $0x123] sm:$0xff]  ;;  %v23792_v61 = vld [vmem:[%s27227_s28] ss:$0 sm:$0xff] }
 0x30d   : > { %20127 = vmatprep.mubr.msk.f32.mxu0 %vm636_vm1, %v8532_v33  ;;  %v6108_v58 = vpop.f32.mrf.mxu1  ;;  %v8148_v41 = vld [vmem:[#allocation3 + $0x142] sm:$0xff] }
 0x30e   : > { %v6465_v28 = vpop.f32.mrf.mxu0  ;;  %v23769_v11 = vadd.f32 %v19826_v0, %v6114_v45  ;;  %v6109_v23 = vadd.f32 %v6108_v58, %v23536_v52  ;;  %v8537_v0 = vld [vmem:[#allocation3 + $0x143] sm:$0xff]  ;;  %v8538_v45 = vld [vmem:[#allocation3 + $0x153] sm:$0xff] }
 0x30f   : > { %v19779_v37 = vpop.f32.mrf.mxu1  ;;  %20078 = vmatmul.mubr.msk.f32.gmra.mxu1 %vm636_vm1, %v8144_v43 }
 0x310   : > { %v19829_v54 = vpop.f32.mrf.mxu0  ;;  %20128 = vmatmul.mubr.msk.f32.gmra.mxu0 %vm636_vm1, %v8533_v55  ;;  %v23774_v29 = vadd.f32 %v6465_v28, %v6109_v23  ;;  %v6124_v36 = vadd.f32 %v19779_v37, %v23542_v46  ;;  %20080 = vmatprep.mubr.msk.f32.mxu1 %vm636_vm1, %v8145_v63  ;;  %v8536_v46 = vld [vmem:[#allocation3 + $0x13b] sm:$0xff]  ;;  %v23809_v37 = vld [vmem:[%s27229_s21] ss:$0 sm:$0xff] }
 0x311   : > { %20130 = vmatprep.mubr.msk.f32.mxu0 %vm636_vm1, %v8534_v50  ;;  %v6118_v15 = vpop.f32.mrf.mxu1  ;;  %v8150_v50 = vld [vmem:[#allocation3 + $0x15a] sm:$0xff] }
 0x312   : > { %v6475_v52 = vpop.f32.mrf.mxu0  ;;  %v23779_v13 = vadd.f32 %v19829_v54, %v6124_v36  ;;  %v6119_v17 = vadd.f32 %v6118_v15, %v23554_v26 }
 0x313   : > { %v19782_v2 = vpop.f32.mrf.mxu1  ;;  %20081 = vmatmul.mubr.msk.f32.gmra.mxu1 %vm636_vm1, %v8146_v25 }
 0x314   : > { %v19832_v60 = vpop.f32.mrf.mxu0  ;;  %20131 = vmatmul.mubr.msk.f32.gmra.mxu0 %vm636_vm1, %v8535_v35  ;;  %v23784_v20 = vadd.f32 %v6475_v52, %v6119_v17  ;;  %v6134_v19 = vadd.f32 %v19782_v2, %v23561_v59  ;;  %20083 = vmatprep.mubr.msk.f32.mxu1 %vm636_vm1, %v8147_v44  ;;  %v8149_v59 = vld [vmem:[#allocation3 + $0x152] sm:$0xff]  ;;  %v8151_v52 = vld [vmem:[#allocation3 + $0x16a] sm:$0xff]  ;;  %v27230_v2 = vld [vmem:[#allocation7_spill] sm:$0xff] }
 0x315   : > { %20133 = vmatprep.mubr.msk.f32.mxu0 %vm636_vm1, %v8536_v46  ;;  %v6128_v39 = vpop.f32.mrf.mxu1  ;;  %v8540_v17 = vld [vmem:[#allocation3 + $0x16b] sm:$0xff] }
 0x316   : > { %v6485_v26 = vpop.f32.mrf.mxu0  ;;  %v23794_v48 = vadd.f32 %v19832_v60, %v6134_v19  ;;  %v6129_v34 = vadd.f32 %v6128_v39, %v23572_v27  ;;  %v27228_v27 = vld [vmem:[#allocation5_spill] sm:$0xff]  ;;  %v972_v60 = vmul.f32 %v27230_v2, %v23792_v61 }
 0x317   : > { %v19785_v10 = vpop.f32.mrf.mxu1  ;;  %20084 = vmatmul.mubr.msk.f32.gmra.mxu1 %vm636_vm1, %v8148_v41  ;;  %v970_v23 = vmul.f32 %v27228_v27, %v23792_v61 }
 0x318   : > { %v19835_v33 = vpop.f32.mrf.mxu0  ;;  %20134 = vmatmul.mubr.msk.f32.gmra.mxu0 %vm636_vm1, %v8537_v0  ;;  %v23799_v58 = vadd.f32 %v6485_v26, %v6129_v34  ;;  %v6144_v28 = vadd.f32 %v19785_v10, %v23578_v18  ;;  %20086 = vmatprep.mubr.msk.f32.mxu1 %vm636_vm1, %v8149_v59  ;;  %v8539_v18 = vld [vmem:[#allocation3 + $0x15b] sm:$0xff]  ;;  %v8152_v26 = vld [vmem:[#allocation3 + $0x172] sm:$0xff]  ;;  %v8542_v10 = vld [vmem:[#allocation3 + $0x183] sm:$0xff] }
 0x319   : > { %20136 = vmatprep.mubr.msk.f32.mxu0 %vm636_vm1, %v8538_v45  ;;  %v6138_v43 = vpop.f32.mrf.mxu1  ;;  %v8541_v34 = vld [vmem:[#allocation3 + $0x173] sm:$0xff] }
 0x31a   : > { %v6495_v55 = vpop.f32.mrf.mxu0  ;;  %v23811_v54 = vadd.f32 %v19835_v33, %v6144_v28  ;;  %v6139_v63 = vadd.f32 %v6138_v43, %v23590_v53  ;;  %v1009_v53 = vadd.f32 %v23809_v37, %v970_v23  ;;  %v8901_v23 = vld [vmem:[#allocation3 + $0x1c] sm:$0xff] }
 0x31b   : > { %v19788_v36 = vpop.f32.mrf.mxu1  ;;  %20087 = vmatmul.mubr.msk.f32.gmra.mxu1 %vm636_vm1, %v8150_v50  ;;  %v8154_v50 = vld [vmem:[#allocation3 + $0x18a] sm:$0xff] }
 0x31c   : > { %v19838_v15 = vpop.f32.mrf.mxu0  ;;  %20137 = vmatmul.mubr.msk.f32.gmra.mxu0 %vm636_vm1, %v8539_v18  ;;  %v23816_v25 = vadd.f32 %v6495_v55, %v6139_v63  ;;  %v6154_v35 = vadd.f32 %v19788_v36, %v23597_v40  ;;  %20089 = vmatprep.mubr.msk.f32.mxu1 %vm636_vm1, %v8151_v52  ;;  %v8153_v40 = vld [vmem:[#allocation3 + $0x182] sm:$0xff]  ;;  %v1041_v45 = vmax.f32 %v1009_v53, 0.0  ;;  %v8543_v18 = vld [vmem:[#allocation3 + $0x18b] sm:$0xff] }
 0x31d   : > { %20139 = vmatprep.mubr.msk.f32.mxu0 %vm636_vm1, %v8540_v17  ;;  %v6148_v44 = vpop.f32.mrf.mxu1  ;;  %v9290_v52 = vld [vmem:[#allocation3 + $0x30] sm:$0xff] }
 0x31e   : > { %v6505_v46 = vpop.f32.mrf.mxu0  ;;  %v23824_v19 = vadd.f32 %v19838_v15, %v6154_v35  ;;  %v6149_v39 = vadd.f32 %v6148_v44, %v23608_v47  ;;  %v1011_v47 = vadd.f32 %v23809_v37, %v972_v60  ;;  %v27232_v44 = vld [vmem:[#allocation9_spill] sm:$0xff] }
 0x31f   : > { %v19791_v41 = vpop.f32.mrf.mxu1  ;;  %20090 = vmatmul.mubr.msk.f32.gmra.mxu1 %vm636_vm1, %v8152_v26 }
 0x320   : > { %v19841_v0 = vpop.f32.mrf.mxu0  ;;  %20140 = vmatmul.mubr.msk.f32.gmra.mxu0 %vm636_vm1, %v8541_v34  ;;  %v23829_v33 = vadd.f32 %v6505_v46, %v6149_v39  ;;  %v6164_v59 = vadd.f32 %v19791_v41, %v23614_v16  ;;  %20092 = vmatprep.mubr.msk.f32.mxu1 %vm636_vm1, %v8153_v40  ;;  %v1043_v53 = vmax.f32 %v1011_v47, 0.0  ;;  %v974_v46 = vmul.f32 %v27232_v44, %v23792_v61  ;;  %v9291_v41 = vld [vmem:[#allocation3 + $0x38] sm:$0xff] }
 0x321   : > { %20142 = vmatprep.mubr.msk.f32.mxu0 %vm636_vm1, %v8542_v10  ;;  %v6158_v28 = vpop.f32.mrf.mxu1  ;;  %v8903_v40 = vld [vmem:[#allocation3 + $0x34] sm:$0xff]  ;;  %v23861_v10 = vld [vmem:[%s27032_s13 + $0x34] sm:$0xf] }
 0x322   : > { %v6515_v27 = vpop.f32.mrf.mxu0  ;;  %v23835_v43 = vadd.f32 %v19841_v0, %v6164_v59  ;;  %v6159_v55 = vadd.f32 %v6158_v28, %v23626_v7  ;;  %v8902_v7 = vld [vmem:[#allocation3 + $0x24] sm:$0xff] }
 0x323   : > { %v16027_v63 = vpop.permute.xlu0 %16026  ;;  %v19794_v16 = vpop.f32.mrf.mxu1  ;;  %20093 = vmatmul.mubr.msk.f32.gmra.mxu1 %vm636_vm1, %v8154_v50  ;;  %v9292_v28 = vld [vmem:[#allocation3 + $0x48] sm:$0xff] }
 0x324   : > { %v23839_v36 = vsel %vm636_vm1, %v1041_v45, %v16027_v63  ;;  %v19844_v15 = vpop.f32.mrf.mxu0  ;;  %20143 = vmatmul.mubr.msk.f32.gmra.mxu0 %vm636_vm1, %v8543_v18  ;;  %v23843_v17 = vadd.f32 %v6515_v27, %v6159_v55  ;;  %v6174_v35 = vadd.f32 %v19794_v16, %v23631_v24  ;;  %20147 = vmatprep.mubr.msk.f32.mxu1 %vm636_vm1, %v8901_v23  ;;  %v27234_v27 = vld [vmem:[#allocation11_spill] sm:$0xff]  ;;  %v9293_v16 = vld [vmem:[#allocation3 + $0x50] sm:$0xff] }
 0x325   : > { %27231 = vst [vmem:[#allocation37_spill] sm:$0xff] %v23839_v36  ;;  %20197 = vmatprep.mubr.msk.f32.mxu0 %vm636_vm1, %v9290_v52  ;;  %v6168_v2 = vpop.f32.mrf.mxu1  ;;  %v976_v23 = vmul.f32 %v27234_v27, %v23792_v61  ;;  %v1013_v63 = vadd.f32 %v23809_v37, %v974_v46  ;;  %v27236_v46 = vld [vmem:[#allocation13_spill] sm:$0xff]  ;;  %v9296_v27 = vld [vmem:[#allocation3 + $0x78] sm:$0xff] }
 0x326   : > { %v6525_v60 = vpop.f32.mrf.mxu0  ;;  %v23850_v39 = vadd.f32 %v19844_v15, %v6174_v35  ;;  %v6169_v26 = vadd.f32 %v6168_v2, %v23642_v12  ;;  %v23866_v12 = vld [vmem:[%s27032_s13 + $0x38] sm:$0xf]  ;;  %v9294_v35 = vld [vmem:[#allocation3 + $0x60] sm:$0xff] }
 0x327   : > { %v16031_v34 = vpop.permute.xlu1 %16030  ;;  %v19849_v24 = vpop.f32.mrf.mxu1  ;;  %20148 = vmatmul.mubr.msk.f32.vlgmr.msra.gmra.mxu1 %vm636_vm1, %v8902_v7  ;;  %v1015_v2 = vadd.f32 %v23809_v37, %v976_v23  ;;  %v1045_v44 = vmax.f32 %v1013_v63, 0.0 }
 0x328   : > { %v23854_v0 = vsel %vm636_vm1, %v1043_v53, %v16031_v34  ;;  %20198 = vmatmul.mubr.msk.f32.vlgmr.msra.gmra.mxu0 %vm636_vm1, %v9291_v41  ;;  %v23868_v59 = vadd.f32 %v6525_v60, %v6169_v26  ;;  %v6924_v45 = vadd.f32 %v19849_v24, %v23658_v42  ;;  %v19899_v47 = vpop.f32.mrf.mxu0  ;;  %20246 = vmatpush3.msk.msra.mxu1 %vm733_vm0, %v23668_v62  ;;  %v8904_v62 = vld [vmem:[#allocation3 + $0x3c] sm:$0xff] }
 0x329   : > { %27233 = vst [vmem:[#allocation45_spill] sm:$0xff] %v23854_v0  ;;  %20150 = vmatprep.mubr.msk.f32.mxu1 %vm636_vm1, %v8903_v40  ;;  %20200 = vmatprep.mubr.msk.f32.mxu0 %vm636_vm1, %v9292_v28  ;;  %v6764_v55 = vpop.f32.mrf.mxu1  ;;  %v978_v26 = vmul.f32 %v27236_v46, %v23792_v61  ;;  %v8906_v40 = vld [vmem:[#allocation3 + $0x54] sm:$0xff]  ;;  %v8907_v28 = vld [vmem:[#allocation3 + $0x64] sm:$0xff] }
 0x32a   : > { %20296 = vmatpush3.msk.msra.mxu0 %vm733_vm0, %v23675_v8  ;;  %v23880_v50 = vadd.f32 %v19899_v47, %v6924_v45  ;;  %v6923_v42 = vadd.f32 %v6764_v55, %v23677_v31  ;;  %v7153_v18 = vpop.f32.mrf.mxu0  ;;  %20345 = vmatprep.subr.msk.mxu1 %vm733_vm0, %v23861_v10  ;;  %v8905_v8 = vld [vmem:[#allocation3 + $0x4c] sm:$0xff] }
 0x32b   : > { %20395 = vmatprep.subr.msk.mxu0 %vm733_vm0, %v23866_v12  ;;  %v23887_v15 = vpop.permute.xlu1 %16028  ;;  %v19852_v52 = vpop.f32.mrf.mxu1  ;;  %20151 = vmatmul.mubr.msk.f32.gmra.mxu1 %vm636_vm1, %v8904_v62  ;;  %v9295_v45 = vld [vmem:[#allocation3 + $0x68] sm:$0xff]  ;;  %v1017_v62 = vadd.f32 %v23809_v37, %v978_v26  ;;  %v9298_v46 = vld [vmem:[#allocation3 + $0x90] sm:$0xff] }
 0x32c   : > { %27235 = vst [vmem:[#allocation46_spill] sm:$0xff] %v23887_v15  ;;  %20201 = vmatmul.mubr.msk.f32.gmra.mxu0 %vm636_vm1, %v9293_v16  ;;  %v23891_v7 = vadd.f32 %v7153_v18, %v6923_v42  ;;  %v6926_v31 = vadd.f32 %v19852_v52, %v23685_v21  ;;  %v19902_v53 = vpop.f32.mrf.mxu0  ;;  %20153 = vmatprep.mubr.msk.f32.mxu1 %vm636_vm1, %v8905_v8  ;;  %v27238_v16 = vld [vmem:[#allocation15_spill] sm:$0xff]  ;;  %v10087_v0 = vld [vmem:[#allocation3 + $0x112] sm:$0xff] }
 0x32d   : > { %20203 = vmatprep.mubr.msk.f32.mxu0 %vm636_vm1, %v9294_v35  ;;  %v6774_v60 = vpop.f32.mrf.mxu1  ;;  %v980_v52 = vmul.f32 %v27238_v16, %v23792_v61 }
 0x32e   : > { %v23899_v34 = vadd.f32 %v19902_v53, %v6926_v31  ;;  %v6925_v41 = vadd.f32 %v6774_v60, %v23693_v51  ;;  %v7163_v24 = vpop.f32.mrf.mxu0  ;;  %v1047_v51 = vmax.f32 %v1015_v2, 0.0  ;;  %v8908_v53 = vld [vmem:[#allocation3 + $0x6c] sm:$0xff]  ;;  %v9297_v60 = vld [vmem:[#allocation3 + $0x80] sm:$0xff] }
 0x32f   : > { %v16035_v21 = vpop.permute.xlu1 %16034  ;;  %v19855_v47 = vpop.f32.mrf.mxu1  ;;  %20154 = vmatmul.mubr.msk.f32.gmra.mxu1 %vm636_vm1, %v8906_v40  ;;  %v8909_v2 = vld [vmem:[#allocation3 + $0x7c] sm:$0xff] }
 0x330   : > { %20204 = vmatmul.mubr.msk.f32.gmra.mxu0 %vm636_vm1, %v9295_v45  ;;  %v23904_v23 = vadd.f32 %v7163_v24, %v6925_v41  ;;  %v23907_v55 = vsel %vm636_vm1, %v1045_v44, %v16035_v21  ;;  %v6928_v63 = vadd.f32 %v19855_v47, %v23699_v3  ;;  %v19905_v42 = vpop.f32.mrf.mxu0  ;;  %20156 = vmatprep.mubr.msk.f32.mxu1 %vm636_vm1, %v8907_v28  ;;  %v1049_v47 = vmax.f32 %v1017_v62, 0.0 }
 0x331   : > { %27237 = vst [vmem:[#allocation47_spill] sm:$0xff] %v23907_v55  ;;  %20206 = vmatprep.mubr.msk.f32.mxu0 %vm636_vm1, %v9296_v27  ;;  %v6784_v18 = vpop.f32.mrf.mxu1  ;;  %v1019_v28 = vadd.f32 %v23809_v37, %v980_v52  ;;  %v10085_v55 = vld [vmem:[#allocation3 + $0xfa] sm:$0xff] }
 0x332   : > { %v23915_v8 = vadd.f32 %v19905_v42, %v6928_v63  ;;  %v6927_v35 = vadd.f32 %v6784_v18, %v23704_v32  ;;  %v7173_v31 = vpop.f32.mrf.mxu0  ;;  %v27240_v32 = vld [vmem:[#allocation17_spill] sm:$0xff]  ;;  %v9299_v18 = vld [vmem:[#allocation3 + $0x98] sm:$0xff] }
 0x333   : > { %v16039_v3 = vpop.permute.xlu1 %16038  ;;  %v19858_v44 = vpop.f32.mrf.mxu1  ;;  %20157 = vmatmul.mubr.msk.f32.gmra.mxu1 %vm636_vm1, %v8908_v53  ;;  %v982_v45 = vmul.f32 %v27240_v32, %v23792_v61 }
 0x334   : > { %20207 = vmatmul.mubr.msk.f32.gmra.mxu0 %vm636_vm1, %v9297_v60  ;;  %v23920_v41 = vadd.f32 %v7173_v31, %v6927_v35  ;;  %v23923_v26 = vsel %vm636_vm1, %v1047_v51, %v16039_v3  ;;  %v6930_v24 = vadd.f32 %v19858_v44, %v23709_v56  ;;  %v19908_v40 = vpop.f32.mrf.mxu0  ;;  %20159 = vmatprep.mubr.msk.f32.mxu1 %vm636_vm1, %v8909_v2  ;;  %v8910_v51 = vld [vmem:[#allocation3 + $0x84] sm:$0xff]  ;;  %v8911_v35 = vld [vmem:[#allocation3 + $0x94] sm:$0xff]  ;;  %v1051_v44 = vmax.f32 %v1019_v28, 0.0 }
 0x335   : > { %27239 = vst [vmem:[#allocation38_spill] sm:$0xff] %v23923_v26  ;;  %20209 = vmatprep.mubr.msk.f32.mxu0 %vm636_vm1, %v9298_v46  ;;  %v6794_v21 = vpop.f32.mrf.mxu1  ;;  %v9300_v31 = vld [vmem:[#allocation3 + $0xa8] sm:$0xff]  ;;  %v27242_v2 = vld [vmem:[#allocation19_spill] sm:$0xff] }
 0x336   : > { %v23931_v27 = vadd.f32 %v19908_v40, %v6930_v24  ;;  %v6929_v63 = vadd.f32 %v6794_v21, %v23714_v6  ;;  %v7183_v42 = vpop.f32.mrf.mxu0  ;;  %v1021_v6 = vadd.f32 %v23809_v37, %v982_v45  ;;  %v984_v46 = vmul.f32 %v27242_v2, %v23792_v61  ;;  %v8912_v21 = vld [vmem:[#allocation3 + $0x9c] sm:$0xff]  ;;  %v8914_v2 = vld [vmem:[#allocation3 + $0xb4] sm:$0xff] }
 0x337   : > { %v16043_v56 = vpop.permute.xlu1 %16042  ;;  %v19861_v16 = vpop.f32.mrf.mxu1  ;;  %20160 = vmatmul.mubr.msk.f32.gmra.mxu1 %vm636_vm1, %v8910_v51  ;;  %v9302_v45 = vld [vmem:[#allocation3 + $0xc0] sm:$0xff] }
 0x338   : > { %20210 = vmatmul.mubr.msk.f32.gmra.mxu0 %vm636_vm1, %v9299_v18  ;;  %v23936_v53 = vadd.f32 %v7183_v42, %v6929_v63  ;;  %v23939_v62 = vsel %vm636_vm1, %v1049_v47, %v16043_v56  ;;  %v6932_v52 = vadd.f32 %v19861_v16, %v23719_v22  ;;  %v19911_v60 = vpop.f32.mrf.mxu0  ;;  %20162 = vmatprep.mubr.msk.f32.mxu1 %vm636_vm1, %v8911_v35  ;;  %v9301_v47 = vld [vmem:[#allocation3 + $0xb0] sm:$0xff] }
 0x339   : > { %27241 = vst [vmem:[#allocation48_spill] sm:$0xff] %v23939_v62  ;;  %20212 = vmatprep.mubr.msk.f32.mxu0 %vm636_vm1, %v9300_v31  ;;  %v6804_v3 = vpop.f32.mrf.mxu1  ;;  %v8913_v42 = vld [vmem:[#allocation3 + $0xac] sm:$0xff]  ;;  %v1023_v35 = vadd.f32 %v23809_v37, %v984_v46  ;;  %v10083_v62 = vld [vmem:[#allocation3 + $0xe2] sm:$0xff] }
 0x33a   : > { %v23947_v24 = vadd.f32 %v19911_v60, %v6932_v52  ;;  %v6931_v40 = vadd.f32 %v6804_v3, %v23724_v57  ;;  %v7193_v32 = vpop.f32.mrf.mxu0  ;;  %v1053_v57 = vmax.f32 %v1021_v6, 0.0  ;;  %v27244_v31 = vld [vmem:[#allocation21_spill] sm:$0xff]  ;;  %v8915_v6 = vld [vmem:[#allocation3 + $0xc4] sm:$0xff] }
 0x33b   : > { %v16047_v22 = vpop.permute.xlu1 %16046  ;;  %v19864_v63 = vpop.f32.mrf.mxu1  ;;  %20163 = vmatmul.mubr.msk.f32.gmra.mxu1 %vm636_vm1, %v8912_v21  ;;  %v986_v52 = vmul.f32 %v27244_v31, %v23792_v61  ;;  %v9304_v21 = vld [vmem:[#allocation3 + $0xd8] sm:$0xff] }
 0x33c   : > { %20213 = vmatmul.mubr.msk.f32.gmra.mxu0 %vm636_vm1, %v9301_v47  ;;  %v23952_v51 = vadd.f32 %v7193_v32, %v6931_v40  ;;  %v23955_v28 = vsel %vm636_vm1, %v1051_v44, %v16047_v22  ;;  %v6934_v18 = vadd.f32 %v19864_v63, %v23729_v30  ;;  %v19914_v56 = vpop.f32.mrf.mxu0  ;;  %20165 = vmatprep.mubr.msk.f32.mxu1 %vm636_vm1, %v8913_v42  ;;  %v9303_v40 = vld [vmem:[#allocation3 + $0xc8] sm:$0xff] }
 0x33d   : > { %27243 = vst [vmem:[#allocation39_spill] sm:$0xff] %v23955_v28  ;;  %20215 = vmatprep.mubr.msk.f32.mxu0 %vm636_vm1, %v9302_v45  ;;  %v6814_v16 = vpop.f32.mrf.mxu1 }
 0x33e   : > { %v23963_v60 = vadd.f32 %v19914_v56, %v6934_v18  ;;  %v6933_v3 = vadd.f32 %v6814_v16, %v23734_v49  ;;  %v7203_v44 = vpop.f32.mrf.mxu0  ;;  %v27246_v49 = vld [vmem:[#allocation23_spill] sm:$0xff]  ;;  %v1055_v18 = vmax.f32 %v1023_v35, 0.0  ;;  %v1025_v56 = vadd.f32 %v23809_v37, %v986_v52 }
 0x33f   : > { %v16051_v30 = vpop.permute.xlu1 %16050  ;;  %v19867_v32 = vpop.f32.mrf.mxu1  ;;  %20166 = vmatmul.mubr.msk.f32.gmra.mxu1 %vm636_vm1, %v8914_v2  ;;  %v988_v42 = vmul.f32 %v27246_v49, %v23792_v61 }
 0x340   : > { %20216 = vmatmul.mubr.msk.f32.gmra.mxu0 %vm636_vm1, %v9303_v40  ;;  %v23968_v47 = vadd.f32 %v7203_v44, %v6933_v3  ;;  %v23971_v46 = vsel %vm636_vm1, %v1053_v57, %v16051_v30  ;;  %v6936_v22 = vadd.f32 %v19867_v32, %v23739_v5  ;;  %v19917_v63 = vpop.f32.mrf.mxu0  ;;  %20168 = vmatprep.mubr.msk.f32.mxu1 %vm636_vm1, %v8915_v6  ;;  %v8916_v3 = vld [vmem:[#allocation3 + $0xcc] sm:$0xff]  ;;  %v9305_v44 = vld [vmem:[#allocation3 + $0xe0] sm:$0xff] }
 0x341   : > { %27245 = vst [vmem:[#allocation49_spill] sm:$0xff] %v23971_v46  ;;  %20218 = vmatprep.mubr.msk.f32.mxu0 %vm636_vm1, %v9304_v21  ;;  %v6824_v45 = vpop.f32.mrf.mxu1  ;;  %v8917_v40 = vld [vmem:[#allocation3 + $0xdc] sm:$0xff]  ;;  %v9306_v30 = vld [vmem:[#allocation3 + $0xf0] sm:$0xff] }
 0x342   : > { %v23979_v16 = vadd.f32 %v19917_v63, %v6936_v22  ;;  %v6935_v31 = vadd.f32 %v6824_v45, %v23744_v9  ;;  %v7213_v57 = vpop.f32.mrf.mxu0  ;;  %v1027_v9 = vadd.f32 %v23809_v37, %v988_v42  ;;  %v1057_v22 = vmax.f32 %v1025_v56, 0.0  ;;  %v27248_v63 = vld [vmem:[#allocation25_spill] sm:$0xff]  ;;  %v9308_v42 = vld [vmem:[#allocation3 + $0x108] sm:$0xff] }
 0x343   : > { %v16055_v5 = vpop.permute.xlu1 %16054  ;;  %v19870_v2 = vpop.f32.mrf.mxu1  ;;  %20169 = vmatmul.mubr.msk.f32.gmra.mxu1 %vm636_vm1, %v8916_v3  ;;  %v990_v49 = vmul.f32 %v27248_v63, %v23792_v61  ;;  %v9307_v3 = vld [vmem:[#allocation3 + $0xf8] sm:$0xff]  ;;  %v10081_v46 = vld [vmem:[#allocation3 + $0xca] sm:$0xff] }
 0x344   : > { %20219 = vmatmul.mubr.msk.f32.gmra.mxu0 %vm636_vm1, %v9305_v44  ;;  %v23984_v32 = vadd.f32 %v7213_v57, %v6935_v31  ;;  %v23987_v35 = vsel %vm636_vm1, %v1055_v18, %v16055_v5  ;;  %v6938_v52 = vadd.f32 %v19870_v2, %v23749_v38  ;;  %v19920_v6 = vpop.f32.mrf.mxu0  ;;  %20171 = vmatprep.mubr.msk.f32.mxu1 %vm636_vm1, %v8917_v40  ;;  %v8918_v57 = vld [vmem:[#allocation3 + $0xe4] sm:$0xff]  ;;  %v8919_v5 = vld [vmem:[#allocation3 + $0xf4] sm:$0xff] }
 0x345   : > { %27247 = vst [vmem:[#allocation50_spill] sm:$0xff] %v23987_v35  ;;  %20221 = vmatprep.mubr.msk.f32.mxu0 %vm636_vm1, %v9306_v30  ;;  %v6834_v21 = vpop.f32.mrf.mxu1 }
 0x346   : > { %v23995_v45 = vadd.f32 %v19920_v6, %v6938_v52  ;;  %v6937_v31 = vadd.f32 %v6834_v21, %v23754_v4  ;;  %v7223_v18 = vpop.f32.mrf.mxu0  ;;  %v1059_v4 = vmax.f32 %v1027_v9, 0.0  ;;  %v1029_v6 = vadd.f32 %v23809_v37, %v990_v49  ;;  %v27250_v21 = vld [vmem:[#allocation27_spill] sm:$0xff]  ;;  %v8921_v9 = vld [vmem:[#allocation3 + $0x10c] sm:$0xff] }
 0x347   : > { %v16059_v38 = vpop.permute.xlu1 %16058  ;;  %v19873_v44 = vpop.f32.mrf.mxu1  ;;  %20172 = vmatmul.mubr.msk.f32.gmra.mxu1 %vm636_vm1, %v8918_v57  ;;  %v992_v63 = vmul.f32 %v27250_v21, %v23792_v61 }
 0x348   : > { %20222 = vmatmul.mubr.msk.f32.gmra.mxu0 %vm636_vm1, %v9307_v3  ;;  %v24000_v2 = vadd.f32 %v7223_v18, %v6937_v31  ;;  %v24003_v56 = vsel %vm636_vm1, %v1057_v22, %v16059_v38  ;;  %v6940_v40 = vadd.f32 %v19873_v44, %v23759_v14  ;;  %v19923_v30 = vpop.f32.mrf.mxu0  ;;  %20174 = vmatprep.mubr.msk.f32.mxu1 %vm636_vm1, %v8919_v5  ;;  %v8920_v18 = vld [vmem:[#allocation3 + $0xfc] sm:$0xff]  ;;  %v9309_v3 = vld [vmem:[#allocation3 + $0x110] sm:$0xff]  ;;  %v1061_v21 = vmax.f32 %v1029_v6, 0.0 }
 0x349   : > { %27249 = vst [vmem:[#allocation51_spill] sm:$0xff] %v24003_v56  ;;  %20224 = vmatprep.mubr.msk.f32.mxu0 %vm636_vm1, %v9308_v42  ;;  %v6844_v52 = vpop.f32.mrf.mxu1  ;;  %v9310_v44 = vld [vmem:[#allocation3 + $0x120] sm:$0xff]  ;;  %v10079_v56 = vld [vmem:[#allocation3 + $0xb2] sm:$0xff] }
 0x34a   : > { %v24011_v57 = vadd.f32 %v19923_v30, %v6940_v40  ;;  %v6939_v31 = vadd.f32 %v6844_v52, %v23764_v1  ;;  %v7233_v22 = vpop.f32.mrf.mxu0  ;;  %v27252_v1 = vld [vmem:[#allocation29_spill] sm:$0xff] }
 0x34b   : > { %v16063_v14 = vpop.permute.xlu1 %16062  ;;  %v19876_v38 = vpop.f32.mrf.mxu1  ;;  %20175 = vmatmul.mubr.msk.f32.gmra.mxu1 %vm636_vm1, %v8920_v18  ;;  %v994_v30 = vmul.f32 %v27252_v1, %v23792_v61  ;;  %v1031_v18 = vadd.f32 %v23809_v37, %v992_v63 }
 0x34c   : > { %20225 = vmatmul.mubr.msk.f32.gmra.mxu0 %vm636_vm1, %v9309_v3  ;;  %v24016_v5 = vadd.f32 %v7233_v22, %v6939_v31  ;;  %v24019_v49 = vsel %vm636_vm1, %v1059_v4, %v16063_v14  ;;  %v6942_v42 = vadd.f32 %v19876_v38, %v23769_v11  ;;  %v19926_v40 = vpop.f32.mrf.mxu0  ;;  %20177 = vmatprep.mubr.msk.f32.mxu1 %vm636_vm1, %v8921_v9  ;;  %v8922_v22 = vld [vmem:[#allocation3 + $0x114] sm:$0xff]  ;;  %v9311_v14 = vld [vmem:[#allocation3 + $0x128] sm:$0xff] }
 0x34d   : > { %27251 = vst [vmem:[#allocation40_spill] sm:$0xff] %v24019_v49  ;;  %20227 = vmatprep.mubr.msk.f32.mxu0 %vm636_vm1, %v9310_v44  ;;  %v6854_v52 = vpop.f32.mrf.mxu1  ;;  %v8923_v9 = vld [vmem:[#allocation3 + $0x124] sm:$0xff]  ;;  %v9312_v44 = vld [vmem:[#allocation3 + $0x138] sm:$0xff] }
 0x34e   : > { %v24027_v3 = vadd.f32 %v19926_v40, %v6942_v42  ;;  %v6941_v31 = vadd.f32 %v6854_v52, %v23774_v29  ;;  %v7243_v4 = vpop.f32.mrf.mxu0  ;;  %v1033_v29 = vadd.f32 %v23809_v37, %v994_v30  ;;  %v1063_v52 = vmax.f32 %v1031_v18, 0.0  ;;  %v9314_v30 = vld [vmem:[#allocation3 + $0x150] sm:$0xff] }
 0x34f   : > { %v16067_v11 = vpop.permute.xlu1 %16066  ;;  %v19879_v38 = vpop.f32.mrf.mxu1  ;;  %20178 = vmatmul.mubr.msk.f32.gmra.mxu1 %vm636_vm1, %v8922_v22  ;;  %v27254_v22 = vld [vmem:[#allocation31_spill] sm:$0xff] }
 0x350   : > { %20228 = vmatmul.mubr.msk.f32.gmra.mxu0 %vm636_vm1, %v9311_v14  ;;  %v24032_v1 = vadd.f32 %v7243_v4, %v6941_v31  ;;  %v24035_v6 = vsel %vm636_vm1, %v1061_v21, %v16067_v11  ;;  %v6944_v63 = vadd.f32 %v19879_v38, %v23779_v13  ;;  %v19929_v42 = vpop.f32.mrf.mxu0  ;;  %20180 = vmatprep.mubr.msk.f32.mxu1 %vm636_vm1, %v8923_v9  ;;  %v8924_v4 = vld [vmem:[#allocation3 + $0x12c] sm:$0xff]  ;;  %v9313_v11 = vld [vmem:[#allocation3 + $0x140] sm:$0xff] }
 0x351   : > { %27253 = vst [vmem:[#allocation52_spill] sm:$0xff] %v24035_v6  ;;  %20230 = vmatprep.mubr.msk.f32.mxu0 %vm636_vm1, %v9312_v44  ;;  %v6864_v40 = vpop.f32.mrf.mxu1  ;;  %v996_v14 = vmul.f32 %v27254_v22, %v23792_v61  ;;  %v8925_v9 = vld [vmem:[#allocation3 + $0x13c] sm:$0xff] }
 0x352   : > { %v24043_v49 = vadd.f32 %v19929_v42, %v6944_v63  ;;  %v6943_v31 = vadd.f32 %v6864_v40, %v23784_v20  ;;  %v7253_v21 = vpop.f32.mrf.mxu0  ;;  %v1065_v20 = vmax.f32 %v1033_v29, 0.0  ;;  %v8927_v29 = vld [vmem:[#allocation3 + $0x154] sm:$0xff] }
 0x353   : > { %v16071_v13 = vpop.permute.xlu1 %16070  ;;  %v19882_v38 = vpop.f32.mrf.mxu1  ;;  %20181 = vmatmul.mubr.msk.f32.gmra.mxu1 %vm636_vm1, %v8924_v4  ;;  %v1035_v22 = vadd.f32 %v23809_v37, %v996_v14  ;;  %v27256_v4 = vld [vmem:[#allocation33_spill] sm:$0xff] }
 0x354   : > { %20231 = vmatmul.mubr.msk.f32.gmra.mxu0 %vm636_vm1, %v9313_v11  ;;  %v24048_v44 = vadd.f32 %v7253_v21, %v6943_v31  ;;  %v24051_v18 = vsel %vm636_vm1, %v1063_v52, %v16071_v13  ;;  %v6946_v63 = vadd.f32 %v19882_v38, %v23794_v48  ;;  %v19932_v42 = vpop.f32.mrf.mxu0  ;;  %20183 = vmatprep.mubr.msk.f32.mxu1 %vm636_vm1, %v8925_v9  ;;  %v8926_v21 = vld [vmem:[#allocation3 + $0x144] sm:$0xff]  ;;  %v9315_v13 = vld [vmem:[#allocation3 + $0x158] sm:$0xff] }
 0x355   : > { %27255 = vst [vmem:[#allocation41_spill] sm:$0xff] %v24051_v18  ;;  %20233 = vmatprep.mubr.msk.f32.mxu0 %vm636_vm1, %v9314_v30  ;;  %v6874_v40 = vpop.f32.mrf.mxu1  ;;  %v998_v11 = vmul.f32 %v27256_v4, %v23792_v61  ;;  %v9316_v9 = vld [vmem:[#allocation3 + $0x168] sm:$0xff] }
 0x356   : > { %v24059_v6 = vadd.f32 %v19932_v42, %v6946_v63  ;;  %v6945_v31 = vadd.f32 %v6874_v40, %v23799_v58  ;;  %v7263_v52 = vpop.f32.mrf.mxu0  ;;  %v1067_v42 = vmax.f32 %v1035_v22, 0.0 }
 0x357   : > { %v16075_v48 = vpop.permute.xlu1 %16074  ;;  %v19885_v38 = vpop.f32.mrf.mxu1  ;;  %20184 = vmatmul.mubr.msk.f32.gmra.mxu1 %vm636_vm1, %v8926_v21  ;;  %v1037_v40 = vadd.f32 %v23809_v37, %v998_v11 }
 0x358   : > { %20234 = vmatmul.mubr.msk.f32.gmra.mxu0 %vm636_vm1, %v9315_v13  ;;  %v24064_v30 = vadd.f32 %v7263_v52, %v6945_v31  ;;  %v24067_v14 = vsel %vm636_vm1, %v1065_v20, %v16075_v48  ;;  %v6948_v61 = vadd.f32 %v19885_v38, %v23811_v54  ;;  %v19935_v63 = vpop.f32.mrf.mxu0  ;;  %20186 = vmatprep.mubr.msk.f32.mxu1 %vm636_vm1, %v8927_v29  ;;  %v8928_v52 = vld [vmem:[#allocation3 + $0x15c] sm:$0xff]  ;;  %v9317_v13 = vld [vmem:[#allocation3 + $0x170] sm:$0xff] }
 0x359   : > { %27257 = vst [vmem:[#allocation53_spill] sm:$0xff] %v24067_v14  ;;  %20236 = vmatprep.mubr.msk.f32.mxu0 %vm636_vm1, %v9316_v9  ;;  %v6884_v58 = vpop.f32.mrf.mxu1  ;;  %v8929_v54 = vld [vmem:[#allocation3 + $0x16c] sm:$0xff]  ;;  %v9318_v38 = vld [vmem:[#allocation3 + $0x180] sm:$0xff]  ;;  %v1069_v9 = vmax.f32 %v1037_v40, 0.0 }
 0x35a   : > { %v24073_v4 = vadd.f32 %v19935_v63, %v6948_v61  ;;  %v6947_v21 = vadd.f32 %v6884_v58, %v23816_v25  ;;  %v7273_v31 = vpop.f32.mrf.mxu0  ;;  %v10077_v14 = vld [vmem:[#allocation3 + $0x9a] sm:$0xff] }
 0x35b   : > { %v19888_v48 = vpop.f32.mrf.mxu1  ;;  %20187 = vmatmul.mubr.msk.f32.gmra.mxu1 %vm636_vm1, %v8928_v52  ;;  %v8930_v52 = vld [vmem:[#allocation3 + $0x174] sm:$0xff] }
 0x35c   : > { %v16079_v20 = vpop.permute.xlu1 %16078  ;;  %20237 = vmatmul.mubr.msk.f32.gmra.mxu0 %vm636_vm1, %v9317_v13  ;;  %v24078_v29 = vadd.f32 %v7273_v31, %v6947_v21  ;;  %v6950_v37 = vadd.f32 %v19888_v48, %v23824_v19  ;;  %v19938_v11 = vpop.f32.mrf.mxu0  ;;  %20189 = vmatprep.mubr.msk.f32.mxu1 %vm636_vm1, %v8929_v54  ;;  %v9319_v21 = vld [vmem:[#allocation3 + $0x188] sm:$0xff] }
 0x35d   : > { %v24081_v22 = vsel %vm636_vm1, %v1067_v42, %v16079_v20  ;;  %20239 = vmatprep.mubr.msk.f32.mxu0 %vm636_vm1, %v9318_v38  ;;  %v6894_v25 = vpop.f32.mrf.mxu1  ;;  %v8931_v19 = vld [vmem:[#allocation3 + $0x184] sm:$0xff]  ;;  %v9320_v42 = vld [vmem:[#allocation3 + $0x198] sm:$0xff] }
 0x35e   : > { %27258 = vst [vmem:[#allocation54_spill] sm:$0xff] %v24081_v22  ;;  %v24086_v61 = vadd.f32 %v19938_v11, %v6950_v37  ;;  %v6949_v63 = vadd.f32 %v6894_v25, %v23829_v33  ;;  %v7283_v58 = vpop.f32.mrf.mxu0  ;;  %v24102_v25 = vld [vmem:[#allocation3 + $0x18c] sm:$0xff] }
 0x35f   : > { %v19891_v13 = vpop.f32.mrf.mxu1  ;;  %20190 = vmatmul.mubr.msk.f32.gmra.mxu1 %vm636_vm1, %v8930_v52 }
 0x360   : > { %v16083_v31 = vpop.permute.xlu1 %16082  ;;  %20240 = vmatmul.mubr.msk.f32.gmra.mxu0 %vm636_vm1, %v9319_v21  ;;  %v24091_v20 = vadd.f32 %v7283_v58, %v6949_v63  ;;  %v6952_v40 = vadd.f32 %v19891_v13, %v23835_v43  ;;  %v19941_v54 = vpop.f32.mrf.mxu0  ;;  %20192 = vmatprep.mubr.msk.f32.mxu1 %vm636_vm1, %v8931_v19  ;;  %v9321_v63 = vld [vmem:[#allocation3 + $0x1a0] sm:$0xff]  ;;  %v9679_v43 = vld [vmem:[#allocation3 + $0x31] sm:$0xff] }
 0x361   : > { %v24094_v48 = vsel %vm636_vm1, %v1069_v9, %v16083_v31  ;;  %20242 = vmatprep.mubr.msk.f32.mxu0 %vm636_vm1, %v9320_v42  ;;  %v6904_v33 = vpop.f32.mrf.mxu1  ;;  %v10068_v9 = vld [vmem:[#allocation3 + $0x32] sm:$0xff] }
 0x362   : > { %27259 = vst [vmem:[#allocation55_spill] sm:$0xff] %v24094_v48  ;;  %v24099_v38 = vadd.f32 %v19941_v54, %v6952_v40  ;;  %v6951_v37 = vadd.f32 %v6904_v33, %v23843_v17  ;;  %v7293_v11 = vpop.f32.mrf.mxu0  ;;  %v9680_v40 = vld [vmem:[#allocation3 + $0x39] sm:$0xff]  ;;  %v10075_v48 = vld [vmem:[#allocation3 + $0x82] sm:$0xff] }
 0x363   : > { %v19894_v58 = vpop.f32.mrf.mxu1  ;;  %20193 = vmatmul.mubr.msk.f32.gmra.mxu1 %vm636_vm1, %v24102_v25  ;;  %v10069_v54 = vld [vmem:[#allocation3 + $0x3a] sm:$0xff] }
 0x364   : > { %20243 = vmatmul.mubr.msk.f32.gmra.mxu0 %vm636_vm1, %v9321_v63  ;;  %v24107_v52 = vadd.f32 %v7293_v11, %v6951_v37  ;;  %v6954_v21 = vadd.f32 %v19894_v58, %v23850_v39  ;;  %v19944_v31 = vpop.f32.mrf.mxu0  ;;  %20247 = vmatprep.mubr.msk.f32.mxu1 %vm636_vm1, %v9679_v43  ;;  %v9681_v37 = vld [vmem:[#allocation3 + $0x49] sm:$0xff] }
 0x365   : > { %20297 = vmatprep.mubr.msk.f32.mxu0 %vm636_vm1, %v10068_v9  ;;  %v6914_v17 = vpop.f32.mrf.mxu1  ;;  %v24120_v39 = vld [vmem:[%s27032_s13 + $0x3c] sm:$0xf]  ;;  %v24125_v11 = vld [vmem:[%s27032_s13 + $0x40] sm:$0xf] }
 0x366   : > { %v24112_v13 = vadd.f32 %v19944_v31, %v6954_v21  ;;  %v6953_v19 = vadd.f32 %v6914_v17, %v23868_v59  ;;  %v7303_v42 = vpop.f32.mrf.mxu0  ;;  %v10070_v43 = vld [vmem:[#allocation3 + $0x4a] sm:$0xff] }
 0x367   : > { %v19949_v33 = vpop.f32.mrf.mxu1  ;;  %20248 = vmatmul.mubr.msk.f32.vlgmr.msra.gmra.mxu1 %vm636_vm1, %v9680_v40 }
 0x368   : > { %20298 = vmatmul.mubr.msk.f32.vlgmr.msra.gmra.mxu0 %vm636_vm1, %v10069_v54  ;;  %v24127_v59 = vadd.f32 %v7303_v42, %v6953_v19  ;;  %v7703_v63 = vadd.f32 %v19949_v33, %v23880_v50  ;;  %v19999_v58 = vpop.f32.mrf.mxu0  ;;  %20346 = vmatpush3.msk.msra.mxu1 %vm733_vm0, %v23861_v10  ;;  %v24139_v19 = vld [vmem:[#allocation3 + $0x51] sm:$0xff]  ;;  %v10072_v42 = vld [vmem:[#allocation3 + $0x62] sm:$0xff] }
 0x369   : > { %20250 = vmatprep.mubr.msk.f32.mxu1 %vm636_vm1, %v9681_v37  ;;  %20300 = vmatprep.mubr.msk.f32.mxu0 %vm636_vm1, %v10070_v43  ;;  %v7543_v9 = vpop.f32.mrf.mxu1  ;;  %v10071_v50 = vld [vmem:[#allocation3 + $0x52] sm:$0xff]  ;;  %v24159_v43 = vld [vmem:[#allocation3 + $0x69] sm:$0xff] }
 0x36a   : > { %20396 = vmatpush3.msk.msra.mxu0 %vm733_vm0, %v23866_v12  ;;  %v24136_v21 = vadd.f32 %v19999_v58, %v7703_v63  ;;  %v7702_v31 = vadd.f32 %v7543_v9, %v23891_v7  ;;  %v7932_v17 = vpop.f32.mrf.mxu0  ;;  %20445 = vmatprep.subr.msk.mxu1 %vm733_vm0, %v24120_v39  ;;  %v24148_v12 = vld [vmem:[#allocation3 + $0x61] sm:$0xff]  ;;  %v10073_v9 = vld [vmem:[#allocation3 + $0x6a] sm:$0xff] }
 0x36b   : > { %20495 = vmatprep.subr.msk.mxu0 %vm733_vm0, %v24125_v11  ;;  %v19952_v10 = vpop.f32.mrf.mxu1  ;;  %20251 = vmatmul.mubr.msk.f32.gmra.mxu1 %vm636_vm1, %v24139_v19 }
 0x36c   : > { %20301 = vmatmul.mubr.msk.f32.gmra.mxu0 %vm636_vm1, %v10071_v50  ;;  %v24150_v7 = vadd.f32 %v7932_v17, %v7702_v31  ;;  %v7705_v40 = vadd.f32 %v19952_v10, %v23899_v34  ;;  %v20002_v54 = vpop.f32.mrf.mxu0  ;;  %20253 = vmatprep.mubr.msk.f32.mxu1 %vm636_vm1, %v24148_v12  ;;  %v24164_v34 = vld [vmem:[#allocation3 + $0x79] sm:$0xff] }
 0x36d   : > { %20303 = vmatprep.mubr.msk.f32.mxu0 %vm636_vm1, %v10072_v42  ;;  %v7553_v33 = vpop.f32.mrf.mxu1  ;;  %v10074_v31 = vld [vmem:[#allocation3 + $0x7a] sm:$0xff] }
 0x36e   : > { %v24156_v37 = vadd.f32 %v20002_v54, %v7705_v40  ;;  %v7704_v63 = vadd.f32 %v7553_v33, %v23904_v23  ;;  %v7942_v58 = vpop.f32.mrf.mxu0 }
 0x36f   : > { %v19955_v50 = vpop.f32.mrf.mxu1  ;;  %20254 = vmatmul.mubr.msk.f32.gmra.mxu1 %vm636_vm1, %v24159_v43 }
 0x370   : > { %20304 = vmatmul.mubr.msk.f32.gmra.mxu0 %vm636_vm1, %v10073_v9  ;;  %v24166_v17 = vadd.f32 %v7942_v58, %v7704_v63  ;;  %v7707_v10 = vadd.f32 %v19955_v50, %v23915_v8  ;;  %v20005_v42 = vpop.f32.mrf.mxu0  ;;  %20256 = vmatprep.mubr.msk.f32.mxu1 %vm636_vm1, %v24164_v34  ;;  %v24175_v9 = vld [vmem:[#allocation3 + $0x81] sm:$0xff]  ;;  %v24180_v8 = vld [vmem:[#allocation3 + $0x91] sm:$0xff] }
 0x371   : > { %20306 = vmatprep.mubr.msk.f32.mxu0 %vm636_vm1, %v10074_v31  ;;  %v7563_v23 = vpop.f32.mrf.mxu1  ;;  %v10076_v63 = vld [vmem:[#allocation3 + $0x92] sm:$0xff] }
 0x372   : > { %v24172_v40 = vadd.f32 %v20005_v42, %v7707_v10  ;;  %v7706_v54 = vadd.f32 %v7563_v23, %v23920_v41  ;;  %v7952_v33 = vpop.f32.mrf.mxu0 }
 0x373   : > { %v19958_v22 = vpop.f32.mrf.mxu1  ;;  %20257 = vmatmul.mubr.msk.f32.gmra.mxu1 %vm636_vm1, %v24175_v9 }
 0x374   : > { %20307 = vmatmul.mubr.msk.f32.gmra.mxu0 %vm636_vm1, %v10075_v48  ;;  %v24182_v58 = vadd.f32 %v7952_v33, %v7706_v54  ;;  %v7709_v50 = vadd.f32 %v19958_v22, %v23931_v27  ;;  %v20008_v31 = vpop.f32.mrf.mxu0  ;;  %20259 = vmatprep.mubr.msk.f32.mxu1 %vm636_vm1, %v24180_v8  ;;  %v24191_v48 = vld [vmem:[#allocation3 + $0x99] sm:$0xff]  ;;  %v24196_v27 = vld [vmem:[#allocation3 + $0xa9] sm:$0xff] }
 0x375   : > { %20309 = vmatprep.mubr.msk.f32.mxu0 %vm636_vm1, %v10076_v63  ;;  %v7573_v41 = vpop.f32.mrf.mxu1  ;;  %v10078_v22 = vld [vmem:[#allocation3 + $0xaa] sm:$0xff] }
 0x376   : > { %v24188_v10 = vadd.f32 %v20008_v31, %v7709_v50  ;;  %v7708_v42 = vadd.f32 %v7573_v41, %v23936_v53  ;;  %v7962_v23 = vpop.f32.mrf.mxu0 }
 0x377   : > { %v19961_v18 = vpop.f32.mrf.mxu1  ;;  %20260 = vmatmul.mubr.msk.f32.gmra.mxu1 %vm636_vm1, %v24191_v48 }
 0x378   : > { %20310 = vmatmul.mubr.msk.f32.gmra.mxu0 %vm636_vm1, %v10077_v14  ;;  %v24198_v54 = vadd.f32 %v7962_v23, %v7708_v42  ;;  %v7711_v33 = vadd.f32 %v19961_v18, %v23947_v24  ;;  %v20011_v63 = vpop.f32.mrf.mxu0  ;;  %20262 = vmatprep.mubr.msk.f32.mxu1 %vm636_vm1, %v24196_v27  ;;  %v24207_v14 = vld [vmem:[#allocation3 + $0xb1] sm:$0xff]  ;;  %v24212_v24 = vld [vmem:[#allocation3 + $0xc1] sm:$0xff] }
 0x379   : > { %20312 = vmatprep.mubr.msk.f32.mxu0 %vm636_vm1, %v10078_v22  ;;  %v7583_v53 = vpop.f32.mrf.mxu1  ;;  %v10080_v18 = vld [vmem:[#allocation3 + $0xc2] sm:$0xff] }
 0x37a   : > { %v24204_v50 = vadd.f32 %v20011_v63, %v7711_v33  ;;  %v7710_v31 = vadd.f32 %v7583_v53, %v23952_v51  ;;  %v7972_v41 = vpop.f32.mrf.mxu0 }
 0x37b   : > { %v19964_v35 = vpop.f32.mrf.mxu1  ;;  %20263 = vmatmul.mubr.msk.f32.gmra.mxu1 %vm636_vm1, %v24207_v14 }
 0x37c   : > { %20313 = vmatmul.mubr.msk.f32.gmra.mxu0 %vm636_vm1, %v10079_v56  ;;  %v24214_v42 = vadd.f32 %v7972_v41, %v7710_v31  ;;  %v7713_v23 = vadd.f32 %v19964_v35, %v23963_v60  ;;  %v20014_v22 = vpop.f32.mrf.mxu0  ;;  %20265 = vmatprep.mubr.msk.f32.mxu1 %vm636_vm1, %v24212_v24  ;;  %v24223_v56 = vld [vmem:[#allocation3 + $0xc9] sm:$0xff]  ;;  %v24228_v60 = vld [vmem:[#allocation3 + $0xd9] sm:$0xff] }
 0x37d   : > { %20315 = vmatprep.mubr.msk.f32.mxu0 %vm636_vm1, %v10080_v18  ;;  %v7593_v51 = vpop.f32.mrf.mxu1  ;;  %v10082_v35 = vld [vmem:[#allocation3 + $0xda] sm:$0xff] }
 0x37e   : > { %v24220_v33 = vadd.f32 %v20014_v22, %v7713_v23  ;;  %v7712_v63 = vadd.f32 %v7593_v51, %v23968_v47  ;;  %v7982_v53 = vpop.f32.mrf.mxu0 }
 0x37f   : > { %v19967_v28 = vpop.f32.mrf.mxu1  ;;  %20266 = vmatmul.mubr.msk.f32.gmra.mxu1 %vm636_vm1, %v24223_v56 }
 0x380   : > { %20316 = vmatmul.mubr.msk.f32.gmra.mxu0 %vm636_vm1, %v10081_v46  ;;  %v24230_v31 = vadd.f32 %v7982_v53, %v7712_v63  ;;  %v7715_v41 = vadd.f32 %v19967_v28, %v23979_v16  ;;  %v20017_v18 = vpop.f32.mrf.mxu0  ;;  %20268 = vmatprep.mubr.msk.f32.mxu1 %vm636_vm1, %v24228_v60  ;;  %v24239_v46 = vld [vmem:[#allocation3 + $0xe1] sm:$0xff]  ;;  %v24244_v28 = vld [vmem:[#allocation3 + $0xf1] sm:$0xff] }
 0x381   : > { %20318 = vmatprep.mubr.msk.f32.mxu0 %vm636_vm1, %v10082_v35  ;;  %v7603_v47 = vpop.f32.mrf.mxu1  ;;  %v10084_v16 = vld [vmem:[#allocation3 + $0xf2] sm:$0xff] }
 0x382   : > { %v24236_v23 = vadd.f32 %v20017_v18, %v7715_v41  ;;  %v7714_v22 = vadd.f32 %v7603_v47, %v23984_v32  ;;  %v7992_v51 = vpop.f32.mrf.mxu0 }
 0x383   : > { %v19970_v26 = vpop.f32.mrf.mxu1  ;;  %20269 = vmatmul.mubr.msk.f32.gmra.mxu1 %vm636_vm1, %v24239_v46 }
 0x384   : > { %20319 = vmatmul.mubr.msk.f32.gmra.mxu0 %vm636_vm1, %v10083_v62  ;;  %v24246_v63 = vadd.f32 %v7992_v51, %v7714_v22  ;;  %v7717_v53 = vadd.f32 %v19970_v26, %v23995_v45  ;;  %v20020_v35 = vpop.f32.mrf.mxu0  ;;  %20271 = vmatprep.mubr.msk.f32.mxu1 %vm636_vm1, %v24244_v28  ;;  %v24255_v62 = vld [vmem:[#allocation3 + $0xf9] sm:$0xff]  ;;  %v24260_v26 = vld [vmem:[#allocation3 + $0x109] sm:$0xff] }
 0x385   : > { %20321 = vmatprep.mubr.msk.f32.mxu0 %vm636_vm1, %v10084_v16  ;;  %v7613_v32 = vpop.f32.mrf.mxu1  ;;  %27260 = vst [vmem:[#allocation42_spill] sm:$0xff] %v24260_v26  ;;  %v10086_v45 = vld [vmem:[#allocation3 + $0x10a] sm:$0xff] }
 0x386   : > { %v24252_v41 = vadd.f32 %v20020_v35, %v7717_v53  ;;  %v7716_v18 = vadd.f32 %v7613_v32, %v24000_v2  ;;  %v8002_v47 = vpop.f32.mrf.mxu0 }
 0x387   : > { %v19973_v15 = vpop.f32.mrf.mxu1  ;;  %20272 = vmatmul.mubr.msk.f32.gmra.mxu1 %vm636_vm1, %v24255_v62 }
 0x388   : > { %20322 = vmatmul.mubr.msk.f32.gmra.mxu0 %vm636_vm1, %v10085_v55  ;;  %v24262_v22 = vadd.f32 %v8002_v47, %v7716_v18  ;;  %v7719_v51 = vadd.f32 %v19973_v15, %v24011_v57  ;;  %v20023_v16 = vpop.f32.mrf.mxu0  ;;  %20274 = vmatprep.mubr.msk.f32.mxu1 %vm636_vm1, %v24260_v26  ;;  %v24271_v55 = vld [vmem:[#allocation3 + $0x111] sm:$0xff]  ;;  %v24276_v15 = vld [vmem:[#allocation3 + $0x121] sm:$0xff] }
 0x389   : > { %20324 = vmatprep.mubr.msk.f32.mxu0 %vm636_vm1, %v10086_v45  ;;  %v7623_v2 = vpop.f32.mrf.mxu1  ;;  %27261 = vst [vmem:[#allocation57_spill] sm:$0xff] %v24271_v55  ;;  %27262 = vst [vmem:[#allocation56_spill] sm:$0xff] %v24276_v15  ;;  %v10088_v57 = vld [vmem:[#allocation3 + $0x122] sm:$0xff] }
 0x38a   : > { %v24268_v53 = vadd.f32 %v20023_v16, %v7719_v51  ;;  %v7718_v35 = vadd.f32 %v7623_v2, %v24016_v5  ;;  %v8012_v32 = vpop.f32.mrf.mxu0 }
 0x38b   : > { %v19976_v36 = vpop.f32.mrf.mxu1  ;;  %20275 = vmatmul.mubr.msk.f32.gmra.mxu1 %vm636_vm1, %v24271_v55  ;;  %v10089_v55 = vld [vmem:[#allocation3 + $0x12a] sm:$0xff] }
 0x38c   : > { %20325 = vmatmul.mubr.msk.f32.gmra.mxu0 %vm636_vm1, %v10087_v0  ;;  %v24278_v18 = vadd.f32 %v8012_v32, %v7718_v35  ;;  %v7721_v47 = vadd.f32 %v19976_v36, %v24027_v3  ;;  %v20026_v45 = vpop.f32.mrf.mxu0  ;;  %20277 = vmatprep.mubr.msk.f32.mxu1 %vm636_vm1, %v24276_v15  ;;  %v24287_v0 = vld [vmem:[#allocation3 + $0x129] sm:$0xff]  ;;  %v24292_v36 = vld [vmem:[#allocation3 + $0x139] sm:$0xff] }
 0x38d   : > { %20327 = vmatprep.mubr.msk.f32.mxu0 %vm636_vm1, %v10088_v57  ;;  %v7633_v5 = vpop.f32.mrf.mxu1  ;;  %27263 = vst [vmem:[#allocation43_spill] sm:$0xff] %v24287_v0  ;;  %27264 = vst [vmem:[#allocation58_spill] sm:$0xff] %v24292_v36  ;;  %v10090_v3 = vld [vmem:[#allocation3 + $0x13a] sm:$0xff] }
 0x38e   : > { %v24284_v51 = vadd.f32 %v20026_v45, %v7721_v47  ;;  %v7720_v16 = vadd.f32 %v7633_v5, %v24032_v1  ;;  %v8022_v2 = vpop.f32.mrf.mxu0 }
 0x38f   : > { %v19979_v26 = vpop.f32.mrf.mxu1  ;;  %20278 = vmatmul.mubr.msk.f32.gmra.mxu1 %vm636_vm1, %v24287_v0  ;;  %v10091_v0 = vld [vmem:[#allocation3 + $0x142] sm:$0xff] }
 0x390   : > { %20328 = vmatmul.mubr.msk.f32.gmra.mxu0 %vm636_vm1, %v10089_v55  ;;  %v24294_v35 = vadd.f32 %v8022_v2, %v7720_v16  ;;  %v7723_v32 = vadd.f32 %v19979_v26, %v24043_v49  ;;  %v20029_v57 = vpop.f32.mrf.mxu0  ;;  %20280 = vmatprep.mubr.msk.f32.mxu1 %vm636_vm1, %v24292_v36  ;;  %v24303_v55 = vld [vmem:[#allocation3 + $0x141] sm:$0xff]  ;;  %v24308_v49 = vld [vmem:[#allocation3 + $0x151] sm:$0xff] }
 0x391   : > { %20330 = vmatprep.mubr.msk.f32.mxu0 %vm636_vm1, %v10090_v3  ;;  %v7643_v1 = vpop.f32.mrf.mxu1  ;;  %27265 = vst [vmem:[#allocation59_spill] sm:$0xff] %v24303_v55  ;;  %27266 = vst [vmem:[#allocation44_spill] sm:$0xff] %v24308_v49  ;;  %v10092_v26 = vld [vmem:[#allocation3 + $0x152] sm:$0xff] }
 0x392   : > { %v24300_v47 = vadd.f32 %v20029_v57, %v7723_v32  ;;  %v7722_v45 = vadd.f32 %v7643_v1, %v24048_v44  ;;  %v8032_v5 = vpop.f32.mrf.mxu0 }
 0x393   : > { %v19982_v15 = vpop.f32.mrf.mxu1  ;;  %20281 = vmatmul.mubr.msk.f32.gmra.mxu1 %vm636_vm1, %v24303_v55  ;;  %v10093_v55 = vld [vmem:[#allocation3 + $0x15a] sm:$0xff] }
 0x394   : > { %20331 = vmatmul.mubr.msk.f32.gmra.mxu0 %vm636_vm1, %v10091_v0  ;;  %v24310_v16 = vadd.f32 %v8032_v5, %v7722_v45  ;;  %v7725_v2 = vadd.f32 %v19982_v15, %v24059_v6  ;;  %v20032_v3 = vpop.f32.mrf.mxu0  ;;  %20283 = vmatprep.mubr.msk.f32.mxu1 %vm636_vm1, %v24308_v49  ;;  %v24319_v0 = vld [vmem:[#allocation3 + $0x159] sm:$0xff]  ;;  %v24324_v6 = vld [vmem:[#allocation3 + $0x169] sm:$0xff] }
 0x395   : > { %20333 = vmatprep.mubr.msk.f32.mxu0 %vm636_vm1, %v10092_v26  ;;  %v7653_v44 = vpop.f32.mrf.mxu1  ;;  %27267 = vst [vmem:[#allocation5_spill] sm:$0xff] %v24319_v0  ;;  %27268 = vst [vmem:[#allocation7_spill] sm:$0xff] %v24324_v6  ;;  %v10094_v15 = vld [vmem:[#allocation3 + $0x16a] sm:$0xff] }
 0x396   : > { %v24316_v32 = vadd.f32 %v20032_v3, %v7725_v2  ;;  %v7724_v57 = vadd.f32 %v7653_v44, %v24064_v30  ;;  %v8042_v1 = vpop.f32.mrf.mxu0 }
 0x397   : > { %v19985_v36 = vpop.f32.mrf.mxu1  ;;  %20284 = vmatmul.mubr.msk.f32.gmra.mxu1 %vm636_vm1, %v24319_v0  ;;  %v10095_v0 = vld [vmem:[#allocation3 + $0x172] sm:$0xff] }
 0x398   : > { %20334 = vmatmul.mubr.msk.f32.gmra.mxu0 %vm636_vm1, %v10093_v55  ;;  %v24326_v45 = vadd.f32 %v8042_v1, %v7724_v57  ;;  %v7727_v5 = vadd.f32 %v19985_v36, %v24073_v4  ;;  %v20035_v26 = vpop.f32.mrf.mxu0  ;;  %20286 = vmatprep.mubr.msk.f32.mxu1 %vm636_vm1, %v24324_v6  ;;  %v24335_v55 = vld [vmem:[#allocation3 + $0x171] sm:$0xff]  ;;  %v24340_v4 = vld [vmem:[#allocation3 + $0x181] sm:$0xff] }
 0x399   : > { %20336 = vmatprep.mubr.msk.f32.mxu0 %vm636_vm1, %v10094_v15  ;;  %v7663_v30 = vpop.f32.mrf.mxu1  ;;  %27269 = vst [vmem:[#allocation9_spill] sm:$0xff] %v24335_v55  ;;  %27270 = vst [vmem:[#allocation11_spill] sm:$0xff] %v24340_v4  ;;  %v10096_v36 = vld [vmem:[#allocation3 + $0x182] sm:$0xff] }
 0x39a   : > { %v24332_v2 = vadd.f32 %v20035_v26, %v7727_v5  ;;  %v7726_v3 = vadd.f32 %v7663_v30, %v24078_v29  ;;  %v8052_v44 = vpop.f32.mrf.mxu0 }
 0x39b   : > { %v19988_v49 = vpop.f32.mrf.mxu1  ;;  %20287 = vmatmul.mubr.msk.f32.gmra.mxu1 %vm636_vm1, %v24335_v55  ;;  %v10097_v55 = vld [vmem:[#allocation3 + $0x18a] sm:$0xff] }
 0x39c   : > { %20337 = vmatmul.mubr.msk.f32.gmra.mxu0 %vm636_vm1, %v10095_v0  ;;  %v24342_v57 = vadd.f32 %v8052_v44, %v7726_v3  ;;  %v7729_v1 = vadd.f32 %v19988_v49, %v24086_v61  ;;  %v20038_v15 = vpop.f32.mrf.mxu0  ;;  %20289 = vmatprep.mubr.msk.f32.mxu1 %vm636_vm1, %v24340_v4  ;;  %v24351_v0 = vld [vmem:[#allocation3 + $0x189] sm:$0xff]  ;;  %v24356_v61 = vld [vmem:[#allocation3 + $0x199] sm:$0xff] }
 0x39d   : > { %20339 = vmatprep.mubr.msk.f32.mxu0 %vm636_vm1, %v10096_v36  ;;  %v7673_v29 = vpop.f32.mrf.mxu1  ;;  %27271 = vst [vmem:[#allocation13_spill] sm:$0xff] %v24351_v0  ;;  %27272 = vst [vmem:[#allocation15_spill] sm:$0xff] %v24356_v61  ;;  %v10098_v49 = vld [vmem:[#allocation3 + $0x19a] sm:$0xff] }
 0x39e   : > { %v24348_v5 = vadd.f32 %v20038_v15, %v7729_v1  ;;  %v7728_v26 = vadd.f32 %v7673_v29, %v24091_v20  ;;  %v8062_v30 = vpop.f32.mrf.mxu0 }
 0x39f   : > { %v19991_v6 = vpop.f32.mrf.mxu1  ;;  %20290 = vmatmul.mubr.msk.f32.gmra.mxu1 %vm636_vm1, %v24351_v0  ;;  %v10099_v0 = vld [vmem:[#allocation3 + $0x1a2] sm:$0xff] }
 0x3a0   : > { %20340 = vmatmul.mubr.msk.f32.gmra.mxu0 %vm636_vm1, %v10097_v55  ;;  %v24358_v3 = vadd.f32 %v8062_v30, %v7728_v26  ;;  %v7731_v44 = vadd.f32 %v19991_v6, %v24099_v38  ;;  %v20041_v36 = vpop.f32.mrf.mxu0  ;;  %20292 = vmatprep.mubr.msk.f32.mxu1 %vm636_vm1, %v24356_v61  ;;  %v24367_v55 = vld [vmem:[#allocation3 + $0x1a1] sm:$0xff]  ;;  %v10457_v38 = vld [vmem:[#allocation3 + $0x33] sm:$0xff] }
 0x3a1   : > { %20342 = vmatprep.mubr.msk.f32.mxu0 %vm636_vm1, %v10098_v49  ;;  %v7683_v20 = vpop.f32.mrf.mxu1  ;;  %27273 = vst [vmem:[#allocation17_spill] sm:$0xff] %v24367_v55  ;;  %v10846_v6 = vld [vmem:[#allocation3 + $0x34] sm:$0xff]  ;;  %v10847_v61 = vld [vmem:[#allocation3 + $0x3c] sm:$0xff] }
 0x3a2   : > { %v24364_v1 = vadd.f32 %v20041_v36, %v7731_v44  ;;  %v7730_v15 = vadd.f32 %v7683_v20, %v24107_v52  ;;  %v8072_v29 = vpop.f32.mrf.mxu0 }
 0x3a3   : > { %v19994_v4 = vpop.f32.mrf.mxu1  ;;  %20293 = vmatmul.mubr.msk.f32.gmra.mxu1 %vm636_vm1, %v24367_v55  ;;  %v10458_v55 = vld [vmem:[#allocation3 + $0x3b] sm:$0xff] }
 0x3a4   : > { %20343 = vmatmul.mubr.msk.f32.gmra.mxu0 %vm636_vm1, %v10099_v0  ;;  %v24372_v26 = vadd.f32 %v8072_v29, %v7730_v15  ;;  %v7733_v30 = vadd.f32 %v19994_v4, %v24112_v13  ;;  %v20044_v49 = vpop.f32.mrf.mxu0  ;;  %20347 = vmatprep.mubr.msk.f32.mxu1 %vm636_vm1, %v10457_v38  ;;  %v24382_v15 = vld [vmem:[#allocation3 + $0x4b] sm:$0xff]  ;;  %v24387_v13 = vld [vmem:[%s27032_s13 + $0x44] sm:$0xf]  ;;  %v24392_v4 = vld [vmem:[%s27032_s13 + $0x48] sm:$0xf] }
 0x3a5   : > { %20397 = vmatprep.mubr.msk.f32.mxu0 %vm636_vm1, %v10846_v6  ;;  %v7693_v52 = vpop.f32.mrf.mxu1  ;;  %27274 = vst [vmem:[#allocation19_spill] sm:$0xff] %v24382_v15 }
 0x3a6   : > { %v24377_v44 = vadd.f32 %v20044_v49, %v7733_v30  ;;  %v7732_v36 = vadd.f32 %v7693_v52, %v24127_v59  ;;  %v8082_v20 = vpop.f32.mrf.mxu0  ;;  %v10849_v52 = vld [vmem:[#allocation3 + $0x54] sm:$0xff] }
 0x3a7   : > { %v20049_v0 = vpop.f32.mrf.mxu1  ;;  %20348 = vmatmul.mubr.msk.f32.vlgmr.msra.gmra.mxu1 %vm636_vm1, %v10458_v55 }
 0x3a8   : > { %20398 = vmatmul.mubr.msk.f32.vlgmr.msra.gmra.mxu0 %vm636_vm1, %v10847_v61  ;;  %v24394_v59 = vadd.f32 %v8082_v20, %v7732_v36  ;;  %v8481_v29 = vadd.f32 %v20049_v0, %v24136_v21  ;;  %v20099_v38 = vpop.f32.mrf.mxu0  ;;  %20446 = vmatpush3.msk.msra.mxu1 %vm733_vm0, %v24120_v39  ;;  %v10848_v61 = vld [vmem:[#allocation3 + $0x4c] sm:$0xff]  ;;  %v10850_v36 = vld [vmem:[#allocation3 + $0x64] sm:$0xff] }
 0x3a9   : > { %20350 = vmatprep.mubr.msk.f32.mxu1 %vm636_vm1, %v24382_v15  ;;  %20400 = vmatprep.mubr.msk.f32.mxu0 %vm636_vm1, %v10848_v61  ;;  %v8321_v55 = vpop.f32.mrf.mxu1  ;;  %v24407_v21 = vld [vmem:[#allocation3 + $0x53] sm:$0xff] }
 0x3aa   : > { %20496 = vmatpush3.msk.msra.mxu0 %vm733_vm0, %v24125_v11  ;;  %v24404_v6 = vadd.f32 %v20099_v38, %v8481_v29  ;;  %v8480_v30 = vadd.f32 %v8321_v55, %v24150_v7  ;;  %v8710_v49 = vpop.f32.mrf.mxu0  ;;  %27275 = vst [vmem:[#allocation21_spill] sm:$0xff] %v24407_v21  ;;  %20545 = vmatprep.subr.msk.mxu1 %vm733_vm0, %v24387_v13  ;;  %v24416_v11 = vld [vmem:[#allocation3 + $0x63] sm:$0xff] }
 0x3ab   : > { %20595 = vmatprep.subr.msk.mxu0 %vm733_vm0, %v24392_v4  ;;  %v20052_v39 = vpop.f32.mrf.mxu1  ;;  %20351 = vmatmul.mubr.msk.f32.gmra.mxu1 %vm636_vm1, %v24407_v21  ;;  %27276 = vst [vmem:[#allocation23_spill] sm:$0xff] %v24416_v11  ;;  %v10851_v21 = vld [vmem:[#allocation3 + $0x6c] sm:$0xff] }
 0x3ac   : > { %20401 = vmatmul.mubr.msk.f32.gmra.mxu0 %vm636_vm1, %v10849_v52  ;;  %v24418_v7 = vadd.f32 %v8710_v49, %v8480_v30  ;;  %v8483_v20 = vadd.f32 %v20052_v39, %v24156_v37  ;;  %v20102_v0 = vpop.f32.mrf.mxu0  ;;  %20353 = vmatprep.mubr.msk.f32.mxu1 %vm636_vm1, %v24416_v11  ;;  %v24427_v52 = vld [vmem:[#allocation3 + $0x6b] sm:$0xff]  ;;  %v24432_v37 = vld [vmem:[#allocation3 + $0x7b] sm:$0xff] }
 0x3ad   : > { %20403 = vmatprep.mubr.msk.f32.mxu0 %vm636_vm1, %v10850_v36  ;;  %v8331_v29 = vpop.f32.mrf.mxu1  ;;  %27277 = vst [vmem:[#allocation25_spill] sm:$0xff] %v24427_v52  ;;  %27278 = vst [vmem:[#allocation27_spill] sm:$0xff] %v24432_v37  ;;  %v10852_v30 = vld [vmem:[#allocation3 + $0x7c] sm:$0xff] }
 0x3ae   : > { %v24424_v38 = vadd.f32 %v20102_v0, %v8483_v20  ;;  %v8482_v61 = vadd.f32 %v8331_v29, %v24166_v17  ;;  %v8720_v55 = vpop.f32.mrf.mxu0 }
 0x3af   : > { %v20055_v15 = vpop.f32.mrf.mxu1  ;;  %20354 = vmatmul.mubr.msk.f32.gmra.mxu1 %vm636_vm1, %v24427_v52  ;;  %v10853_v52 = vld [vmem:[#allocation3 + $0x84] sm:$0xff] }
 0x3b0   : > { %20404 = vmatmul.mubr.msk.f32.gmra.mxu0 %vm636_vm1, %v10851_v21  ;;  %v24434_v49 = vadd.f32 %v8720_v55, %v8482_v61  ;;  %v8485_v39 = vadd.f32 %v20055_v15, %v24172_v40  ;;  %v20105_v36 = vpop.f32.mrf.mxu0  ;;  %20356 = vmatprep.mubr.msk.f32.mxu1 %vm636_vm1, %v24432_v37  ;;  %v24443_v21 = vld [vmem:[#allocation3 + $0x83] sm:$0xff]  ;;  %v24448_v40 = vld [vmem:[#allocation3 + $0x93] sm:$0xff] }
 0x3b1   : > { %20406 = vmatprep.mubr.msk.f32.mxu0 %vm636_vm1, %v10852_v30  ;;  %v8341_v17 = vpop.f32.mrf.mxu1  ;;  %27279 = vst [vmem:[#allocation29_spill] sm:$0xff] %v24443_v21  ;;  %27280 = vst [vmem:[#allocation31_spill] sm:$0xff] %v24448_v40  ;;  %v10854_v15 = vld [vmem:[#allocation3 + $0x94] sm:$0xff] }
 0x3b2   : > { %v24440_v20 = vadd.f32 %v20105_v36, %v8485_v39  ;;  %v8484_v0 = vadd.f32 %v8341_v17, %v24182_v58  ;;  %v8730_v29 = vpop.f32.mrf.mxu0 }
 0x3b3   : > { %v20058_v11 = vpop.f32.mrf.mxu1  ;;  %20357 = vmatmul.mubr.msk.f32.gmra.mxu1 %vm636_vm1, %v24443_v21  ;;  %v10855_v21 = vld [vmem:[#allocation3 + $0x9c] sm:$0xff] }
 0x3b4   : > { %20407 = vmatmul.mubr.msk.f32.gmra.mxu0 %vm636_vm1, %v10853_v52  ;;  %v24450_v61 = vadd.f32 %v8730_v29, %v8484_v0  ;;  %v8487_v55 = vadd.f32 %v20058_v11, %v24188_v10  ;;  %v20108_v30 = vpop.f32.mrf.mxu0  ;;  %20359 = vmatprep.mubr.msk.f32.mxu1 %vm636_vm1, %v24448_v40  ;;  %v24459_v52 = vld [vmem:[#allocation3 + $0x9b] sm:$0xff]  ;;  %v24464_v10 = vld [vmem:[#allocation3 + $0xab] sm:$0xff] }
 0x3b5   : > { %20409 = vmatprep.mubr.msk.f32.mxu0 %vm636_vm1, %v10854_v15  ;;  %v8351_v58 = vpop.f32.mrf.mxu1  ;;  %27281 = vst [vmem:[#allocation33_spill] sm:$0xff] %v24459_v52  ;;  %27282 = vst [vmem:[#allocation60_spill] sm:$0xff] %v24464_v10  ;;  %v10856_v11 = vld [vmem:[#allocation3 + $0xac] sm:$0xff] }
 0x3b6   : > { %v24456_v39 = vadd.f32 %v20108_v30, %v8487_v55  ;;  %v8486_v36 = vadd.f32 %v8351_v58, %v24198_v54  ;;  %v8740_v17 = vpop.f32.mrf.mxu0 }
 0x3b7   : > { %v20061_v37 = vpop.f32.mrf.mxu1  ;;  %20360 = vmatmul.mubr.msk.f32.gmra.mxu1 %vm636_vm1, %v24459_v52  ;;  %v10857_v52 = vld [vmem:[#allocation3 + $0xb4] sm:$0xff] }
 0x3b8   : > { %20410 = vmatmul.mubr.msk.f32.gmra.mxu0 %vm636_vm1, %v10855_v21  ;;  %v24466_v0 = vadd.f32 %v8740_v17, %v8486_v36  ;;  %v8489_v29 = vadd.f32 %v20061_v37, %v24204_v50  ;;  %v20111_v15 = vpop.f32.mrf.mxu0  ;;  %20362 = vmatprep.mubr.msk.f32.mxu1 %vm636_vm1, %v24464_v10  ;;  %v24475_v21 = vld [vmem:[#allocation3 + $0xb3] sm:$0xff]  ;;  %v24480_v50 = vld [vmem:[#allocation3 + $0xc3] sm:$0xff] }
 0x3b9   : > { %20412 = vmatprep.mubr.msk.f32.mxu0 %vm636_vm1, %v10856_v11  ;;  %v8361_v54 = vpop.f32.mrf.mxu1  ;;  %27283 = vst [vmem:[#allocation61_spill] sm:$0xff] %v24475_v21  ;;  %27284 = vst [vmem:[#allocation62_spill] sm:$0xff] %v24480_v50  ;;  %v10858_v37 = vld [vmem:[#allocation3 + $0xc4] sm:$0xff] }
 0x3ba   : > { %v24472_v55 = vadd.f32 %v20111_v15, %v8489_v29  ;;  %v8488_v30 = vadd.f32 %v8361_v54, %v24214_v42  ;;  %v8750_v58 = vpop.f32.mrf.mxu0 }
 0x3bb   : > { %v20064_v40 = vpop.f32.mrf.mxu1  ;;  %20363 = vmatmul.mubr.msk.f32.gmra.mxu1 %vm636_vm1, %v24475_v21  ;;  %v10859_v21 = vld [vmem:[#allocation3 + $0xcc] sm:$0xff] }
 0x3bc   : > { %20413 = vmatmul.mubr.msk.f32.gmra.mxu0 %vm636_vm1, %v10857_v52  ;;  %v24482_v36 = vadd.f32 %v8750_v58, %v8488_v30  ;;  %v8491_v17 = vadd.f32 %v20064_v40, %v24220_v33  ;;  %v20114_v11 = vpop.f32.mrf.mxu0  ;;  %20365 = vmatprep.mubr.msk.f32.mxu1 %vm636_vm1, %v24480_v50  ;;  %v24491_v52 = vld [vmem:[#allocation3 + $0xcb] sm:$0xff]  ;;  %v24496_v33 = vld [vmem:[#allocation3 + $0xdb] sm:$0xff] }
 0x3bd   : > { %20415 = vmatprep.mubr.msk.f32.mxu0 %vm636_vm1, %v10858_v37  ;;  %v8371_v42 = vpop.f32.mrf.mxu1  ;;  %27285 = vst [vmem:[#allocation63_spill] sm:$0xff] %v24491_v52  ;;  %27286 = vst [vmem:[#allocation64_spill] sm:$0xff] %v24496_v33  ;;  %v10860_v40 = vld [vmem:[#allocation3 + $0xdc] sm:$0xff] }
 0x3be   : > { %v24488_v29 = vadd.f32 %v20114_v11, %v8491_v17  ;;  %v8490_v15 = vadd.f32 %v8371_v42, %v24230_v31  ;;  %v8760_v54 = vpop.f32.mrf.mxu0 }
 0x3bf   : > { %v20067_v10 = vpop.f32.mrf.mxu1  ;;  %20366 = vmatmul.mubr.msk.f32.gmra.mxu1 %vm636_vm1, %v24491_v52  ;;  %v10861_v52 = vld [vmem:[#allocation3 + $0xe4] sm:$0xff] }
 0x3c0   : > { %20416 = vmatmul.mubr.msk.f32.gmra.mxu0 %vm636_vm1, %v10859_v21  ;;  %v24498_v30 = vadd.f32 %v8760_v54, %v8490_v15  ;;  %v8493_v58 = vadd.f32 %v20067_v10, %v24236_v23  ;;  %v20117_v37 = vpop.f32.mrf.mxu0  ;;  %20368 = vmatprep.mubr.msk.f32.mxu1 %vm636_vm1, %v24496_v33  ;;  %v24507_v21 = vld [vmem:[#allocation3 + $0xe3] sm:$0xff]  ;;  %v24512_v23 = vld [vmem:[#allocation3 + $0xf3] sm:$0xff] }
 0x3c1   : > { %20418 = vmatprep.mubr.msk.f32.mxu0 %vm636_vm1, %v10860_v40  ;;  %v8381_v31 = vpop.f32.mrf.mxu1  ;;  %27287 = vst [vmem:[#allocation65_spill] sm:$0xff] %v24507_v21  ;;  %27288 = vst [vmem:[#allocation66_spill] sm:$0xff] %v24512_v23  ;;  %v10862_v10 = vld [vmem:[#allocation3 + $0xf4] sm:$0xff] }
 0x3c2   : > { %v24504_v17 = vadd.f32 %v20117_v37, %v8493_v58  ;;  %v8492_v11 = vadd.f32 %v8381_v31, %v24246_v63  ;;  %v8770_v42 = vpop.f32.mrf.mxu0 }
 0x3c3   : > { %v20070_v50 = vpop.f32.mrf.mxu1  ;;  %20369 = vmatmul.mubr.msk.f32.gmra.mxu1 %vm636_vm1, %v24507_v21  ;;  %v10863_v21 = vld [vmem:[#allocation3 + $0xfc] sm:$0xff] }
 0x3c4   : > { %20419 = vmatmul.mubr.msk.f32.gmra.mxu0 %vm636_vm1, %v10861_v52  ;;  %v24514_v15 = vadd.f32 %v8770_v42, %v8492_v11  ;;  %v8495_v54 = vadd.f32 %v20070_v50, %v24252_v41  ;;  %v20120_v40 = vpop.f32.mrf.mxu0  ;;  %20371 = vmatprep.mubr.msk.f32.mxu1 %vm636_vm1, %v24512_v23  ;;  %v24523_v52 = vld [vmem:[#allocation3 + $0xfb] sm:$0xff]  ;;  %v24528_v41 = vld [vmem:[#allocation3 + $0x10b] sm:$0xff] }
 0x3c5   : > { %20421 = vmatprep.mubr.msk.f32.mxu0 %vm636_vm1, %v10862_v10  ;;  %v8391_v63 = vpop.f32.mrf.mxu1  ;;  %27289 = vst [vmem:[#allocation67_spill] sm:$0xff] %v24523_v52  ;;  %27290 = vst [vmem:[#allocation68_spill] sm:$0xff] %v24528_v41  ;;  %v10864_v50 = vld [vmem:[#allocation3 + $0x10c] sm:$0xff] }
 0x3c6   : > { %v24520_v58 = vadd.f32 %v20120_v40, %v8495_v54  ;;  %v8494_v37 = vadd.f32 %v8391_v63, %v24262_v22  ;;  %v8780_v31 = vpop.f32.mrf.mxu0 }
 0x3c7   : > { %v20073_v33 = vpop.f32.mrf.mxu1  ;;  %20372 = vmatmul.mubr.msk.f32.gmra.mxu1 %vm636_vm1, %v24523_v52  ;;  %v10865_v52 = vld [vmem:[#allocation3 + $0x114] sm:$0xff] }
 0x3c8   : > { %20422 = vmatmul.mubr.msk.f32.gmra.mxu0 %vm636_vm1, %v10863_v21  ;;  %v24530_v11 = vadd.f32 %v8780_v31, %v8494_v37  ;;  %v8497_v42 = vadd.f32 %v20073_v33, %v24268_v53  ;;  %v20123_v10 = vpop.f32.mrf.mxu0  ;;  %20374 = vmatprep.mubr.msk.f32.mxu1 %vm636_vm1, %v24528_v41  ;;  %v24539_v21 = vld [vmem:[#allocation3 + $0x113] sm:$0xff]  ;;  %v24544_v53 = vld [vmem:[#allocation3 + $0x123] sm:$0xff] }
 0x3c9   : > { %20424 = vmatprep.mubr.msk.f32.mxu0 %vm636_vm1, %v10864_v50  ;;  %v8401_v22 = vpop.f32.mrf.mxu1  ;;  %27291 = vst [vmem:[#allocation69_spill] sm:$0xff] %v24539_v21  ;;  %27292 = vst [vmem:[#allocation70_spill] sm:$0xff] %v24544_v53  ;;  %v10866_v33 = vld [vmem:[#allocation3 + $0x124] sm:$0xff] }
 0x3ca   : > { %v24536_v54 = vadd.f32 %v20123_v10, %v8497_v42  ;;  %v8496_v40 = vadd.f32 %v8401_v22, %v24278_v18  ;;  %v8790_v63 = vpop.f32.mrf.mxu0 }
 0x3cb   : > { %v20076_v23 = vpop.f32.mrf.mxu1  ;;  %20375 = vmatmul.mubr.msk.f32.gmra.mxu1 %vm636_vm1, %v24539_v21  ;;  %v10867_v21 = vld [vmem:[#allocation3 + $0x12c] sm:$0xff] }
 0x3cc   : > { %20425 = vmatmul.mubr.msk.f32.gmra.mxu0 %vm636_vm1, %v10865_v52  ;;  %v24546_v37 = vadd.f32 %v8790_v63, %v8496_v40  ;;  %v8499_v31 = vadd.f32 %v20076_v23, %v24284_v51  ;;  %v20126_v50 = vpop.f32.mrf.mxu0  ;;  %20377 = vmatprep.mubr.msk.f32.mxu1 %vm636_vm1, %v24544_v53  ;;  %v24555_v52 = vld [vmem:[#allocation3 + $0x12b] sm:$0xff]  ;;  %v24560_v51 = vld [vmem:[#allocation3 + $0x13b] sm:$0xff] }
 0x3cd   : > { %20427 = vmatprep.mubr.msk.f32.mxu0 %vm636_vm1, %v10866_v33  ;;  %v8411_v18 = vpop.f32.mrf.mxu1  ;;  %27293 = vst [vmem:[#allocation71_spill] sm:$0xff] %v24555_v52  ;;  %27294 = vst [vmem:[#allocation72_spill] sm:$0xff] %v24560_v51  ;;  %v10868_v23 = vld [vmem:[#allocation3 + $0x13c] sm:$0xff] }
 0x3ce   : > { %v24552_v42 = vadd.f32 %v20126_v50, %v8499_v31  ;;  %v8498_v10 = vadd.f32 %v8411_v18, %v24294_v35  ;;  %v8800_v22 = vpop.f32.mrf.mxu0 }
 0x3cf   : > { %v20079_v41 = vpop.f32.mrf.mxu1  ;;  %20378 = vmatmul.mubr.msk.f32.gmra.mxu1 %vm636_vm1, %v24555_v52  ;;  %v10869_v52 = vld [vmem:[#allocation3 + $0x144] sm:$0xff] }
 0x3d0   : > { %20428 = vmatmul.mubr.msk.f32.gmra.mxu0 %vm636_vm1, %v10867_v21  ;;  %v24562_v40 = vadd.f32 %v8800_v22, %v8498_v10  ;;  %v8501_v63 = vadd.f32 %v20079_v41, %v24300_v47  ;;  %v20129_v33 = vpop.f32.mrf.mxu0  ;;  %20380 = vmatprep.mubr.msk.f32.mxu1 %vm636_vm1, %v24560_v51  ;;  %v24571_v21 = vld [vmem:[#allocation3 + $0x143] sm:$0xff]  ;;  %v24576_v47 = vld [vmem:[#allocation3 + $0x153] sm:$0xff] }
 0x3d1   : > { %20430 = vmatprep.mubr.msk.f32.mxu0 %vm636_vm1, %v10868_v23  ;;  %v8421_v35 = vpop.f32.mrf.mxu1  ;;  %27295 = vst [vmem:[#allocation73_spill] sm:$0xff] %v24571_v21  ;;  %27296 = vst [vmem:[#allocation74_spill] sm:$0xff] %v24576_v47  ;;  %v10870_v41 = vld [vmem:[#allocation3 + $0x154] sm:$0xff] }
 0x3d2   : > { %v24568_v31 = vadd.f32 %v20129_v33, %v8501_v63  ;;  %v8500_v50 = vadd.f32 %v8421_v35, %v24310_v16  ;;  %v8810_v18 = vpop.f32.mrf.mxu0 }
 0x3d3   : > { %v20082_v53 = vpop.f32.mrf.mxu1  ;;  %20381 = vmatmul.mubr.msk.f32.gmra.mxu1 %vm636_vm1, %v24571_v21  ;;  %v10871_v21 = vld [vmem:[#allocation3 + $0x15c] sm:$0xff] }
 0x3d4   : > { %20431 = vmatmul.mubr.msk.f32.gmra.mxu0 %vm636_vm1, %v10869_v52  ;;  %v24578_v10 = vadd.f32 %v8810_v18, %v8500_v50  ;;  %v8503_v22 = vadd.f32 %v20082_v53, %v24316_v32  ;;  %v20132_v23 = vpop.f32.mrf.mxu0  ;;  %20383 = vmatprep.mubr.msk.f32.mxu1 %vm636_vm1, %v24576_v47  ;;  %v24587_v52 = vld [vmem:[#allocation3 + $0x15b] sm:$0xff]  ;;  %v24592_v32 = vld [vmem:[#allocation3 + $0x16b] sm:$0xff] }
 0x3d5   : > { %20433 = vmatprep.mubr.msk.f32.mxu0 %vm636_vm1, %v10870_v41  ;;  %v8431_v16 = vpop.f32.mrf.mxu1  ;;  %27297 = vst [vmem:[#allocation75_spill] sm:$0xff] %v24587_v52  ;;  %v10872_v53 = vld [vmem:[#allocation3 + $0x16c] sm:$0xff] }
 0x3d6   : > { %v24584_v63 = vadd.f32 %v20132_v23, %v8503_v22  ;;  %v8502_v33 = vadd.f32 %v8431_v16, %v24326_v45  ;;  %v8820_v35 = vpop.f32.mrf.mxu0 }
 0x3d7   : > { %v20085_v51 = vpop.f32.mrf.mxu1  ;;  %20384 = vmatmul.mubr.msk.f32.gmra.mxu1 %vm636_vm1, %v24587_v52  ;;  %v10873_v52 = vld [vmem:[#allocation3 + $0x174] sm:$0xff] }
 0x3d8   : > { %20434 = vmatmul.mubr.msk.f32.gmra.mxu0 %vm636_vm1, %v10871_v21  ;;  %v24594_v50 = vadd.f32 %v8820_v35, %v8502_v33  ;;  %v8505_v18 = vadd.f32 %v20085_v51, %v24332_v2  ;;  %v20135_v41 = vpop.f32.mrf.mxu0  ;;  %20386 = vmatprep.mubr.msk.f32.mxu1 %vm636_vm1, %v24592_v32  ;;  %v24603_v21 = vld [vmem:[#allocation3 + $0x173] sm:$0xff]  ;;  %v24608_v2 = vld [vmem:[#allocation3 + $0x183] sm:$0xff] }
 0x3d9   : > { %20436 = vmatprep.mubr.msk.f32.mxu0 %vm636_vm1, %v10872_v53  ;;  %v8441_v45 = vpop.f32.mrf.mxu1  ;;  %27298 = vst [vmem:[#allocation76_spill] sm:$0xff] %v24603_v21  ;;  %27299 = vst [vmem:[#allocation77_spill] sm:$0xff] %v24608_v2  ;;  %v10874_v51 = vld [vmem:[#allocation3 + $0x184] sm:$0xff] }
 0x3da   : > { %v24600_v22 = vadd.f32 %v20135_v41, %v8505_v18  ;;  %v8504_v23 = vadd.f32 %v8441_v45, %v24342_v57  ;;  %v8830_v16 = vpop.f32.mrf.mxu0 }
 0x3db   : > { %v20088_v47 = vpop.f32.mrf.mxu1  ;;  %20387 = vmatmul.mubr.msk.f32.gmra.mxu1 %vm636_vm1, %v24603_v21 }
 0x3dc   : > { %20437 = vmatmul.mubr.msk.f32.gmra.mxu0 %vm636_vm1, %v10873_v52  ;;  %v24610_v33 = vadd.f32 %v8830_v16, %v8504_v23  ;;  %v8507_v35 = vadd.f32 %v20088_v47, %v24348_v5  ;;  %v20138_v53 = vpop.f32.mrf.mxu0  ;;  %20389 = vmatprep.mubr.msk.f32.mxu1 %vm636_vm1, %v24608_v2  ;;  %v24619_v52 = vld [vmem:[#allocation3 + $0x18b] sm:$0xff]  ;;  %v24625_v5 = vld [vmem:[#allocation3 + $0x19b] sm:$0xff] }
 0x3dd   : > { %20439 = vmatprep.mubr.msk.f32.mxu0 %vm636_vm1, %v10874_v51  ;;  %v8451_v57 = vpop.f32.mrf.mxu1  ;;  %27300 = vst [vmem:[#allocation78_spill] sm:$0xff] %v24619_v52  ;;  %27301 = vst [vmem:[#allocation79_spill] sm:$0xff] %v24625_v5  ;;  %v10876_v47 = vld [vmem:[#allocation3 + $0x19c] sm:$0xff] }
 0x3de   : > { %v24616_v18 = vadd.f32 %v20138_v53, %v8507_v35  ;;  %v8506_v41 = vadd.f32 %v8451_v57, %v24358_v3  ;;  %v8840_v45 = vpop.f32.mrf.mxu0 }
 0x3df   : > { %v20091_v21 = vpop.f32.mrf.mxu1  ;;  %20390 = vmatmul.mubr.msk.f32.gmra.mxu1 %vm636_vm1, %v24619_v52  ;;  %v10877_v52 = vld [vmem:[#allocation3 + $0x1a4] sm:$0xff] }
 0x3e0   : > { %20440 = vmatmul.mubr.msk.f32.gmra.mxu0 %vm636_vm1, %v24102_v25  ;;  %v24627_v23 = vadd.f32 %v8840_v45, %v8506_v41  ;;  %v8509_v16 = vadd.f32 %v20091_v21, %v24364_v1  ;;  %v20141_v51 = vpop.f32.mrf.mxu0  ;;  %20392 = vmatprep.mubr.msk.f32.mxu1 %vm636_vm1, %v24625_v5  ;;  %v24636_v25 = vld [vmem:[#allocation3 + $0x1a3] sm:$0xff] }
 0x3e1   : > { %20442 = vmatprep.mubr.msk.f32.mxu0 %vm636_vm1, %v10876_v47  ;;  %v8461_v3 = vpop.f32.mrf.mxu1  ;;  %27302 = vst [vmem:[#allocation80_spill] sm:$0xff] %v24636_v25  ;;  %v11236_v1 = vld [vmem:[#allocation3 + $0x48] sm:$0xff] }
 0x3e2   : > { %v24633_v35 = vadd.f32 %v20141_v51, %v8509_v16  ;;  %v8508_v53 = vadd.f32 %v8461_v3, %v24372_v26  ;;  %v8850_v57 = vpop.f32.mrf.mxu0  ;;  %v21014_v47 = vld [vmem:[#allocation3 + $0x49] sm:$0xff] }
 0x3e3   : > { %v20094_v2 = vpop.f32.mrf.mxu1  ;;  %20393 = vmatmul.mubr.msk.f32.gmra.mxu1 %vm636_vm1, %v24636_v25  ;;  %v11237_v25 = vld [vmem:[#allocation3 + $0x50] sm:$0xff] }
 0x3e4   : > { %20443 = vmatmul.mubr.msk.f32.gmra.mxu0 %vm636_vm1, %v10877_v52  ;;  %v24641_v21 = vadd.f32 %v8850_v57, %v8508_v53  ;;  %v8511_v41 = vadd.f32 %v20094_v2, %v24377_v44  ;;  %v20144_v45 = vpop.f32.mrf.mxu0  ;;  %20447 = vmatprep.mubr.msk.f32.mxu1 %vm636_vm1, %v11236_v1  ;;  %v24652_v44 = vld [vmem:[#allocation3 + $0x60] sm:$0xff]  ;;  %v24657_v2 = vld [vmem:[%s27032_s13 + $0x4c] sm:$0xf] }
 0x3e5   : > { %20497 = vmatprep.mubr.msk.f32.mxu0 %vm636_vm1, %v21014_v47  ;;  %v8471_v26 = vpop.f32.mrf.mxu1  ;;  %v24662_v52 = vld [vmem:[%s27032_s13 + $0x50] sm:$0xf] }
 0x3e6   : > { %v24646_v16 = vadd.f32 %v20144_v45, %v8511_v41  ;;  %v8510_v51 = vadd.f32 %v8471_v26, %v24394_v59  ;;  %v8860_v3 = vpop.f32.mrf.mxu0 }
 0x3e7   : > { %v20149_v5 = vpop.f32.mrf.mxu1  ;;  %20448 = vmatmul.mubr.msk.f32.vlgmr.msra.gmra.mxu1 %vm636_vm1, %v11237_v25 }
 0x3e8   : > { %20498 = vmatmul.mubr.msk.f32.vlgmr.msra.gmra.mxu0 %vm636_vm1, %v24139_v19  ;;  %v24664_v59 = vadd.f32 %v8860_v3, %v8510_v51  ;;  %v9259_v53 = vadd.f32 %v20149_v5, %v24404_v6  ;;  %v20199_v57 = vpop.f32.mrf.mxu0  ;;  %20546 = vmatpush3.msk.msra.mxu1 %vm733_vm0, %v24387_v13  ;;  %v24678_v6 = vld [vmem:[#allocation3 + $0x68] sm:$0xff] }
 0x3e9   : > { %20450 = vmatprep.mubr.msk.f32.mxu1 %vm636_vm1, %v24652_v44  ;;  %20500 = vmatprep.mubr.msk.f32.mxu0 %vm636_vm1, %v24148_v12  ;;  %v9099_v19 = vpop.f32.mrf.mxu1  ;;  %v24688_v12 = vld [vmem:[#allocation3 + $0x78] sm:$0xff] }
 0x3ea   : > { %20596 = vmatpush3.msk.msra.mxu0 %vm733_vm0, %v24392_v4  ;;  %v24675_v25 = vadd.f32 %v20199_v57, %v9259_v53  ;;  %v9258_v1 = vadd.f32 %v9099_v19, %v24418_v7  ;;  %v9488_v41 = vpop.f32.mrf.mxu0  ;;  %20645 = vmatprep.subr.msk.mxu1 %vm733_vm0, %v24657_v2 }
 0x3eb   : > { %20695 = vmatprep.subr.msk.mxu0 %vm733_vm0, %v24662_v52  ;;  %v20152_v13 = vpop.f32.mrf.mxu1  ;;  %20451 = vmatmul.mubr.msk.f32.gmra.mxu1 %vm636_vm1, %v24678_v6 }
 0x3ec   : > { %20501 = vmatmul.mubr.msk.f32.gmra.mxu0 %vm636_vm1, %v24159_v43  ;;  %v24690_v4 = vadd.f32 %v9488_v41, %v9258_v1  ;;  %v9261_v7 = vadd.f32 %v20152_v13, %v24424_v38  ;;  %v20202_v5 = vpop.f32.mrf.mxu0  ;;  %20453 = vmatprep.mubr.msk.f32.mxu1 %vm636_vm1, %v24688_v12  ;;  %v24700_v43 = vld [vmem:[#allocation3 + $0x80] sm:$0xff]  ;;  %v24706_v38 = vld [vmem:[#allocation3 + $0x90] sm:$0xff] }
 0x3ed   : > { %20503 = vmatprep.mubr.msk.f32.mxu0 %vm636_vm1, %v24164_v34  ;;  %v9109_v45 = vpop.f32.mrf.mxu1 }
 0x3ee   : > { %v24697_v47 = vadd.f32 %v20202_v5, %v9261_v7  ;;  %v9260_v26 = vadd.f32 %v9109_v45, %v24434_v49  ;;  %v9498_v51 = vpop.f32.mrf.mxu0 }
 0x3ef   : > { %v20155_v3 = vpop.f32.mrf.mxu1  ;;  %20454 = vmatmul.mubr.msk.f32.gmra.mxu1 %vm636_vm1, %v24700_v43 }
 0x3f0   : > { %20504 = vmatmul.mubr.msk.f32.gmra.mxu0 %vm636_vm1, %v24175_v9  ;;  %v24708_v53 = vadd.f32 %v9498_v51, %v9260_v26  ;;  %v9263_v34 = vadd.f32 %v20155_v3, %v24440_v20  ;;  %v20205_v57 = vpop.f32.mrf.mxu0  ;;  %20456 = vmatprep.mubr.msk.f32.mxu1 %vm636_vm1, %v24706_v38  ;;  %v24718_v9 = vld [vmem:[#allocation3 + $0x98] sm:$0xff]  ;;  %v24724_v20 = vld [vmem:[#allocation3 + $0xa8] sm:$0xff] }
 0x3f1   : > { %20506 = vmatprep.mubr.msk.f32.mxu0 %vm636_vm1, %v24180_v8  ;;  %v9119_v49 = vpop.f32.mrf.mxu1 }
 0x3f2   : > { %v24715_v19 = vadd.f32 %v20205_v57, %v9263_v34  ;;  %v9262_v1 = vadd.f32 %v9119_v49, %v24450_v61  ;;  %v9508_v41 = vpop.f32.mrf.mxu0 }
 0x3f3   : > { %v20158_v13 = vpop.f32.mrf.mxu1  ;;  %20457 = vmatmul.mubr.msk.f32.gmra.mxu1 %vm636_vm1, %v24718_v9 }
 0x3f4   : > { %20507 = vmatmul.mubr.msk.f32.gmra.mxu0 %vm636_vm1, %v24191_v48  ;;  %v24726_v7 = vadd.f32 %v9508_v41, %v9262_v1  ;;  %v9265_v8 = vadd.f32 %v20158_v13, %v24456_v39  ;;  %v20208_v5 = vpop.f32.mrf.mxu0  ;;  %20459 = vmatprep.mubr.msk.f32.mxu1 %vm636_vm1, %v24724_v20  ;;  %v24736_v48 = vld [vmem:[#allocation3 + $0xb0] sm:$0xff]  ;;  %v24742_v39 = vld [vmem:[#allocation3 + $0xc0] sm:$0xff] }
 0x3f5   : > { %20509 = vmatprep.mubr.msk.f32.mxu0 %vm636_vm1, %v24196_v27  ;;  %v9129_v61 = vpop.f32.mrf.mxu1 }
 0x3f6   : > { %v24733_v45 = vadd.f32 %v20208_v5, %v9265_v8  ;;  %v9264_v26 = vadd.f32 %v9129_v61, %v24466_v0  ;;  %v9518_v51 = vpop.f32.mrf.mxu0 }
 0x3f7   : > { %v20161_v3 = vpop.f32.mrf.mxu1  ;;  %20460 = vmatmul.mubr.msk.f32.gmra.mxu1 %vm636_vm1, %v24736_v48 }
 0x3f8   : > { %20510 = vmatmul.mubr.msk.f32.gmra.mxu0 %vm636_vm1, %v24207_v14  ;;  %v24744_v34 = vadd.f32 %v9518_v51, %v9264_v26  ;;  %v9267_v27 = vadd.f32 %v20161_v3, %v24472_v55  ;;  %v20211_v57 = vpop.f32.mrf.mxu0  ;;  %20462 = vmatprep.mubr.msk.f32.mxu1 %vm636_vm1, %v24742_v39  ;;  %v24754_v14 = vld [vmem:[#allocation3 + $0xc8] sm:$0xff]  ;;  %v24760_v55 = vld [vmem:[#allocation3 + $0xd8] sm:$0xff] }
 0x3f9   : > { %20512 = vmatprep.mubr.msk.f32.mxu0 %vm636_vm1, %v24212_v24  ;;  %v9139_v0 = vpop.f32.mrf.mxu1 }
 0x3fa   : > { %v24751_v49 = vadd.f32 %v20211_v57, %v9267_v27  ;;  %v9266_v1 = vadd.f32 %v9139_v0, %v24482_v36  ;;  %v9528_v41 = vpop.f32.mrf.mxu0 }
 0x3fb   : > { %v20164_v13 = vpop.f32.mrf.mxu1  ;;  %20463 = vmatmul.mubr.msk.f32.gmra.mxu1 %vm636_vm1, %v24754_v14 }
 0x3fc   : > { %20513 = vmatmul.mubr.msk.f32.gmra.mxu0 %vm636_vm1, %v24223_v56  ;;  %v24762_v8 = vadd.f32 %v9528_v41, %v9266_v1  ;;  %v9269_v24 = vadd.f32 %v20164_v13, %v24488_v29  ;;  %v20214_v5 = vpop.f32.mrf.mxu0  ;;  %20465 = vmatprep.mubr.msk.f32.mxu1 %vm636_vm1, %v24760_v55  ;;  %v24772_v56 = vld [vmem:[#allocation3 + $0xe0] sm:$0xff]  ;;  %v24778_v29 = vld [vmem:[#allocation3 + $0xf0] sm:$0xff] }
 0x3fd   : > { %20515 = vmatprep.mubr.msk.f32.mxu0 %vm636_vm1, %v24228_v60  ;;  %v9149_v36 = vpop.f32.mrf.mxu1 }
 0x3fe   : > { %v24769_v61 = vadd.f32 %v20214_v5, %v9269_v24  ;;  %v9268_v26 = vadd.f32 %v9149_v36, %v24498_v30  ;;  %v9538_v51 = vpop.f32.mrf.mxu0 }
 0x3ff   : > { %v20167_v3 = vpop.f32.mrf.mxu1  ;;  %20466 = vmatmul.mubr.msk.f32.gmra.mxu1 %vm636_vm1, %v24772_v56 }
 0x400   : > { %20516 = vmatmul.mubr.msk.f32.gmra.mxu0 %vm636_vm1, %v24239_v46  ;;  %v24780_v27 = vadd.f32 %v9538_v51, %v9268_v26  ;;  %v9271_v60 = vadd.f32 %v20167_v3, %v24504_v17  ;;  %v20217_v57 = vpop.f32.mrf.mxu0  ;;  %20468 = vmatprep.mubr.msk.f32.mxu1 %vm636_vm1, %v24778_v29  ;;  %v24790_v46 = vld [vmem:[#allocation3 + $0xf8] sm:$0xff]  ;;  %v24796_v17 = vld [vmem:[#allocation3 + $0x108] sm:$0xff] }
 0x401   : > { %20518 = vmatprep.mubr.msk.f32.mxu0 %vm636_vm1, %v24244_v28  ;;  %v9159_v30 = vpop.f32.mrf.mxu1 }
 0x402   : > { %v24787_v0 = vadd.f32 %v20217_v57, %v9271_v60  ;;  %v9270_v1 = vadd.f32 %v9159_v30, %v24514_v15  ;;  %v9548_v41 = vpop.f32.mrf.mxu0  ;;  %v27303_v15 = vld [vmem:[#allocation42_spill] sm:$0xff]  ;;  %v24814_v57 = vld [vmem:[#allocation3 + $0x120] sm:$0xff] }
 0x403   : > { %v20170_v13 = vpop.f32.mrf.mxu1  ;;  %20469 = vmatmul.mubr.msk.f32.gmra.mxu1 %vm636_vm1, %v24790_v46 }
 0x404   : > { %20519 = vmatmul.mubr.msk.f32.gmra.mxu0 %vm636_vm1, %v24255_v62  ;;  %v24798_v24 = vadd.f32 %v9548_v41, %v9270_v1  ;;  %v9273_v28 = vadd.f32 %v20170_v13, %v24520_v58  ;;  %v20220_v5 = vpop.f32.mrf.mxu0  ;;  %20471 = vmatprep.mubr.msk.f32.mxu1 %vm636_vm1, %v24796_v17  ;;  %v24808_v62 = vld [vmem:[#allocation3 + $0x110] sm:$0xff] }
 0x405   : > { %20521 = vmatprep.mubr.msk.f32.mxu0 %vm636_vm1, %v27303_v15  ;;  %v9169_v36 = vpop.f32.mrf.mxu1  ;;  %27304 = vst [vmem:[#allocation42_spill] sm:$0xff] %v24808_v62  ;;  %v27305_v58 = vld [vmem:[#allocation57_spill] sm:$0xff] }
 0x406   : > { %v24805_v26 = vadd.f32 %v20220_v5, %v9273_v28  ;;  %v9272_v51 = vadd.f32 %v9169_v36, %v24530_v11  ;;  %v9558_v3 = vpop.f32.mrf.mxu0  ;;  %27306 = vst [vmem:[#allocation57_spill] sm:$0xff] %v24814_v57  ;;  %v27307_v11 = vld [vmem:[#allocation56_spill] sm:$0xff] }
 0x407   : > { %v20173_v60 = vpop.f32.mrf.mxu1  ;;  %20472 = vmatmul.mubr.msk.f32.gmra.mxu1 %vm636_vm1, %v24808_v62  ;;  %v24826_v36 = vld [vmem:[#allocation3 + $0x128] sm:$0xff] }
 0x408   : > { %20522 = vmatmul.mubr.msk.f32.gmra.mxu0 %vm636_vm1, %v27305_v58  ;;  %v24816_v30 = vadd.f32 %v9558_v3, %v9272_v51  ;;  %v9275_v1 = vadd.f32 %v20173_v60, %v24536_v54  ;;  %v20223_v41 = vpop.f32.mrf.mxu0  ;;  %20474 = vmatprep.mubr.msk.f32.mxu1 %vm636_vm1, %v24814_v57  ;;  %27308 = vst [vmem:[#allocation56_spill] sm:$0xff] %v24826_v36  ;;  %v27309_v54 = vld [vmem:[#allocation43_spill] sm:$0xff]  ;;  %v24832_v51 = vld [vmem:[#allocation3 + $0x138] sm:$0xff] }
 0x409   : > { %20524 = vmatprep.mubr.msk.f32.mxu0 %vm636_vm1, %v27307_v11  ;;  %v9179_v13 = vpop.f32.mrf.mxu1  ;;  %27310 = vst [vmem:[#allocation43_spill] sm:$0xff] %v24832_v51 }
 0x40a   : > { %v24823_v28 = vadd.f32 %v20223_v41, %v9275_v1  ;;  %v9274_v5 = vadd.f32 %v9179_v13, %v24546_v37  ;;  %v9568_v15 = vpop.f32.mrf.mxu0  ;;  %v27311_v37 = vld [vmem:[#allocation58_spill] sm:$0xff] }
 0x40b   : > { %v20176_v58 = vpop.f32.mrf.mxu1  ;;  %20475 = vmatmul.mubr.msk.f32.gmra.mxu1 %vm636_vm1, %v24826_v36 }
 0x40c   : > { %20525 = vmatmul.mubr.msk.f32.gmra.mxu0 %vm636_vm1, %v27309_v54  ;;  %v24834_v3 = vadd.f32 %v9568_v15, %v9274_v5  ;;  %v9277_v60 = vadd.f32 %v20176_v58, %v24552_v42  ;;  %v20226_v1 = vpop.f32.mrf.mxu0  ;;  %20477 = vmatprep.mubr.msk.f32.mxu1 %vm636_vm1, %v24832_v51  ;;  %v24844_v54 = vld [vmem:[#allocation3 + $0x140] sm:$0xff]  ;;  %v24850_v5 = vld [vmem:[#allocation3 + $0x150] sm:$0xff] }
 0x40d   : > { %20527 = vmatprep.mubr.msk.f32.mxu0 %vm636_vm1, %v27311_v37  ;;  %v9189_v41 = vpop.f32.mrf.mxu1  ;;  %27312 = vst [vmem:[#allocation58_spill] sm:$0xff] %v24844_v54  ;;  %v27313_v42 = vld [vmem:[#allocation59_spill] sm:$0xff] }
 0x40e   : > { %v24841_v11 = vadd.f32 %v20226_v1, %v9277_v60  ;;  %v9276_v13 = vadd.f32 %v9189_v41, %v24562_v40  ;;  %v9578_v36 = vpop.f32.mrf.mxu0  ;;  %27314 = vst [vmem:[#allocation59_spill] sm:$0xff] %v24850_v5  ;;  %v27315_v40 = vld [vmem:[#allocation44_spill] sm:$0xff] }
 0x40f   : > { %v20179_v57 = vpop.f32.mrf.mxu1  ;;  %20478 = vmatmul.mubr.msk.f32.gmra.mxu1 %vm636_vm1, %v24844_v54 }
 0x410   : > { %20528 = vmatmul.mubr.msk.f32.gmra.mxu0 %vm636_vm1, %v27313_v42  ;;  %v24852_v15 = vadd.f32 %v9578_v36, %v9276_v13  ;;  %v9279_v58 = vadd.f32 %v20179_v57, %v24568_v31  ;;  %v20229_v60 = vpop.f32.mrf.mxu0  ;;  %20480 = vmatprep.mubr.msk.f32.mxu1 %vm636_vm1, %v24850_v5  ;;  %v24862_v42 = vld [vmem:[#allocation3 + $0x158] sm:$0xff]  ;;  %v27317_v31 = vld [vmem:[#allocation5_spill] sm:$0xff]  ;;  %v24868_v57 = vld [vmem:[#allocation3 + $0x168] sm:$0xff] }
 0x411   : > { %20530 = vmatprep.mubr.msk.f32.mxu0 %vm636_vm1, %v27315_v40  ;;  %v9199_v1 = vpop.f32.mrf.mxu1  ;;  %27316 = vst [vmem:[#allocation44_spill] sm:$0xff] %v24862_v42  ;;  %27318 = vst [vmem:[#allocation5_spill] sm:$0xff] %v24868_v57 }
 0x412   : > { %v24859_v37 = vadd.f32 %v20229_v60, %v9279_v58  ;;  %v9278_v41 = vadd.f32 %v9199_v1, %v24578_v10  ;;  %v9588_v54 = vpop.f32.mrf.mxu0  ;;  %v27319_v10 = vld [vmem:[#allocation7_spill] sm:$0xff] }
 0x413   : > { %v20182_v51 = vpop.f32.mrf.mxu1  ;;  %20481 = vmatmul.mubr.msk.f32.gmra.mxu1 %vm636_vm1, %v24862_v42 }
 0x414   : > { %20531 = vmatmul.mubr.msk.f32.gmra.mxu0 %vm636_vm1, %v27317_v31  ;;  %v24870_v36 = vadd.f32 %v9588_v54, %v9278_v41  ;;  %v9281_v13 = vadd.f32 %v20182_v51, %v24584_v63  ;;  %v20232_v58 = vpop.f32.mrf.mxu0  ;;  %20483 = vmatprep.mubr.msk.f32.mxu1 %vm636_vm1, %v24868_v57  ;;  %v24880_v31 = vld [vmem:[#allocation3 + $0x170] sm:$0xff]  ;;  %v24886_v51 = vld [vmem:[#allocation3 + $0x180] sm:$0xff] }
 0x415   : > { %20533 = vmatprep.mubr.msk.f32.mxu0 %vm636_vm1, %v27319_v10  ;;  %v9209_v60 = vpop.f32.mrf.mxu1  ;;  %27320 = vst [vmem:[#allocation7_spill] sm:$0xff] %v24880_v31  ;;  %v27321_v63 = vld [vmem:[#allocation9_spill] sm:$0xff] }
 0x416   : > { %v24877_v40 = vadd.f32 %v20232_v58, %v9281_v13  ;;  %v9280_v1 = vadd.f32 %v9209_v60, %v24594_v50  ;;  %v9598_v42 = vpop.f32.mrf.mxu0  ;;  %27322 = vst [vmem:[#allocation9_spill] sm:$0xff] %v24886_v51  ;;  %v27323_v50 = vld [vmem:[#allocation11_spill] sm:$0xff] }
 0x417   : > { %v20185_v5 = vpop.f32.mrf.mxu1  ;;  %20484 = vmatmul.mubr.msk.f32.gmra.mxu1 %vm636_vm1, %v24880_v31 }
 0x418   : > { %20534 = vmatmul.mubr.msk.f32.gmra.mxu0 %vm636_vm1, %v27321_v63  ;;  %v24888_v54 = vadd.f32 %v9598_v42, %v9280_v1  ;;  %v9283_v41 = vadd.f32 %v20185_v5, %v24600_v22  ;;  %v20235_v13 = vpop.f32.mrf.mxu0  ;;  %20486 = vmatprep.mubr.msk.f32.mxu1 %vm636_vm1, %v24886_v51  ;;  %v24898_v63 = vld [vmem:[#allocation3 + $0x188] sm:$0xff]  ;;  %v27325_v22 = vld [vmem:[#allocation13_spill] sm:$0xff]  ;;  %v24904_v5 = vld [vmem:[#allocation3 + $0x198] sm:$0xff] }
 0x419   : > { %20536 = vmatprep.mubr.msk.f32.mxu0 %vm636_vm1, %v27323_v50  ;;  %v9219_v58 = vpop.f32.mrf.mxu1  ;;  %27324 = vst [vmem:[#allocation11_spill] sm:$0xff] %v24898_v63  ;;  %27326 = vst [vmem:[#allocation13_spill] sm:$0xff] %v24904_v5  ;;  %v24913_v50 = vld [vmem:[#allocation3 + $0x1b0] sm:$0xff] }
 0x41a   : > { %v24895_v10 = vadd.f32 %v20235_v13, %v9283_v41  ;;  %v9282_v60 = vadd.f32 %v9219_v58, %v24610_v33  ;;  %v9608_v31 = vpop.f32.mrf.mxu0  ;;  %v27327_v33 = vld [vmem:[#allocation15_spill] sm:$0xff]  ;;  %v11655_v58 = vld [vmem:[#allocation3 + $0x1b1] sm:$0xff] }
 0x41b   : > { %v20188_v57 = vpop.f32.mrf.mxu1  ;;  %20487 = vmatmul.mubr.msk.f32.gmra.mxu1 %vm636_vm1, %v24898_v63  ;;  %27328 = vst [vmem:[#allocation15_spill] sm:$0xff] %v24913_v50 }
 0x41c   : > { %20537 = vmatmul.mubr.msk.f32.gmra.mxu0 %vm636_vm1, %v27325_v22  ;;  %v24906_v42 = vadd.f32 %v9608_v31, %v9282_v60  ;;  %v9285_v1 = vadd.f32 %v20188_v57, %v24616_v18  ;;  %v20238_v41 = vpop.f32.mrf.mxu0  ;;  %20489 = vmatprep.mubr.msk.f32.mxu1 %vm636_vm1, %v24904_v5  ;;  %v24918_v31 = vld [vmem:[#allocation3 + $0x1a0] sm:$0xff]  ;;  %v27330_v18 = vld [vmem:[#allocation17_spill] sm:$0xff] }
 0x41d   : > { %20539 = vmatprep.mubr.msk.f32.mxu0 %vm636_vm1, %v27327_v33  ;;  %v9229_v13 = vpop.f32.mrf.mxu1  ;;  %27329 = vst [vmem:[#allocation81_spill] sm:$0xff] %v24918_v31 }
 0x41e   : > { %v24915_v63 = vadd.f32 %v20238_v41, %v9285_v1  ;;  %v9284_v22 = vadd.f32 %v9229_v13, %v24627_v23  ;;  %v9618_v51 = vpop.f32.mrf.mxu0  ;;  %v24930_v23 = vld [vmem:[#allocation3 + $0x1b8] sm:$0xff] }
 0x41f   : > { %v20191_v60 = vpop.f32.mrf.mxu1  ;;  %20490 = vmatmul.mubr.msk.f32.gmra.mxu1 %vm636_vm1, %v24918_v31  ;;  %27331 = vst [vmem:[#allocation17_spill] sm:$0xff] %v24930_v23  ;;  %v11656_v1 = vld [vmem:[#allocation3 + $0x1b9] sm:$0xff] }
 0x420   : > { %20540 = vmatmul.mubr.msk.f32.gmra.mxu0 %vm636_vm1, %v27330_v18  ;;  %v24924_v57 = vadd.f32 %v9618_v51, %v9284_v22  ;;  %v9287_v33 = vadd.f32 %v20191_v60, %v24633_v35  ;;  %v20241_v5 = vpop.f32.mrf.mxu0  ;;  %20492 = vmatprep.mubr.msk.f32.mxu1 %vm636_vm1, %v24913_v50  ;;  %v12014_v35 = vld [vmem:[#allocation3 + $0x4a] sm:$0xff]  ;;  %v27332_v60 = vld [vmem:[#allocation19_spill] sm:$0xff] }
 0x421   : > { %20542 = vmatprep.mubr.msk.f32.mxu0 %vm636_vm1, %v11655_v58  ;;  %v9239_v41 = vpop.f32.mrf.mxu1 }
 0x422   : > { %v24932_v13 = vadd.f32 %v20241_v5, %v9287_v33  ;;  %v9286_v31 = vadd.f32 %v9239_v41, %v24641_v21  ;;  %v9628_v62 = vpop.f32.mrf.mxu0 }
 0x423   : > { %v20194_v18 = vpop.f32.mrf.mxu1  ;;  %20493 = vmatmul.mubr.msk.f32.gmra.mxu1 %vm636_vm1, %v24930_v23  ;;  %v12015_v23 = vld [vmem:[#allocation3 + $0x52] sm:$0xff] }
 0x424   : > { %20543 = vmatmul.mubr.msk.f32.gmra.mxu0 %vm636_vm1, %v11656_v1  ;;  %v24938_v51 = vadd.f32 %v9628_v62, %v9286_v31  ;;  %v9289_v58 = vadd.f32 %v20194_v18, %v24646_v16  ;;  %v20244_v22 = vpop.f32.mrf.mxu0  ;;  %20547 = vmatprep.mubr.msk.f32.mxu1 %vm636_vm1, %v12014_v35  ;;  %v27333_v62 = vld [vmem:[#allocation21_spill] sm:$0xff]  ;;  %v24950_v16 = vld [vmem:[#allocation3 + $0x62] sm:$0xff] }
 0x425   : > { %20597 = vmatprep.mubr.msk.f32.mxu0 %vm636_vm1, %v27332_v60  ;;  %v9249_v5 = vpop.f32.mrf.mxu1  ;;  %v24955_v31 = vld [vmem:[%s27032_s13 + $0x54] sm:$0xf]  ;;  %v24960_v1 = vld [vmem:[%s27032_s13 + $0x58] sm:$0xf] }
 0x426   : > { %v24944_v21 = vadd.f32 %v20244_v22, %v9289_v58  ;;  %v9288_v33 = vadd.f32 %v9249_v5, %v24664_v59  ;;  %v9638_v41 = vpop.f32.mrf.mxu0  ;;  %v27334_v35 = vld [vmem:[#allocation23_spill] sm:$0xff] }
 0x427   : > { %v20249_v50 = vpop.f32.mrf.mxu1  ;;  %20548 = vmatmul.mubr.msk.f32.vlgmr.msra.gmra.mxu1 %vm636_vm1, %v12015_v23 }
 0x428   : > { %20598 = vmatmul.mubr.msk.f32.vlgmr.msra.gmra.mxu0 %vm636_vm1, %v27333_v62  ;;  %v24962_v59 = vadd.f32 %v9638_v41, %v9288_v33  ;;  %v10037_v18 = vadd.f32 %v20249_v50, %v24675_v25  ;;  %v20299_v23 = vpop.f32.mrf.mxu0  ;;  %20646 = vmatpush3.msk.msra.mxu1 %vm733_vm0, %v24657_v2  ;;  %v24976_v25 = vld [vmem:[#allocation3 + $0x6a] sm:$0xff]  ;;  %v27338_v62 = vld [vmem:[#allocation27_spill] sm:$0xff] }
 0x429   : > { %20550 = vmatprep.mubr.msk.f32.mxu1 %vm636_vm1, %v24950_v16  ;;  %20600 = vmatprep.mubr.msk.f32.mxu0 %vm636_vm1, %v27334_v35  ;;  %v9877_v58 = vpop.f32.mrf.mxu1  ;;  %27335 = vst [vmem:[#allocation19_spill] sm:$0xff] %v24976_v25  ;;  %v27336_v50 = vld [vmem:[#allocation25_spill] sm:$0xff] }
 0x42a   : > { %20696 = vmatpush3.msk.msra.mxu0 %vm733_vm0, %v24662_v52  ;;  %v24973_v22 = vadd.f32 %v20299_v23, %v10037_v18  ;;  %v10036_v60 = vadd.f32 %v9877_v58, %v24690_v4  ;;  %v10266_v5 = vpop.f32.mrf.mxu0  ;;  %20745 = vmatprep.subr.msk.mxu1 %vm733_vm0, %v24955_v31  ;;  %v24986_v52 = vld [vmem:[#allocation3 + $0x7a] sm:$0xff] }
 0x42b   : > { %20795 = vmatprep.subr.msk.mxu0 %vm733_vm0, %v24960_v1  ;;  %v20252_v2 = vpop.f32.mrf.mxu1  ;;  %20551 = vmatmul.mubr.msk.f32.gmra.mxu1 %vm636_vm1, %v24976_v25  ;;  %27337 = vst [vmem:[#allocation21_spill] sm:$0xff] %v24986_v52 }
 0x42c   : > { %20601 = vmatmul.mubr.msk.f32.gmra.mxu0 %vm636_vm1, %v27336_v50  ;;  %v24988_v33 = vadd.f32 %v10266_v5, %v10036_v60  ;;  %v10039_v4 = vadd.f32 %v20252_v2, %v24697_v47  ;;  %v20302_v41 = vpop.f32.mrf.mxu0  ;;  %20553 = vmatprep.mubr.msk.f32.mxu1 %vm636_vm1, %v24986_v52  ;;  %v24998_v50 = vld [vmem:[#allocation3 + $0x82] sm:$0xff]  ;;  %v27340_v47 = vld [vmem:[#allocation29_spill] sm:$0xff] }
 0x42d   : > { %20603 = vmatprep.mubr.msk.f32.mxu0 %vm636_vm1, %v27338_v62  ;;  %v9887_v18 = vpop.f32.mrf.mxu1  ;;  %27339 = vst [vmem:[#allocation23_spill] sm:$0xff] %v24998_v50  ;;  %v25004_v60 = vld [vmem:[#allocation3 + $0x92] sm:$0xff] }
 0x42e   : > { %v24995_v23 = vadd.f32 %v20302_v41, %v10039_v4  ;;  %v10038_v35 = vadd.f32 %v9887_v18, %v24708_v53  ;;  %v10276_v58 = vpop.f32.mrf.mxu0  ;;  %27341 = vst [vmem:[#allocation25_spill] sm:$0xff] %v25004_v60  ;;  %v27342_v53 = vld [vmem:[#allocation31_spill] sm:$0xff] }
 0x42f   : > { %v20255_v25 = vpop.f32.mrf.mxu1  ;;  %20554 = vmatmul.mubr.msk.f32.gmra.mxu1 %vm636_vm1, %v24998_v50 }
 0x430   : > { %20604 = vmatmul.mubr.msk.f32.gmra.mxu0 %vm636_vm1, %v27340_v47  ;;  %v25006_v5 = vadd.f32 %v10276_v58, %v10038_v35  ;;  %v10041_v2 = vadd.f32 %v20255_v25, %v24715_v19  ;;  %v20305_v4 = vpop.f32.mrf.mxu0  ;;  %20556 = vmatprep.mubr.msk.f32.mxu1 %vm636_vm1, %v25004_v60  ;;  %v25016_v47 = vld [vmem:[#allocation3 + $0x9a] sm:$0xff]  ;;  %v27344_v19 = vld [vmem:[#allocation33_spill] sm:$0xff] }
 0x431   : > { %20606 = vmatprep.mubr.msk.f32.mxu0 %vm636_vm1, %v27342_v53  ;;  %v9897_v41 = vpop.f32.mrf.mxu1  ;;  %27343 = vst [vmem:[#allocation27_spill] sm:$0xff] %v25016_v47  ;;  %v25022_v25 = vld [vmem:[#allocation3 + $0xaa] sm:$0xff] }
 0x432   : > { %v25013_v62 = vadd.f32 %v20305_v4, %v10041_v2  ;;  %v10040_v18 = vadd.f32 %v9897_v41, %v24726_v7  ;;  %v10286_v50 = vpop.f32.mrf.mxu0  ;;  %27345 = vst [vmem:[#allocation29_spill] sm:$0xff] %v25022_v25  ;;  %v27346_v7 = vld [vmem:[#allocation60_spill] sm:$0xff] }
 0x433   : > { %v20258_v52 = vpop.f32.mrf.mxu1  ;;  %20557 = vmatmul.mubr.msk.f32.gmra.mxu1 %vm636_vm1, %v25016_v47 }
 0x434   : > { %20607 = vmatmul.mubr.msk.f32.gmra.mxu0 %vm636_vm1, %v27344_v19  ;;  %v25024_v35 = vadd.f32 %v10286_v50, %v10040_v18  ;;  %v10043_v58 = vadd.f32 %v20258_v52, %v24733_v45  ;;  %v20308_v2 = vpop.f32.mrf.mxu0  ;;  %20559 = vmatprep.mubr.msk.f32.mxu1 %vm636_vm1, %v25022_v25  ;;  %v25034_v19 = vld [vmem:[#allocation3 + $0xb2] sm:$0xff]  ;;  %v25040_v52 = vld [vmem:[#allocation3 + $0xc2] sm:$0xff] }
 0x435   : > { %20609 = vmatprep.mubr.msk.f32.mxu0 %vm636_vm1, %v27346_v7  ;;  %v9907_v4 = vpop.f32.mrf.mxu1  ;;  %27347 = vst [vmem:[#allocation31_spill] sm:$0xff] %v25034_v19  ;;  %v27348_v45 = vld [vmem:[#allocation61_spill] sm:$0xff]  ;;  %27349 = vst [vmem:[#allocation33_spill] sm:$0xff] %v25040_v52 }
 0x436   : > { %v25031_v53 = vadd.f32 %v20308_v2, %v10043_v58  ;;  %v10042_v41 = vadd.f32 %v9907_v4, %v24744_v34  ;;  %v10296_v47 = vpop.f32.mrf.mxu0  ;;  %v27350_v34 = vld [vmem:[#allocation62_spill] sm:$0xff] }
 0x437   : > { %v20261_v60 = vpop.f32.mrf.mxu1  ;;  %20560 = vmatmul.mubr.msk.f32.gmra.mxu1 %vm636_vm1, %v25034_v19 }
 0x438   : > { %20610 = vmatmul.mubr.msk.f32.gmra.mxu0 %vm636_vm1, %v27348_v45  ;;  %v25042_v50 = vadd.f32 %v10296_v47, %v10042_v41  ;;  %v10045_v18 = vadd.f32 %v20261_v60, %v24751_v49  ;;  %v20311_v58 = vpop.f32.mrf.mxu0  ;;  %20562 = vmatprep.mubr.msk.f32.mxu1 %vm636_vm1, %v25040_v52  ;;  %v25052_v45 = vld [vmem:[#allocation3 + $0xca] sm:$0xff]  ;;  %v27352_v49 = vld [vmem:[#allocation63_spill] sm:$0xff] }
 0x439   : > { %20612 = vmatprep.mubr.msk.f32.mxu0 %vm636_vm1, %v27350_v34  ;;  %v9917_v2 = vpop.f32.mrf.mxu1  ;;  %27351 = vst [vmem:[#allocation60_spill] sm:$0xff] %v25052_v45  ;;  %v25058_v60 = vld [vmem:[#allocation3 + $0xda] sm:$0xff] }
 0x43a   : > { %v25049_v7 = vadd.f32 %v20311_v58, %v10045_v18  ;;  %v10044_v4 = vadd.f32 %v9917_v2, %v24762_v8  ;;  %v10306_v19 = vpop.f32.mrf.mxu0  ;;  %27353 = vst [vmem:[#allocation61_spill] sm:$0xff] %v25058_v60  ;;  %v27354_v8 = vld [vmem:[#allocation64_spill] sm:$0xff] }
 0x43b   : > { %v20264_v25 = vpop.f32.mrf.mxu1  ;;  %20563 = vmatmul.mubr.msk.f32.gmra.mxu1 %vm636_vm1, %v25052_v45 }
 0x43c   : > { %20613 = vmatmul.mubr.msk.f32.gmra.mxu0 %vm636_vm1, %v27352_v49  ;;  %v25060_v47 = vadd.f32 %v10306_v19, %v10044_v4  ;;  %v10047_v41 = vadd.f32 %v20264_v25, %v24769_v61  ;;  %v20314_v18 = vpop.f32.mrf.mxu0  ;;  %20565 = vmatprep.mubr.msk.f32.mxu1 %vm636_vm1, %v25058_v60  ;;  %v25070_v49 = vld [vmem:[#allocation3 + $0xe2] sm:$0xff]  ;;  %v27356_v61 = vld [vmem:[#allocation65_spill] sm:$0xff] }
 0x43d   : > { %20615 = vmatprep.mubr.msk.f32.mxu0 %vm636_vm1, %v27354_v8  ;;  %v9927_v58 = vpop.f32.mrf.mxu1  ;;  %27355 = vst [vmem:[#allocation62_spill] sm:$0xff] %v25070_v49  ;;  %v25076_v25 = vld [vmem:[#allocation3 + $0xf2] sm:$0xff] }
 0x43e   : > { %v25067_v34 = vadd.f32 %v20314_v18, %v10047_v41  ;;  %v10046_v2 = vadd.f32 %v9927_v58, %v24780_v27  ;;  %v10316_v45 = vpop.f32.mrf.mxu0  ;;  %27357 = vst [vmem:[#allocation63_spill] sm:$0xff] %v25076_v25  ;;  %v27358_v27 = vld [vmem:[#allocation66_spill] sm:$0xff] }
 0x43f   : > { %v20267_v52 = vpop.f32.mrf.mxu1  ;;  %20566 = vmatmul.mubr.msk.f32.gmra.mxu1 %vm636_vm1, %v25070_v49 }
 0x440   : > { %20616 = vmatmul.mubr.msk.f32.gmra.mxu0 %vm636_vm1, %v27356_v61  ;;  %v25078_v19 = vadd.f32 %v10316_v45, %v10046_v2  ;;  %v10049_v4 = vadd.f32 %v20267_v52, %v24787_v0  ;;  %v20317_v41 = vpop.f32.mrf.mxu0  ;;  %20568 = vmatprep.mubr.msk.f32.mxu1 %vm636_vm1, %v25076_v25  ;;  %v25088_v61 = vld [vmem:[#allocation3 + $0xfa] sm:$0xff]  ;;  %v25094_v52 = vld [vmem:[#allocation3 + $0x10a] sm:$0xff] }
 0x441   : > { %20618 = vmatprep.mubr.msk.f32.mxu0 %vm636_vm1, %v27358_v27  ;;  %v9937_v18 = vpop.f32.mrf.mxu1  ;;  %27359 = vst [vmem:[#allocation64_spill] sm:$0xff] %v25088_v61  ;;  %v27360_v0 = vld [vmem:[#allocation67_spill] sm:$0xff]  ;;  %27361 = vst [vmem:[#allocation65_spill] sm:$0xff] %v25094_v52 }
 0x442   : > { %v25085_v8 = vadd.f32 %v20317_v41, %v10049_v4  ;;  %v10048_v58 = vadd.f32 %v9937_v18, %v24798_v24  ;;  %v10326_v49 = vpop.f32.mrf.mxu0  ;;  %v27362_v24 = vld [vmem:[#allocation68_spill] sm:$0xff] }
 0x443   : > { %v20270_v60 = vpop.f32.mrf.mxu1  ;;  %20569 = vmatmul.mubr.msk.f32.gmra.mxu1 %vm636_vm1, %v25088_v61 }
 0x444   : > { %20619 = vmatmul.mubr.msk.f32.gmra.mxu0 %vm636_vm1, %v27360_v0  ;;  %v25096_v45 = vadd.f32 %v10326_v49, %v10048_v58  ;;  %v10051_v2 = vadd.f32 %v20270_v60, %v24805_v26  ;;  %v20320_v4 = vpop.f32.mrf.mxu0  ;;  %20571 = vmatprep.mubr.msk.f32.mxu1 %vm636_vm1, %v25094_v52  ;;  %v25106_v0 = vld [vmem:[#allocation3 + $0x112] sm:$0xff]  ;;  %v25112_v60 = vld [vmem:[#allocation3 + $0x122] sm:$0xff] }
 0x445   : > { %20621 = vmatprep.mubr.msk.f32.mxu0 %vm636_vm1, %v27362_v24  ;;  %v9947_v41 = vpop.f32.mrf.mxu1  ;;  %27363 = vst [vmem:[#allocation66_spill] sm:$0xff] %v25106_v0  ;;  %v27364_v26 = vld [vmem:[#allocation69_spill] sm:$0xff]  ;;  %27365 = vst [vmem:[#allocation67_spill] sm:$0xff] %v25112_v60 }
 0x446   : > { %v25103_v27 = vadd.f32 %v20320_v4, %v10051_v2  ;;  %v10050_v18 = vadd.f32 %v9947_v41, %v24816_v30  ;;  %v10336_v61 = vpop.f32.mrf.mxu0  ;;  %v27366_v30 = vld [vmem:[#allocation70_spill] sm:$0xff] }
 0x447   : > { %v20273_v25 = vpop.f32.mrf.mxu1  ;;  %20572 = vmatmul.mubr.msk.f32.gmra.mxu1 %vm636_vm1, %v25106_v0 }
 0x448   : > { %20622 = vmatmul.mubr.msk.f32.gmra.mxu0 %vm636_vm1, %v27364_v26  ;;  %v25114_v49 = vadd.f32 %v10336_v61, %v10050_v18  ;;  %v10053_v58 = vadd.f32 %v20273_v25, %v24823_v28  ;;  %v20323_v2 = vpop.f32.mrf.mxu0  ;;  %20574 = vmatprep.mubr.msk.f32.mxu1 %vm636_vm1, %v25112_v60  ;;  %v25124_v26 = vld [vmem:[#allocation3 + $0x12a] sm:$0xff]  ;;  %v27368_v28 = vld [vmem:[#allocation71_spill] sm:$0xff] }
 0x449   : > { %20624 = vmatprep.mubr.msk.f32.mxu0 %vm636_vm1, %v27366_v30  ;;  %v9957_v4 = vpop.f32.mrf.mxu1  ;;  %27367 = vst [vmem:[#allocation68_spill] sm:$0xff] %v25124_v26  ;;  %v25130_v25 = vld [vmem:[#allocation3 + $0x13a] sm:$0xff] }
 0x44a   : > { %v25121_v24 = vadd.f32 %v20323_v2, %v10053_v58  ;;  %v10052_v41 = vadd.f32 %v9957_v4, %v24834_v3  ;;  %v10346_v0 = vpop.f32.mrf.mxu0  ;;  %27369 = vst [vmem:[#allocation69_spill] sm:$0xff] %v25130_v25  ;;  %v27370_v3 = vld [vmem:[#allocation72_spill] sm:$0xff] }
 0x44b   : > { %v20276_v52 = vpop.f32.mrf.mxu1  ;;  %20575 = vmatmul.mubr.msk.f32.gmra.mxu1 %vm636_vm1, %v25124_v26 }
 0x44c   : > { %20625 = vmatmul.mubr.msk.f32.gmra.mxu0 %vm636_vm1, %v27368_v28  ;;  %v25132_v61 = vadd.f32 %v10346_v0, %v10052_v41  ;;  %v10055_v18 = vadd.f32 %v20276_v52, %v24841_v11  ;;  %v20326_v58 = vpop.f32.mrf.mxu0  ;;  %20577 = vmatprep.mubr.msk.f32.mxu1 %vm636_vm1, %v25130_v25  ;;  %v25142_v28 = vld [vmem:[#allocation3 + $0x142] sm:$0xff]  ;;  %v27372_v11 = vld [vmem:[#allocation73_spill] sm:$0xff] }
 0x44d   : > { %20627 = vmatprep.mubr.msk.f32.mxu0 %vm636_vm1, %v27370_v3  ;;  %v9967_v2 = vpop.f32.mrf.mxu1  ;;  %27371 = vst [vmem:[#allocation70_spill] sm:$0xff] %v25142_v28  ;;  %v25148_v52 = vld [vmem:[#allocation3 + $0x152] sm:$0xff] }
 0x44e   : > { %v25139_v30 = vadd.f32 %v20326_v58, %v10055_v18  ;;  %v10054_v4 = vadd.f32 %v9967_v2, %v24852_v15  ;;  %v10356_v26 = vpop.f32.mrf.mxu0  ;;  %27373 = vst [vmem:[#allocation71_spill] sm:$0xff] %v25148_v52  ;;  %v27374_v15 = vld [vmem:[#allocation74_spill] sm:$0xff] }
 0x44f   : > { %v20279_v60 = vpop.f32.mrf.mxu1  ;;  %20578 = vmatmul.mubr.msk.f32.gmra.mxu1 %vm636_vm1, %v25142_v28 }
 0x450   : > { %20628 = vmatmul.mubr.msk.f32.gmra.mxu0 %vm636_vm1, %v27372_v11  ;;  %v25150_v0 = vadd.f32 %v10356_v26, %v10054_v4  ;;  %v10057_v41 = vadd.f32 %v20279_v60, %v24859_v37  ;;  %v20329_v18 = vpop.f32.mrf.mxu0  ;;  %20580 = vmatprep.mubr.msk.f32.mxu1 %vm636_vm1, %v25148_v52  ;;  %v25160_v11 = vld [vmem:[#allocation3 + $0x15a] sm:$0xff]  ;;  %v25166_v60 = vld [vmem:[#allocation3 + $0x16a] sm:$0xff] }
 0x451   : > { %20630 = vmatprep.mubr.msk.f32.mxu0 %vm636_vm1, %v27374_v15  ;;  %v9977_v58 = vpop.f32.mrf.mxu1  ;;  %27375 = vst [vmem:[#allocation72_spill] sm:$0xff] %v25160_v11  ;;  %v27376_v37 = vld [vmem:[#allocation75_spill] sm:$0xff]  ;;  %27377 = vst [vmem:[#allocation73_spill] sm:$0xff] %v25166_v60 }
 0x452   : > { %v25157_v3 = vadd.f32 %v20329_v18, %v10057_v41  ;;  %v10056_v2 = vadd.f32 %v9977_v58, %v24870_v36  ;;  %v10366_v28 = vpop.f32.mrf.mxu0 }
 0x453   : > { %v20282_v25 = vpop.f32.mrf.mxu1  ;;  %20581 = vmatmul.mubr.msk.f32.gmra.mxu1 %vm636_vm1, %v25160_v11 }
 0x454   : > { %20631 = vmatmul.mubr.msk.f32.gmra.mxu0 %vm636_vm1, %v27376_v37  ;;  %v25168_v26 = vadd.f32 %v10366_v28, %v10056_v2  ;;  %v10059_v4 = vadd.f32 %v20282_v25, %v24877_v40  ;;  %v20332_v41 = vpop.f32.mrf.mxu0  ;;  %20583 = vmatprep.mubr.msk.f32.mxu1 %vm636_vm1, %v25166_v60  ;;  %v25178_v37 = vld [vmem:[#allocation3 + $0x172] sm:$0xff]  ;;  %v27379_v40 = vld [vmem:[#allocation76_spill] sm:$0xff] }
 0x455   : > { %20633 = vmatprep.mubr.msk.f32.mxu0 %vm636_vm1, %v24592_v32  ;;  %v9987_v36 = vpop.f32.mrf.mxu1  ;;  %27378 = vst [vmem:[#allocation74_spill] sm:$0xff] %v25178_v37  ;;  %v25184_v25 = vld [vmem:[#allocation3 + $0x182] sm:$0xff] }
 0x456   : > { %v25175_v18 = vadd.f32 %v20332_v41, %v10059_v4  ;;  %v10058_v15 = vadd.f32 %v9987_v36, %v24888_v54  ;;  %v10376_v58 = vpop.f32.mrf.mxu0  ;;  %27380 = vst [vmem:[#allocation75_spill] sm:$0xff] %v25184_v25  ;;  %v27381_v54 = vld [vmem:[#allocation77_spill] sm:$0xff] }
 0x457   : > { %v20285_v11 = vpop.f32.mrf.mxu1  ;;  %20584 = vmatmul.mubr.msk.f32.gmra.mxu1 %vm636_vm1, %v25178_v37 }
 0x458   : > { %20634 = vmatmul.mubr.msk.f32.gmra.mxu0 %vm636_vm1, %v27379_v40  ;;  %v25186_v28 = vadd.f32 %v10376_v58, %v10058_v15  ;;  %v10061_v32 = vadd.f32 %v20285_v11, %v24895_v10  ;;  %v20335_v2 = vpop.f32.mrf.mxu0  ;;  %20586 = vmatprep.mubr.msk.f32.mxu1 %vm636_vm1, %v25184_v25  ;;  %v25196_v40 = vld [vmem:[#allocation3 + $0x18a] sm:$0xff]  ;;  %v27383_v10 = vld [vmem:[#allocation78_spill] sm:$0xff] }
 0x459   : > { %20636 = vmatprep.mubr.msk.f32.mxu0 %vm636_vm1, %v27381_v54  ;;  %v9997_v4 = vpop.f32.mrf.mxu1  ;;  %27382 = vst [vmem:[#allocation76_spill] sm:$0xff] %v25196_v40  ;;  %v25202_v11 = vld [vmem:[#allocation3 + $0x19a] sm:$0xff]  ;;  %v25211_v54 = vld [vmem:[#allocation3 + $0x1b2] sm:$0xff] }
 0x45a   : > { %v25193_v41 = vadd.f32 %v20335_v2, %v10061_v32  ;;  %v10060_v36 = vadd.f32 %v9997_v4, %v24906_v42  ;;  %v10386_v37 = vpop.f32.mrf.mxu0  ;;  %27384 = vst [vmem:[#allocation77_spill] sm:$0xff] %v25202_v11  ;;  %v27385_v42 = vld [vmem:[#allocation79_spill] sm:$0xff]  ;;  %v12433_v4 = vld [vmem:[#allocation3 + $0x1b3] sm:$0xff] }
 0x45b   : > { %v20288_v60 = vpop.f32.mrf.mxu1  ;;  %20587 = vmatmul.mubr.msk.f32.gmra.mxu1 %vm636_vm1, %v25196_v40 }
 0x45c   : > { %20637 = vmatmul.mubr.msk.f32.gmra.mxu0 %vm636_vm1, %v27383_v10  ;;  %v25204_v15 = vadd.f32 %v10386_v37, %v10060_v36  ;;  %v10063_v58 = vadd.f32 %v20288_v60, %v24915_v63  ;;  %v20338_v32 = vpop.f32.mrf.mxu0  ;;  %20589 = vmatprep.mubr.msk.f32.mxu1 %vm636_vm1, %v25202_v11  ;;  %v25216_v37 = vld [vmem:[#allocation3 + $0x1a2] sm:$0xff] }
 0x45d   : > { %20639 = vmatprep.mubr.msk.f32.mxu0 %vm636_vm1, %v27385_v42  ;;  %v10007_v2 = vpop.f32.mrf.mxu1  ;;  %27386 = vst [vmem:[#allocation78_spill] sm:$0xff] %v25216_v37  ;;  %v27387_v63 = vld [vmem:[#allocation80_spill] sm:$0xff] }
 0x45e   : > { %v25213_v40 = vadd.f32 %v20338_v32, %v10063_v58  ;;  %v10062_v10 = vadd.f32 %v10007_v2, %v24924_v57  ;;  %v10396_v25 = vpop.f32.mrf.mxu0  ;;  %v25228_v57 = vld [vmem:[#allocation3 + $0x1ba] sm:$0xff] }
 0x45f   : > { %v20291_v36 = vpop.f32.mrf.mxu1  ;;  %20590 = vmatmul.mubr.msk.f32.gmra.mxu1 %vm636_vm1, %v25216_v37  ;;  %27388 = vst [vmem:[#allocation79_spill] sm:$0xff] %v25228_v57  ;;  %v12434_v58 = vld [vmem:[#allocation3 + $0x1bb] sm:$0xff] }
 0x460   : > { %20640 = vmatmul.mubr.msk.f32.gmra.mxu0 %vm636_vm1, %v27387_v63  ;;  %v25222_v60 = vadd.f32 %v10396_v25, %v10062_v10  ;;  %v10065_v42 = vadd.f32 %v20291_v36, %v24932_v13  ;;  %v20341_v11 = vpop.f32.mrf.mxu0  ;;  %20592 = vmatprep.mubr.msk.f32.mxu1 %vm636_vm1, %v25211_v54  ;;  %v12792_v13 = vld [vmem:[#allocation3 + $0x4c] sm:$0xff] }
 0x461   : > { %20642 = vmatprep.mubr.msk.f32.mxu0 %vm636_vm1, %v12433_v4  ;;  %v10017_v32 = vpop.f32.mrf.mxu1 }
 0x462   : > { %v25230_v2 = vadd.f32 %v20341_v11, %v10065_v42  ;;  %v10064_v37 = vadd.f32 %v10017_v32, %v24938_v51  ;;  %v10406_v52 = vpop.f32.mrf.mxu0  ;;  %v12793_v32 = vld [vmem:[#allocation3 + $0x54] sm:$0xff] }
 0x463   : > { %v20294_v63 = vpop.f32.mrf.mxu1  ;;  %20593 = vmatmul.mubr.msk.f32.gmra.mxu1 %vm636_vm1, %v25228_v57 }
 0x464   : > { %20643 = vmatmul.mubr.msk.f32.gmra.mxu0 %vm636_vm1, %v12434_v58  ;;  %v25236_v25 = vadd.f32 %v10406_v52, %v10064_v37  ;;  %v10067_v4 = vadd.f32 %v20294_v63, %v24944_v21  ;;  %v20344_v10 = vpop.f32.mrf.mxu0  ;;  %20647 = vmatprep.mubr.msk.f32.mxu1 %vm636_vm1, %v12792_v13  ;;  %v25248_v21 = vld [vmem:[#allocation3 + $0x64] sm:$0xff]  ;;  %v25253_v52 = vld [vmem:[%s27032_s13 + $0x5c] sm:$0xf] }
 0x465   : > { %20697 = vmatprep.mubr.msk.f32.mxu0 %vm636_vm1, %v24652_v44  ;;  %v10027_v11 = vpop.f32.mrf.mxu1  ;;  %v25258_v44 = vld [vmem:[%s27032_s13 + $0x60] sm:$0xf] }
 0x466   : > { %v25242_v51 = vadd.f32 %v20344_v10, %v10067_v4  ;;  %v10066_v36 = vadd.f32 %v10027_v11, %v24962_v59  ;;  %v10416_v42 = vpop.f32.mrf.mxu0 }
 0x467   : > { %v20349_v57 = vpop.f32.mrf.mxu1  ;;  %20648 = vmatmul.mubr.msk.f32.vlgmr.msra.gmra.mxu1 %vm636_vm1, %v12793_v32 }
 0x468   : > { %20698 = vmatmul.mubr.msk.f32.vlgmr.msra.gmra.mxu0 %vm636_vm1, %v24678_v6  ;;  %v25260_v59 = vadd.f32 %v10416_v42, %v10066_v36  ;;  %v10815_v37 = vadd.f32 %v20349_v57, %v24973_v22  ;;  %v20399_v58 = vpop.f32.mrf.mxu0  ;;  %20746 = vmatpush3.msk.msra.mxu1 %vm733_vm0, %v24955_v31  ;;  %v25274_v22 = vld [vmem:[#allocation3 + $0x6c] sm:$0xff] }
 0x469   : > { %20650 = vmatprep.mubr.msk.f32.mxu1 %vm636_vm1, %v25248_v21  ;;  %20700 = vmatprep.mubr.msk.f32.mxu0 %vm636_vm1, %v24688_v12  ;;  %v10655_v6 = vpop.f32.mrf.mxu1  ;;  %v25284_v12 = vld [vmem:[#allocation3 + $0x7c] sm:$0xff] }
 0x46a   : > { %20796 = vmatpush3.msk.msra.mxu0 %vm733_vm0, %v24960_v1  ;;  %v25271_v63 = vadd.f32 %v20399_v58, %v10815_v37  ;;  %v10814_v13 = vadd.f32 %v10655_v6, %v24988_v33  ;;  %v11044_v4 = vpop.f32.mrf.mxu0  ;;  %20845 = vmatprep.subr.msk.mxu1 %vm733_vm0, %v25253_v52 }
 0x46b   : > { %20895 = vmatprep.subr.msk.mxu0 %vm733_vm0, %v25258_v44  ;;  %v20352_v31 = vpop.f32.mrf.mxu1  ;;  %20651 = vmatmul.mubr.msk.f32.gmra.mxu1 %vm636_vm1, %v25274_v22 }
 0x46c   : > { %20701 = vmatmul.mubr.msk.f32.gmra.mxu0 %vm636_vm1, %v24700_v43  ;;  %v25286_v1 = vadd.f32 %v11044_v4, %v10814_v13  ;;  %v10817_v33 = vadd.f32 %v20352_v31, %v24995_v23  ;;  %v20402_v57 = vpop.f32.mrf.mxu0  ;;  %20653 = vmatprep.mubr.msk.f32.mxu1 %vm636_vm1, %v25284_v12  ;;  %v25296_v43 = vld [vmem:[#allocation3 + $0x84] sm:$0xff]  ;;  %v25302_v23 = vld [vmem:[#allocation3 + $0x94] sm:$0xff] }
 0x46d   : > { %20703 = vmatprep.mubr.msk.f32.mxu0 %vm636_vm1, %v24706_v38  ;;  %v10665_v10 = vpop.f32.mrf.mxu1 }
 0x46e   : > { %v25293_v11 = vadd.f32 %v20402_v57, %v10817_v33  ;;  %v10816_v36 = vadd.f32 %v10665_v10, %v25006_v5  ;;  %v11054_v42 = vpop.f32.mrf.mxu0 }
 0x46f   : > { %v20355_v32 = vpop.f32.mrf.mxu1  ;;  %20654 = vmatmul.mubr.msk.f32.gmra.mxu1 %vm636_vm1, %v25296_v43 }
 0x470   : > { %20704 = vmatmul.mubr.msk.f32.gmra.mxu0 %vm636_vm1, %v24718_v9  ;;  %v25304_v37 = vadd.f32 %v11054_v42, %v10816_v36  ;;  %v10819_v38 = vadd.f32 %v20355_v32, %v25013_v62  ;;  %v20405_v58 = vpop.f32.mrf.mxu0  ;;  %20656 = vmatprep.mubr.msk.f32.mxu1 %vm636_vm1, %v25302_v23  ;;  %v25314_v9 = vld [vmem:[#allocation3 + $0x9c] sm:$0xff]  ;;  %v25320_v62 = vld [vmem:[#allocation3 + $0xac] sm:$0xff] }
 0x471   : > { %20706 = vmatprep.mubr.msk.f32.mxu0 %vm636_vm1, %v24724_v20  ;;  %v10675_v5 = vpop.f32.mrf.mxu1 }
 0x472   : > { %v25311_v6 = vadd.f32 %v20405_v58, %v10819_v38  ;;  %v10818_v13 = vadd.f32 %v10675_v5, %v25024_v35  ;;  %v11064_v4 = vpop.f32.mrf.mxu0 }
 0x473   : > { %v20358_v31 = vpop.f32.mrf.mxu1  ;;  %20657 = vmatmul.mubr.msk.f32.gmra.mxu1 %vm636_vm1, %v25314_v9 }
 0x474   : > { %20707 = vmatmul.mubr.msk.f32.gmra.mxu0 %vm636_vm1, %v24736_v48  ;;  %v25322_v33 = vadd.f32 %v11064_v4, %v10818_v13  ;;  %v10821_v20 = vadd.f32 %v20358_v31, %v25031_v53  ;;  %v20408_v57 = vpop.f32.mrf.mxu0  ;;  %20659 = vmatprep.mubr.msk.f32.mxu1 %vm636_vm1, %v25320_v62  ;;  %v25332_v48 = vld [vmem:[#allocation3 + $0xb4] sm:$0xff]  ;;  %v25338_v53 = vld [vmem:[#allocation3 + $0xc4] sm:$0xff] }
 0x475   : > { %20709 = vmatprep.mubr.msk.f32.mxu0 %vm636_vm1, %v24742_v39  ;;  %v10685_v35 = vpop.f32.mrf.mxu1 }
 0x476   : > { %v25329_v10 = vadd.f32 %v20408_v57, %v10821_v20  ;;  %v10820_v36 = vadd.f32 %v10685_v35, %v25042_v50  ;;  %v11074_v42 = vpop.f32.mrf.mxu0 }
 0x477   : > { %v20361_v32 = vpop.f32.mrf.mxu1  ;;  %20660 = vmatmul.mubr.msk.f32.gmra.mxu1 %vm636_vm1, %v25332_v48 }
 0x478   : > { %20710 = vmatmul.mubr.msk.f32.gmra.mxu0 %vm636_vm1, %v24754_v14  ;;  %v25340_v38 = vadd.f32 %v11074_v42, %v10820_v36  ;;  %v10823_v39 = vadd.f32 %v20361_v32, %v25049_v7  ;;  %v20411_v58 = vpop.f32.mrf.mxu0  ;;  %20662 = vmatprep.mubr.msk.f32.mxu1 %vm636_vm1, %v25338_v53  ;;  %v25350_v14 = vld [vmem:[#allocation3 + $0xcc] sm:$0xff]  ;;  %v25356_v7 = vld [vmem:[#allocation3 + $0xdc] sm:$0xff] }
 0x479   : > { %20712 = vmatprep.mubr.msk.f32.mxu0 %vm636_vm1, %v24760_v55  ;;  %v10695_v50 = vpop.f32.mrf.mxu1 }
 0x47a   : > { %v25347_v5 = vadd.f32 %v20411_v58, %v10823_v39  ;;  %v10822_v13 = vadd.f32 %v10695_v50, %v25060_v47  ;;  %v11084_v4 = vpop.f32.mrf.mxu0 }
 0x47b   : > { %v20364_v31 = vpop.f32.mrf.mxu1  ;;  %20663 = vmatmul.mubr.msk.f32.gmra.mxu1 %vm636_vm1, %v25350_v14 }
 0x47c   : > { %20713 = vmatmul.mubr.msk.f32.gmra.mxu0 %vm636_vm1, %v24772_v56  ;;  %v25358_v20 = vadd.f32 %v11084_v4, %v10822_v13  ;;  %v10825_v55 = vadd.f32 %v20364_v31, %v25067_v34  ;;  %v20414_v57 = vpop.f32.mrf.mxu0  ;;  %20665 = vmatprep.mubr.msk.f32.mxu1 %vm636_vm1, %v25356_v7  ;;  %v25368_v56 = vld [vmem:[#allocation3 + $0xe4] sm:$0xff]  ;;  %v25374_v34 = vld [vmem:[#allocation3 + $0xf4] sm:$0xff] }
 0x47d   : > { %20715 = vmatprep.mubr.msk.f32.mxu0 %vm636_vm1, %v24778_v29  ;;  %v10705_v47 = vpop.f32.mrf.mxu1 }
 0x47e   : > { %v25365_v35 = vadd.f32 %v20414_v57, %v10825_v55  ;;  %v10824_v36 = vadd.f32 %v10705_v47, %v25078_v19  ;;  %v11094_v42 = vpop.f32.mrf.mxu0  ;;  %v25392_v55 = vld [vmem:[#allocation3 + $0x10c] sm:$0xff] }
 0x47f   : > { %v20367_v32 = vpop.f32.mrf.mxu1  ;;  %20666 = vmatmul.mubr.msk.f32.gmra.mxu1 %vm636_vm1, %v25368_v56 }
 0x480   : > { %20716 = vmatmul.mubr.msk.f32.gmra.mxu0 %vm636_vm1, %v24790_v46  ;;  %v25376_v39 = vadd.f32 %v11094_v42, %v10824_v36  ;;  %v10827_v29 = vadd.f32 %v20367_v32, %v25085_v8  ;;  %v20417_v58 = vpop.f32.mrf.mxu0  ;;  %20668 = vmatprep.mubr.msk.f32.mxu1 %vm636_vm1, %v25374_v34  ;;  %v25386_v46 = vld [vmem:[#allocation3 + $0xfc] sm:$0xff] }
 0x481   : > { %20718 = vmatprep.mubr.msk.f32.mxu0 %vm636_vm1, %v24796_v17  ;;  %v10715_v19 = vpop.f32.mrf.mxu1  ;;  %27389 = vst [vmem:[#allocation80_spill] sm:$0xff] %v25386_v46  ;;  %v27390_v8 = vld [vmem:[#allocation42_spill] sm:$0xff] }
 0x482   : > { %v25383_v50 = vadd.f32 %v20417_v58, %v10827_v29  ;;  %v10826_v13 = vadd.f32 %v10715_v19, %v25096_v45  ;;  %v11104_v4 = vpop.f32.mrf.mxu0  ;;  %27391 = vst [vmem:[#allocation42_spill] sm:$0xff] %v25392_v55  ;;  %v27392_v45 = vld [vmem:[#allocation57_spill] sm:$0xff] }
 0x483   : > { %v20370_v31 = vpop.f32.mrf.mxu1  ;;  %20669 = vmatmul.mubr.msk.f32.gmra.mxu1 %vm636_vm1, %v25386_v46  ;;  %v25404_v58 = vld [vmem:[#allocation3 + $0x114] sm:$0xff] }
 0x484   : > { %20719 = vmatmul.mubr.msk.f32.gmra.mxu0 %vm636_vm1, %v27390_v8  ;;  %v25394_v57 = vadd.f32 %v11104_v4, %v10826_v13  ;;  %v10829_v17 = vadd.f32 %v20370_v31, %v25103_v27  ;;  %v20420_v47 = vpop.f32.mrf.mxu0  ;;  %20671 = vmatprep.mubr.msk.f32.mxu1 %vm636_vm1, %v25392_v55  ;;  %27393 = vst [vmem:[#allocation57_spill] sm:$0xff] %v25404_v58  ;;  %v27394_v27 = vld [vmem:[#allocation56_spill] sm:$0xff] }
 0x485   : > { %20721 = vmatprep.mubr.msk.f32.mxu0 %vm636_vm1, %v27392_v45  ;;  %v10725_v36 = vpop.f32.mrf.mxu1  ;;  %v25410_v13 = vld [vmem:[#allocation3 + $0x124] sm:$0xff] }
 0x486   : > { %v25401_v42 = vadd.f32 %v20420_v47, %v10829_v17  ;;  %v10828_v32 = vadd.f32 %v10725_v36, %v25114_v49  ;;  %v11114_v29 = vpop.f32.mrf.mxu0  ;;  %27395 = vst [vmem:[#allocation56_spill] sm:$0xff] %v25410_v13  ;;  %v27396_v49 = vld [vmem:[#allocation43_spill] sm:$0xff] }
 0x487   : > { %v20373_v19 = vpop.f32.mrf.mxu1  ;;  %20672 = vmatmul.mubr.msk.f32.gmra.mxu1 %vm636_vm1, %v25404_v58 }
 0x488   : > { %20722 = vmatmul.mubr.msk.f32.gmra.mxu0 %vm636_vm1, %v27394_v27  ;;  %v25412_v4 = vadd.f32 %v11114_v29, %v10828_v32  ;;  %v10831_v31 = vadd.f32 %v20373_v19, %v25121_v24  ;;  %v20423_v8 = vpop.f32.mrf.mxu0  ;;  %20674 = vmatprep.mubr.msk.f32.mxu1 %vm636_vm1, %v25410_v13  ;;  %v25422_v27 = vld [vmem:[#allocation3 + $0x12c] sm:$0xff]  ;;  %v27398_v24 = vld [vmem:[#allocation58_spill] sm:$0xff] }
 0x489   : > { %20724 = vmatprep.mubr.msk.f32.mxu0 %vm636_vm1, %v27396_v49  ;;  %v10735_v17 = vpop.f32.mrf.mxu1  ;;  %27397 = vst [vmem:[#allocation43_spill] sm:$0xff] %v25422_v27  ;;  %v25428_v32 = vld [vmem:[#allocation3 + $0x13c] sm:$0xff] }
 0x48a   : > { %v25419_v47 = vadd.f32 %v20423_v8, %v10831_v31  ;;  %v10830_v45 = vadd.f32 %v10735_v17, %v25132_v61  ;;  %v11124_v36 = vpop.f32.mrf.mxu0  ;;  %27399 = vst [vmem:[#allocation58_spill] sm:$0xff] %v25428_v32  ;;  %v27400_v61 = vld [vmem:[#allocation59_spill] sm:$0xff] }
 0x48b   : > { %v20376_v58 = vpop.f32.mrf.mxu1  ;;  %20675 = vmatmul.mubr.msk.f32.gmra.mxu1 %vm636_vm1, %v25422_v27 }
 0x48c   : > { %20725 = vmatmul.mubr.msk.f32.gmra.mxu0 %vm636_vm1, %v27398_v24  ;;  %v25430_v29 = vadd.f32 %v11124_v36, %v10830_v45  ;;  %v10833_v19 = vadd.f32 %v20376_v58, %v25139_v30  ;;  %v20426_v31 = vpop.f32.mrf.mxu0  ;;  %20677 = vmatprep.mubr.msk.f32.mxu1 %vm636_vm1, %v25428_v32  ;;  %v25440_v24 = vld [vmem:[#allocation3 + $0x144] sm:$0xff]  ;;  %v25446_v58 = vld [vmem:[#allocation3 + $0x154] sm:$0xff] }
 0x48d   : > { %20727 = vmatprep.mubr.msk.f32.mxu0 %vm636_vm1, %v27400_v61  ;;  %v10745_v8 = vpop.f32.mrf.mxu1  ;;  %27401 = vst [vmem:[#allocation59_spill] sm:$0xff] %v25440_v24  ;;  %v27402_v30 = vld [vmem:[#allocation44_spill] sm:$0xff] }
 0x48e   : > { %v25437_v49 = vadd.f32 %v20426_v31, %v10833_v19  ;;  %v10832_v17 = vadd.f32 %v10745_v8, %v25150_v0  ;;  %v11134_v27 = vpop.f32.mrf.mxu0  ;;  %27403 = vst [vmem:[#allocation44_spill] sm:$0xff] %v25446_v58  ;;  %v27404_v0 = vld [vmem:[#allocation5_spill] sm:$0xff] }
 0x48f   : > { %v20379_v13 = vpop.f32.mrf.mxu1  ;;  %20678 = vmatmul.mubr.msk.f32.gmra.mxu1 %vm636_vm1, %v25440_v24 }
 0x490   : > { %20728 = vmatmul.mubr.msk.f32.gmra.mxu0 %vm636_vm1, %v27402_v30  ;;  %v25448_v45 = vadd.f32 %v11134_v27, %v10832_v17  ;;  %v10835_v36 = vadd.f32 %v20379_v13, %v25157_v3  ;;  %v20429_v19 = vpop.f32.mrf.mxu0  ;;  %20680 = vmatprep.mubr.msk.f32.mxu1 %vm636_vm1, %v25446_v58  ;;  %v25458_v30 = vld [vmem:[#allocation3 + $0x15c] sm:$0xff]  ;;  %v25464_v13 = vld [vmem:[#allocation3 + $0x16c] sm:$0xff] }
 0x491   : > { %20730 = vmatprep.mubr.msk.f32.mxu0 %vm636_vm1, %v27404_v0  ;;  %v10755_v31 = vpop.f32.mrf.mxu1  ;;  %27405 = vst [vmem:[#allocation5_spill] sm:$0xff] %v25458_v30  ;;  %v27406_v3 = vld [vmem:[#allocation7_spill] sm:$0xff] }
 0x492   : > { %v25455_v61 = vadd.f32 %v20429_v19, %v10835_v36  ;;  %v10834_v8 = vadd.f32 %v10755_v31, %v25168_v26  ;;  %v11144_v24 = vpop.f32.mrf.mxu0  ;;  %27407 = vst [vmem:[#allocation7_spill] sm:$0xff] %v25464_v13  ;;  %v27408_v26 = vld [vmem:[#allocation9_spill] sm:$0xff] }
 0x493   : > { %v20382_v32 = vpop.f32.mrf.mxu1  ;;  %20681 = vmatmul.mubr.msk.f32.gmra.mxu1 %vm636_vm1, %v25458_v30 }
 0x494   : > { %20731 = vmatmul.mubr.msk.f32.gmra.mxu0 %vm636_vm1, %v27406_v3  ;;  %v25466_v27 = vadd.f32 %v11144_v24, %v10834_v8  ;;  %v10837_v17 = vadd.f32 %v20382_v32, %v25175_v18  ;;  %v20432_v36 = vpop.f32.mrf.mxu0  ;;  %20683 = vmatprep.mubr.msk.f32.mxu1 %vm636_vm1, %v25464_v13  ;;  %v25476_v3 = vld [vmem:[#allocation3 + $0x174] sm:$0xff]  ;;  %v27410_v18 = vld [vmem:[#allocation11_spill] sm:$0xff] }
 0x495   : > { %20733 = vmatprep.mubr.msk.f32.mxu0 %vm636_vm1, %v27408_v26  ;;  %v10765_v19 = vpop.f32.mrf.mxu1  ;;  %27409 = vst [vmem:[#allocation9_spill] sm:$0xff] %v25476_v3  ;;  %v25482_v32 = vld [vmem:[#allocation3 + $0x184] sm:$0xff] }
 0x496   : > { %v25473_v0 = vadd.f32 %v20432_v36, %v10837_v17  ;;  %v10836_v31 = vadd.f32 %v10765_v19, %v25186_v28  ;;  %v11154_v30 = vpop.f32.mrf.mxu0  ;;  %27411 = vst [vmem:[#allocation11_spill] sm:$0xff] %v25482_v32  ;;  %v27412_v28 = vld [vmem:[#allocation13_spill] sm:$0xff] }
 0x497   : > { %v20385_v58 = vpop.f32.mrf.mxu1  ;;  %20684 = vmatmul.mubr.msk.f32.gmra.mxu1 %vm636_vm1, %v25476_v3 }
 0x498   : > { %20734 = vmatmul.mubr.msk.f32.gmra.mxu0 %vm636_vm1, %v27410_v18  ;;  %v25484_v24 = vadd.f32 %v11154_v30, %v10836_v31  ;;  %v10839_v8 = vadd.f32 %v20385_v58, %v25193_v41  ;;  %v20435_v17 = vpop.f32.mrf.mxu0  ;;  %20686 = vmatprep.mubr.msk.f32.mxu1 %vm636_vm1, %v25482_v32  ;;  %v25494_v18 = vld [vmem:[#allocation3 + $0x18c] sm:$0xff]  ;;  %v12820_v58 = vld [vmem:[#allocation3 + $0x19c] sm:$0xff] }
 0x499   : > { %20736 = vmatprep.mubr.msk.f32.mxu0 %vm636_vm1, %v27412_v28  ;;  %v10775_v36 = vpop.f32.mrf.mxu1  ;;  %27413 = vst [vmem:[#allocation13_spill] sm:$0xff] %v25494_v18  ;;  %v27414_v41 = vld [vmem:[#allocation81_spill] sm:$0xff] }
 0x49a   : > { %v25491_v26 = vadd.f32 %v20435_v17, %v10839_v8  ;;  %v10838_v19 = vadd.f32 %v10775_v36, %v25204_v15  ;;  %v11164_v3 = vpop.f32.mrf.mxu0  ;;  %v27415_v8 = vld [vmem:[#allocation15_spill] sm:$0xff]  ;;  %v12822_v17 = vld [vmem:[#allocation3 + $0x1b4] sm:$0xff]  ;;  %v13212_v36 = vld [vmem:[#allocation3 + $0x1c8] sm:$0xff] }
 0x49b   : > { %v20388_v13 = vpop.f32.mrf.mxu1  ;;  %20687 = vmatmul.mubr.msk.f32.gmra.mxu1 %vm636_vm1, %v25494_v18 }
 0x49c   : > { %20737 = vmatmul.mubr.msk.f32.gmra.mxu0 %vm636_vm1, %v27414_v41  ;;  %v25500_v30 = vadd.f32 %v11164_v3, %v10838_v19  ;;  %v10841_v31 = vadd.f32 %v20388_v13, %v25213_v40  ;;  %v20438_v28 = vpop.f32.mrf.mxu0  ;;  %20689 = vmatprep.mubr.msk.f32.mxu1 %vm636_vm1, %v12820_v58  ;;  %v12821_v41 = vld [vmem:[#allocation3 + $0x1a4] sm:$0xff]  ;;  %v27416_v3 = vld [vmem:[#allocation17_spill] sm:$0xff]  ;;  %v12823_v58 = vld [vmem:[#allocation3 + $0x1bc] sm:$0xff] }
 0x49d   : > { %20739 = vmatprep.mubr.msk.f32.mxu0 %vm636_vm1, %v27415_v8  ;;  %v10785_v15 = vpop.f32.mrf.mxu1 }
 0x49e   : > { %v25506_v32 = vadd.f32 %v20438_v28, %v10841_v31  ;;  %v10840_v18 = vadd.f32 %v10785_v15, %v25222_v60  ;;  %v11174_v55 = vpop.f32.mrf.mxu0  ;;  %v13213_v31 = vld [vmem:[#allocation3 + $0x1d0] sm:$0xff] }
 0x49f   : > { %v20391_v46 = vpop.f32.mrf.mxu1  ;;  %20690 = vmatmul.mubr.msk.f32.gmra.mxu1 %vm636_vm1, %v12821_v41 }
 0x4a0   : > { %20740 = vmatmul.mubr.msk.f32.gmra.mxu0 %vm636_vm1, %v27416_v3  ;;  %v25512_v40 = vadd.f32 %v11174_v55, %v10840_v18  ;;  %v10843_v13 = vadd.f32 %v20391_v46, %v25230_v2  ;;  %v20441_v19 = vpop.f32.mrf.mxu0  ;;  %20692 = vmatprep.mubr.msk.f32.mxu1 %vm636_vm1, %v12822_v17  ;;  %v13571_v55 = vld [vmem:[#allocation3 + $0x61] sm:$0xff] }
 0x4a1   : > { %20742 = vmatprep.mubr.msk.f32.mxu0 %vm636_vm1, %v13212_v36  ;;  %v10795_v60 = vpop.f32.mrf.mxu1 }
 0x4a2   : > { %v25517_v28 = vadd.f32 %v20441_v19, %v10843_v13  ;;  %v10842_v8 = vadd.f32 %v10795_v60, %v25236_v25  ;;  %v11184_v15 = vpop.f32.mrf.mxu0  ;;  %v13572_v13 = vld [vmem:[#allocation3 + $0x69] sm:$0xff] }
 0x4a3   : > { %v20394_v41 = vpop.f32.mrf.mxu1  ;;  %20693 = vmatmul.mubr.msk.f32.gmra.mxu1 %vm636_vm1, %v12823_v58  ;;  %v27417_v58 = vld [vmem:[#allocation19_spill] sm:$0xff] }
 0x4a4   : > { %20743 = vmatmul.mubr.msk.f32.gmra.mxu0 %vm636_vm1, %v13213_v31  ;;  %v25522_v2 = vadd.f32 %v11184_v15, %v10842_v8  ;;  %v10845_v46 = vadd.f32 %v20394_v41, %v25242_v51  ;;  %v20444_v18 = vpop.f32.mrf.mxu0  ;;  %20747 = vmatprep.mubr.msk.f32.mxu1 %vm636_vm1, %v13571_v55  ;;  %v13573_v51 = vld [vmem:[#allocation3 + $0x79] sm:$0xff]  ;;  %v25537_v31 = vld [vmem:[%s27035_s16] sm:$0xf] }
 0x4a5   : > { %20797 = vmatprep.mubr.msk.f32.mxu0 %vm636_vm1, %v24950_v16  ;;  %v10805_v17 = vpop.f32.mrf.mxu1 }
 0x4a6   : > { %v25528_v36 = vadd.f32 %v20444_v18, %v10845_v46  ;;  %v10844_v25 = vadd.f32 %v10805_v17, %v25260_v59  ;;  %v11194_v3 = vpop.f32.mrf.mxu0  ;;  %v27418_v59 = vld [vmem:[#allocation21_spill] sm:$0xff]  ;;  %v13574_v18 = vld [vmem:[#allocation3 + $0x81] sm:$0xff] }
 0x4a7   : > { %v20449_v19 = vpop.f32.mrf.mxu1  ;;  %20748 = vmatmul.mubr.msk.f32.vlgmr.msra.gmra.mxu1 %vm636_vm1, %v13572_v13  ;;  %v13575_v17 = vld [vmem:[#allocation3 + $0x91] sm:$0xff] }
 0x4a8   : > { %20798 = vmatmul.mubr.msk.f32.vlgmr.msra.gmra.mxu0 %vm636_vm1, %v27417_v58  ;;  %v25539_v16 = vadd.f32 %v11194_v3, %v10844_v25  ;;  %v11594_v60 = vadd.f32 %v20449_v19, %v25271_v63  ;;  %v20499_v8 = vpop.f32.mrf.mxu0  ;;  %20846 = vmatpush3.msk.msra.mxu1 %vm733_vm0, %v25253_v52  ;;  %v27419_v52 = vld [vmem:[#allocation23_spill] sm:$0xff]  ;;  %v21031_v25 = vmov -inf   ;;  %v27420_v13 = vld [vmem:[#allocation25_spill] sm:$0xff] }
 0x4a9   : > { %20750 = vmatprep.mubr.msk.f32.mxu1 %vm636_vm1, %v13573_v51  ;;  %20800 = vmatprep.mubr.msk.f32.mxu0 %vm636_vm1, %v27418_v59  ;;  %v11434_v15 = vpop.f32.mrf.mxu1  ;;  %15237 = vst.msk [vmem:[#allocation4] sm:$0xff] %vm636_vm1, %v21031_v25  ;;  %15238 = vst.msk [vmem:[#allocation4 + $0x8] sm:$0xff] %vm636_vm1, %v21031_v25  ;;  %v27421_v59 = vld [vmem:[#allocation27_spill] sm:$0xff] }
 0x4aa   : > { %20896 = vmatpush3.msk.msra.mxu0 %vm733_vm0, %v25258_v44  ;;  %v25549_v41 = vadd.f32 %v20499_v8, %v11594_v60  ;;  %v11593_v55 = vadd.f32 %v11434_v15, %v25286_v1  ;;  %v11823_v46 = vpop.f32.mrf.mxu0  ;;  %20945 = vmatprep.subr.msk.mxu1 %vm733_vm0, %v25537_v31  ;;  %15245 = vst.msk [vmem:[#allocation4 + $0x18] sm:$0x1] %vm1758_vm2, %v21031_v25  ;;  %15246 = vst.msk [vmem:[#allocation4 + $0x30] sm:$0x1] %vm1758_vm2, %v21031_v25  ;;  %v13576_v60 = vld [vmem:[#allocation3 + $0x99] sm:$0xff]  ;;  %v13577_v15 = vld [vmem:[#allocation3 + $0xa9] sm:$0xff] }
 0x4ab   : > { %v20452_v63 = vpop.f32.mrf.mxu1  ;;  %20751 = vmatmul.mubr.msk.f32.gmra.mxu1 %vm636_vm1, %v13574_v18  ;;  %15239 = vst.msk [vmem:[#allocation4 + $0x10] sm:$0x3] %vm1752_vm3, %v21031_v25  ;;  %15243 = vst.msk [vmem:[#allocation4 + $0x1a8] sm:$0x3] %vm1752_vm3, %v21031_v25 }
 0x4ac   : > { %20801 = vmatmul.mubr.msk.f32.gmra.mxu0 %vm636_vm1, %v27419_v52  ;;  %15241 = vst.msk [vmem:[#allocation4 + $0x198] sm:$0xff] %vm636_vm1, %v21031_v25  ;;  %15242 = vst.msk [vmem:[#allocation4 + $0x1a0] sm:$0xff] %vm636_vm1, %v21031_v25  ;;  %v25595_v44 = vadd.f32 %v11823_v46, %v11593_v55  ;;  %v11596_v1 = vadd.f32 %v20452_v63, %v25293_v11  ;;  %v20502_v3 = vpop.f32.mrf.mxu0  ;;  %20753 = vmatprep.mubr.msk.f32.mxu1 %vm636_vm1, %v13575_v17  ;;  %v27422_v63 = vld [vmem:[#allocation29_spill] sm:$0xff] }
 0x4ad   : > { %15247 = vst.msk [vmem:[#allocation4 + $0x48] sm:$0x1] %vm1758_vm2, %v21031_v25  ;;  %15248 = vst.msk [vmem:[#allocation4 + $0x60] sm:$0x1] %vm1758_vm2, %v21031_v25  ;;  %20803 = vmatprep.mubr.msk.f32.mxu0 %vm636_vm1, %v27420_v13  ;;  %v11444_v19 = vpop.f32.mrf.mxu1  ;;  %v27423_v13 = vld [vmem:[#allocation31_spill] sm:$0xff] }
 0x4ae   : > { %15249 = vst.msk [vmem:[#allocation4 + $0x78] sm:$0x1] %vm1758_vm2, %v21031_v25  ;;  %15250 = vst.msk [vmem:[#allocation4 + $0x90] sm:$0x1] %vm1758_vm2, %v21031_v25  ;;  %v25605_v58 = vadd.f32 %v20502_v3, %v11596_v1  ;;  %v11595_v51 = vadd.f32 %v11444_v19, %v25304_v37  ;;  %v11833_v11 = vpop.f32.mrf.mxu0  ;;  %v13578_v1 = vld [vmem:[#allocation3 + $0xb1] sm:$0xff] }
 0x4af   : > { %15251 = vst.msk [vmem:[#allocation4 + $0xa8] sm:$0x1] %vm1758_vm2, %v21031_v25  ;;  %15252 = vst.msk [vmem:[#allocation4 + $0xc0] sm:$0x1] %vm1758_vm2, %v21031_v25  ;;  %v20455_v8 = vpop.f32.mrf.mxu1  ;;  %20754 = vmatmul.mubr.msk.f32.gmra.mxu1 %vm636_vm1, %v13576_v60  ;;  %v27424_v60 = vld [vmem:[#allocation33_spill] sm:$0xff] }
 0x4b0   : > { %15253 = vst.msk [vmem:[#allocation4 + $0xd8] sm:$0x1] %vm1758_vm2, %v21031_v25  ;;  %15254 = vst.msk [vmem:[#allocation4 + $0xf0] sm:$0x1] %vm1758_vm2, %v21031_v25  ;;  %20804 = vmatmul.mubr.msk.f32.gmra.mxu0 %vm636_vm1, %v27421_v59  ;;  %v25611_v55 = vadd.f32 %v11833_v11, %v11595_v51  ;;  %v11598_v46 = vadd.f32 %v20455_v8, %v25311_v6  ;;  %v20505_v18 = vpop.f32.mrf.mxu0  ;;  %20756 = vmatprep.mubr.msk.f32.mxu1 %vm636_vm1, %v13577_v15  ;;  %v13579_v6 = vld [vmem:[#allocation3 + $0xc1] sm:$0xff] }
 0x4b1   : > { %15255 = vst.msk [vmem:[#allocation4 + $0x108] sm:$0x1] %vm1758_vm2, %v21031_v25  ;;  %15256 = vst.msk [vmem:[#allocation4 + $0x120] sm:$0x1] %vm1758_vm2, %v21031_v25  ;;  %20806 = vmatprep.mubr.msk.f32.mxu0 %vm636_vm1, %v27422_v63  ;;  %v11454_v37 = vpop.f32.mrf.mxu1  ;;  %v27425_v63 = vld [vmem:[#allocation60_spill] sm:$0xff] }
 0x4b2   : > { %15257 = vst.msk [vmem:[#allocation4 + $0x138] sm:$0x1] %vm1758_vm2, %v21031_v25  ;;  %15258 = vst.msk [vmem:[#allocation4 + $0x150] sm:$0x1] %vm1758_vm2, %v21031_v25  ;;  %v25617_v52 = vadd.f32 %v20505_v18, %v11598_v46  ;;  %v11597_v17 = vadd.f32 %v11454_v37, %v25322_v33  ;;  %v13580_v46 = vld [vmem:[#allocation3 + $0xc9] sm:$0xff] }
 0x4b3   : > { %15259 = vst.msk [vmem:[#allocation4 + $0x168] sm:$0x1] %vm1758_vm2, %v21031_v25  ;;  %15260 = vst.msk [vmem:[#allocation4 + $0x180] sm:$0x1] %vm1758_vm2, %v21031_v25  ;;  %v20458_v3 = vpop.f32.mrf.mxu1  ;;  %20757 = vmatmul.mubr.msk.f32.gmra.mxu1 %vm636_vm1, %v13578_v1  ;;  %v27426_v1 = vld [vmem:[#allocation61_spill] sm:$0xff] }
 0x4b4   : > { %15263 = vst.msk [vmem:[#allocation4 + $0x29] sm:$0x1] %vm1758_vm2, %v21031_v25  ;;  %15264 = vst.msk [vmem:[#allocation4 + $0x41] sm:$0x1] %vm1758_vm2, %v21031_v25  ;;  %20807 = vmatmul.mubr.msk.f32.gmra.mxu0 %vm636_vm1, %v27423_v13  ;;  %v11600_v51 = vadd.f32 %v20458_v3, %v25329_v10  ;;  %20759 = vmatprep.mubr.msk.f32.mxu1 %vm636_vm1, %v13579_v6  ;;  %v13581_v10 = vld [vmem:[#allocation3 + $0xd9] sm:$0xff] }
 0x4b5   : > { %15265 = vst.msk [vmem:[#allocation4 + $0x59] sm:$0x1] %vm1758_vm2, %v21031_v25  ;;  %15266 = vst.msk [vmem:[#allocation4 + $0x71] sm:$0x1] %vm1758_vm2, %v21031_v25  ;;  %20809 = vmatprep.mubr.msk.f32.mxu0 %vm636_vm1, %v27424_v60  ;;  %v11464_v33 = vpop.f32.mrf.mxu1  ;;  %v27427_v60 = vld [vmem:[#allocation62_spill] sm:$0xff] }
 0x4b6   : > { %15267 = vst.msk [vmem:[#allocation4 + $0x89] sm:$0x1] %vm1758_vm2, %v21031_v25  ;;  %15268 = vst.msk [vmem:[#allocation4 + $0xa1] sm:$0x1] %vm1758_vm2, %v21031_v25  ;;  %v11599_v59 = vadd.f32 %v11464_v33, %v25340_v38 }
 0x4b7   : > { %15269 = vst.msk [vmem:[#allocation4 + $0xb9] sm:$0x1] %vm1758_vm2, %v21031_v25  ;;  %15270 = vst.msk [vmem:[#allocation4 + $0xd1] sm:$0x1] %vm1758_vm2, %v21031_v25  ;;  %v20461_v18 = vpop.f32.mrf.mxu1  ;;  %20760 = vmatmul.mubr.msk.f32.gmra.mxu1 %vm636_vm1, %v13580_v46  ;;  %v27428_v46 = vld [vmem:[#allocation63_spill] sm:$0xff] }
 0x4b8   : > { %15271 = vst.msk [vmem:[#allocation4 + $0xe9] sm:$0x1] %vm1758_vm2, %v21031_v25  ;;  %15272 = vst.msk [vmem:[#allocation4 + $0x101] sm:$0x1] %vm1758_vm2, %v21031_v25  ;;  %20810 = vmatmul.mubr.msk.f32.gmra.mxu0 %vm636_vm1, %v27425_v63  ;;  %20762 = vmatprep.mubr.msk.f32.mxu1 %vm636_vm1, %v13581_v10 }
 0x4b9   : > { %15273 = vst.msk [vmem:[#allocation4 + $0x119] sm:$0x1] %vm1758_vm2, %v21031_v25  ;;  %15274 = vst.msk [vmem:[#allocation4 + $0x131] sm:$0x1] %vm1758_vm2, %v21031_v25  ;;  %20812 = vmatprep.mubr.msk.f32.mxu0 %vm636_vm1, %v27426_v1  ;;  %v11474_v38 = vpop.f32.mrf.mxu1  ;;  %v27429_v1 = vld [vmem:[#allocation64_spill] sm:$0xff] }
 0x4ba   : > { %15275 = vst.msk [vmem:[#allocation4 + $0x149] sm:$0x1] %vm1758_vm2, %v21031_v25  ;;  %15276 = vst.msk [vmem:[#allocation4 + $0x161] sm:$0x1] %vm1758_vm2, %v21031_v25  ;;  %v11601_v13 = vadd.f32 %v11474_v38, %v25358_v20 }
 0x4bb   : > { %15277 = vst.msk [vmem:[#allocation4 + $0x179] sm:$0x1] %vm1758_vm2, %v21031_v25  ;;  %15278 = vst.msk [vmem:[#allocation4 + $0x191] sm:$0x1] %vm1758_vm2, %v21031_v25 }
 0x4bc   : > { %15244 = vst.msk [vmem:[#allocation4] sm:$0x1] %vm1758_vm2, %v21031_v25  ;;  %15261 = vst.msk [vmem:[#allocation4 + $0x198] sm:$0x1] %vm1758_vm2, %v21031_v25  ;;  %20813 = vmatmul.mubr.msk.f32.gmra.mxu0 %vm636_vm1, %v27427_v60 }
 0x4bd   : > { %15262 = vst.msk [vmem:[#allocation4 + $0x11] sm:$0x1] %vm1758_vm2, %v21031_v25  ;;  %15279 = vst.msk [vmem:[#allocation4 + $0x1a9] sm:$0x1] %vm1758_vm2, %v21031_v25  ;;  %v11843_v25 = vpop.f32.mrf.mxu0  ;;  %20815 = vmatprep.mubr.msk.f32.mxu0 %vm636_vm1, %v27428_v46  ;;  %v27431_v46 = vld [vmem:[#allocation66_spill] sm:$0xff] }
 0x4be   : > { %v25623_v19 = vadd.f32 %v11843_v25, %v11597_v17  ;;  %v11602_v17 = vadd.f32 %v20461_v18, %v25347_v5  ;;  %v13583_v5 = vld [vmem:[#allocation3 + $0xf1] sm:$0xff] }
 0x4bf   : > { %v20508_v11 = vpop.f32.mrf.mxu0 }
 0x4c0   : > { %v25629_v8 = vadd.f32 %v20508_v11, %v11600_v51  ;;  %v13582_v51 = vld [vmem:[#allocation3 + $0xe1] sm:$0xff]  ;;  %v20464_v11 = vpop.f32.mrf.mxu1  ;;  %20816 = vmatmul.mubr.msk.f32.gmra.mxu0 %vm636_vm1, %v27429_v1 }
 0x4c1   : > { %v11853_v15 = vpop.f32.mrf.mxu0  ;;  %20763 = vmatmul.mubr.msk.f32.gmra.mxu1 %vm636_vm1, %v13582_v51  ;;  %v27430_v51 = vld [vmem:[#allocation65_spill] sm:$0xff] }
 0x4c2   : > { %v25635_v37 = vadd.f32 %v11853_v15, %v11599_v59  ;;  %v11604_v59 = vadd.f32 %v20464_v11, %v25365_v35  ;;  %20765 = vmatprep.mubr.msk.f32.mxu1 %vm636_vm1, %v13583_v5  ;;  %v11484_v20 = vpop.f32.mrf.mxu1  ;;  %v13585_v35 = vld [vmem:[#allocation3 + $0x109] sm:$0xff]  ;;  %20818 = vmatprep.mubr.msk.f32.mxu0 %vm636_vm1, %v27430_v51 }
 0x4c3   : > { %v20511_v25 = vpop.f32.mrf.mxu0  ;;  %v11603_v63 = vadd.f32 %v11484_v20, %v25376_v39  ;;  %v27433_v51 = vld [vmem:[#allocation68_spill] sm:$0xff] }
 0x4c4   : > { %v25641_v3 = vadd.f32 %v20511_v25, %v11602_v17  ;;  %v13584_v17 = vld [vmem:[#allocation3 + $0xf9] sm:$0xff]  ;;  %v20467_v25 = vpop.f32.mrf.mxu1  ;;  %20819 = vmatmul.mubr.msk.f32.gmra.mxu0 %vm636_vm1, %v27431_v46 }
 0x4c5   : > { %v11863_v6 = vpop.f32.mrf.mxu0  ;;  %20766 = vmatmul.mubr.msk.f32.gmra.mxu1 %vm636_vm1, %v13584_v17  ;;  %v27432_v17 = vld [vmem:[#allocation67_spill] sm:$0xff] }
 0x4c6   : > { %v25647_v33 = vadd.f32 %v11863_v6, %v11601_v13  ;;  %v11606_v13 = vadd.f32 %v20467_v25, %v25383_v50  ;;  %20768 = vmatprep.mubr.msk.f32.mxu1 %vm636_vm1, %v13585_v35  ;;  %v11494_v39 = vpop.f32.mrf.mxu1  ;;  %v13587_v50 = vld [vmem:[#allocation3 + $0x121] sm:$0xff]  ;;  %20821 = vmatprep.mubr.msk.f32.mxu0 %vm636_vm1, %v27432_v17  ;;  %v27435_v17 = vld [vmem:[#allocation70_spill] sm:$0xff] }
 0x4c7   : > { %v20514_v15 = vpop.f32.mrf.mxu0  ;;  %v11605_v60 = vadd.f32 %v11494_v39, %v25394_v57 }
 0x4c8   : > { %v25653_v18 = vadd.f32 %v20514_v15, %v11604_v59  ;;  %v13586_v59 = vld [vmem:[#allocation3 + $0x111] sm:$0xff]  ;;  %v20470_v15 = vpop.f32.mrf.mxu1  ;;  %20822 = vmatmul.mubr.msk.f32.gmra.mxu0 %vm636_vm1, %v27433_v51 }
 0x4c9   : > { %v11873_v10 = vpop.f32.mrf.mxu0  ;;  %20769 = vmatmul.mubr.msk.f32.gmra.mxu1 %vm636_vm1, %v13586_v59  ;;  %v27434_v59 = vld [vmem:[#allocation69_spill] sm:$0xff] }
 0x4ca   : > { %v25659_v38 = vadd.f32 %v11873_v10, %v11603_v63  ;;  %v11608_v63 = vadd.f32 %v20470_v15, %v25401_v42  ;;  %20771 = vmatprep.mubr.msk.f32.mxu1 %vm636_vm1, %v13587_v50  ;;  %v11504_v57 = vpop.f32.mrf.mxu1  ;;  %v13589_v42 = vld [vmem:[#allocation3 + $0x139] sm:$0xff]  ;;  %20824 = vmatprep.mubr.msk.f32.mxu0 %vm636_vm1, %v27434_v59  ;;  %v27437_v59 = vld [vmem:[#allocation72_spill] sm:$0xff] }
 0x4cb   : > { %v20517_v6 = vpop.f32.mrf.mxu0  ;;  %v11607_v1 = vadd.f32 %v11504_v57, %v25412_v4 }
 0x4cc   : > { %v25665_v11 = vadd.f32 %v20517_v6, %v11606_v13  ;;  %v13588_v13 = vld [vmem:[#allocation3 + $0x129] sm:$0xff]  ;;  %v20473_v6 = vpop.f32.mrf.mxu1  ;;  %20825 = vmatmul.mubr.msk.f32.gmra.mxu0 %vm636_vm1, %v27435_v17 }
 0x4cd   : > { %v11883_v5 = vpop.f32.mrf.mxu0  ;;  %20772 = vmatmul.mubr.msk.f32.gmra.mxu1 %vm636_vm1, %v13588_v13  ;;  %v27436_v13 = vld [vmem:[#allocation71_spill] sm:$0xff] }
 0x4ce   : > { %v25671_v20 = vadd.f32 %v11883_v5, %v11605_v60  ;;  %v11610_v60 = vadd.f32 %v20473_v6, %v25419_v47  ;;  %20774 = vmatprep.mubr.msk.f32.mxu1 %vm636_vm1, %v13589_v42  ;;  %v11514_v4 = vpop.f32.mrf.mxu1  ;;  %v13591_v47 = vld [vmem:[#allocation3 + $0x151] sm:$0xff]  ;;  %20827 = vmatprep.mubr.msk.f32.mxu0 %vm636_vm1, %v27436_v13 }
 0x4cf   : > { %v20520_v10 = vpop.f32.mrf.mxu0  ;;  %v11609_v46 = vadd.f32 %v11514_v4, %v25430_v29  ;;  %v27439_v13 = vld [vmem:[#allocation74_spill] sm:$0xff] }
 0x4d0   : > { %v25677_v25 = vadd.f32 %v20520_v10, %v11608_v63  ;;  %v13590_v63 = vld [vmem:[#allocation3 + $0x141] sm:$0xff]  ;;  %v20476_v10 = vpop.f32.mrf.mxu1  ;;  %20828 = vmatmul.mubr.msk.f32.gmra.mxu0 %vm636_vm1, %v27437_v59 }
 0x4d1   : > { %v11893_v35 = vpop.f32.mrf.mxu0  ;;  %20775 = vmatmul.mubr.msk.f32.gmra.mxu1 %vm636_vm1, %v13590_v63  ;;  %v27438_v63 = vld [vmem:[#allocation73_spill] sm:$0xff] }
 0x4d2   : > { %v25683_v39 = vadd.f32 %v11893_v35, %v11607_v1  ;;  %v11612_v1 = vadd.f32 %v20476_v10, %v25437_v49  ;;  %20777 = vmatprep.mubr.msk.f32.mxu1 %vm636_vm1, %v13591_v47  ;;  %v11524_v29 = vpop.f32.mrf.mxu1  ;;  %v13593_v49 = vld [vmem:[#allocation3 + $0x169] sm:$0xff]  ;;  %20830 = vmatprep.mubr.msk.f32.mxu0 %vm636_vm1, %v27438_v63 }
 0x4d3   : > { %v20523_v5 = vpop.f32.mrf.mxu0  ;;  %v11611_v51 = vadd.f32 %v11524_v29, %v25448_v45  ;;  %v27441_v63 = vld [vmem:[#allocation76_spill] sm:$0xff] }
 0x4d4   : > { %v25689_v15 = vadd.f32 %v20523_v5, %v11610_v60  ;;  %v13592_v60 = vld [vmem:[#allocation3 + $0x159] sm:$0xff]  ;;  %v20479_v5 = vpop.f32.mrf.mxu1  ;;  %20831 = vmatmul.mubr.msk.f32.gmra.mxu0 %vm636_vm1, %v27439_v13 }
 0x4d5   : > { %v11903_v50 = vpop.f32.mrf.mxu0  ;;  %20778 = vmatmul.mubr.msk.f32.gmra.mxu1 %vm636_vm1, %v13592_v60  ;;  %v27440_v60 = vld [vmem:[#allocation75_spill] sm:$0xff] }
 0x4d6   : > { %v25695_v57 = vadd.f32 %v11903_v50, %v11609_v46  ;;  %v11614_v46 = vadd.f32 %v20479_v5, %v25455_v61  ;;  %20780 = vmatprep.mubr.msk.f32.mxu1 %vm636_vm1, %v13593_v49  ;;  %v11534_v45 = vpop.f32.mrf.mxu1  ;;  %v13595_v61 = vld [vmem:[#allocation3 + $0x181] sm:$0xff]  ;;  %20833 = vmatprep.mubr.msk.f32.mxu0 %vm636_vm1, %v27440_v60 }
 0x4d7   : > { %v20526_v35 = vpop.f32.mrf.mxu0  ;;  %v11613_v17 = vadd.f32 %v11534_v45, %v25466_v27 }
 0x4d8   : > { %v25701_v6 = vadd.f32 %v20526_v35, %v11612_v1  ;;  %v13594_v1 = vld [vmem:[#allocation3 + $0x171] sm:$0xff]  ;;  %v20482_v35 = vpop.f32.mrf.mxu1  ;;  %20834 = vmatmul.mubr.msk.f32.gmra.mxu0 %vm636_vm1, %v27441_v63 }
 0x4d9   : > { %v11913_v42 = vpop.f32.mrf.mxu0  ;;  %20781 = vmatmul.mubr.msk.f32.gmra.mxu1 %vm636_vm1, %v13594_v1  ;;  %v27442_v1 = vld [vmem:[#allocation77_spill] sm:$0xff] }
 0x4da   : > { %v25707_v4 = vadd.f32 %v11913_v42, %v11611_v51  ;;  %v11616_v51 = vadd.f32 %v20482_v35, %v25473_v0  ;;  %20783 = vmatprep.mubr.msk.f32.mxu1 %vm636_vm1, %v13595_v61  ;;  %v11544_v27 = vpop.f32.mrf.mxu1  ;;  %v13597_v0 = vld [vmem:[#allocation3 + $0x199] sm:$0xff]  ;;  %20836 = vmatprep.mubr.msk.f32.mxu0 %vm636_vm1, %v27442_v1  ;;  %v13599_v35 = vld [vmem:[#allocation3 + $0x1b1] sm:$0xff] }
 0x4db   : > { %v20529_v50 = vpop.f32.mrf.mxu0  ;;  %v11615_v59 = vadd.f32 %v11544_v27, %v25484_v24  ;;  %v27443_v27 = vld [vmem:[#allocation78_spill] sm:$0xff]  ;;  %v13990_v63 = vld [vmem:[#allocation3 + $0x1ca] sm:$0xff] }
 0x4dc   : > { %v25713_v10 = vadd.f32 %v20529_v50, %v11614_v46  ;;  %v13596_v46 = vld [vmem:[#allocation3 + $0x189] sm:$0xff]  ;;  %v20485_v50 = vpop.f32.mrf.mxu1  ;;  %20837 = vmatmul.mubr.msk.f32.gmra.mxu0 %vm636_vm1, %v27443_v27 }
 0x4dd   : > { %v11923_v47 = vpop.f32.mrf.mxu0  ;;  %20784 = vmatmul.mubr.msk.f32.gmra.mxu1 %vm636_vm1, %v13596_v46  ;;  %20839 = vmatprep.mubr.msk.f32.mxu0 %vm636_vm1, %v25211_v54  ;;  %v13600_v46 = vld [vmem:[#allocation3 + $0x1b9] sm:$0xff] }
 0x4de   : > { %v25719_v29 = vadd.f32 %v11923_v47, %v11613_v17  ;;  %v11618_v17 = vadd.f32 %v20485_v50, %v25491_v26  ;;  %20786 = vmatprep.mubr.msk.f32.mxu1 %vm636_vm1, %v13597_v0  ;;  %v11554_v24 = vpop.f32.mrf.mxu1  ;;  %v13601_v50 = vld [vmem:[#allocation3 + $0x1c9] sm:$0xff] }
 0x4df   : > { %v20532_v42 = vpop.f32.mrf.mxu0  ;;  %v11617_v61 = vadd.f32 %v11554_v24, %v25500_v30  ;;  %v27444_v24 = vld [vmem:[#allocation79_spill] sm:$0xff] }
 0x4e0   : > { %v25725_v5 = vadd.f32 %v20532_v42, %v11616_v51  ;;  %v13598_v42 = vld [vmem:[#allocation3 + $0x1a1] sm:$0xff]  ;;  %v20488_v60 = vpop.f32.mrf.mxu1  ;;  %20840 = vmatmul.mubr.msk.f32.gmra.mxu0 %vm636_vm1, %v27444_v24 }
 0x4e1   : > { %v11933_v49 = vpop.f32.mrf.mxu0  ;;  %20787 = vmatmul.mubr.msk.f32.gmra.mxu1 %vm636_vm1, %v13598_v42  ;;  %20842 = vmatprep.mubr.msk.f32.mxu0 %vm636_vm1, %v13990_v63 }
 0x4e2   : > { %v25731_v45 = vadd.f32 %v11933_v49, %v11615_v59  ;;  %v11620_v59 = vadd.f32 %v20488_v60, %v25506_v32  ;;  %20789 = vmatprep.mubr.msk.f32.mxu1 %vm636_vm1, %v13599_v35  ;;  %v11564_v30 = vpop.f32.mrf.mxu1 }
 0x4e3   : > { %v20535_v47 = vpop.f32.mrf.mxu0 }
 0x4e4   : > { %v25737_v13 = vadd.f32 %v20535_v47, %v11618_v17  ;;  %v11619_v17 = vadd.f32 %v11564_v30, %v25512_v40  ;;  %v20491_v1 = vpop.f32.mrf.mxu1 }
 0x4e5   : > { %v11943_v51 = vpop.f32.mrf.mxu0  ;;  %20790 = vmatmul.mubr.msk.f32.gmra.mxu1 %vm636_vm1, %v13600_v46  ;;  %v11622_v35 = vadd.f32 %v20491_v1, %v25517_v28 }
 0x4e6   : > { %v25743_v26 = vadd.f32 %v11943_v51, %v11617_v61  ;;  %20792 = vmatprep.mubr.msk.f32.mxu1 %vm636_vm1, %v13601_v50  ;;  %v13602_v61 = vld [vmem:[#allocation3 + $0x1d1] sm:$0xff]  ;;  %v11574_v42 = vpop.f32.mrf.mxu1 }
 0x4e7   : > { %v20538_v49 = vpop.f32.mrf.mxu0  ;;  %v13991_v51 = vld [vmem:[#allocation3 + $0x1d2] sm:$0xff]  ;;  %v11621_v60 = vadd.f32 %v11574_v42, %v25522_v2 }
 0x4e8   : > { %v25749_v0 = vadd.f32 %v20538_v49, %v11620_v59  ;;  %v20494_v59 = vpop.f32.mrf.mxu1  ;;  %20843 = vmatmul.mubr.msk.f32.gmra.mxu0 %vm636_vm1, %v13991_v51  ;;  %v14349_v49 = vld [vmem:[#allocation3 + $0x63] sm:$0xff] }
 0x4e9   : > { %v11953_v47 = vpop.f32.mrf.mxu0  ;;  %20793 = vmatmul.mubr.msk.f32.gmra.mxu1 %vm636_vm1, %v13602_v61  ;;  %v11624_v46 = vadd.f32 %v20494_v59, %v25528_v36  ;;  %20897 = vmatprep.mubr.msk.f32.mxu0 %vm636_vm1, %v25248_v21  ;;  %v14351_v36 = vld [vmem:[#allocation3 + $0x7b] sm:$0xff]  ;;  %v14352_v51 = vld [vmem:[#allocation3 + $0x83] sm:$0xff] }
 0x4ea   : > { %v25755_v32 = vadd.f32 %v11953_v47, %v11619_v17  ;;  %20847 = vmatprep.mubr.msk.f32.mxu1 %vm636_vm1, %v14349_v49  ;;  %v11584_v50 = vpop.f32.mrf.mxu1  ;;  %v14350_v47 = vld [vmem:[#allocation3 + $0x6b] sm:$0xff] }
 0x4eb   : > { %v20541_v54 = vpop.f32.mrf.mxu0  ;;  %v11623_v2 = vadd.f32 %v11584_v50, %v25539_v16 }
 0x4ec   : > { %v25760_v40 = vadd.f32 %v20541_v54, %v11622_v35  ;;  %v20549_v1 = vpop.f32.mrf.mxu1  ;;  %20898 = vmatmul.mubr.msk.f32.vlgmr.msra.gmra.mxu0 %vm636_vm1, %v25274_v22 }
 0x4ed   : > { %v11963_v27 = vpop.f32.mrf.mxu0  ;;  %20848 = vmatmul.mubr.msk.f32.vlgmr.msra.gmra.mxu1 %vm636_vm1, %v14350_v47  ;;  %v12372_v35 = vadd.f32 %v20549_v1, %v25549_v41  ;;  %20900 = vmatprep.mubr.msk.f32.mxu0 %vm636_vm1, %v25284_v12  ;;  %v14353_v41 = vld [vmem:[#allocation3 + $0x93] sm:$0xff] }
 0x4ee   : > { %v25765_v28 = vadd.f32 %v11963_v27, %v11621_v60  ;;  %20850 = vmatprep.mubr.msk.f32.mxu1 %vm636_vm1, %v14351_v36  ;;  %v12212_v21 = vpop.f32.mrf.mxu1  ;;  %20946 = vmatpush3.msk.msra.mxu1 %vm733_vm0, %v25537_v31  ;;  %v14356_v1 = vld [vmem:[#allocation3 + $0xb3] sm:$0xff] }
 0x4ef   : > { %v20544_v30 = vpop.f32.mrf.mxu0  ;;  %v12371_v61 = vadd.f32 %v12212_v21, %v25595_v44 }
 0x4f0   : > { %v25771_v63 = vadd.f32 %v20544_v30, %v11624_v46  ;;  %v20552_v42 = vpop.f32.mrf.mxu1  ;;  %20901 = vmatmul.mubr.msk.f32.gmra.mxu0 %vm636_vm1, %v25296_v43  ;;  %v14354_v46 = vld [vmem:[#allocation3 + $0x9b] sm:$0xff]  ;;  %v14355_v43 = vld [vmem:[#allocation3 + $0xab] sm:$0xff] }
 0x4f1   : > { %v11973_v17 = vpop.f32.mrf.mxu0  ;;  %20851 = vmatmul.mubr.msk.f32.gmra.mxu1 %vm636_vm1, %v14352_v51  ;;  %v12374_v12 = vadd.f32 %v20552_v42, %v25605_v58  ;;  %20903 = vmatprep.mubr.msk.f32.mxu0 %vm636_vm1, %v25302_v23 }
 0x4f2   : > { %v25777_v24 = vadd.f32 %v11973_v17, %v11623_v2  ;;  %20853 = vmatprep.mubr.msk.f32.mxu1 %vm636_vm1, %v14353_v41  ;;  %v12222_v31 = vpop.f32.mrf.mxu1 }
 0x4f3   : > { %v20599_v54 = vpop.f32.mrf.mxu0  ;;  %v12373_v59 = vadd.f32 %v12222_v31, %v25611_v55  ;;  %v14360_v31 = vld [vmem:[#allocation3 + $0xe3] sm:$0xff] }
 0x4f4   : > { %v25785_v16 = vadd.f32 %v20599_v54, %v12372_v35  ;;  %v20555_v30 = vpop.f32.mrf.mxu1  ;;  %20904 = vmatmul.mubr.msk.f32.gmra.mxu0 %vm636_vm1, %v25314_v9  ;;  %v14357_v9 = vld [vmem:[#allocation3 + $0xc3] sm:$0xff] }
 0x4f5   : > { %v12601_v22 = vpop.f32.mrf.mxu0  ;;  %20854 = vmatmul.mubr.msk.f32.gmra.mxu1 %vm636_vm1, %v14354_v46  ;;  %v12376_v50 = vadd.f32 %v20555_v30, %v25617_v52  ;;  %20906 = vmatprep.mubr.msk.f32.mxu0 %vm636_vm1, %v25320_v62 }
 0x4f6   : > { %v25791_v60 = vadd.f32 %v12601_v22, %v12371_v61  ;;  %20856 = vmatprep.mubr.msk.f32.mxu1 %vm636_vm1, %v14355_v43  ;;  %v12232_v23 = vpop.f32.mrf.mxu1  ;;  %v14358_v22 = vld [vmem:[#allocation3 + $0xcb] sm:$0xff] }
 0x4f7   : > { %v20602_v27 = vpop.f32.mrf.mxu0  ;;  %v12375_v17 = vadd.f32 %v12232_v23, %v25623_v19 }
 0x4f8   : > { %v25797_v44 = vadd.f32 %v20602_v27, %v12374_v12  ;;  %v20558_v36 = vpop.f32.mrf.mxu1  ;;  %20907 = vmatmul.mubr.msk.f32.gmra.mxu0 %vm636_vm1, %v25332_v48  ;;  %v14359_v48 = vld [vmem:[#allocation3 + $0xdb] sm:$0xff] }
 0x4f9   : > { %v12611_v49 = vpop.f32.mrf.mxu0  ;;  %20857 = vmatmul.mubr.msk.f32.gmra.mxu1 %vm636_vm1, %v14356_v1  ;;  %v12378_v35 = vadd.f32 %v20558_v36, %v25629_v8  ;;  %20909 = vmatprep.mubr.msk.f32.mxu0 %vm636_vm1, %v25338_v53 }
 0x4fa   : > { %v25803_v58 = vadd.f32 %v12611_v49, %v12373_v59  ;;  %20859 = vmatprep.mubr.msk.f32.mxu1 %vm636_vm1, %v14357_v9  ;;  %v12242_v62 = vpop.f32.mrf.mxu1 }
 0x4fb   : > { %v20605_v2 = vpop.f32.mrf.mxu0  ;;  %v12377_v21 = vadd.f32 %v12242_v62, %v25635_v37  ;;  %v27447_v62 = vld [vmem:[#allocation57_spill] sm:$0xff] }
 0x4fc   : > { %v25809_v55 = vadd.f32 %v20605_v2, %v12376_v50  ;;  %v20561_v51 = vpop.f32.mrf.mxu1  ;;  %20910 = vmatmul.mubr.msk.f32.gmra.mxu0 %vm636_vm1, %v25350_v14  ;;  %v14361_v14 = vld [vmem:[#allocation3 + $0xf3] sm:$0xff]  ;;  %v14362_v50 = vld [vmem:[#allocation3 + $0xfb] sm:$0xff] }
 0x4fd   : > { %v12621_v47 = vpop.f32.mrf.mxu0  ;;  %20860 = vmatmul.mubr.msk.f32.gmra.mxu1 %vm636_vm1, %v14358_v22  ;;  %v12380_v42 = vadd.f32 %v20561_v51, %v25641_v3  ;;  %20912 = vmatprep.mubr.msk.f32.mxu0 %vm636_vm1, %v25356_v7  ;;  %v27448_v51 = vld [vmem:[#allocation56_spill] sm:$0xff] }
 0x4fe   : > { %v25815_v52 = vadd.f32 %v12621_v47, %v12375_v17  ;;  %20862 = vmatprep.mubr.msk.f32.mxu1 %vm636_vm1, %v14359_v48  ;;  %v12252_v53 = vpop.f32.mrf.mxu1 }
 0x4ff   : > { %v20608_v54 = vpop.f32.mrf.mxu0  ;;  %v12379_v12 = vadd.f32 %v12252_v53, %v25647_v33  ;;  %v14366_v53 = vld [vmem:[#allocation3 + $0x12b] sm:$0xff] }
 0x500   : > { %v25821_v19 = vadd.f32 %v20608_v54, %v12378_v35  ;;  %v20564_v59 = vpop.f32.mrf.mxu1  ;;  %20913 = vmatmul.mubr.msk.f32.gmra.mxu0 %vm636_vm1, %v25368_v56  ;;  %v27445_v56 = vld [vmem:[#allocation80_spill] sm:$0xff]  ;;  %v14364_v35 = vld [vmem:[#allocation3 + $0x113] sm:$0xff] }
 0x501   : > { %v12631_v61 = vpop.f32.mrf.mxu0  ;;  %20863 = vmatmul.mubr.msk.f32.gmra.mxu1 %vm636_vm1, %v14360_v31  ;;  %v12382_v49 = vadd.f32 %v20564_v59, %v25653_v18  ;;  %20915 = vmatprep.mubr.msk.f32.mxu0 %vm636_vm1, %v25374_v34  ;;  %v14363_v18 = vld [vmem:[#allocation3 + $0x10b] sm:$0xff]  ;;  %v27446_v34 = vld [vmem:[#allocation42_spill] sm:$0xff] }
 0x502   : > { %v25827_v8 = vadd.f32 %v12631_v61, %v12377_v21  ;;  %20865 = vmatprep.mubr.msk.f32.mxu1 %vm636_vm1, %v14361_v14  ;;  %v12262_v7 = vpop.f32.mrf.mxu1 }
 0x503   : > { %v20611_v41 = vpop.f32.mrf.mxu0  ;;  %v12381_v30 = vadd.f32 %v12262_v7, %v25659_v38 }
 0x504   : > { %v25833_v37 = vadd.f32 %v20611_v41, %v12380_v42  ;;  %v20567_v2 = vpop.f32.mrf.mxu1  ;;  %20916 = vmatmul.mubr.msk.f32.gmra.mxu0 %vm636_vm1, %v27445_v56 }
 0x505   : > { %v12641_v27 = vpop.f32.mrf.mxu0  ;;  %20866 = vmatmul.mubr.msk.f32.gmra.mxu1 %vm636_vm1, %v14362_v50  ;;  %v12384_v17 = vadd.f32 %v20567_v2, %v25665_v11  ;;  %20918 = vmatprep.mubr.msk.f32.mxu0 %vm636_vm1, %v27446_v34  ;;  %v14365_v11 = vld [vmem:[#allocation3 + $0x123] sm:$0xff] }
 0x506   : > { %v25839_v3 = vadd.f32 %v12641_v27, %v12379_v12  ;;  %20868 = vmatprep.mubr.msk.f32.mxu1 %vm636_vm1, %v14363_v18  ;;  %v12272_v38 = vpop.f32.mrf.mxu1  ;;  %v27449_v27 = vld [vmem:[#allocation43_spill] sm:$0xff] }
 0x507   : > { %v20614_v46 = vpop.f32.mrf.mxu0  ;;  %v12383_v36 = vadd.f32 %v12272_v38, %v25671_v20  ;;  %v27451_v2 = vld [vmem:[#allocation59_spill] sm:$0xff] }
 0x508   : > { %v25845_v33 = vadd.f32 %v20614_v46, %v12382_v49  ;;  %v20570_v54 = vpop.f32.mrf.mxu1  ;;  %20919 = vmatmul.mubr.msk.f32.gmra.mxu0 %vm636_vm1, %v27447_v62  ;;  %v27450_v49 = vld [vmem:[#allocation58_spill] sm:$0xff] }
 0x509   : > { %v12651_v43 = vpop.f32.mrf.mxu0  ;;  %20869 = vmatmul.mubr.msk.f32.gmra.mxu1 %vm636_vm1, %v14364_v35  ;;  %v12386_v61 = vadd.f32 %v20570_v54, %v25677_v25  ;;  %20921 = vmatprep.mubr.msk.f32.mxu0 %vm636_vm1, %v27448_v51  ;;  %v14367_v25 = vld [vmem:[#allocation3 + $0x13b] sm:$0xff]  ;;  %v27453_v54 = vld [vmem:[#allocation5_spill] sm:$0xff] }
 0x50a   : > { %v25851_v23 = vadd.f32 %v12651_v43, %v12381_v30  ;;  %20871 = vmatprep.mubr.msk.f32.mxu1 %vm636_vm1, %v14365_v11  ;;  %v12282_v20 = vpop.f32.mrf.mxu1  ;;  %v14368_v43 = vld [vmem:[#allocation3 + $0x143] sm:$0xff]  ;;  %v15351_v51 = vld [vmem:[#allocation4 + $0x19] sm:$0xff] }
 0x50b   : > { %v20617_v47 = vpop.f32.mrf.mxu0  ;;  %v12385_v42 = vadd.f32 %v12282_v20, %v25683_v39 }
 0x50c   : > { %v25857_v1 = vadd.f32 %v20617_v47, %v12384_v17  ;;  %v20573_v12 = vpop.f32.mrf.mxu1  ;;  %20922 = vmatmul.mubr.msk.f32.gmra.mxu0 %vm636_vm1, %v27449_v27  ;;  %v27452_v47 = vld [vmem:[#allocation44_spill] sm:$0xff] }
 0x50d   : > { %v12661_v9 = vpop.f32.mrf.mxu0  ;;  %20872 = vmatmul.mubr.msk.f32.gmra.mxu1 %vm636_vm1, %v14366_v53  ;;  %v12388_v59 = vadd.f32 %v20573_v12, %v25689_v15  ;;  %20924 = vmatprep.mubr.msk.f32.mxu0 %vm636_vm1, %v27450_v49  ;;  %v14369_v15 = vld [vmem:[#allocation3 + $0x153] sm:$0xff] }
 0x50e   : > { %v25863_v21 = vadd.f32 %v12661_v9, %v12383_v36  ;;  %20874 = vmatprep.mubr.msk.f32.mxu1 %vm636_vm1, %v14367_v25  ;;  %v12292_v39 = vpop.f32.mrf.mxu1  ;;  %v14370_v9 = vld [vmem:[#allocation3 + $0x15b] sm:$0xff]  ;;  %v14372_v25 = vld [vmem:[#allocation3 + $0x173] sm:$0xff] }
 0x50f   : > { %v20620_v22 = vpop.f32.mrf.mxu0  ;;  %v12387_v7 = vadd.f32 %v12292_v39, %v25695_v57  ;;  %v27455_v49 = vld [vmem:[#allocation9_spill] sm:$0xff] }
 0x510   : > { %v25869_v48 = vadd.f32 %v20620_v22, %v12386_v61  ;;  %v20576_v50 = vpop.f32.mrf.mxu1  ;;  %20925 = vmatmul.mubr.msk.f32.gmra.mxu0 %vm636_vm1, %v27451_v2  ;;  %v27454_v22 = vld [vmem:[#allocation7_spill] sm:$0xff] }
 0x511   : > { %v12671_v41 = vpop.f32.mrf.mxu0  ;;  %20875 = vmatmul.mubr.msk.f32.gmra.mxu1 %vm636_vm1, %v14368_v43  ;;  %v12390_v18 = vadd.f32 %v20576_v50, %v25701_v6  ;;  %20927 = vmatprep.mubr.msk.f32.mxu0 %vm636_vm1, %v27452_v47  ;;  %v14371_v6 = vld [vmem:[#allocation3 + $0x16b] sm:$0xff]  ;;  %v15352_v43 = vld [vmem:[#allocation4 + $0x21] sm:$0xff] }
 0x512   : > { %v25875_v31 = vadd.f32 %v12671_v41, %v12385_v42  ;;  %20877 = vmatprep.mubr.msk.f32.mxu1 %vm636_vm1, %v14369_v15  ;;  %v12302_v57 = vpop.f32.mrf.mxu1  ;;  %v15313_v42 = vld [vmem:[#allocation4] sm:$0xff] }
 0x513   : > { %v20623_v14 = vpop.f32.mrf.mxu0  ;;  %v12389_v38 = vadd.f32 %v12302_v57, %v25707_v4  ;;  %v15315_v4 = vld [vmem:[#allocation4 + $0x18] sm:$0xff]  ;;  %v15349_v41 = vld [vmem:[#allocation4 + $0x1] sm:$0xff] }
 0x514   : > { %v25881_v46 = vadd.f32 %v20623_v14, %v12388_v59  ;;  %v20579_v35 = vpop.f32.mrf.mxu1  ;;  %20928 = vmatmul.mubr.msk.f32.gmra.mxu0 %vm636_vm1, %v27453_v54  ;;  %v14373_v59 = vld [vmem:[#allocation3 + $0x183] sm:$0xff]  ;;  %v15387_v39 = vmax.f32 %v15315_v4, %v15351_v51  ;;  %v15385_v47 = vmax.f32 %v15313_v42, %v15349_v41  ;;  %v15423_v57 = vld [vmem:[#allocation4 + $0x1a] sm:$0xff]  ;;  %v27457_v51 = vld [vmem:[#allocation13_spill] sm:$0xff] }
 0x515   : > { %v12681_v30 = vpop.f32.mrf.mxu0  ;;  %20878 = vmatmul.mubr.msk.f32.gmra.mxu1 %vm636_vm1, %v14370_v9  ;;  %v12392_v11 = vadd.f32 %v20579_v35, %v25713_v10  ;;  %20930 = vmatprep.mubr.msk.f32.mxu0 %vm636_vm1, %v27454_v22  ;;  %v15316_v14 = vld [vmem:[#allocation4 + $0x20] sm:$0xff] }
 0x516   : > { %v25887_v56 = vadd.f32 %v12681_v30, %v12387_v7  ;;  %20880 = vmatprep.mubr.msk.f32.mxu1 %vm636_vm1, %v14371_v6  ;;  %v12312_v20 = vpop.f32.mrf.mxu1  ;;  %v15314_v7 = vld [vmem:[#allocation4 + $0x8] sm:$0xff]  ;;  %v15388_v22 = vmax.f32 %v15316_v14, %v15352_v43  ;;  %v25923_v41 = vmax.f32 %v15387_v39, %v15423_v57  ;;  %v21015_v14 = vld [vmem:[#allocation3 + $0x19c] sm:$0xff] }
 0x517   : > { %v20626_v17 = vpop.f32.mrf.mxu0  ;;  %v12391_v12 = vadd.f32 %v12312_v20, %v25719_v29  ;;  %v15350_v30 = vld [vmem:[#allocation4 + $0x9] sm:$0xff]  ;;  %v27456_v29 = vld [vmem:[#allocation11_spill] sm:$0xff] }
 0x518   : > { %v25893_v34 = vadd.f32 %v20626_v17, %v12390_v18  ;;  %v20582_v10 = vpop.f32.mrf.mxu1  ;;  %20931 = vmatmul.mubr.msk.f32.gmra.mxu0 %vm636_vm1, %v27455_v49  ;;  %v15317_v18 = vld [vmem:[#allocation4 + $0x30] sm:$0xff]  ;;  %v14375_v20 = vld [vmem:[#allocation3 + $0x19b] sm:$0xff] }
 0x519   : > { %v12691_v36 = vpop.f32.mrf.mxu0  ;;  %20881 = vmatmul.mubr.msk.f32.gmra.mxu1 %vm636_vm1, %v14372_v25  ;;  %v12394_v2 = vadd.f32 %v20582_v10, %v25725_v5  ;;  %20933 = vmatprep.mubr.msk.f32.mxu0 %vm636_vm1, %v27456_v29  ;;  %v15353_v17 = vld [vmem:[#allocation4 + $0x31] sm:$0xff]  ;;  %v15354_v5 = vld [vmem:[#allocation4 + $0x39] sm:$0xff] }
 0x51a   : > { %v25899_v62 = vadd.f32 %v12691_v36, %v12389_v38  ;;  %20883 = vmatprep.mubr.msk.f32.mxu1 %vm636_vm1, %v14373_v59  ;;  %v12322_v38 = vpop.f32.mrf.mxu1  ;;  %v15421_v36 = vld [vmem:[#allocation4 + $0x2] sm:$0xff]  ;;  %v14374_v6 = vld [vmem:[#allocation3 + $0x18b] sm:$0xff]  ;;  %v15389_v42 = vmax.f32 %v15317_v18, %v15353_v17 }
 0x51b   : > { %v20629_v61 = vpop.f32.mrf.mxu0  ;;  %v12393_v35 = vadd.f32 %v12322_v38, %v25731_v45  ;;  %v15425_v10 = vld [vmem:[#allocation4 + $0x32] sm:$0xff]  ;;  %v15457_v49 = vmax.f32 %v15385_v47, %v15421_v36  ;;  %v14376_v17 = vld [vmem:[#allocation3 + $0x1a3] sm:$0xff]  ;;  %v14378_v36 = vld [vmem:[#allocation3 + $0x1bb] sm:$0xff] }
 0x51c   : > { %v25905_v53 = vadd.f32 %v20629_v61, %v12392_v11  ;;  %v15318_v11 = vld [vmem:[#allocation4 + $0x38] sm:$0xff]  ;;  %v15386_v61 = vmax.f32 %v15314_v7, %v15350_v30  ;;  %v20585_v4 = vpop.f32.mrf.mxu1  ;;  %20934 = vmatmul.mubr.msk.f32.gmra.mxu0 %vm636_vm1, %v27457_v51  ;;  %v15319_v7 = vld [vmem:[#allocation4 + $0x48] sm:$0xff]  ;;  %v15320_v38 = vld [vmem:[#allocation4 + $0x50] sm:$0xff] }
 0x51d   : > { %v12701_v27 = vpop.f32.mrf.mxu0  ;;  %20884 = vmatmul.mubr.msk.f32.gmra.mxu1 %vm636_vm1, %v14374_v6  ;;  %v12396_v45 = vadd.f32 %v20585_v4, %v25737_v13  ;;  %20936 = vmatprep.mubr.msk.f32.mxu0 %vm636_vm1, %v21015_v14  ;;  %v15355_v30 = vld [vmem:[#allocation4 + $0x49] sm:$0xff]  ;;  %v15390_v39 = vmax.f32 %v15318_v11, %v15354_v5  ;;  %v25937_v6 = vmax.f32 %v15389_v42, %v15425_v10  ;;  %v15426_v11 = vld [vmem:[#allocation4 + $0x3a] sm:$0xff] }
 0x51e   : > { %v25911_v50 = vadd.f32 %v12701_v27, %v12391_v12  ;;  %v15422_v12 = vld [vmem:[#allocation4 + $0xa] sm:$0xff]  ;;  %v15424_v27 = vld [vmem:[#allocation4 + $0x22] sm:$0xff]  ;;  %20886 = vmatprep.mubr.msk.f32.mxu1 %vm636_vm1, %v14375_v20  ;;  %v12332_v43 = vpop.f32.mrf.mxu1  ;;  %v15391_v5 = vmax.f32 %v15319_v7, %v15355_v30  ;;  %v15493_v51 = vmax.f32 %v15457_v49, %v25923_v41 }
 0x51f   : > { %v20632_v15 = vpop.f32.mrf.mxu0  ;;  %v12395_v29 = vadd.f32 %v12332_v43, %v25743_v26  ;;  %v15458_v13 = vmax.f32 %v15386_v61, %v15422_v12  ;;  %v25933_v57 = vmax.f32 %v15388_v22, %v15424_v27  ;;  %v21016_v47 = vld [vmem:[#allocation3 + $0x1a4] sm:$0xff]  ;;  %v21017_v22 = vld [vmem:[#allocation3 + $0x1b4] sm:$0xff]  ;;  %v25948_v30 = vmax.f32 %v15390_v39, %v15426_v11  ;;  %v21018_v49 = vld [vmem:[#allocation3 + $0x1bc] sm:$0xff] }
 0x520   : > { %v25917_v9 = vadd.f32 %v20632_v15, %v12394_v2  ;;  %v14377_v2 = vld [vmem:[#allocation3 + $0x1b3] sm:$0xff]  ;;  %20937 = vmatmul.mubr.msk.f32.gmra.mxu0 %vm636_vm1, %v21016_v47  ;;  %v15427_v20 = vld [vmem:[#allocation4 + $0x4a] sm:$0xff]  ;;  %v15321_v12 = vld [vmem:[#allocation4 + $0x60] sm:$0xff]  ;;  %v15525_v47 = vmax.f32 %v15493_v51, %v25937_v6 }
 0x521   : > { %v12711_v54 = vpop.f32.mrf.mxu0  ;;  %20887 = vmatmul.mubr.msk.f32.gmra.mxu1 %vm636_vm1, %v14376_v17  ;;  %20939 = vmatprep.mubr.msk.f32.mxu0 %vm636_vm1, %v21017_v22  ;;  %v15357_v27 = vld [vmem:[#allocation4 + $0x61] sm:$0xff]  ;;  %v14379_v42 = vld [vmem:[#allocation3 + $0x1cb] sm:$0xff]  ;;  %v15494_v43 = vmax.f32 %v15458_v13, %v25933_v57  ;;  %v14769_v17 = vld [vmem:[#allocation3 + $0x1d4] sm:$0xff] }
 0x522   : > { %v25925_v25 = vadd.f32 %v12711_v54, %v12393_v35  ;;  %v15356_v35 = vld [vmem:[#allocation4 + $0x51] sm:$0xff]  ;;  %v20588_v54 = vpop.f32.mrf.mxu1  ;;  %20889 = vmatprep.mubr.msk.f32.mxu1 %vm636_vm1, %v14377_v2  ;;  %v15322_v11 = vld [vmem:[#allocation4 + $0x68] sm:$0xff] }
 0x523   : > { %v20635_v59 = vpop.f32.mrf.mxu0  ;;  %v12398_v26 = vadd.f32 %v20588_v54, %v25749_v0  ;;  %v15392_v14 = vmax.f32 %v15320_v38, %v15356_v35  ;;  %v15428_v2 = vld [vmem:[#allocation4 + $0x52] sm:$0xff]  ;;  %v25953_v54 = vmax.f32 %v15391_v5, %v15427_v20  ;;  %v15495_v38 = vmax.f32 %v25923_v41, %v25937_v6 }
 0x524   : > { %v25930_v15 = vadd.f32 %v20635_v59, %v12396_v45  ;;  %v12342_v45 = vpop.f32.mrf.mxu1  ;;  %v14768_v59 = vld [vmem:[#allocation3 + $0x1cc] sm:$0xff]  ;;  %20940 = vmatmul.mubr.msk.f32.gmra.mxu0 %vm636_vm1, %v21018_v49  ;;  %v15323_v22 = vld [vmem:[#allocation4 + $0x78] sm:$0xff] }
 0x525   : > { %v12721_v18 = vpop.f32.mrf.mxu0  ;;  %v12397_v7 = vadd.f32 %v12342_v45, %v25755_v32  ;;  %20890 = vmatmul.mubr.msk.f32.gmra.mxu1 %vm636_vm1, %v14378_v36  ;;  %v15393_v32 = vmax.f32 %v15321_v12, %v15357_v27  ;;  %20942 = vmatprep.mubr.msk.f32.mxu0 %vm636_vm1, %v14768_v59  ;;  %v15429_v36 = vld [vmem:[#allocation4 + $0x62] sm:$0xff]  ;;  %v15359_v41 = vld [vmem:[#allocation4 + $0x79] sm:$0xff]  ;;  %v15526_v27 = vmax.f32 %v15494_v43, %v25948_v30 }
 0x526   : > { %v25939_v4 = vadd.f32 %v12721_v18, %v12395_v29  ;;  %v20591_v29 = vpop.f32.mrf.mxu1  ;;  %v14380_v18 = vld [vmem:[#allocation3 + $0x1d3] sm:$0xff]  ;;  %20892 = vmatprep.mubr.msk.f32.mxu1 %vm636_vm1, %v14379_v42  ;;  %v15496_v45 = vmax.f32 %v25933_v57, %v25948_v30  ;;  %v15527_v51 = vmax.f32 %v15495_v38, %v25953_v54  ;;  %v15497_v57 = vmax.f32 %v25937_v6, %v25953_v54 }
 0x527   : > { %v20638_v61 = vpop.f32.mrf.mxu0  ;;  %v12400_v39 = vadd.f32 %v20591_v29, %v25760_v40  ;;  %v25974_v59 = vmax.f32 %v15393_v32, %v15429_v36  ;;  %v15430_v29 = vld [vmem:[#allocation4 + $0x6a] sm:$0xff]  ;;  %v15395_v49 = vmax.f32 %v15323_v22, %v15359_v41  ;;  %v15431_v32 = vld [vmem:[#allocation4 + $0x7a] sm:$0xff]  ;;  %v15432_v22 = vld [vmem:[#allocation4 + $0x82] sm:$0xff] }
 0x528   : > { %v25945_v10 = vadd.f32 %v20638_v61, %v12398_v26  ;;  %v15358_v26 = vld [vmem:[#allocation4 + $0x69] sm:$0xff]  ;;  %v12352_v5 = vpop.f32.mrf.mxu1  ;;  %v25963_v61 = vmax.f32 %v15392_v14, %v15428_v2  ;;  %20943 = vmatmul.mubr.msk.f32.gmra.mxu0 %vm636_vm1, %v14769_v17  ;;  %v15361_v17 = vld [vmem:[#allocation4 + $0x91] sm:$0xff] }
 0x529   : > { %v12731_v0 = vpop.f32.mrf.mxu0  ;;  %v12399_v12 = vadd.f32 %v12352_v5, %v25765_v28  ;;  %20893 = vmatmul.mubr.msk.f32.gmra.mxu1 %vm636_vm1, %v14380_v18  ;;  %v15394_v14 = vmax.f32 %v15322_v11, %v15358_v26  ;;  %v15325_v18 = vld [vmem:[#allocation4 + $0x90] sm:$0xff]  ;;  %v15499_v5 = vmax.f32 %v25953_v54, %v25974_v59 }
 0x52a   : > { %v25957_v35 = vadd.f32 %v12731_v0, %v12397_v7  ;;  %v20594_v42 = vpop.f32.mrf.mxu1  ;;  %v15324_v7 = vld [vmem:[#allocation4 + $0x80] sm:$0xff]  ;;  %20947 = vmatprep.mubr.msk.f32.mxu1 %vm636_vm1, %v15525_v47  ;;  %v15528_v11 = vmax.f32 %v15496_v45, %v25963_v61  ;;  %v15498_v6 = vmax.f32 %v25948_v30, %v25963_v61  ;;  %v15397_v41 = vmax.f32 %v15325_v18, %v15361_v17 }
 0x52b   : > { %v20641_v13 = vpop.f32.mrf.mxu0  ;;  %v15360_v0 = vld [vmem:[#allocation4 + $0x81] sm:$0xff]  ;;  %v12402_v28 = vadd.f32 %v20594_v42, %v25771_v63  ;;  %v25987_v47 = vmax.f32 %v15394_v14, %v15430_v29  ;;  %v15529_v45 = vmax.f32 %v15497_v57, %v25974_v59  ;;  %v15433_v42 = vld [vmem:[#allocation4 + $0x92] sm:$0xff] }
 0x52c   : > { %v25965_v20 = vadd.f32 %v20641_v13, %v12400_v39  ;;  %v12362_v38 = vpop.f32.mrf.mxu1  ;;  %v15396_v63 = vmax.f32 %v15324_v7, %v15360_v0  ;;  %v15326_v14 = vld [vmem:[#allocation4 + $0x98] sm:$0xff]  ;;  %v15327_v0 = vld [vmem:[#allocation4 + $0xa8] sm:$0xff] }
 0x52d   : > { %v12741_v40 = vpop.f32.mrf.mxu0  ;;  %v12401_v13 = vadd.f32 %v12362_v38, %v25777_v24  ;;  %20948 = vmatmul.mubr.msk.f32.vlgmr.msra.gmra.mxu1 %vm636_vm1, %v15526_v27  ;;  %v25998_v27 = vmax.f32 %v15395_v49, %v15431_v32  ;;  %v15362_v7 = vld [vmem:[#allocation4 + $0x99] sm:$0xff]  ;;  %v15530_v57 = vmax.f32 %v15498_v6, %v25987_v47  ;;  %v26009_v49 = vmax.f32 %v15397_v41, %v15433_v42  ;;  %v15328_v32 = vld [vmem:[#allocation4 + $0xb0] sm:$0xff] }
 0x52e   : > { %v25976_v2 = vadd.f32 %v12741_v40, %v12399_v12  ;;  %v20649_v26 = vpop.f32.mrf.mxu1  ;;  %20950 = vmatprep.mubr.msk.f32.mxu1 %vm636_vm1, %v15527_v51  ;;  %v26003_v18 = vmax.f32 %v15396_v63, %v15432_v22  ;;  %v15398_v38 = vmax.f32 %v15326_v14, %v15362_v7  ;;  %v15329_v6 = vld [vmem:[#allocation4 + $0xc0] sm:$0xff] }
 0x52f   : > { %v20644_v43 = vpop.f32.mrf.mxu0  ;;  %v13150_v24 = vadd.f32 %v20649_v26, %v25785_v16  ;;  %v15500_v16 = vmax.f32 %v25963_v61, %v25987_v47  ;;  %v15501_v17 = vmax.f32 %v25974_v59, %v25998_v27  ;;  %v15531_v61 = vmax.f32 %v15499_v5, %v25998_v27  ;;  %v15365_v22 = vld [vmem:[#allocation4 + $0xc1] sm:$0xff] }
 0x530   : > { %v25982_v39 = vadd.f32 %v20644_v43, %v12402_v28  ;;  %v12990_v30 = vpop.f32.mrf.mxu1  ;;  %v15363_v28 = vld [vmem:[#allocation4 + $0xa9] sm:$0xff] }
 0x531   : > { %v12751_v36 = vpop.f32.mrf.mxu0  ;;  %v13149_v43 = vadd.f32 %v12990_v30, %v25791_v60  ;;  %20951 = vmatmul.mubr.msk.f32.gmra.mxu1 %vm636_vm1, %v15528_v11  ;;  %v15434_v11 = vld [vmem:[#allocation4 + $0x9a] sm:$0xff]  ;;  %v15399_v26 = vmax.f32 %v15327_v0, %v15363_v28  ;;  %v15532_v14 = vmax.f32 %v15500_v16, %v26003_v18  ;;  %v15502_v30 = vmax.f32 %v25987_v47, %v26003_v18  ;;  %v15436_v0 = vld [vmem:[#allocation4 + $0xb2] sm:$0xff] }
 0x532   : > { %v25993_v12 = vadd.f32 %v12751_v36, %v12401_v13  ;;  %v20652_v51 = vpop.f32.mrf.mxu1  ;;  %v15364_v13 = vld [vmem:[#allocation4 + $0xb1] sm:$0xff]  ;;  %20953 = vmatprep.mubr.msk.f32.mxu1 %vm636_vm1, %v15529_v45  ;;  %v15533_v45 = vmax.f32 %v15501_v17, %v26009_v49  ;;  %v26024_v5 = vmax.f32 %v15398_v38, %v15434_v11  ;;  %v15401_v28 = vmax.f32 %v15329_v6, %v15365_v22  ;;  %v15330_v17 = vld [vmem:[#allocation4 + $0xc8] sm:$0xff]  ;;  %v15367_v47 = vld [vmem:[#allocation4 + $0xd9] sm:$0xff] }
 0x533   : > { %v20699_v40 = vpop.f32.mrf.mxu0  ;;  %v13152_v36 = vadd.f32 %v20652_v51, %v25797_v44  ;;  %v15400_v7 = vmax.f32 %v15328_v32, %v15364_v13  ;;  %v15503_v51 = vmax.f32 %v25998_v27, %v26009_v49  ;;  %v15366_v38 = vld [vmem:[#allocation4 + $0xc9] sm:$0xff]  ;;  %v15331_v13 = vld [vmem:[#allocation4 + $0xd8] sm:$0xff] }
 0x534   : > { %v26000_v54 = vadd.f32 %v20699_v40, %v13150_v24  ;;  %v13000_v41 = vpop.f32.mrf.mxu1  ;;  %v15435_v24 = vld [vmem:[#allocation4 + $0xaa] sm:$0xff]  ;;  %v15534_v27 = vmax.f32 %v15502_v30, %v26024_v5 }
 0x535   : > { %v13380_v29 = vpop.f32.mrf.mxu0  ;;  %v13151_v59 = vadd.f32 %v13000_v41, %v25803_v58  ;;  %20954 = vmatmul.mubr.msk.f32.gmra.mxu1 %vm636_vm1, %v15530_v57  ;;  %v26032_v16 = vmax.f32 %v15399_v26, %v15435_v24  ;;  %v15437_v57 = vld [vmem:[#allocation4 + $0xc2] sm:$0xff]  ;;  %v15402_v41 = vmax.f32 %v15330_v17, %v15366_v38  ;;  %v15333_v30 = vld [vmem:[#allocation4 + $0xf0] sm:$0xff] }
 0x536   : > { %v26013_v60 = vadd.f32 %v13380_v29, %v13149_v43  ;;  %v20655_v44 = vpop.f32.mrf.mxu1  ;;  %20956 = vmatprep.mubr.msk.f32.mxu1 %vm636_vm1, %v15531_v61  ;;  %v15504_v61 = vmax.f32 %v26003_v18, %v26024_v5  ;;  %v26045_v6 = vmax.f32 %v15401_v28, %v15437_v57  ;;  %v15332_v24 = vld [vmem:[#allocation4 + $0xe0] sm:$0xff] }
 0x537   : > { %v20702_v63 = vpop.f32.mrf.mxu0  ;;  %v13154_v58 = vadd.f32 %v20655_v44, %v25809_v55  ;;  %v26039_v55 = vmax.f32 %v15400_v7, %v15436_v0  ;;  %v15505_v22 = vmax.f32 %v26009_v49, %v26032_v16  ;;  %v15535_v18 = vmax.f32 %v15503_v51, %v26032_v16  ;;  %v15369_v0 = vld [vmem:[#allocation4 + $0xf1] sm:$0xff] }
 0x538   : > { %v26018_v40 = vadd.f32 %v20702_v63, %v13152_v36  ;;  %v13010_v32 = vpop.f32.mrf.mxu1  ;;  %v15403_v44 = vmax.f32 %v15331_v13, %v15367_v47  ;;  %v15440_v13 = vld [vmem:[#allocation4 + $0xe2] sm:$0xff]  ;;  %v15405_v47 = vmax.f32 %v15333_v30, %v15369_v0 }
 0x539   : > { %v13390_v42 = vpop.f32.mrf.mxu0  ;;  %v13153_v63 = vadd.f32 %v13010_v32, %v25815_v52  ;;  %20957 = vmatmul.mubr.msk.f32.gmra.mxu1 %vm636_vm1, %v15532_v14  ;;  %v15438_v14 = vld [vmem:[#allocation4 + $0xca] sm:$0xff]  ;;  %v15536_v17 = vmax.f32 %v15504_v61, %v26039_v55  ;;  %v15506_v32 = vmax.f32 %v26024_v5, %v26039_v55 }
 0x53a   : > { %v26028_v43 = vadd.f32 %v13390_v42, %v13151_v59  ;;  %v20658_v26 = vpop.f32.mrf.mxu1  ;;  %v15368_v59 = vld [vmem:[#allocation4 + $0xe1] sm:$0xff]  ;;  %20959 = vmatprep.mubr.msk.f32.mxu1 %vm636_vm1, %v15533_v45  ;;  %v15537_v45 = vmax.f32 %v15505_v22, %v26045_v6  ;;  %v26060_v51 = vmax.f32 %v15402_v41, %v15438_v14  ;;  %v15334_v22 = vld [vmem:[#allocation4 + $0xf8] sm:$0xff]  ;;  %v15371_v5 = vld [vmem:[#allocation4 + $0x109] sm:$0xff] }
 0x53b   : > { %v20705_v29 = vpop.f32.mrf.mxu0  ;;  %v13156_v42 = vadd.f32 %v20658_v26, %v25821_v19  ;;  %v15404_v38 = vmax.f32 %v15332_v24, %v15368_v59  ;;  %v15507_v26 = vmax.f32 %v26032_v16, %v26045_v6  ;;  %v15370_v41 = vld [vmem:[#allocation4 + $0xf9] sm:$0xff]  ;;  %v15335_v59 = vld [vmem:[#allocation4 + $0x108] sm:$0xff] }
 0x53c   : > { %v26036_v36 = vadd.f32 %v20705_v29, %v13154_v58  ;;  %v13020_v28 = vpop.f32.mrf.mxu1  ;;  %v15439_v58 = vld [vmem:[#allocation4 + $0xda] sm:$0xff]  ;;  %v15538_v16 = vmax.f32 %v15506_v32, %v26060_v51 }
 0x53d   : > { %v13400_v11 = vpop.f32.mrf.mxu0  ;;  %v13155_v49 = vadd.f32 %v13020_v28, %v25827_v8  ;;  %20960 = vmatmul.mubr.msk.f32.gmra.mxu1 %vm636_vm1, %v15534_v27  ;;  %v26068_v61 = vmax.f32 %v15403_v44, %v15439_v58  ;;  %v15441_v27 = vld [vmem:[#allocation4 + $0xf2] sm:$0xff]  ;;  %v15406_v28 = vmax.f32 %v15334_v22, %v15370_v41  ;;  %v15337_v32 = vld [vmem:[#allocation4 + $0x120] sm:$0xff] }
 0x53e   : > { %v26049_v52 = vadd.f32 %v13400_v11, %v13153_v63  ;;  %v20661_v19 = vpop.f32.mrf.mxu1  ;;  %20962 = vmatprep.mubr.msk.f32.mxu1 %vm636_vm1, %v15535_v18  ;;  %v15508_v18 = vmax.f32 %v26039_v55, %v26060_v51  ;;  %v26081_v30 = vmax.f32 %v15405_v47, %v15441_v27  ;;  %v15336_v58 = vld [vmem:[#allocation4 + $0x110] sm:$0xff] }
 0x53f   : > { %v20708_v7 = vpop.f32.mrf.mxu0  ;;  %v13158_v8 = vadd.f32 %v20661_v19, %v25833_v37  ;;  %v26075_v37 = vmax.f32 %v15404_v38, %v15440_v13  ;;  %v15509_v0 = vmax.f32 %v26045_v6, %v26068_v61  ;;  %v15539_v55 = vmax.f32 %v15507_v26, %v26068_v61  ;;  %v15373_v13 = vld [vmem:[#allocation4 + $0x121] sm:$0xff] }
 0x540   : > { %v26054_v29 = vadd.f32 %v20708_v7, %v13156_v42  ;;  %v13030_v24 = vpop.f32.mrf.mxu1  ;;  %v15407_v19 = vmax.f32 %v15335_v59, %v15371_v5  ;;  %v15444_v59 = vld [vmem:[#allocation4 + $0x112] sm:$0xff]  ;;  %v15409_v5 = vmax.f32 %v15337_v32, %v15373_v13 }
 0x541   : > { %v13410_v57 = vpop.f32.mrf.mxu0  ;;  %v13157_v7 = vadd.f32 %v13030_v24, %v25839_v3  ;;  %20963 = vmatmul.mubr.msk.f32.gmra.mxu1 %vm636_vm1, %v15536_v17  ;;  %v15442_v17 = vld [vmem:[#allocation4 + $0xfa] sm:$0xff]  ;;  %v15540_v22 = vmax.f32 %v15508_v18, %v26075_v37  ;;  %v15510_v24 = vmax.f32 %v26060_v51, %v26075_v37 }
 0x542   : > { %v26064_v63 = vadd.f32 %v13410_v57, %v13155_v49  ;;  %v20664_v44 = vpop.f32.mrf.mxu1  ;;  %v15372_v49 = vld [vmem:[#allocation4 + $0x111] sm:$0xff]  ;;  %20965 = vmatprep.mubr.msk.f32.mxu1 %vm636_vm1, %v15537_v45  ;;  %v15541_v45 = vmax.f32 %v15509_v0, %v26081_v30  ;;  %v26096_v26 = vmax.f32 %v15406_v28, %v15442_v17  ;;  %v15338_v0 = vld [vmem:[#allocation4 + $0x128] sm:$0xff]  ;;  %v15375_v51 = vld [vmem:[#allocation4 + $0x139] sm:$0xff] }
 0x543   : > { %v20711_v11 = vpop.f32.mrf.mxu0  ;;  %v13160_v57 = vadd.f32 %v20664_v44, %v25845_v33  ;;  %v15408_v41 = vmax.f32 %v15336_v58, %v15372_v49  ;;  %v15511_v44 = vmax.f32 %v26068_v61, %v26081_v30  ;;  %v15374_v28 = vld [vmem:[#allocation4 + $0x129] sm:$0xff]  ;;  %v15339_v49 = vld [vmem:[#allocation4 + $0x138] sm:$0xff] }
 0x544   : > { %v26072_v42 = vadd.f32 %v20711_v11, %v13158_v8  ;;  %v13040_v47 = vpop.f32.mrf.mxu1  ;;  %v15443_v8 = vld [vmem:[#allocation4 + $0x10a] sm:$0xff]  ;;  %v15542_v61 = vmax.f32 %v15510_v24, %v26096_v26 }
 0x545   : > { %v13420_v14 = vpop.f32.mrf.mxu0  ;;  %v13159_v6 = vadd.f32 %v13040_v47, %v25851_v23  ;;  %20966 = vmatmul.mubr.msk.f32.gmra.mxu1 %vm636_vm1, %v15538_v16  ;;  %v26104_v18 = vmax.f32 %v15407_v19, %v15443_v8  ;;  %v15445_v16 = vld [vmem:[#allocation4 + $0x122] sm:$0xff]  ;;  %v15410_v47 = vmax.f32 %v15338_v0, %v15374_v28  ;;  %v15341_v24 = vld [vmem:[#allocation4 + $0x150] sm:$0xff] }
 0x546   : > { %v26085_v3 = vadd.f32 %v13420_v14, %v13157_v7  ;;  %v20667_v33 = vpop.f32.mrf.mxu1  ;;  %20968 = vmatprep.mubr.msk.f32.mxu1 %vm636_vm1, %v15539_v55  ;;  %v15512_v55 = vmax.f32 %v26075_v37, %v26096_v26  ;;  %v26117_v32 = vmax.f32 %v15409_v5, %v15445_v16  ;;  %v15340_v8 = vld [vmem:[#allocation4 + $0x140] sm:$0xff] }
 0x547   : > { %v20714_v38 = vpop.f32.mrf.mxu0  ;;  %v13162_v23 = vadd.f32 %v20667_v33, %v25857_v1  ;;  %v26111_v1 = vmax.f32 %v15408_v41, %v15444_v59  ;;  %v15513_v13 = vmax.f32 %v26081_v30, %v26104_v18  ;;  %v15543_v37 = vmax.f32 %v15511_v44, %v26104_v18  ;;  %v15377_v59 = vld [vmem:[#allocation4 + $0x151] sm:$0xff] }
 0x548   : > { %v26090_v11 = vadd.f32 %v20714_v38, %v13160_v57  ;;  %v13050_v58 = vpop.f32.mrf.mxu1  ;;  %v15411_v33 = vmax.f32 %v15339_v49, %v15375_v51  ;;  %v15448_v49 = vld [vmem:[#allocation4 + $0x142] sm:$0xff]  ;;  %v15413_v51 = vmax.f32 %v15341_v24, %v15377_v59 }
 0x549   : > { %v13430_v27 = vpop.f32.mrf.mxu0  ;;  %v13161_v38 = vadd.f32 %v13050_v58, %v25863_v21  ;;  %20969 = vmatmul.mubr.msk.f32.gmra.mxu1 %vm636_vm1, %v15540_v22  ;;  %v15446_v22 = vld [vmem:[#allocation4 + $0x12a] sm:$0xff]  ;;  %v15544_v0 = vmax.f32 %v15512_v55, %v26111_v1  ;;  %v15514_v58 = vmax.f32 %v26096_v26, %v26111_v1 }
 0x54a   : > { %v26100_v7 = vadd.f32 %v13430_v27, %v13159_v6  ;;  %v20670_v19 = vpop.f32.mrf.mxu1  ;;  %v15376_v6 = vld [vmem:[#allocation4 + $0x141] sm:$0xff]  ;;  %20971 = vmatprep.mubr.msk.f32.mxu1 %vm636_vm1, %v15541_v45  ;;  %v15545_v45 = vmax.f32 %v15513_v13, %v26117_v32  ;;  %v26132_v44 = vmax.f32 %v15410_v47, %v15446_v22  ;;  %v15342_v13 = vld [vmem:[#allocation4 + $0x158] sm:$0xff]  ;;  %v15379_v26 = vld [vmem:[#allocation4 + $0x169] sm:$0xff] }
 0x54b   : > { %v20717_v14 = vpop.f32.mrf.mxu0  ;;  %v13164_v27 = vadd.f32 %v20670_v19, %v25869_v48  ;;  %v15412_v28 = vmax.f32 %v15340_v8, %v15376_v6  ;;  %v15515_v19 = vmax.f32 %v26104_v18, %v26117_v32  ;;  %v15378_v47 = vld [vmem:[#allocation4 + $0x159] sm:$0xff]  ;;  %v15343_v6 = vld [vmem:[#allocation4 + $0x168] sm:$0xff] }
 0x54c   : > { %v26108_v57 = vadd.f32 %v20717_v14, %v13162_v23  ;;  %v13060_v5 = vpop.f32.mrf.mxu1  ;;  %v15447_v23 = vld [vmem:[#allocation4 + $0x13a] sm:$0xff]  ;;  %v15546_v18 = vmax.f32 %v15514_v58, %v26132_v44 }
 0x54d   : > { %v13440_v17 = vpop.f32.mrf.mxu0  ;;  %v13163_v30 = vadd.f32 %v13060_v5, %v25875_v31  ;;  %20972 = vmatmul.mubr.msk.f32.gmra.mxu1 %vm636_vm1, %v15542_v61  ;;  %v26140_v55 = vmax.f32 %v15411_v33, %v15447_v23  ;;  %v15449_v61 = vld [vmem:[#allocation4 + $0x152] sm:$0xff]  ;;  %v15414_v5 = vmax.f32 %v15342_v13, %v15378_v47  ;;  %v15345_v58 = vld [vmem:[#allocation4 + $0x180] sm:$0xff] }
 0x54e   : > { %v26121_v21 = vadd.f32 %v13440_v17, %v13161_v38  ;;  %v20673_v48 = vpop.f32.mrf.mxu1  ;;  %20974 = vmatprep.mubr.msk.f32.mxu1 %vm636_vm1, %v15543_v37  ;;  %v15516_v37 = vmax.f32 %v26111_v1, %v26132_v44  ;;  %v26153_v24 = vmax.f32 %v15413_v51, %v15449_v61  ;;  %v15344_v23 = vld [vmem:[#allocation4 + $0x170] sm:$0xff] }
 0x54f   : > { %v20720_v41 = vpop.f32.mrf.mxu0  ;;  %v13166_v31 = vadd.f32 %v20673_v48, %v25881_v46  ;;  %v26147_v46 = vmax.f32 %v15412_v28, %v15448_v49  ;;  %v15517_v59 = vmax.f32 %v26117_v32, %v26140_v55  ;;  %v15547_v1 = vmax.f32 %v15515_v19, %v26140_v55  ;;  %v15381_v49 = vld [vmem:[#allocation4 + $0x181] sm:$0xff] }
 0x550   : > { %v26126_v14 = vadd.f32 %v20720_v41, %v13164_v27  ;;  %v13070_v8 = vpop.f32.mrf.mxu1  ;;  %v15415_v48 = vmax.f32 %v15343_v6, %v15379_v26  ;;  %v15452_v6 = vld [vmem:[#allocation4 + $0x172] sm:$0xff]  ;;  %v15417_v26 = vmax.f32 %v15345_v58, %v15381_v49 }
 0x551   : > { %v13450_v16 = vpop.f32.mrf.mxu0  ;;  %v13165_v41 = vadd.f32 %v13070_v8, %v25887_v56  ;;  %20975 = vmatmul.mubr.msk.f32.gmra.mxu1 %vm636_vm1, %v15544_v0  ;;  %v15450_v0 = vld [vmem:[#allocation4 + $0x15a] sm:$0xff]  ;;  %v15548_v13 = vmax.f32 %v15516_v37, %v26147_v46  ;;  %v15518_v8 = vmax.f32 %v26132_v44, %v26147_v46 }
 0x552   : > { %v26136_v38 = vadd.f32 %v13450_v16, %v13163_v30  ;;  %v20676_v33 = vpop.f32.mrf.mxu1  ;;  %v15380_v30 = vld [vmem:[#allocation4 + $0x171] sm:$0xff]  ;;  %20977 = vmatprep.mubr.msk.f32.mxu1 %vm636_vm1, %v15545_v45  ;;  %v15549_v45 = vmax.f32 %v15517_v59, %v26153_v24  ;;  %v15486_v19 = vmax.f32 %v15414_v5, %v15450_v0  ;;  %v15382_v59 = vld [vmem:[#allocation4 + $0x189] sm:$0xff] }
 0x553   : > { %v20723_v17 = vpop.f32.mrf.mxu0  ;;  %v13168_v16 = vadd.f32 %v20676_v33, %v25893_v34  ;;  %v15416_v47 = vmax.f32 %v15344_v23, %v15380_v30  ;;  %v15519_v33 = vmax.f32 %v26140_v55, %v26153_v24  ;;  %v15346_v23 = vld [vmem:[#allocation4 + $0x188] sm:$0xff]  ;;  %v15347_v30 = vld [vmem:[#allocation4 + $0x198] sm:$0xff] }
 0x554   : > { %v26144_v27 = vadd.f32 %v20723_v17, %v13166_v31  ;;  %v13080_v51 = vpop.f32.mrf.mxu1  ;;  %v15451_v31 = vld [vmem:[#allocation4 + $0x16a] sm:$0xff] }
 0x555   : > { %v13460_v22 = vpop.f32.mrf.mxu0  ;;  %v13167_v32 = vadd.f32 %v13080_v51, %v25899_v62  ;;  %20978 = vmatmul.mubr.msk.f32.gmra.mxu1 %vm636_vm1, %v15546_v18  ;;  %v15487_v37 = vmax.f32 %v15415_v48, %v15451_v31  ;;  %v15453_v18 = vld [vmem:[#allocation4 + $0x182] sm:$0xff]  ;;  %v15488_v58 = vmax.f32 %v15416_v47, %v15452_v6  ;;  %v15418_v51 = vmax.f32 %v15346_v23, %v15382_v59 }
 0x556   : > { %v26157_v56 = vadd.f32 %v13460_v22, %v13165_v41  ;;  %v20679_v34 = vpop.f32.mrf.mxu1  ;;  %20980 = vmatprep.mubr.msk.f32.mxu1 %vm636_vm1, %v15547_v1  ;;  %v15550_v1 = vmax.f32 %v15518_v8, %v15486_v19  ;;  %v15489_v48 = vmax.f32 %v15417_v26, %v15453_v18  ;;  %v15348_v6 = vld [vmem:[#allocation4 + $0x1a0] sm:$0xff] }
 0x557   : > { %v20726_v28 = vpop.f32.mrf.mxu0  ;;  %v13170_v22 = vadd.f32 %v20679_v34, %v25905_v53  ;;  %v15520_v53 = vmax.f32 %v26147_v46, %v15486_v19  ;;  %v15521_v55 = vmax.f32 %v26153_v24, %v15487_v37  ;;  %v15454_v34 = vld [vmem:[#allocation4 + $0x18a] sm:$0xff]  ;;  %v15384_v46 = vld [vmem:[#allocation4 + $0x1a1] sm:$0xff]  ;;  %v15522_v59 = vmax.f32 %v15486_v19, %v15488_v58 }
 0x558   : > { %v26162_v17 = vadd.f32 %v20726_v28, %v13168_v16  ;;  %v13090_v5 = vpop.f32.mrf.mxu1  ;;  %v15383_v16 = vld [vmem:[#allocation4 + $0x199] sm:$0xff]  ;;  %v15490_v23 = vmax.f32 %v15418_v51, %v15454_v34 }
 0x559   : > { %v13470_v61 = vpop.f32.mrf.mxu0  ;;  %v13169_v28 = vadd.f32 %v13090_v5, %v25911_v50  ;;  %20981 = vmatmul.mubr.msk.f32.gmra.mxu1 %vm636_vm1, %v15548_v13  ;;  %v15551_v50 = vmax.f32 %v15519_v33, %v15487_v37  ;;  %v15419_v47 = vmax.f32 %v15347_v30, %v15383_v16  ;;  %v15552_v26 = vmax.f32 %v15520_v53, %v15488_v58 }
 0x55a   : > { %27458 = vst [vmem:[#allocation81_spill] sm:$0xff] %v26162_v17  ;;  %v26170_v41 = vadd.f32 %v13470_v61, %v13167_v32  ;;  %v20682_v49 = vpop.f32.mrf.mxu1  ;;  %20983 = vmatprep.mubr.msk.f32.mxu1 %vm636_vm1, %v15549_v45  ;;  %v15420_v45 = vmax.f32 %v15348_v6, %v15384_v46  ;;  %v15554_v19 = vmax.f32 %v15522_v59, %v15490_v23 }
 0x55b   : > { %v20729_v62 = vpop.f32.mrf.mxu0  ;;  %v13172_v32 = vadd.f32 %v20682_v49, %v25917_v9  ;;  %v15553_v9 = vmax.f32 %v15521_v55, %v15489_v48 }
 0x55c   : > { %27459 = vst [vmem:[#allocation15_spill] sm:$0xff] %v26170_v41  ;;  %v26176_v44 = vadd.f32 %v20729_v62, %v13170_v22  ;;  %v13100_v22 = vpop.f32.mrf.mxu1  ;;  %v15455_v62 = vld [vmem:[#allocation4 + $0x19a] sm:$0xff] }
 0x55d   : > { %v13480_v0 = vpop.f32.mrf.mxu0  ;;  %v13171_v8 = vadd.f32 %v13100_v22, %v25925_v25  ;;  %20984 = vmatmul.mubr.msk.f32.gmra.mxu1 %vm636_vm1, %v15550_v1  ;;  %v15491_v16 = vmax.f32 %v15419_v47, %v15455_v62 }
 0x55e   : > { %27460 = vst [vmem:[#allocation17_spill] sm:$0xff] %v26176_v44  ;;  %v26182_v31 = vadd.f32 %v13480_v0, %v13169_v28  ;;  %v20685_v18 = vpop.f32.mrf.mxu1  ;;  %20986 = vmatprep.mubr.msk.f32.mxu1 %vm636_vm1, %v15551_v50  ;;  %v15523_v28 = vmax.f32 %v15487_v37, %v15489_v48  ;;  %v15456_v0 = vld [vmem:[#allocation4 + $0x1a2] sm:$0xff] }
 0x55f   : > { %v20732_v61 = vpop.f32.mrf.mxu0  ;;  %v13174_v5 = vadd.f32 %v20685_v18, %v25930_v15  ;;  %v15492_v51 = vmax.f32 %v15420_v45, %v15456_v0 }
 0x560   : > { %27461 = vst [vmem:[#allocation19_spill] sm:$0xff] %v26182_v31  ;;  %v26186_v13 = vadd.f32 %v20732_v61, %v13172_v32  ;;  %v13110_v25 = vpop.f32.mrf.mxu1  ;;  %v15524_v32 = vmax.f32 %v15488_v58, %v15490_v23  ;;  %v15555_v37 = vmax.f32 %v15523_v28, %v15491_v16 }
 0x561   : > { %v13490_v24 = vpop.f32.mrf.mxu0  ;;  %v13173_v53 = vadd.f32 %v13110_v25, %v25939_v4  ;;  %20987 = vmatmul.mubr.msk.f32.gmra.mxu1 %vm636_vm1, %v15552_v26 }
 0x562   : > { %27462 = vst [vmem:[#allocation21_spill] sm:$0xff] %v26186_v13  ;;  %v26190_v33 = vadd.f32 %v13490_v24, %v13171_v8  ;;  %v20688_v55 = vpop.f32.mrf.mxu1  ;;  %20989 = vmatprep.mubr.msk.f32.mxu1 %vm636_vm1, %v15553_v9  ;;  %v15556_v46 = vmax.f32 %v15524_v32, %v15492_v51 }
 0x563   : > { %v20735_v30 = vpop.f32.mrf.mxu0  ;;  %v13176_v15 = vadd.f32 %v20688_v55, %v25945_v10 }
 0x564   : > { %27463 = vst [vmem:[#allocation23_spill] sm:$0xff] %v26190_v33  ;;  %v26194_v49 = vadd.f32 %v20735_v30, %v13174_v5  ;;  %v13120_v48 = vpop.f32.mrf.mxu1 }
 0x565   : > { %v13500_v1 = vpop.f32.mrf.mxu0  ;;  %v13175_v4 = vadd.f32 %v13120_v48, %v25957_v35  ;;  %20990 = vmatmul.mubr.msk.f32.gmra.mxu1 %vm636_vm1, %v15554_v19 }
 0x566   : > { %27464 = vst [vmem:[#allocation25_spill] sm:$0xff] %v26194_v49  ;;  %v26198_v61 = vadd.f32 %v13500_v1, %v13173_v53  ;;  %v20691_v6 = vpop.f32.mrf.mxu1  ;;  %20992 = vmatprep.mubr.msk.f32.mxu1 %vm636_vm1, %v15555_v37 }
 0x567   : > { %v20738_v50 = vpop.f32.mrf.mxu0  ;;  %v13178_v58 = vadd.f32 %v20691_v6, %v25965_v20 }
 0x568   : > { %27465 = vst [vmem:[#allocation27_spill] sm:$0xff] %v26198_v61  ;;  %v26202_v34 = vadd.f32 %v20738_v50, %v13176_v15  ;;  %v13130_v10 = vpop.f32.mrf.mxu1 }
 0x569   : > { %v13510_v47 = vpop.f32.mrf.mxu0  ;;  %v13177_v24 = vadd.f32 %v13130_v10, %v25976_v2  ;;  %20993 = vmatmul.mubr.msk.f32.gmra.mxu1 %vm636_vm1, %v15556_v46 }
 0x56a   : > { %27466 = vst [vmem:[#allocation29_spill] sm:$0xff] %v26202_v34  ;;  %v26206_v22 = vadd.f32 %v13510_v47, %v13175_v4  ;;  %v20694_v18 = vpop.f32.mrf.mxu1 }
 0x56b   : > { %v20741_v62 = vpop.f32.mrf.mxu0  ;;  %v13180_v9 = vadd.f32 %v20694_v18, %v25982_v39 }
 0x56c   : > { %27467 = vst [vmem:[#allocation31_spill] sm:$0xff] %v26206_v22  ;;  %v26210_v8 = vadd.f32 %v20741_v62, %v13178_v58  ;;  %v13140_v59 = vpop.f32.mrf.mxu1 }
 0x56d   : > { %v13520_v26 = vpop.f32.mrf.mxu0  ;;  %v13179_v20 = vadd.f32 %v13140_v59, %v25993_v12 }
 0x56e   : > { %27468 = vst [vmem:[#allocation33_spill] sm:$0xff] %v26210_v8  ;;  %v26214_v35 = vadd.f32 %v13520_v26, %v13177_v24  ;;  %v20749_v30 = vpop.f32.mrf.mxu1 }
 0x56f   : > { %v20744_v23 = vpop.f32.mrf.mxu0 }
 0x570   : > { %27469 = vst [vmem:[#allocation60_spill] sm:$0xff] %v26214_v35  ;;  %v26217_v45 = vadd.f32 %v20744_v23, %v13180_v9  ;;  %v13769_v2 = vpop.f32.mrf.mxu1 }
 0x571   : > { %v13530_v5 = vpop.f32.mrf.mxu0 }
 0x572   : > { %27470 = vst [vmem:[#allocation61_spill] sm:$0xff] %v26217_v45  ;;  %v26220_v16 = vadd.f32 %v13530_v5, %v13179_v20  ;;  %v20752_v25 = vpop.f32.mrf.mxu1 }
 0x573   : > { %v26222_v28 = vpop.f32.mrf.mxu0 }
 0x574   : > { %27471 = vst [vmem:[#allocation62_spill] sm:$0xff] %v26220_v16  ;;  %v26228_v1 = vpop.f32.mrf.mxu1 }
 0x575   : > { %v26224_v0 = vpop.f32.mrf.mxu0 }
 0x576   : > { %v26232_v55 = vpop.f32.mrf.mxu1 }
 0x577   : > { %v26226_v53 = vpop.f32.mrf.mxu0 }
 0x578   : > { %v26236_v12 = vpop.f32.mrf.mxu1 }
 0x579   : > { %v26230_v39 = vpop.f32.mrf.mxu0 }
 0x57a   : > { %v26240_v32 = vpop.f32.mrf.mxu1 }
 0x57b   : > { %v26234_v19 = vpop.f32.mrf.mxu0 }
 0x57c   : > { %v26244_v50 = vpop.f32.mrf.mxu1 }
 0x57d   : > { %v26238_v51 = vpop.f32.mrf.mxu0 }
 0x57e   : > { %v26248_v48 = vpop.f32.mrf.mxu1 }
 0x57f   : > { %v26242_v15 = vpop.f32.mrf.mxu0 }
 0x580   : > { %v26252_v47 = vpop.f32.mrf.mxu1 }
 0x581   : > { %v26246_v37 = vpop.f32.mrf.mxu0 }
 0x582   : > { %v26256_v46 = vpop.f32.mrf.mxu1 }
 0x583   : > { %v26250_v4 = vpop.f32.mrf.mxu0 }
 0x584   : > { %v26260_v62 = vpop.f32.mrf.mxu1 }
 0x585   : > { %v26254_v6 = vpop.f32.mrf.mxu0 }
 0x586   : > { %v26264_v24 = vpop.f32.mrf.mxu1 }
 0x587   : > { %v26258_v58 = vpop.f32.mrf.mxu0 }
 0x588   : > { %v26268_v18 = vpop.f32.mrf.mxu1 }
 0x589   : > { %v26262_v10 = vpop.f32.mrf.mxu0 }
 0x58a   : > { %v26272_v23 = vpop.f32.mrf.mxu1 }
 0x58b   : > { %v26266_v26 = vpop.f32.mrf.mxu0 }
 0x58c   : > { %v26276_v20 = vpop.f32.mrf.mxu1 }
 0x58d   : > { %v26270_v9 = vpop.f32.mrf.mxu0 }
 0x58e   : > { %v26280_v16 = vpop.f32.mrf.mxu1 }
 0x58f   : > { %v26274_v59 = vpop.f32.mrf.mxu0 }
 0x590   : > { %v26284_v35 = vpop.f32.mrf.mxu1 }
 0x591   : > { %v26278_v5 = vpop.f32.mrf.mxu0 }
 0x592   : > { %v26288_v22 = vpop.f32.mrf.mxu1 }
 0x593   : > { %v26282_v45 = vpop.f32.mrf.mxu0  ;;  %27473 = vst [vmem:[#allocation64_spill] sm:$0xff] %v26288_v22 }
 0x594   : > { %v26292_v61 = vpop.f32.mrf.mxu1 }
 0x595   : > { %v26286_v8 = vpop.f32.mrf.mxu0  ;;  %27475 = vst [vmem:[#allocation66_spill] sm:$0xff] %v26292_v61 }
 0x596   : > { %27472 = vst [vmem:[#allocation63_spill] sm:$0xff] %v26286_v8  ;;  %v26296_v33 = vpop.f32.mrf.mxu1 }
 0x597   : > { %v26290_v34 = vpop.f32.mrf.mxu0  ;;  %27477 = vst [vmem:[#allocation68_spill] sm:$0xff] %v26296_v33 }
 0x598   : > { %27474 = vst [vmem:[#allocation65_spill] sm:$0xff] %v26290_v34  ;;  %v26300_v31 = vpop.f32.mrf.mxu1 }
 0x599   : > { %v26294_v49 = vpop.f32.mrf.mxu0  ;;  %27479 = vst [vmem:[#allocation70_spill] sm:$0xff] %v26300_v31 }
 0x59a   : > { %27476 = vst [vmem:[#allocation67_spill] sm:$0xff] %v26294_v49  ;;  %v26304_v41 = vpop.f32.mrf.mxu1 }
 0x59b   : > { %v26298_v13 = vpop.f32.mrf.mxu0  ;;  %27481 = vst [vmem:[#allocation72_spill] sm:$0xff] %v26304_v41 }
 0x59c   : > { %27478 = vst [vmem:[#allocation69_spill] sm:$0xff] %v26298_v13  ;;  %v26308_v8 = vpop.f32.mrf.mxu1 }
 0x59d   : > { %v26302_v44 = vpop.f32.mrf.mxu0  ;;  %27483 = vst [vmem:[#allocation74_spill] sm:$0xff] %v26308_v8 }
 0x59e   : > { %27480 = vst [vmem:[#allocation71_spill] sm:$0xff] %v26302_v44  ;;  %v26312_v34 = vpop.f32.mrf.mxu1 }
 0x59f   : > { %v26306_v17 = vpop.f32.mrf.mxu0  ;;  %27485 = vst [vmem:[#allocation76_spill] sm:$0xff] %v26312_v34 }
 0x5a0   : > { %27482 = vst [vmem:[#allocation73_spill] sm:$0xff] %v26306_v17  ;;  %v26316_v49 = vpop.f32.mrf.mxu1 }
 0x5a1   : > { %v26310_v22 = vpop.f32.mrf.mxu0  ;;  %27487 = vst [vmem:[#allocation78_spill] sm:$0xff] %v26316_v49 }
 0x5a2   : > { %27484 = vst [vmem:[#allocation75_spill] sm:$0xff] %v26310_v22  ;;  %v26320_v13 = vpop.f32.mrf.mxu1 }
 0x5a3   : > { %v26314_v61 = vpop.f32.mrf.mxu0  ;;  %27489 = vst [vmem:[#allocation80_spill] sm:$0xff] %v26320_v13 }
 0x5a4   : > { %27486 = vst [vmem:[#allocation77_spill] sm:$0xff] %v26314_v61  ;;  %v26324_v44 = vpop.f32.mrf.mxu1  ;;  %v13929_v61 = vadd.f32 %v20749_v30, %v26000_v54  ;;  %v13930_v54 = vadd.f32 %v26228_v1, %v26028_v43 }
 0x5a5   : > { %v26318_v33 = vpop.f32.mrf.mxu0  ;;  %27491 = vst [vmem:[#allocation57_spill] sm:$0xff] %v26324_v44 }
 0x5a6   : > { %27488 = vst [vmem:[#allocation79_spill] sm:$0xff] %v26318_v33  ;;  %v26328_v17 = vpop.f32.mrf.mxu1  ;;  %v13928_v33 = vadd.f32 %v13769_v2, %v26013_v60  ;;  %v13933_v60 = vadd.f32 %v26232_v55, %v26036_v36  ;;  %v26356_v2 = vld [vmem:[%s27033_s14] ss:$0 sm:$0xff]  ;;  %v14319_v36 = vadd.f32 %v26230_v39, %v13930_v54 }
 0x5a7   : > { %v26322_v31 = vpop.f32.mrf.mxu0  ;;  %27493 = vst [vmem:[#allocation43_spill] sm:$0xff] %v26328_v17  ;;  %v13931_v17 = vadd.f32 %v20752_v25, %v26018_v40 }
 0x5a8   : > { %27490 = vst [vmem:[#allocation42_spill] sm:$0xff] %v26322_v31  ;;  %v26332_v22 = vpop.f32.mrf.mxu1 }
 0x5a9   : > { %v26326_v41 = vpop.f32.mrf.mxu0  ;;  %27495 = vst [vmem:[#allocation59_spill] sm:$0xff] %v26332_v22  ;;  %v14317_v22 = vadd.f32 %v26224_v0, %v13928_v33  ;;  %v14320_v40 = vadd.f32 %v26226_v53, %v13931_v17  ;;  %v13932_v33 = vadd.f32 %v26236_v12, %v26049_v52  ;;  %v14322_v17 = vadd.f32 %v26234_v19, %v13933_v60 }
 0x5aa   : > { %27492 = vst [vmem:[#allocation56_spill] sm:$0xff] %v26326_v41  ;;  %v26337_v49 = vpop.f32.mrf.mxu1  ;;  %v14318_v41 = vadd.f32 %v26222_v28, %v13929_v61 }
 0x5ab   : > { %v26330_v8 = vpop.f32.mrf.mxu0  ;;  %v14321_v39 = vadd.f32 %v26238_v51, %v13932_v33 }
 0x5ac   : > { %27494 = vst [vmem:[#allocation58_spill] sm:$0xff] %v26330_v8  ;;  %v26342_v31 = vpop.f32.mrf.mxu1 }
 0x5ad   : > { %v26335_v34 = vpop.f32.mrf.mxu0 }
 0x5ae   : > { %27496 = vst [vmem:[#allocation44_spill] sm:$0xff] %v26335_v34  ;;  %v20849_v8 = vpop.f32.mrf.mxu1 }
 0x5af   : > { %v26340_v13 = vpop.f32.mrf.mxu0  ;;  %v14707_v30 = vadd.f32 %v20849_v8, %v14318_v41  ;;  %v26364_v41 = vld [vmem:[%s27034_s15] ss:$0 sm:$0xff] }
 0x5b0   : > { %v14547_v61 = vpop.f32.mrf.mxu1 }
 0x5b1   : > { %v26346_v44 = vpop.f32.mrf.mxu0  ;;  %v14706_v25 = vadd.f32 %v14547_v61, %v14317_v22 }
 0x5b2   : > { %27497 = vst [vmem:[#allocation5_spill] sm:$0xff] %v26346_v44  ;;  %v20852_v43 = vpop.f32.mrf.mxu1 }
 0x5b3   : > { %v20899_v34 = vpop.f32.mrf.mxu0  ;;  %v14709_v1 = vadd.f32 %v20852_v43, %v14320_v40 }
 0x5b4   : > { %v15096_v28 = vadd.f32 %v20899_v34, %v14707_v30  ;;  %v13935_v34 = vadd.f32 %v26240_v32, %v26054_v29  ;;  %v14557_v22 = vpop.f32.mrf.mxu1 }
 0x5b5   : > { %v14936_v44 = vpop.f32.mrf.mxu0  ;;  %v14708_v12 = vadd.f32 %v14557_v22, %v14319_v36 }
 0x5b6   : > { %v15135_v8 = vmul.f32 %v26356_v2, %v15096_v28  ;;  %v15095_v0 = vadd.f32 %v14936_v44, %v14706_v25  ;;  %v13934_v44 = vadd.f32 %v26244_v50, %v26064_v63  ;;  %v20855_v54 = vpop.f32.mrf.mxu1  ;;  %v14324_v32 = vadd.f32 %v26242_v15, %v13935_v34 }
 0x5b7   : > { %v20902_v55 = vpop.f32.mrf.mxu0  ;;  %v14711_v60 = vadd.f32 %v20855_v54, %v14322_v17  ;;  %v13937_v25 = vadd.f32 %v26248_v48, %v26072_v42  ;;  %v13936_v15 = vadd.f32 %v26252_v47, %v26085_v3 }
 0x5b8   : > { %v15134_v52 = vmul.f32 %v26356_v2, %v15095_v0  ;;  %v15098_v53 = vadd.f32 %v20902_v55, %v14709_v1  ;;  %v15174_v61 = vadd.f32 %v26364_v41, %v15135_v8  ;;  %v14567_v43 = vpop.f32.mrf.mxu1  ;;  %v14323_v0 = vadd.f32 %v26246_v37, %v13934_v44 }
 0x5b9   : > { %v14946_v30 = vpop.f32.mrf.mxu0  ;;  %v14710_v8 = vadd.f32 %v14567_v43, %v14321_v39  ;;  %v14325_v44 = vadd.f32 %v26254_v6, %v13936_v15 }
 0x5ba   : > { %v15137_v40 = vmul.f32 %v26356_v2, %v15098_v53  ;;  %v15097_v19 = vadd.f32 %v14946_v30, %v14708_v12  ;;  %v15206_v29 = vmax.f32 %v15174_v61, 0.0  ;;  %v15173_v36 = vadd.f32 %v26364_v41, %v15134_v52  ;;  %v20858_v1 = vpop.f32.mrf.mxu1 }
 0x5bb   : > { %v20905_v28 = vpop.f32.mrf.mxu0  ;;  %v14713_v17 = vadd.f32 %v20858_v1, %v14324_v32  ;;  %v14326_v52 = vadd.f32 %v26250_v4, %v13937_v25  ;;  %v13939_v53 = vadd.f32 %v26256_v46, %v26090_v11  ;;  %v13938_v4 = vadd.f32 %v26260_v62, %v26100_v7 }
 0x5bc   : > { %v15136_v51 = vmul.f32 %v26356_v2, %v15097_v19  ;;  %v15100_v33 = vadd.f32 %v20905_v28, %v14711_v60  ;;  %16154 = vrot.lane.b32.xlu1 %v15206_v29, %s21032_s1  ;;  %v15176_v50 = vadd.f32 %v26364_v41, %v15137_v40  ;;  %v15205_v42 = vmax.f32 %v15173_v36, 0.0  ;;  %v14577_v12 = vpop.f32.mrf.mxu1 }
 0x5bd   : > { %v14956_v63 = vpop.f32.mrf.mxu0  ;;  %v14712_v30 = vadd.f32 %v14577_v12, %v14323_v0  ;;  %v14328_v29 = vadd.f32 %v26258_v58, %v13939_v53  ;;  %v13941_v32 = vadd.f32 %v26264_v24, %v26108_v57  ;;  %v13940_v58 = vadd.f32 %v26268_v18, %v26121_v21 }
 0x5be   : > { %v15139_v48 = vmul.f32 %v26356_v2, %v15100_v33  ;;  %v15099_v55 = vadd.f32 %v14956_v63, %v14710_v8  ;;  %v15208_v22 = vmax.f32 %v15176_v50, 0.0  ;;  %16152 = vrot.lane.b32.xlu0 %v15205_v42, %s21032_s1  ;;  %v15175_v37 = vadd.f32 %v26364_v41, %v15136_v51  ;;  %v20861_v11 = vpop.f32.mrf.mxu1 }
 0x5bf   : > { %v20908_v34 = vpop.f32.mrf.mxu0  ;;  %v14715_v19 = vadd.f32 %v20861_v11, %v14326_v52  ;;  %v14327_v33 = vadd.f32 %v26262_v10, %v13938_v4  ;;  %v14330_v1 = vadd.f32 %v26266_v26, %v13941_v32  ;;  %v13943_v42 = vadd.f32 %v26272_v23, %v26126_v14  ;;  %v27499_v32 = vld [vmem:[#allocation64_spill] sm:$0xff] }
 0x5c0   : > { %v15138_v3 = vmul.f32 %v26356_v2, %v15099_v55  ;;  %v15102_v47 = vadd.f32 %v20908_v34, %v14713_v17  ;;  %16158 = vrot.lane.b32.xlu1 %v15208_v22, %s21032_s1  ;;  %v15178_v39 = vadd.f32 %v26364_v41, %v15139_v48  ;;  %v15207_v46 = vmax.f32 %v15175_v37, 0.0  ;;  %v14587_v25 = vpop.f32.mrf.mxu1 }
 0x5c1   : > { %v14966_v61 = vpop.f32.mrf.mxu0  ;;  %v14714_v43 = vadd.f32 %v14587_v25, %v14325_v44  ;;  %v14329_v22 = vadd.f32 %v26270_v9, %v13940_v58  ;;  %v13942_v26 = vadd.f32 %v26276_v20, %v26136_v38 }
 0x5c2   : > { %v15141_v54 = vmul.f32 %v26356_v2, %v15102_v47  ;;  %v15101_v40 = vadd.f32 %v14966_v61, %v14712_v30  ;;  %v15210_v28 = vmax.f32 %v15178_v39, 0.0  ;;  %16156 = vrot.lane.b32.xlu0 %v15207_v46, %s21032_s1  ;;  %v15177_v6 = vadd.f32 %v26364_v41, %v15138_v3  ;;  %v20864_v57 = vpop.f32.mrf.mxu1 }
 0x5c3   : > { %v20911_v60 = vpop.f32.mrf.mxu0  ;;  %v14717_v50 = vadd.f32 %v20864_v57, %v14328_v29  ;;  %v14332_v47 = vadd.f32 %v26274_v59, %v13943_v42  ;;  %v13945_v30 = vadd.f32 %v26280_v16, %v26144_v27  ;;  %v14331_v11 = vadd.f32 %v26278_v5, %v13942_v26  ;;  %v27498_v29 = vld [vmem:[#allocation81_spill] sm:$0xff] }
 0x5c4   : > { %v15140_v7 = vmul.f32 %v26356_v2, %v15101_v40  ;;  %v15104_v62 = vadd.f32 %v20911_v60, %v14715_v19  ;;  %16162 = vrot.lane.b32.xlu1 %v15210_v28, %s21032_s1  ;;  %v15180_v51 = vadd.f32 %v26364_v41, %v15141_v54  ;;  %v15209_v24 = vmax.f32 %v15177_v6, 0.0  ;;  %v14597_v48 = vpop.f32.mrf.mxu1 }
 0x5c5   : > { %v14976_v36 = vpop.f32.mrf.mxu0  ;;  %v14716_v55 = vadd.f32 %v14597_v48, %v14327_v33  ;;  %v13944_v59 = vadd.f32 %v26284_v35, %v26157_v56  ;;  %v14334_v28 = vadd.f32 %v26282_v45, %v13945_v30  ;;  %v13947_v25 = vadd.f32 %v27499_v32, %v27498_v29  ;;  %v27501_v45 = vld [vmem:[#allocation15_spill] sm:$0xff]  ;;  %v27502_v33 = vld [vmem:[#allocation66_spill] sm:$0xff]  ;;  %v27504_v48 = vld [vmem:[#allocation17_spill] sm:$0xff] }
 0x5c6   : > { %v15143_v8 = vmul.f32 %v26356_v2, %v15104_v62  ;;  %v15103_v63 = vadd.f32 %v14976_v36, %v14714_v43  ;;  %v15212_v15 = vmax.f32 %v15180_v51, 0.0  ;;  %16160 = vrot.lane.b32.xlu0 %v15209_v24, %s21032_s1  ;;  %v15179_v10 = vadd.f32 %v26364_v41, %v15140_v7  ;;  %v20867_v14 = vpop.f32.mrf.mxu1  ;;  %v27500_v36 = vld [vmem:[#allocation63_spill] sm:$0xff] }
 0x5c7   : > { %v20914_v0 = vpop.f32.mrf.mxu0  ;;  %v14719_v12 = vadd.f32 %v20867_v14, %v14330_v1  ;;  %v14333_v51 = vadd.f32 %v27500_v36, %v13944_v59  ;;  %v13946_v58 = vadd.f32 %v27502_v33, %v27501_v45  ;;  %v27503_v1 = vld [vmem:[#allocation65_spill] sm:$0xff]  ;;  %v27513_v32 = vld [vmem:[#allocation23_spill] sm:$0xff] }
 0x5c8   : > { %v15142_v21 = vmul.f32 %v26356_v2, %v15103_v63  ;;  %v15106_v18 = vadd.f32 %v20914_v0, %v14717_v50  ;;  %16166 = vrot.lane.b32.xlu1 %v15212_v15, %s21032_s1  ;;  %v15182_v34 = vadd.f32 %v26364_v41, %v15143_v8  ;;  %v15211_v23 = vmax.f32 %v15179_v10, 0.0  ;;  %v14607_v61 = vpop.f32.mrf.mxu1  ;;  %v27505_v10 = vld [vmem:[#allocation68_spill] sm:$0xff]  ;;  %v27515_v45 = vld [vmem:[#allocation73_spill] sm:$0xff] }
 0x5c9   : > { %v14986_v17 = vpop.f32.mrf.mxu0  ;;  %v14718_v39 = vadd.f32 %v14607_v61, %v14329_v22  ;;  %v14336_v42 = vadd.f32 %v27503_v1, %v13947_v25  ;;  %v27514_v25 = vld [vmem:[#allocation74_spill] sm:$0xff] }
 0x5ca   : > { %v15145_v52 = vmul.f32 %v26356_v2, %v15106_v18  ;;  %v15105_v53 = vadd.f32 %v14986_v17, %v14716_v55  ;;  %v15214_v3 = vmax.f32 %v15182_v34, 0.0  ;;  %16164 = vrot.lane.b32.xlu0 %v15211_v23, %s21032_s1  ;;  %v15181_v9 = vadd.f32 %v26364_v41, %v15142_v21  ;;  %v20870_v27 = vpop.f32.mrf.mxu1  ;;  %v27506_v23 = vld [vmem:[#allocation67_spill] sm:$0xff] }
 0x5cb   : > { %v20917_v37 = vpop.f32.mrf.mxu0  ;;  %v14721_v40 = vadd.f32 %v20870_v27, %v14332_v47  ;;  %v13949_v21 = vadd.f32 %v27505_v10, %v27504_v48  ;;  %v27518_v48 = vld [vmem:[#allocation75_spill] sm:$0xff] }
 0x5cc   : > { %v15144_v38 = vmul.f32 %v26356_v2, %v15105_v53  ;;  %v15108_v20 = vadd.f32 %v20917_v37, %v14719_v12  ;;  %16170 = vrot.lane.b32.xlu1 %v15214_v3, %s21032_s1  ;;  %v15184_v4 = vadd.f32 %v26364_v41, %v15145_v52  ;;  %v15213_v16 = vmax.f32 %v15181_v9, 0.0  ;;  %v14617_v6 = vpop.f32.mrf.mxu1  ;;  %v27507_v53 = vld [vmem:[#allocation19_spill] sm:$0xff]  ;;  %v27508_v12 = vld [vmem:[#allocation70_spill] sm:$0xff] }
 0x5cd   : > { %v14996_v44 = vpop.f32.mrf.mxu0  ;;  %v14720_v7 = vadd.f32 %v14617_v6, %v14331_v11  ;;  %v14335_v52 = vadd.f32 %v27506_v23, %v13946_v58  ;;  %v13948_v37 = vadd.f32 %v27508_v12, %v27507_v53  ;;  %v27511_v11 = vld [vmem:[#allocation72_spill] sm:$0xff]  ;;  %v13950_v6 = vadd.f32 %v27514_v25, %v27513_v32  ;;  %v27516_v58 = vld [vmem:[#allocation25_spill] sm:$0xff]  ;;  %v27527_v25 = vld [vmem:[#allocation42_spill] sm:$0xff] }
 0x5ce   : > { %v15147_v46 = vmul.f32 %v26356_v2, %v15108_v20  ;;  %v15107_v54 = vadd.f32 %v14996_v44, %v14718_v39  ;;  %v15216_v60 = vmax.f32 %v15184_v4, 0.0  ;;  %16168 = vrot.lane.b32.xlu0 %v15213_v16, %s21032_s1  ;;  %v15183_v5 = vadd.f32 %v26364_v41, %v15144_v38  ;;  %v20873_v57 = vpop.f32.mrf.mxu1  ;;  %v27509_v39 = vld [vmem:[#allocation69_spill] sm:$0xff] }
 0x5cf   : > { %v20920_v19 = vpop.f32.mrf.mxu0  ;;  %v14723_v50 = vadd.f32 %v20873_v57, %v14334_v28  ;;  %v14338_v44 = vadd.f32 %v27509_v39, %v13949_v21  ;;  %v27510_v4 = vld [vmem:[#allocation21_spill] sm:$0xff]  ;;  %v27512_v28 = vld [vmem:[#allocation71_spill] sm:$0xff]  ;;  %v27517_v57 = vld [vmem:[#allocation76_spill] sm:$0xff]  ;;  %v14339_v10 = vadd.f32 %v27518_v48, %v13950_v6 }
 0x5d0   : > { %v15146_v56 = vmul.f32 %v26356_v2, %v15107_v54  ;;  %v15110_v35 = vadd.f32 %v20920_v19, %v14721_v40  ;;  %16174 = vrot.lane.b32.xlu1 %v15216_v60, %s21032_s1  ;;  %v15186_v43 = vadd.f32 %v26364_v41, %v15147_v46  ;;  %v15215_v24 = vmax.f32 %v15183_v5, 0.0  ;;  %v14627_v18 = vpop.f32.mrf.mxu1  ;;  %v27519_v21 = vld [vmem:[#allocation27_spill] sm:$0xff]  ;;  %v27521_v12 = vld [vmem:[#allocation77_spill] sm:$0xff] }
 0x5d1   : > { %v15006_v62 = vpop.f32.mrf.mxu0  ;;  %v14722_v22 = vadd.f32 %v14627_v18, %v14333_v51  ;;  %v13951_v59 = vadd.f32 %v27511_v11, %v27510_v4  ;;  %v14337_v29 = vadd.f32 %v27512_v28, %v13948_v37  ;;  %v27520_v18 = vld [vmem:[#allocation78_spill] sm:$0xff]  ;;  %v27524_v11 = vld [vmem:[#allocation79_spill] sm:$0xff] }
 0x5d2   : > { %v15149_v8 = vmul.f32 %v26356_v2, %v15110_v35  ;;  %v15109_v63 = vadd.f32 %v15006_v62, %v14720_v7  ;;  %v15218_v15 = vmax.f32 %v15186_v43, 0.0  ;;  %16172 = vrot.lane.b32.xlu0 %v15215_v24, %s21032_s1  ;;  %v15185_v55 = vadd.f32 %v26364_v41, %v15146_v56  ;;  %v20876_v3 = vpop.f32.mrf.mxu1  ;;  %v26471_v35 = vpop.permute.xlu0 %16024 }
 0x5d3   : > { %v20923_v0 = vpop.f32.mrf.mxu0  ;;  %v14725_v9 = vadd.f32 %v20876_v3, %v14336_v42  ;;  %v14340_v33 = vadd.f32 %v27515_v45, %v13951_v59  ;;  %v13953_v24 = vadd.f32 %v27517_v57, %v27516_v58  ;;  %v27522_v3 = vld [vmem:[#allocation29_spill] sm:$0xff] }
 0x5d4   : > { %v15148_v17 = vmul.f32 %v26356_v2, %v15109_v63  ;;  %v15112_v34 = vadd.f32 %v20923_v0, %v14723_v50  ;;  %16178 = vrot.lane.b32.xlu1 %v15218_v15, %s21032_s1  ;;  %v15188_v14 = vadd.f32 %v26364_v41, %v15149_v8  ;;  %v15217_v47 = vmax.f32 %v15185_v55, 0.0  ;;  %v14637_v27 = vpop.f32.mrf.mxu1 }
 0x5d5   : > { %v15016_v26 = vpop.f32.mrf.mxu0  ;;  %v14724_v40 = vadd.f32 %v14637_v27, %v14335_v52  ;;  %v13952_v55 = vadd.f32 %v27520_v18, %v27519_v21  ;;  %v14342_v37 = vadd.f32 %v27521_v12, %v13953_v24  ;;  %v27525_v27 = vld [vmem:[#allocation31_spill] sm:$0xff]  ;;  %v27530_v24 = vld [vmem:[#allocation56_spill] sm:$0xff] }
 0x5d6   : > { %v15151_v30 = vmul.f32 %v26356_v2, %v15112_v34  ;;  %v15111_v61 = vadd.f32 %v15016_v26, %v14722_v22  ;;  %v15220_v20 = vmax.f32 %v15188_v14, 0.0  ;;  %16176 = vrot.lane.b32.xlu0 %v15217_v47, %s21032_s1  ;;  %v15187_v16 = vadd.f32 %v26364_v41, %v15148_v17  ;;  %v20879_v5 = vpop.f32.mrf.mxu1  ;;  %v26485_v22 = vpop.permute.xlu0 %16032  ;;  %v27523_v47 = vld [vmem:[#allocation80_spill] sm:$0xff] }
 0x5d7   : > { %v20926_v38 = vpop.f32.mrf.mxu0  ;;  %v14727_v43 = vadd.f32 %v20879_v5, %v14338_v44  ;;  %v14341_v59 = vadd.f32 %v27524_v11, %v13952_v55  ;;  %v27528_v5 = vld [vmem:[#allocation33_spill] sm:$0xff]  ;;  %v27533_v55 = vld [vmem:[#allocation58_spill] sm:$0xff] }
 0x5d8   : > { %v15150_v46 = vmul.f32 %v26356_v2, %v15111_v61  ;;  %v15114_v54 = vadd.f32 %v20926_v38, %v14725_v9  ;;  %16182 = vrot.lane.b32.xlu1 %v15220_v20, %s21032_s1  ;;  %v15190_v60 = vadd.f32 %v26364_v41, %v15151_v30  ;;  %v15219_v56 = vmax.f32 %v15187_v16, 0.0  ;;  %v14647_v8 = vpop.f32.mrf.mxu1  ;;  %v27526_v16 = vld [vmem:[#allocation57_spill] sm:$0xff] }
 0x5d9   : > { %v15026_v19 = vpop.f32.mrf.mxu0  ;;  %v14726_v15 = vadd.f32 %v14647_v8, %v14337_v29  ;;  %v13955_v30 = vadd.f32 %v27523_v47, %v27522_v3  ;;  %v27535_v47 = vld [vmem:[#allocation44_spill] sm:$0xff] }
 0x5da   : > { %v15153_v7 = vmul.f32 %v26356_v2, %v15114_v54  ;;  %v15113_v62 = vadd.f32 %v15026_v19, %v14724_v40  ;;  %v15222_v51 = vmax.f32 %v15190_v60, 0.0  ;;  %16180 = vrot.lane.b32.xlu0 %v15219_v56, %s21032_s1  ;;  %v15189_v63 = vadd.f32 %v26364_v41, %v15150_v46  ;;  %v20882_v17 = vpop.f32.mrf.mxu1  ;;  %v27529_v56 = vld [vmem:[#allocation43_spill] sm:$0xff] }
 0x5db   : > { %v20929_v36 = vpop.f32.mrf.mxu0  ;;  %v14729_v23 = vadd.f32 %v20882_v17, %v14340_v33  ;;  %v13954_v46 = vadd.f32 %v27526_v16, %v27525_v27  ;;  %v14344_v6 = vadd.f32 %v27527_v25, %v13955_v30 }
 0x5dc   : > { %v15152_v50 = vmul.f32 %v26356_v2, %v15113_v62  ;;  %v15116_v0 = vadd.f32 %v20929_v36, %v14727_v43  ;;  %16186 = vrot.lane.b32.xlu1 %v15222_v51, %s21032_s1  ;;  %v15192_v42 = vadd.f32 %v26364_v41, %v15153_v7  ;;  %v15221_v34 = vmax.f32 %v15189_v63, 0.0  ;;  %v14657_v61 = vpop.f32.mrf.mxu1  ;;  %v26505_v36 = vpop.permute.xlu0 %16036  ;;  %v27531_v63 = vld [vmem:[#allocation60_spill] sm:$0xff] }
 0x5dd   : > { %v15036_v1 = vpop.f32.mrf.mxu0  ;;  %v14728_v39 = vadd.f32 %v14657_v61, %v14339_v10  ;;  %v13957_v7 = vadd.f32 %v27529_v56, %v27528_v5  ;;  %v14343_v8 = vadd.f32 %v27530_v24, %v13954_v46  ;;  %v27536_v61 = vld [vmem:[#allocation62_spill] sm:$0xff] }
 0x5de   : > { %v15155_v26 = vmul.f32 %v26356_v2, %v15116_v0  ;;  %v15115_v14 = vadd.f32 %v15036_v1, %v14726_v15  ;;  %v15224_v53 = vmax.f32 %v15192_v42, 0.0  ;;  %16184 = vrot.lane.b32.xlu0 %v15221_v34, %s21032_s1  ;;  %v15191_v9 = vadd.f32 %v26364_v41, %v15152_v50  ;;  %v20885_v54 = vpop.f32.mrf.mxu1  ;;  %v27532_v50 = vld [vmem:[#allocation59_spill] sm:$0xff]  ;;  %v27534_v34 = vld [vmem:[#allocation61_spill] sm:$0xff] }
 0x5df   : > { %v20932_v52 = vpop.f32.mrf.mxu0  ;;  %v14731_v28 = vadd.f32 %v20885_v54, %v14342_v37  ;;  %v13956_v0 = vadd.f32 %v27532_v50, %v27531_v63  ;;  %v14346_v17 = vadd.f32 %v27533_v55, %v13957_v7 }
 0x5e0   : > { %v15154_v38 = vmul.f32 %v26356_v2, %v15115_v14  ;;  %v15118_v20 = vadd.f32 %v20932_v52, %v14729_v23  ;;  %16190 = vrot.lane.b32.xlu1 %v15224_v53, %s21032_s1  ;;  %v15194_v4 = vadd.f32 %v26364_v41, %v15155_v26  ;;  %v15223_v40 = vmax.f32 %v15191_v9, 0.0  ;;  %v14667_v62 = vpop.f32.mrf.mxu1 }
 0x5e1   : > { %v15046_v44 = vpop.f32.mrf.mxu0  ;;  %v14730_v33 = vadd.f32 %v14667_v62, %v14341_v59  ;;  %v13959_v26 = vadd.f32 %v26337_v49, %v27534_v34  ;;  %v14345_v30 = vadd.f32 %v27535_v47, %v13956_v0  ;;  %v13958_v9 = vadd.f32 %v26342_v31, %v27536_v61  ;;  %v26551_v0 = vld [vmem:[%s27037_s18] ss:$0 sm:$0xff] }
 0x5e2   : > { %v15157_v19 = vmul.f32 %v26356_v2, %v15118_v20  ;;  %v15117_v60 = vadd.f32 %v15046_v44, %v14728_v39  ;;  %v15226_v32 = vmax.f32 %v15194_v4, 0.0  ;;  %16188 = vrot.lane.b32.xlu0 %v15223_v40, %s21032_s1  ;;  %v15193_v43 = vadd.f32 %v26364_v41, %v15154_v38  ;;  %v20888_v15 = vpop.f32.mrf.mxu1  ;;  %v26525_v20 = vpop.permute.xlu0 %16040 }
 0x5e3   : > { %v20935_v29 = vpop.f32.mrf.mxu0  ;;  %v14733_v10 = vadd.f32 %v20888_v15, %v14344_v6  ;;  %v14348_v27 = vadd.f32 %v26340_v13, %v13959_v26 }
 0x5e4   : > { %v15156_v51 = vmul.f32 %v26356_v2, %v15117_v60  ;;  %v15120_v45 = vadd.f32 %v20935_v29, %v14731_v28  ;;  %16194 = vrot.lane.b32.xlu1 %v15226_v32, %s21032_s1  ;;  %v15196_v57 = vadd.f32 %v26364_v41, %v15157_v19  ;;  %v15225_v1 = vmax.f32 %v15193_v43, 0.0  ;;  %v14677_v14 = vpop.f32.mrf.mxu1  ;;  %v27537_v28 = vld [vmem:[#allocation5_spill] sm:$0xff] }
 0x5e5   : > { %v15056_v58 = vpop.f32.mrf.mxu0  ;;  %v14732_v12 = vadd.f32 %v14677_v14, %v14343_v8  ;;  %v14347_v29 = vadd.f32 %v27537_v28, %v13958_v9 }
 0x5e6   : > { %v15159_v42 = vmul.f32 %v26356_v2, %v15120_v45  ;;  %v15119_v48 = vadd.f32 %v15056_v58, %v14730_v33  ;;  %v15228_v18 = vmax.f32 %v15196_v57, 0.0  ;;  %16192 = vrot.lane.b32.xlu0 %v15225_v1, %s21032_s1  ;;  %v15195_v23 = vadd.f32 %v26364_v41, %v15156_v51  ;;  %v20891_v49 = vpop.f32.mrf.mxu1  ;;  %v26541_v51 = vld [vmem:[%s27036_s17] ss:$0 sm:$0xff]  ;;  %v26543_v45 = vpop.permute.xlu0 %16044 }
 0x5e7   : > { %v20938_v21 = vpop.f32.mrf.mxu0  ;;  %v14735_v4 = vadd.f32 %v20891_v49, %v14346_v17 }
 0x5e8   : > { %v15158_v52 = vmul.f32 %v26356_v2, %v15119_v48  ;;  %v15122_v53 = vadd.f32 %v20938_v21, %v14733_v10  ;;  %16198 = vrot.lane.b32.xlu1 %v15228_v18, %s21032_s1  ;;  %v15198_v3 = vadd.f32 %v26364_v41, %v15159_v42  ;;  %v15227_v38 = vmax.f32 %v15195_v23, 0.0  ;;  %v14687_v16 = vpop.f32.mrf.mxu1 }
 0x5e9   : > { %v15066_v37 = vpop.f32.mrf.mxu0  ;;  %v14734_v40 = vadd.f32 %v14687_v16, %v14345_v30 }
 0x5ea   : > { %v15161_v39 = vmul.f32 %v26356_v2, %v15122_v53  ;;  %v15121_v44 = vadd.f32 %v15066_v37, %v14732_v12  ;;  %v15230_v59 = vmax.f32 %v15198_v3, 0.0  ;;  %16196 = vrot.lane.b32.xlu0 %v15227_v38, %s21032_s1  ;;  %v15197_v46 = vadd.f32 %v26364_v41, %v15158_v52  ;;  %v20894_v32 = vpop.f32.mrf.mxu1  ;;  %v26563_v53 = vpop.permute.xlu0 %16048 }
 0x5eb   : > { %v20941_v11 = vpop.f32.mrf.mxu0  ;;  %v14737_v5 = vadd.f32 %v20894_v32, %v14348_v27 }
 0x5ec   : > { %v15160_v54 = vmul.f32 %v26356_v2, %v15121_v44  ;;  %v15124_v31 = vadd.f32 %v20941_v11, %v14735_v4  ;;  %16202 = vrot.lane.b32.xlu1 %v15230_v59, %s21032_s1  ;;  %v15200_v60 = vadd.f32 %v26364_v41, %v15161_v39  ;;  %v15229_v25 = vmax.f32 %v15197_v46, 0.0  ;;  %v14697_v62 = vpop.f32.mrf.mxu1 }
 0x5ed   : > { %v15076_v19 = vpop.f32.mrf.mxu0  ;;  %v14736_v57 = vadd.f32 %v14697_v62, %v14347_v29 }
 0x5ee   : > { %v15163_v13 = vmul.f32 %v26356_v2, %v15124_v31  ;;  %v15123_v6 = vadd.f32 %v15076_v19, %v14734_v40  ;;  %v15232_v7 = vmax.f32 %v15200_v60, 0.0  ;;  %16200 = vrot.lane.b32.xlu0 %v15229_v25, %s21032_s1  ;;  %v15199_v43 = vadd.f32 %v26364_v41, %v15160_v54  ;;  %v20949_v50 = vpop.f32.mrf.mxu1 }
 0x5ef   : > { %v20944_v56 = vpop.f32.mrf.mxu0  ;;  %v15890_v42 = vmul.f32 %v20949_v50, %v26541_v51 }
 0x5f0   : > { %v15162_v33 = vmul.f32 %v26356_v2, %v15123_v6  ;;  %v15126_v58 = vadd.f32 %v20944_v56, %v14737_v5  ;;  %16206 = vrot.lane.b32.xlu1 %v15232_v7, %s21032_s1  ;;  %v15202_v24 = vadd.f32 %v26364_v41, %v15163_v13  ;;  %v15231_v63 = vmax.f32 %v15199_v43, 0.0  ;;  %v15723_v10 = vpop.f32.mrf.mxu1 }
 0x5f1   : > { %v15086_v8 = vpop.f32.mrf.mxu0  ;;  %v15929_v55 = vadd.f32 %v26551_v0, %v15890_v42  ;;  %v15889_v34 = vmul.f32 %v26541_v51, %v15723_v10 }
 0x5f2   : > { %v15165_v15 = vmul.f32 %v26356_v2, %v15126_v58  ;;  %v15125_v1 = vadd.f32 %v15086_v8, %v14736_v57  ;;  %v15234_v48 = vmax.f32 %v15202_v24, 0.0  ;;  %16204 = vrot.lane.b32.xlu0 %v15231_v63, %s21032_s1  ;;  %v15201_v21 = vadd.f32 %v26364_v41, %v15162_v33  ;;  %v20952_v14 = vpop.f32.mrf.mxu1 }
 0x5f3   : > { %v15892_v23 = vmul.f32 %v20952_v14, %v26541_v51  ;;  %v15961_v37 = vmax.f32 %v15929_v55, 0.0  ;;  %v15928_v47 = vadd.f32 %v26551_v0, %v15889_v34 }
 0x5f4   : > { %v15164_v18 = vmul.f32 %v26356_v2, %v15125_v1  ;;  %16210 = vrot.lane.b32.xlu1 %v15234_v48, %s21032_s1  ;;  %v15204_v17 = vadd.f32 %v26364_v41, %v15165_v15  ;;  %v15233_v26 = vmax.f32 %v15201_v21, 0.0  ;;  %v15733_v12 = vpop.f32.mrf.mxu1 }
 0x5f5   : > { %v15931_v3 = vadd.f32 %v26551_v0, %v15892_v23  ;;  %v15891_v30 = vmul.f32 %v26541_v51, %v15733_v12  ;;  %v15960_v4 = vmax.f32 %v15928_v47, 0.0 }
 0x5f6   : > { %v15236_v52 = vmax.f32 %v15204_v17, 0.0  ;;  %16208 = vrot.lane.b32.xlu0 %v15233_v26, %s21032_s1  ;;  %v15203_v2 = vadd.f32 %v26364_v41, %v15164_v18  ;;  %v20955_v9 = vpop.f32.mrf.mxu1  ;;  %v26575_v41 = vpop.permute.xlu0 %16052 }
 0x5f7   : > { %v15894_v49 = vmul.f32 %v20955_v9, %v26541_v51  ;;  %v15963_v39 = vmax.f32 %v15931_v3, 0.0  ;;  %v15930_v11 = vadd.f32 %v26551_v0, %v15891_v30 }
 0x5f8   : > { %16214 = vrot.lane.b32.xlu1 %v15236_v52, %s21032_s1  ;;  %v15235_v61 = vmax.f32 %v15203_v2, 0.0  ;;  %v15743_v38 = vpop.f32.mrf.mxu1 }
 0x5f9   : > { %v15933_v44 = vadd.f32 %v26551_v0, %v15894_v49  ;;  %v15893_v59 = vmul.f32 %v26541_v51, %v15743_v38  ;;  %v15962_v40 = vmax.f32 %v15930_v11, 0.0 }
 0x5fa   : > { %16212 = vrot.lane.b32.xlu0 %v15235_v61, %s21032_s1  ;;  %v20958_v27 = vpop.f32.mrf.mxu1  ;;  %v26586_v32 = vpop.permute.xlu0 %16056 }
 0x5fb   : > { %v15896_v16 = vmul.f32 %v20958_v27, %v26541_v51  ;;  %v15965_v54 = vmax.f32 %v15933_v44, 0.0  ;;  %v15932_v19 = vadd.f32 %v26551_v0, %v15893_v59 }
 0x5fc   : > { %16282 = vrot.lane.b32.xlu1 %v15961_v37, %s21033_s25  ;;  %v15753_v46 = vpop.f32.mrf.mxu1 }
 0x5fd   : > { %v15935_v31 = vadd.f32 %v26551_v0, %v15896_v16  ;;  %v15895_v60 = vmul.f32 %v26541_v51, %v15753_v46  ;;  %v15964_v5 = vmax.f32 %v15932_v19, 0.0 }
 0x5fe   : > { %16280 = vrot.lane.b32.xlu0 %v15960_v4, %s21033_s25  ;;  %v20961_v28 = vpop.f32.mrf.mxu1  ;;  %v26597_v24 = vpop.permute.xlu0 %16060 }
 0x5ff   : > { %v15898_v29 = vmul.f32 %v20961_v28, %v26541_v51  ;;  %v15967_v13 = vmax.f32 %v15935_v31, 0.0  ;;  %v15934_v56 = vadd.f32 %v26551_v0, %v15895_v60 }
 0x600   : > { %16286 = vrot.lane.b32.xlu1 %v15963_v39, %s21033_s25  ;;  %v15763_v25 = vpop.f32.mrf.mxu1 }
 0x601   : > { %v15937_v6 = vadd.f32 %v26551_v0, %v15898_v29  ;;  %v15897_v7 = vmul.f32 %v26541_v51, %v15763_v25  ;;  %v15966_v8 = vmax.f32 %v15934_v56, 0.0 }
 0x602   : > { %16284 = vrot.lane.b32.xlu0 %v15962_v40, %s21033_s25  ;;  %v20964_v62 = vpop.f32.mrf.mxu1  ;;  %v26608_v26 = vpop.permute.xlu0 %16064 }
 0x603   : > { %v15900_v43 = vmul.f32 %v20964_v62, %v26541_v51  ;;  %v15969_v58 = vmax.f32 %v15937_v6, 0.0  ;;  %v15936_v63 = vadd.f32 %v26551_v0, %v15897_v7 }
 0x604   : > { %16290 = vrot.lane.b32.xlu1 %v15965_v54, %s21033_s25  ;;  %v15773_v33 = vpop.f32.mrf.mxu1 }
 0x605   : > { %v15939_v57 = vadd.f32 %v26551_v0, %v15900_v43  ;;  %v15899_v50 = vmul.f32 %v26541_v51, %v15773_v33  ;;  %v15968_v21 = vmax.f32 %v15936_v63, 0.0 }
 0x606   : > { %16288 = vrot.lane.b32.xlu0 %v15964_v5, %s21033_s25  ;;  %v20967_v15 = vpop.f32.mrf.mxu1  ;;  %v26619_v49 = vpop.permute.xlu0 %16068 }
 0x607   : > { %v15902_v1 = vmul.f32 %v20967_v15, %v26541_v51  ;;  %v15971_v48 = vmax.f32 %v15939_v57, 0.0  ;;  %v15938_v18 = vadd.f32 %v26551_v0, %v15899_v50 }
 0x608   : > { %16294 = vrot.lane.b32.xlu1 %v15967_v13, %s21033_s25  ;;  %v15783_v42 = vpop.f32.mrf.mxu1 }
 0x609   : > { %v15941_v10 = vadd.f32 %v26551_v0, %v15902_v1  ;;  %v15901_v55 = vmul.f32 %v26541_v51, %v15783_v42  ;;  %v15970_v12 = vmax.f32 %v15938_v18, 0.0 }
 0x60a   : > { %16292 = vrot.lane.b32.xlu0 %v15966_v8, %s21033_s25  ;;  %v20970_v17 = vpop.f32.mrf.mxu1  ;;  %v26630_v60 = vpop.permute.xlu0 %16072 }
 0x60b   : > { %v15904_v34 = vmul.f32 %v20970_v17, %v26541_v51  ;;  %v15973_v23 = vmax.f32 %v15941_v10, 0.0  ;;  %v15940_v2 = vadd.f32 %v26551_v0, %v15901_v55 }
 0x60c   : > { %16298 = vrot.lane.b32.xlu1 %v15969_v58, %s21033_s25  ;;  %v15793_v14 = vpop.f32.mrf.mxu1 }
 0x60d   : > { %v15943_v52 = vadd.f32 %v26551_v0, %v15904_v34  ;;  %v15903_v37 = vmul.f32 %v26541_v51, %v15793_v14  ;;  %v15972_v38 = vmax.f32 %v15940_v2, 0.0 }
 0x60e   : > { %16296 = vrot.lane.b32.xlu0 %v15968_v21, %s21033_s25  ;;  %v20973_v3 = vpop.f32.mrf.mxu1  ;;  %v26641_v58 = vpop.permute.xlu0 %16076 }
 0x60f   : > { %v15906_v47 = vmul.f32 %v20973_v3, %v26541_v51  ;;  %v15975_v61 = vmax.f32 %v15943_v52, 0.0  ;;  %v15942_v39 = vadd.f32 %v26551_v0, %v15903_v37 }
 0x610   : > { %16302 = vrot.lane.b32.xlu1 %v15971_v48, %s21033_s25  ;;  %v15803_v30 = vpop.f32.mrf.mxu1 }
 0x611   : > { %v15945_v9 = vadd.f32 %v26551_v0, %v15906_v47  ;;  %v15905_v44 = vmul.f32 %v26541_v51, %v15803_v30  ;;  %v15974_v46 = vmax.f32 %v15942_v39, 0.0  ;;  %v26659_v47 = vpop.permute.xlu1 %16086 }
 0x612   : > { %16300 = vrot.lane.b32.xlu0 %v15970_v12, %s21033_s25  ;;  %v20976_v4 = vpop.f32.mrf.mxu1  ;;  %v26652_v34 = vpop.permute.xlu0 %16080 }
 0x613   : > { %v15908_v11 = vmul.f32 %v20976_v4, %v26541_v51  ;;  %v15977_v27 = vmax.f32 %v15945_v9, 0.0  ;;  %v15944_v54 = vadd.f32 %v26551_v0, %v15905_v44 }
 0x614   : > { %16306 = vrot.lane.b32.xlu1 %v15973_v23, %s21033_s25  ;;  %v15813_v59 = vpop.f32.mrf.mxu1 }
 0x615   : > { %v15947_v16 = vadd.f32 %v26551_v0, %v15908_v11  ;;  %v15907_v31 = vmul.f32 %v26541_v51, %v15813_v59  ;;  %v15976_v13 = vmax.f32 %v15944_v54, 0.0 }
 0x616   : > { %16304 = vrot.lane.b32.xlu0 %v15972_v38, %s21033_s25  ;;  %v20979_v40 = vpop.f32.mrf.mxu1  ;;  %v26665_v39 = vpop.permute.xlu0 %16084 }
 0x617   : > { %v15910_v19 = vmul.f32 %v20979_v40, %v26541_v51  ;;  %v15979_v29 = vmax.f32 %v15947_v16, 0.0  ;;  %v15946_v6 = vadd.f32 %v26551_v0, %v15907_v31 }
 0x618   : > { %16310 = vrot.lane.b32.xlu1 %v15975_v61, %s21033_s25  ;;  %v15823_v28 = vpop.f32.mrf.mxu1 }
 0x619   : > { %v15949_v25 = vadd.f32 %v26551_v0, %v15910_v19  ;;  %v15909_v5 = vmul.f32 %v26541_v51, %v15823_v28  ;;  %v15978_v57 = vmax.f32 %v15946_v6, 0.0 }
 0x61a   : > { %16308 = vrot.lane.b32.xlu0 %v15974_v46, %s21033_s25  ;;  %v20982_v56 = vpop.f32.mrf.mxu1 }
 0x61b   : > { %v15912_v7 = vmul.f32 %v20982_v56, %v26541_v51  ;;  %v15981_v43 = vmax.f32 %v15949_v25, 0.0  ;;  %v15948_v8 = vadd.f32 %v26551_v0, %v15909_v5 }
 0x61c   : > { %16314 = vrot.lane.b32.xlu1 %v15977_v27, %s21033_s25  ;;  %v15833_v62 = vpop.f32.mrf.mxu1 }
 0x61d   : > { %v15951_v33 = vadd.f32 %v26551_v0, %v15912_v7  ;;  %v15911_v63 = vmul.f32 %v26541_v51, %v15833_v62  ;;  %v15980_v10 = vmax.f32 %v15948_v8, 0.0 }
 0x61e   : > { %16312 = vrot.lane.b32.xlu0 %v15976_v13, %s21033_s25  ;;  %v20985_v50 = vpop.f32.mrf.mxu1 }
 0x61f   : > { %v15914_v15 = vmul.f32 %v20985_v50, %v26541_v51  ;;  %v15983_v42 = vmax.f32 %v15951_v33, 0.0  ;;  %v15950_v21 = vadd.f32 %v26551_v0, %v15911_v63 }
 0x620   : > { %16318 = vrot.lane.b32.xlu1 %v15979_v29, %s21033_s25  ;;  %v15843_v1 = vpop.f32.mrf.mxu1 }
 0x621   : > { %v15953_v48 = vadd.f32 %v26551_v0, %v15914_v15  ;;  %v15913_v18 = vmul.f32 %v26541_v51, %v15843_v1  ;;  %v15982_v12 = vmax.f32 %v15950_v21, 0.0 }
 0x622   : > { %16316 = vrot.lane.b32.xlu0 %v15978_v57, %s21033_s25  ;;  %v20988_v55 = vpop.f32.mrf.mxu1 }
 0x623   : > { %v15916_v17 = vmul.f32 %v20988_v55, %v26541_v51  ;;  %v15985_v23 = vmax.f32 %v15953_v48, 0.0  ;;  %v15952_v2 = vadd.f32 %v26551_v0, %v15913_v18 }
 0x624   : > { %16322 = vrot.lane.b32.xlu1 %v15981_v43, %s21033_s25  ;;  %v15853_v14 = vpop.f32.mrf.mxu1 }
 0x625   : > { %v15955_v52 = vadd.f32 %v26551_v0, %v15916_v17  ;;  %v15915_v37 = vmul.f32 %v26541_v51, %v15853_v14  ;;  %v15984_v44 = vmax.f32 %v15952_v2, 0.0 }
 0x626   : > { %16320 = vrot.lane.b32.xlu0 %v15980_v10, %s21033_s25  ;;  %v20991_v3 = vpop.f32.mrf.mxu1 }
 0x627   : > { %v15918_v30 = vmul.f32 %v20991_v3, %v26541_v51  ;;  %v15987_v9 = vmax.f32 %v15955_v52, 0.0  ;;  %v15954_v4 = vadd.f32 %v26551_v0, %v15915_v37  ;;  %v26736_v3 = vld [vmem:[%s27227_s28] ss:$0 sm:$0xff] }
 0x628   : > { %16326 = vrot.lane.b32.xlu1 %v15983_v42, %s21033_s25  ;;  %v15863_v61 = vpop.f32.mrf.mxu1 }
 0x629   : > { %v15957_v38 = vadd.f32 %v26551_v0, %v15918_v30  ;;  %v15917_v11 = vmul.f32 %v26541_v51, %v15863_v61  ;;  %v15986_v40 = vmax.f32 %v15954_v4, 0.0  ;;  %v27538_v30 = vld [vmem:[#allocation6_spill] sm:$0xff] }
 0x62a   : > { %16324 = vrot.lane.b32.xlu0 %v15982_v12, %s21033_s25  ;;  %v20994_v59 = vpop.f32.mrf.mxu1  ;;  %v969_v61 = vmul.f32 %v26736_v3, %v27538_v30 }
 0x62b   : > { %v15920_v16 = vmul.f32 %v20994_v59, %v26541_v51  ;;  %v15989_v54 = vmax.f32 %v15957_v38, 0.0  ;;  %v15956_v19 = vadd.f32 %v26551_v0, %v15917_v11  ;;  %v27539_v38 = vld [vmem:[#allocation8_spill] sm:$0xff]  ;;  %v26749_v11 = vld [vmem:[%s27229_s21] ss:$0 sm:$0xff] }
 0x62c   : > { %16330 = vrot.lane.b32.xlu1 %v15985_v23, %s21033_s25  ;;  %v15873_v46 = vpop.f32.mrf.mxu1  ;;  %v1008_v59 = vadd.f32 %v26749_v11, %v969_v61 }
 0x62d   : > { %v15959_v31 = vadd.f32 %v26551_v0, %v15920_v16  ;;  %v15919_v29 = vmul.f32 %v26541_v51, %v15873_v46  ;;  %v15988_v6 = vmax.f32 %v15956_v19, 0.0 }
 0x62e   : > { %v26669_v27 = vpop.permute.xlu1 %16154  ;;  %16328 = vrot.lane.b32.xlu0 %v15984_v44, %s21033_s25  ;;  %v971_v44 = vmul.f32 %v26736_v3, %v27539_v38 }
 0x62f   : > { %v15991_v13 = vmax.f32 %v15959_v31, 0.0  ;;  %v15958_v5 = vadd.f32 %v26551_v0, %v15919_v29  ;;  %v1040_v31 = vmax.f32 %v1008_v59, 0.0  ;;  %v27542_v29 = vld [vmem:[#allocation37_spill] sm:$0xff]  ;;  %v27543_v59 = vld [vmem:[#allocation12_spill] sm:$0xff] }
 0x630   : > { %16334 = vrot.lane.b32.xlu1 %v15987_v9, %s21033_s25  ;;  %v16153_v28 = vpop.permute.xlu0 %16152  ;;  %v1010_v46 = vadd.f32 %v26749_v11, %v971_v44 }
 0x631   : > { %v15990_v62 = vmax.f32 %v15958_v5, 0.0 }
 0x632   : > { %v16159_v25 = vpop.permute.xlu1 %16158  ;;  %16332 = vrot.lane.b32.xlu0 %v15986_v40, %s21033_s25  ;;  %v27541_v40 = vld [vmem:[#allocation10_spill] sm:$0xff]  ;;  %v1042_v30 = vmax.f32 %v1010_v46, 0.0 }
 0x633   : > { %v973_v19 = vmul.f32 %v26736_v3, %v27541_v40  ;;  %v975_v40 = vmul.f32 %v26736_v3, %v27543_v59  ;;  %v27545_v46 = vld [vmem:[#allocation46_spill] sm:$0xff] }
 0x634   : > { %16338 = vrot.lane.b32.xlu1 %v15989_v54, %s21033_s25  ;;  %v26680_v56 = vpop.permute.xlu0 %16156 }
 0x635   : > { %v1012_v44 = vadd.f32 %v26749_v11, %v973_v19 }
 0x636   : > { %v26682_v7 = vpop.permute.xlu1 %16162  ;;  %16336 = vrot.lane.b32.xlu0 %v15988_v6, %s21033_s25 }
 0x638   : > { %16342 = vrot.lane.b32.xlu1 %v15991_v13, %s21033_s25  ;;  %v26686_v43 = vpop.permute.xlu0 %16160  ;;  %v16410_v13 = vsel %vm16408_vm5, %v27542_v29, %v26669_v27 }
 0x63a   : > { %v26688_v51 = vpop.permute.xlu1 %16166  ;;  %16340 = vrot.lane.b32.xlu0 %v15990_v62, %s21033_s25  ;;  %v16376_v62 = vsel %vm636_vm1, %v1040_v31, %v26471_v35  ;;  %v27546_v31 = vld [vmem:[#allocation14_spill] sm:$0xff] }
 0x63b   : > { %v16409_v61 = vsel %vm16408_vm5, %v16376_v62, %v16153_v28  ;;  %v16378_v28 = vsel %vm636_vm1, %v1042_v30, %v27545_v46  ;;  %v977_v19 = vmul.f32 %v26736_v3, %v27546_v31  ;;  %v27547_v62 = vld [vmem:[#allocation47_spill] sm:$0xff] }
 0x63c   : > { %v26691_v33 = vpop.permute.xlu0 %16164 }
 0x63e   : > { %v26693_v57 = vpop.permute.xlu1 %16170 }
 0x640   : > { %v26695_v0 = vpop.permute.xlu0 %16168 }
 0x642   : > { %v26697_v8 = vpop.permute.xlu1 %16174 }
 0x644   : > { %v26699_v63 = vpop.permute.xlu0 %16172 }
 0x646   : > { %v26701_v50 = vpop.permute.xlu1 %16178 }
 0x648   : > { %v26703_v15 = vpop.permute.xlu0 %16176 }
 0x64a   : > { %v26705_v1 = vpop.permute.xlu1 %16182 }
 0x64c   : > { %v26707_v42 = vpop.permute.xlu0 %16180 }
 0x64e   : > { %v26709_v48 = vpop.permute.xlu1 %16186 }
 0x650   : > { %v26711_v10 = vpop.permute.xlu0 %16184 }
 0x652   : > { %v26713_v21 = vpop.permute.xlu1 %16190 }
 0x654   : > { %v26715_v18 = vpop.permute.xlu0 %16188 }
 0x656   : > { %v26717_v55 = vpop.permute.xlu1 %16194 }
 0x658   : > { %v26719_v17 = vpop.permute.xlu0 %16192 }
 0x65a   : > { %v26721_v14 = vpop.permute.xlu1 %16198 }
 0x65c   : > { %v26723_v23 = vpop.permute.xlu0 %16196 }
 0x65e   : > { %v26725_v52 = vpop.permute.xlu1 %16202 }
 0x660   : > { %v26727_v12 = vpop.permute.xlu0 %16200 }
 0x662   : > { %v26729_v2 = vpop.permute.xlu1 %16206 }
 0x664   : > { %v26731_v37 = vpop.permute.xlu0 %16204 }
 0x666   : > { %v26740_v9 = vpop.permute.xlu1 %16210 }
 0x668   : > { %v26744_v4 = vpop.permute.xlu0 %16208 }
 0x66a   : > { %v26752_v16 = vpop.permute.xlu1 %16214 }
 0x66c   : > { %v26755_v54 = vpop.permute.xlu0 %16212 }
 0x66d   : > { %27540 = vst [vmem:[#allocation7_spill] sm:$0xff] %v26755_v54  ;;  %v27544_v54 = vld [vmem:[#allocation45_spill] sm:$0xff] }
 0x66e   : > { %v16283_v6 = vpop.permute.xlu1 %16282  ;;  %v16412_v27 = vsel %vm16408_vm5, %v27544_v54, %v16159_v25  ;;  %v1044_v54 = vmax.f32 %v1012_v44, 0.0  ;;  %v1016_v44 = vadd.f32 %v26749_v11, %v977_v19 }
 0x66f   : > { %v16443_v5 = vsel %vm16441_vm6, %v16410_v13, %v16283_v6  ;;  %v16411_v6 = vsel %vm16408_vm5, %v16378_v28, %v26680_v56 }
 0x670   : > { %16476 = vst.msk [vmem:[%s26762_s2 + $0x8] sm:$0xff] %vm16474_vm7, %v16443_v5  ;;  %v16281_v38 = vpop.permute.xlu0 %16280  ;;  %v1014_v5 = vadd.f32 %v26749_v11, %v975_v40  ;;  %v16380_v56 = vsel %vm636_vm1, %v1044_v54, %v26485_v22  ;;  %v1048_v19 = vmax.f32 %v1016_v44, 0.0  ;;  %v27550_v54 = vld [vmem:[#allocation18_spill] sm:$0xff] }
 0x671   : > { %v16442_v29 = vsel %vm16441_vm6, %v16409_v61, %v16281_v38  ;;  %v16414_v61 = vsel %vm16408_vm5, %v27547_v62, %v26682_v7  ;;  %v16413_v40 = vsel %vm16408_vm5, %v16380_v56, %v26686_v43  ;;  %v27551_v62 = vld [vmem:[#allocation48_spill] sm:$0xff] }
 0x672   : > { %v16287_v13 = vpop.permute.xlu1 %16286  ;;  %16475 = vst.msk [vmem:[%s26762_s2] sm:$0xff] %vm16474_vm7, %v16442_v29  ;;  %v1046_v7 = vmax.f32 %v1014_v5, 0.0  ;;  %v27548_v29 = vld [vmem:[#allocation16_spill] sm:$0xff]  ;;  %v981_v5 = vmul.f32 %v26736_v3, %v27550_v54 }
 0x673   : > { %v16445_v35 = vsel %vm16441_vm6, %v16412_v27, %v16287_v13  ;;  %v979_v13 = vmul.f32 %v26736_v3, %v27548_v29 }
 0x674   : > { %16478 = vst.msk [vmem:[%s26762_s2 + $0x18] sm:$0xff] %vm16474_vm7, %v16445_v35  ;;  %v16285_v25 = vpop.permute.xlu0 %16284  ;;  %v27549_v35 = vld [vmem:[#allocation38_spill] sm:$0xff]  ;;  %v16382_v43 = vsel %vm636_vm1, %v1046_v7, %v26505_v36  ;;  %v27553_v7 = vld [vmem:[#allocation39_spill] sm:$0xff] }
 0x675   : > { %v16444_v38 = vsel %vm16441_vm6, %v16411_v6, %v16285_v25  ;;  %v16416_v46 = vsel %vm16408_vm5, %v27549_v35, %v26688_v51  ;;  %v16415_v6 = vsel %vm16408_vm5, %v16382_v43, %v26691_v33  ;;  %v1018_v51 = vadd.f32 %v26749_v11, %v979_v13 }
 0x676   : > { %v16291_v30 = vpop.permute.xlu1 %16290  ;;  %16477 = vst.msk [vmem:[%s26762_s2 + $0x10] sm:$0xff] %vm16474_vm7, %v16444_v38  ;;  %v16384_v33 = vsel %vm636_vm1, %v1048_v19, %v26525_v20  ;;  %v16420_v29 = vsel %vm16408_vm5, %v27553_v7, %v26697_v8  ;;  %v27555_v19 = vld [vmem:[#allocation49_spill] sm:$0xff]  ;;  %v27559_v7 = vld [vmem:[#allocation51_spill] sm:$0xff] }
 0x677   : > { %v16447_v59 = vsel %vm16441_vm6, %v16414_v61, %v16291_v30  ;;  %v16418_v61 = vsel %vm16408_vm5, %v27551_v62, %v26693_v57  ;;  %v16417_v44 = vsel %vm16408_vm5, %v16384_v33, %v26695_v0 }
 0x678   : > { %16480 = vst.msk [vmem:[%s26762_s2 + $0x28] sm:$0xff] %vm16474_vm7, %v16447_v59  ;;  %v16289_v27 = vpop.permute.xlu0 %16288  ;;  %v27552_v59 = vld [vmem:[#allocation20_spill] sm:$0xff] }
 0x679   : > { %v16446_v28 = vsel %vm16441_vm6, %v16413_v40, %v16289_v27  ;;  %v983_v56 = vmul.f32 %v26736_v3, %v27552_v59  ;;  %v1050_v40 = vmax.f32 %v1018_v51, 0.0  ;;  %v1020_v27 = vadd.f32 %v26749_v11, %v981_v5 }
 0x67a   : > { %v16295_v22 = vpop.permute.xlu1 %16294  ;;  %16479 = vst.msk [vmem:[%s26762_s2 + $0x20] sm:$0xff] %vm16474_vm7, %v16446_v28 }
 0x67b   : > { %v16449_v31 = vsel %vm16441_vm6, %v16416_v46, %v16295_v22  ;;  %v16386_v0 = vsel %vm636_vm1, %v1050_v40, %v26543_v45  ;;  %v1022_v46 = vadd.f32 %v26749_v11, %v983_v56  ;;  %v1052_v8 = vmax.f32 %v1020_v27, 0.0  ;;  %v27558_v56 = vld [vmem:[#allocation26_spill] sm:$0xff] }
 0x67c   : > { %16482 = vst.msk [vmem:[%s26762_s2 + $0x38] sm:$0xff] %vm16474_vm7, %v16449_v31  ;;  %v16293_v25 = vpop.permute.xlu0 %16292  ;;  %v16419_v28 = vsel %vm16408_vm5, %v16386_v0, %v26699_v63  ;;  %v27554_v31 = vld [vmem:[#allocation22_spill] sm:$0xff] }
 0x67d   : > { %v16448_v38 = vsel %vm16441_vm6, %v16415_v6, %v16293_v25  ;;  %v985_v43 = vmul.f32 %v26736_v3, %v27554_v31  ;;  %v16422_v6 = vsel %vm16408_vm5, %v27555_v19, %v26701_v50  ;;  %v16388_v63 = vsel %vm636_vm1, %v1052_v8, %v26563_v53  ;;  %v27561_v8 = vld [vmem:[#allocation40_spill] sm:$0xff] }
 0x67e   : > { %v16299_v36 = vpop.permute.xlu1 %16298  ;;  %16481 = vst.msk [vmem:[%s26762_s2 + $0x30] sm:$0xff] %vm16474_vm7, %v16448_v38  ;;  %v1054_v54 = vmax.f32 %v1022_v46, 0.0  ;;  %v16421_v5 = vsel %vm16408_vm5, %v16388_v63, %v26703_v15  ;;  %v16428_v31 = vsel %vm16408_vm5, %v27561_v8, %v26713_v21 }
 0x67f   : > { %v16451_v30 = vsel %vm16441_vm6, %v16418_v61, %v16299_v36  ;;  %v1024_v50 = vadd.f32 %v26749_v11, %v985_v43  ;;  %v27556_v61 = vld [vmem:[#allocation24_spill] sm:$0xff]  ;;  %v27557_v36 = vld [vmem:[#allocation50_spill] sm:$0xff] }
 0x680   : > { %16484 = vst.msk [vmem:[%s26762_s2 + $0x48] sm:$0xff] %vm16474_vm7, %v16451_v30  ;;  %v16297_v57 = vpop.permute.xlu0 %16296  ;;  %v987_v38 = vmul.f32 %v26736_v3, %v27556_v61  ;;  %v16424_v30 = vsel %vm16408_vm5, %v27557_v36, %v26705_v1  ;;  %v16390_v15 = vsel %vm636_vm1, %v1054_v54, %v26575_v41  ;;  %v27563_v54 = vld [vmem:[#allocation52_spill] sm:$0xff] }
 0x681   : > { %v16450_v13 = vsel %vm16441_vm6, %v16417_v44, %v16297_v57  ;;  %v989_v44 = vmul.f32 %v26736_v3, %v27558_v56  ;;  %v16423_v57 = vsel %vm16408_vm5, %v16390_v15, %v26707_v42  ;;  %v1056_v40 = vmax.f32 %v1024_v50, 0.0  ;;  %v27564_v61 = vld [vmem:[#allocation32_spill] sm:$0xff] }
 0x682   : > { %v16303_v20 = vpop.permute.xlu1 %16302  ;;  %16483 = vst.msk [vmem:[%s26762_s2 + $0x40] sm:$0xff] %vm16474_vm7, %v16450_v13  ;;  %v1026_v27 = vadd.f32 %v26749_v11, %v987_v38  ;;  %v995_v38 = vmul.f32 %v26736_v3, %v27564_v61 }
 0x683   : > { %v16453_v35 = vsel %vm16441_vm6, %v16420_v29, %v16303_v20  ;;  %v16426_v29 = vsel %vm16408_vm5, %v27559_v7, %v26709_v48  ;;  %v16392_v42 = vsel %vm636_vm1, %v1056_v40, %v26586_v32  ;;  %v27566_v40 = vld [vmem:[#allocation34_spill] sm:$0xff]  ;;  %v27567_v7 = vld [vmem:[#allocation53_spill] sm:$0xff] }
 0x684   : > { %16486 = vst.msk [vmem:[%s26762_s2 + $0x58] sm:$0xff] %vm16474_vm7, %v16453_v35  ;;  %v16301_v22 = vpop.permute.xlu0 %16300  ;;  %v1028_v35 = vadd.f32 %v26749_v11, %v989_v44  ;;  %v16425_v0 = vsel %vm16408_vm5, %v16392_v42, %v26711_v10  ;;  %v1058_v48 = vmax.f32 %v1026_v27, 0.0  ;;  %v1034_v44 = vadd.f32 %v26749_v11, %v995_v38 }
 0x685   : > { %v16452_v25 = vsel %vm16441_vm6, %v16419_v28, %v16301_v22  ;;  %v27560_v28 = vld [vmem:[#allocation28_spill] sm:$0xff]  ;;  %v997_v27 = vmul.f32 %v26736_v3, %v27566_v40 }
 0x686   : > { %v16307_v45 = vpop.permute.xlu1 %16306  ;;  %16485 = vst.msk [vmem:[%s26762_s2 + $0x50] sm:$0xff] %vm16474_vm7, %v16452_v25  ;;  %v991_v22 = vmul.f32 %v26736_v3, %v27560_v28  ;;  %v16394_v10 = vsel %vm636_vm1, %v1058_v48, %v26597_v24  ;;  %v27569_v48 = vld [vmem:[#allocation36_spill] sm:$0xff] }
 0x687   : > { %v16455_v51 = vsel %vm16441_vm6, %v16422_v6, %v16307_v45  ;;  %v1060_v6 = vmax.f32 %v1028_v35, 0.0  ;;  %v16427_v25 = vsel %vm16408_vm5, %v16394_v10, %v26715_v18  ;;  %v1066_v35 = vmax.f32 %v1034_v44, 0.0 }
 0x688   : > { %16488 = vst.msk [vmem:[%s26762_s2 + $0x68] sm:$0xff] %vm16474_vm7, %v16455_v51  ;;  %v16305_v62 = vpop.permute.xlu0 %16304  ;;  %v1030_v21 = vadd.f32 %v26749_v11, %v991_v22  ;;  %v27562_v51 = vld [vmem:[#allocation30_spill] sm:$0xff]  ;;  %v999_v28 = vmul.f32 %v26736_v3, %v27569_v48 }
 0x689   : > { %v16454_v33 = vsel %vm16441_vm6, %v16421_v5, %v16305_v62  ;;  %v993_v63 = vmul.f32 %v26736_v3, %v27562_v51  ;;  %v16430_v5 = vsel %vm16408_vm5, %v27563_v54, %v26717_v55  ;;  %v16396_v18 = vsel %vm636_vm1, %v1060_v6, %v26608_v26  ;;  %v27570_v22 = vld [vmem:[#allocation54_spill] sm:$0xff]  ;;  %v27571_v6 = vld [vmem:[#allocation55_spill] sm:$0xff] }
 0x68a   : > { %v16311_v53 = vpop.permute.xlu1 %16310  ;;  %16487 = vst.msk [vmem:[%s26762_s2 + $0x60] sm:$0xff] %vm16474_vm7, %v16454_v33  ;;  %v16429_v36 = vsel %vm16408_vm5, %v16396_v18, %v26719_v17  ;;  %v16436_v8 = vsel %vm16408_vm5, %v27570_v22, %v26729_v2  ;;  %v1038_v10 = vadd.f32 %v26749_v11, %v999_v28 }
 0x68b   : > { %v16457_v59 = vsel %vm16441_vm6, %v16424_v30, %v16311_v53  ;;  %v1062_v30 = vmax.f32 %v1030_v21, 0.0  ;;  %v1032_v33 = vadd.f32 %v26749_v11, %v993_v63  ;;  %v27565_v53 = vld [vmem:[#allocation41_spill] sm:$0xff] }
 0x68c   : > { %16490 = vst.msk [vmem:[%s26762_s2 + $0x78] sm:$0xff] %vm16474_vm7, %v16457_v59  ;;  %v16309_v1 = vpop.permute.xlu0 %16308  ;;  %v16432_v59 = vsel %vm16408_vm5, %v27565_v53, %v26721_v14  ;;  %v1070_v54 = vmax.f32 %v1038_v10, 0.0 }
 0x68d   : > { %v16456_v13 = vsel %vm16441_vm6, %v16423_v57, %v16309_v1  ;;  %v16398_v17 = vsel %vm636_vm1, %v1062_v30, %v26619_v49  ;;  %v1064_v1 = vmax.f32 %v1032_v33, 0.0 }
 0x68e   : > { %v16315_v41 = vpop.permute.xlu1 %16314  ;;  %16489 = vst.msk [vmem:[%s26762_s2 + $0x70] sm:$0xff] %vm16474_vm7, %v16456_v13  ;;  %v16431_v57 = vsel %vm16408_vm5, %v16398_v17, %v26723_v23 }
 0x68f   : > { %v16459_v20 = vsel %vm16441_vm6, %v16426_v29, %v16315_v41  ;;  %v16434_v29 = vsel %vm16408_vm5, %v27567_v7, %v26725_v52  ;;  %v27568_v41 = vld [vmem:[#allocation35_spill] sm:$0xff]  ;;  %v16400_v42 = vsel %vm636_vm1, %v1064_v1, %v26630_v60 }
 0x690   : > { %16492 = vst.msk [vmem:[%s26762_s2 + $0x88] sm:$0xff] %vm16474_vm7, %v16459_v20  ;;  %v16313_v46 = vpop.permute.xlu0 %16312  ;;  %v1000_v20 = vmul.f32 %v26736_v3, %v27568_v41  ;;  %v16433_v52 = vsel %vm16408_vm5, %v16400_v42, %v26727_v12 }
 0x691   : > { %v16458_v43 = vsel %vm16441_vm6, %v16425_v0, %v16313_v46  ;;  %v1036_v46 = vadd.f32 %v26749_v11, %v997_v27 }
 0x692   : > { %v16319_v32 = vpop.permute.xlu1 %16318  ;;  %16491 = vst.msk [vmem:[%s26762_s2 + $0x80] sm:$0xff] %vm16474_vm7, %v16458_v43  ;;  %v1039_v43 = vadd.f32 %v26749_v11, %v1000_v20 }
 0x693   : > { %v16461_v19 = vsel %vm16441_vm6, %v16428_v31, %v16319_v32  ;;  %v16402_v32 = vsel %vm636_vm1, %v1066_v35, %v26641_v58 }
 0x694   : > { %16494 = vst.msk [vmem:[%s26762_s2 + $0x98] sm:$0xff] %vm16474_vm7, %v16461_v19  ;;  %v16317_v45 = vpop.permute.xlu0 %16316  ;;  %v16435_v3 = vsel %vm16408_vm5, %v16402_v32, %v26731_v37  ;;  %v1068_v19 = vmax.f32 %v1036_v46, 0.0  ;;  %v1071_v51 = vmax.f32 %v1039_v43, 0.0 }
 0x695   : > { %v16460_v62 = vsel %vm16441_vm6, %v16427_v25, %v16317_v45  ;;  %v16438_v25 = vsel %vm16408_vm5, %v27571_v6, %v26740_v9 }
 0x696   : > { %v16323_v24 = vpop.permute.xlu1 %16322  ;;  %16493 = vst.msk [vmem:[%s26762_s2 + $0x90] sm:$0xff] %vm16474_vm7, %v16460_v62  ;;  %v16404_v37 = vsel %vm636_vm1, %v1068_v19, %v26652_v34  ;;  %v16407_v11 = vsel %vm636_vm1, %v1071_v51, %v26659_v47  ;;  %v27572_v47 = vld [vmem:[#allocation7_spill] sm:$0xff] }
 0x697   : > { %v16463_v50 = vsel %vm16441_vm6, %v16430_v5, %v16323_v24  ;;  %v16437_v9 = vsel %vm16408_vm5, %v16404_v37, %v26744_v4  ;;  %v16440_v5 = vsel %vm16408_vm5, %v16407_v11, %v26752_v16 }
 0x698   : > { %16496 = vst.msk [vmem:[%s26762_s2 + $0xa8] sm:$0xff] %vm16474_vm7, %v16463_v50  ;;  %v16321_v55 = vpop.permute.xlu0 %16320  ;;  %v16406_v50 = vsel %vm636_vm1, %v1070_v54, %v26665_v39 }
 0x699   : > { %v16462_v15 = vsel %vm16441_vm6, %v16429_v36, %v16321_v55  ;;  %v16439_v4 = vsel %vm16408_vm5, %v16406_v50, %v27572_v47 }
 0x69a   : > { %v16327_v26 = vpop.permute.xlu1 %16326  ;;  %16495 = vst.msk [vmem:[%s26762_s2 + $0xa0] sm:$0xff] %vm16474_vm7, %v16462_v15 }
 0x69b   : > { %v16465_v56 = vsel %vm16441_vm6, %v16432_v59, %v16327_v26 }
 0x69c   : > { %16498 = vst.msk [vmem:[%s26762_s2 + $0xb8] sm:$0xff] %vm16474_vm7, %v16465_v56  ;;  %v16325_v14 = vpop.permute.xlu0 %16324 }
 0x69d   : > { %v16464_v13 = vsel %vm16441_vm6, %v16431_v57, %v16325_v14 }
 0x69e   : > { %v16331_v49 = vpop.permute.xlu1 %16330  ;;  %16497 = vst.msk [vmem:[%s26762_s2 + $0xb0] sm:$0xff] %vm16474_vm7, %v16464_v13 }
 0x69f   : > { %v16467_v23 = vsel %vm16441_vm6, %v16434_v29, %v16331_v49 }
 0x6a0   : > { %16500 = vst.msk [vmem:[%s26762_s2 + $0xc8] sm:$0xff] %vm16474_vm7, %v16467_v23  ;;  %v16329_v0 = vpop.permute.xlu0 %16328 }
 0x6a1   : > { %v16466_v31 = vsel %vm16441_vm6, %v16433_v52, %v16329_v0 }
 0x6a2   : > { %v16335_v60 = vpop.permute.xlu1 %16334  ;;  %16499 = vst.msk [vmem:[%s26762_s2 + $0xc0] sm:$0xff] %vm16474_vm7, %v16466_v31 }
 0x6a3   : > { %v16469_v12 = vsel %vm16441_vm6, %v16436_v8, %v16335_v60 }
 0x6a4   : > { %16502 = vst.msk [vmem:[%s26762_s2 + $0xd8] sm:$0xff] %vm16474_vm7, %v16469_v12  ;;  %v16333_v2 = vpop.permute.xlu0 %16332 }
 0x6a5   : > { %v16468_v45 = vsel %vm16441_vm6, %v16435_v3, %v16333_v2 }
 0x6a6   : > { %v16339_v21 = vpop.permute.xlu1 %16338  ;;  %16501 = vst.msk [vmem:[%s26762_s2 + $0xd0] sm:$0xff] %vm16474_vm7, %v16468_v45 }
 0x6a7   : > { %v16471_v58 = vsel %vm16441_vm6, %v16438_v25, %v16339_v21 }
 0x6a8   : > { %16504 = vst.msk [vmem:[%s26762_s2 + $0xe8] sm:$0xff] %vm16474_vm7, %v16471_v58  ;;  %v16337_v63 = vpop.permute.xlu0 %16336 }
 0x6a9   : > { %v16470_v62 = vsel %vm16441_vm6, %v16437_v9, %v16337_v63 }
 0x6aa   : > { %v16343_v24 = vpop.permute.xlu1 %16342  ;;  %16503 = vst.msk [vmem:[%s26762_s2 + $0xe0] sm:$0xff] %vm16474_vm7, %v16470_v62 }
 0x6ab   : > { %v16473_v34 = vsel %vm16441_vm6, %v16440_v5, %v16343_v24 }
 0x6ac   : > { %16506 = vst.msk [vmem:[%s26762_s2 + $0xf8] sm:$0xff] %vm16474_vm7, %v16473_v34  ;;  %v16341_v18 = vpop.permute.xlu0 %16340 }
 0x6ad   : > { %v16472_v61 = vsel %vm16441_vm6, %v16439_v4, %v16341_v18 }
 0x6ae   : > { %16505 = vst.msk [vmem:[%s26762_s2 + $0xf0] sm:$0xff] %vm16474_vm7, %v16472_v61 }
 0x6af PF: > { %s29_s0 = sadd.s32 1, %s21027_s0  }
 0x6b0   : > { %p26_p4 = scmp.ge.s32.totalorder %s29_s0, 4  }
 0x6b2   :  { %28 = sbr.rel (!%p26_p4) target bundleno = 5 (0x5), region = 136 }

</bundles_post_ra>
